<compile_context>
chip_gen: v7x
topology: tpu7x:2x2x1
jax: 0.10.0
libtpu: 0.0.40
codegen_flags: <defaults>
</compile_context>

<pallas_src>
import functools

import jax
import jax.numpy as jnp
from jax.experimental import pallas as pl
from jax.experimental.pallas import tpu as pltpu


# ---------------------------- module channel layout ---------------------------

ALPHA = 0.75
IN_CH = 256
OUT_CH = 256
C_LOW_IN = int(ALPHA * IN_CH)             # 192
C_HIGH_IN = IN_CH - C_LOW_IN              # 64
C_LOW_OUT = int(ALPHA * OUT_CH)           # 192
C_HIGH_OUT = OUT_CH - C_LOW_OUT           # 64
C_H2H_PAD = 128                           # lane-dense padded h2h Cout

_VMEM_LIMIT = 32 * 1024 * 1024


# ------------------------------ Pallas kernels --------------------------------

def _conv3x3_accumulate(x_ref, w_ref, acc_ref, *, NB, TH, W, cin):
    """acc_ref (NB*TH*W, cout_blk) f32 <- 3x3 'same' conv of x_ref with w_ref.

    x_ref: (NB, TH+2, W+2, cin) bf16, zero halo already baked in.
    w_ref: (3, 3*cin, cout_blk) bf16, kw taps folded into K (K idx = kw*cin+ci).
    One sublane (W) slice per kw + one lane-aligned concat; kh offsets are free
    outer-dim row slices.
    TODO(synk): replace the kw=1,2 sublane-offset slices with pltpu.roll (XLU)
    once non-multiple-of-8 sublane rolls are validated on all target chips.
    """
    x = x_ref[...]
    xcat = jnp.concatenate([x[:, :, kw:kw + W, :] for kw in range(3)],
                           axis=-1)                        # (NB, TH+2, W, 3*cin)
    for kh in range(3):
        patch = xcat[:, kh:kh + TH, :, :].reshape(NB * TH * W, 3 * cin)
        contrib = jnp.dot(patch, w_ref[kh],
                          preferred_element_type=jnp.float32)
        if kh == 0:
            acc_ref[...] = contrib
        else:
            acc_ref[...] += contrib


def _half_conv_kernel(x_ref, w_ref, b_ref, o_ref, acc_ref, *, NB, TH, W, cin):
    # Fused (l2h | h2l + l2l) half-resolution conv; grid axis = Cout blocks.
    _conv3x3_accumulate(x_ref, w_ref, acc_ref, NB=NB, TH=TH, W=W, cin=cin)
    o_ref[...] = (acc_ref[...] + b_ref[...]).astype(o_ref.dtype)


def _h2h_up_add_kernel(x_ref, w_ref, b_ref, xl_ref, u_ref, o_ref, acc_ref, *,
                       NB, TH, W, cin):
    # h2h conv (Cout zero-padded to 128 lanes) + fused epilogue:
    #   out = conv(x) + bias + U @ X_l2h   (U = align_corners bilinear matrix)
    _conv3x3_accumulate(x_ref, w_ref, acc_ref, NB=NB, TH=TH, W=W, cin=cin)
    up = jnp.dot(u_ref[...], xl_ref[...], preferred_element_type=jnp.float32)
    o_ref[...] = (acc_ref[...] + b_ref[...] + up).astype(o_ref.dtype)


# ---------------------------- pallas_call wrappers -----------------------------

def half_conv(xpad_half, w_k3, b_row, *, cout_block=128):
    """Fused half-res 3x3 conv.  xpad_half: (N, Hp+2, Wp+2, 256) bf16 padded.

    Returns (N*Hp*Wp, 256) f32; rows ordered (n, h, w) row-major.
    """
    N, Hp2, Wp2, cin = xpad_half.shape
    Hp, Wp = Hp2 - 2, Wp2 - 2
    cout = w_k3.shape[-1]
    assert cout % cout_block == 0
    M = N * Hp * Wp
    kernel = functools.partial(_half_conv_kernel, NB=N, TH=Hp, W=Wp, cin=cin)
    return pl.pallas_call(
        kernel,
        out_shape=jax.ShapeDtypeStruct((M, cout), jnp.float32),
        grid=(cout // cout_block,),
        in_specs=[
            # whole batch-merged activation tile, resident across both steps
            pl.BlockSpec((N, Hp2, Wp2, cin), lambda j: (0, 0, 0, 0)),
            pl.BlockSpec((3, 3 * cin, cout_block), lambda j: (0, 0, j)),
            pl.BlockSpec((1, cout_block), lambda j: (0, j)),
        ],
        out_specs=pl.BlockSpec((M, cout_block), lambda j: (0, j)),
        scratch_shapes=[pltpu.VMEM((M, cout_block), jnp.float32)],
        compiler_params=pltpu.CompilerParams(
            dimension_semantics=("parallel",),
            vmem_limit_bytes=_VMEM_LIMIT),
    )(xpad_half, w_k3, b_row)


def h2h_up_add(xpad_full, w_k3, b_row, y_half, u):
    """h2h conv + fused upsample(X_l2h)+add epilogue.

    xpad_full: (N, H+2, W+2, 256) bf16; y_half: (N*Hp*Wp, 256) f32 (half-res
    kernel output, cols [0:64] = X_l2h); u: (H*W, Hp*Wp) f32 interpolation
    matrix.  Returns (N*H*W, 128) f32 (cols [0:64] valid).
    """
    N, H2, W2, cin = xpad_full.shape
    H, W = H2 - 2, W2 - 2
    cout = w_k3.shape[-1]                     # 128, lane dense
    Mi = H * W
    Ml = u.shape[1]
    assert y_half.shape[0] == N * Ml and y_half.shape[1] >= cout
    assert u.shape[0] == Mi
    kernel = functools.partial(_h2h_up_add_kernel, NB=1, TH=H, W=W, cin=cin)
    return pl.pallas_call(
        kernel,
        out_shape=jax.ShapeDtypeStruct((N * Mi, cout), jnp.float32),
        grid=(N,),
        in_specs=[
            pl.BlockSpec((1, H2, W2, cin), lambda n: (n, 0, 0, 0)),
            pl.BlockSpec((3, 3 * cin, cout), lambda n: (0, 0, 0)),  # resident
            pl.BlockSpec((1, cout), lambda n: (0, 0)),              # resident
            pl.BlockSpec((Ml, cout), lambda n: (n, 0)),  # per-image X_l2h rows
            pl.BlockSpec((Mi, Ml), lambda n: (0, 0)),               # resident
        ],
        out_specs=pl.BlockSpec((Mi, cout), lambda n: (n, 0)),
        scratch_shapes=[pltpu.VMEM((Mi, cout), jnp.float32)],
        compiler_params=pltpu.CompilerParams(
            dimension_semantics=("parallel",),
            vmem_limit_bytes=_VMEM_LIMIT),
    )(xpad_full, w_k3, b_row, y_half, u)


# --------------------------------- JAX glue ------------------------------------

def avgpool2x2(x):
    # nn.AvgPool2d(kernel_size=2, stride=2), floor mode
    N, H, W, C = x.shape
    H2, W2 = H // 2, W // 2
    x = x[:, :H2 * 2, :W2 * 2, :]
    return x.reshape(N, H2, 2, W2, 2, C).mean(axis=(2, 4))


def _bilinear_matrix_1d(n_in, n_out):
    # 1-D align_corners=True bilinear interpolation matrix, shape (n_out, n_in)
    if n_in == 1 or n_out == 1:
        return jnp.zeros((n_out, n_in), jnp.float32).at[:, 0].set(1.0)
    src = jnp.arange(n_out, dtype=jnp.float32) * ((n_in - 1) / (n_out - 1))
    i0 = jnp.floor(src).astype(jnp.int32)
    i1 = jnp.minimum(i0 + 1, n_in - 1)
    w = src - i0.astype(jnp.float32)
    rows = jnp.arange(n_out)
    m = jnp.zeros((n_out, n_in), jnp.float32)
    m = m.at[rows, i0].add(1.0 - w)
    m = m.at[rows, i1].add(w)
    return m


def build_upsample_matrix(hp, wp, h_out, w_out):
    # Matches Upsample(scale=2, bilinear, align_corners=True), followed (only
    # if sizes still mismatch) by F.interpolate(size=..., align_corners=True).
    u = jnp.kron(_bilinear_matrix_1d(hp, 2 * hp),
                 _bilinear_matrix_1d(wp, 2 * wp))          # (4*hp*wp, hp*wp)
    if (2 * hp, 2 * wp) != (h_out, w_out):
        u2 = jnp.kron(_bilinear_matrix_1d(2 * hp, h_out),
                      _bilinear_matrix_1d(2 * wp, w_out))
        u = u2 @ u
    return u                                               # (h_out*w_out, hp*wp)


# ------------------------------ module parameters ------------------------------

def init_params(key):
    # deterministic synthetic weights, HWIO layout (3, 3, Cin, Cout)
    ks = jax.random.split(key, 8)
    scale = 0.05

    def w(k, cin, cout):
        return scale * jax.random.normal(k, (3, 3, cin, cout), jnp.float32)

    def b(k, cout):
        return scale * jax.random.normal(k, (cout,), jnp.float32)

    return {
        "l2l_w": w(ks[0], C_LOW_IN, C_LOW_OUT),   "l2l_b": b(ks[1], C_LOW_OUT),
        "l2h_w": w(ks[2], C_LOW_IN, C_HIGH_OUT),  "l2h_b": b(ks[3], C_HIGH_OUT),
        "h2l_w": w(ks[4], C_HIGH_IN, C_LOW_OUT),  "h2l_b": b(ks[5], C_LOW_OUT),
        "h2h_w": w(ks[6], C_HIGH_IN, C_HIGH_OUT), "h2h_b": b(ks[7], C_HIGH_OUT),
    }


def prepare_fused_params(params):
    """Fuse (l2h, h2l, l2l) into one 256->256 half-res conv and zero-pad h2h to
    a lane-dense 256-in / 128-out conv.  Weights packed (3, 3*Cin, Cout) bf16
    (K index = kw*Cin + ci), biases (1, Cout) f32.

    Fused half-res conv output channel layout:
        [0:64]   = l2h(X_l_pool)
        [64:256] = h2l(X_h_pool) + l2l(X_l_pool)
    Padded h2h output layout: [0:64] = h2h(X_h), [64:128] = 0.
    """
    wf = jnp.zeros((3, 3, IN_CH, OUT_CH), jnp.float32)
    wf = wf.at[:, :, :C_HIGH_IN, C_HIGH_OUT:].set(params["h2l_w"])
    wf = wf.at[:, :, C_HIGH_IN:, :C_HIGH_OUT].set(params["l2h_w"])
    wf = wf.at[:, :, C_HIGH_IN:, C_HIGH_OUT:].set(params["l2l_w"])
    bf = jnp.concatenate([params["l2h_b"], params["h2l_b"] + params["l2l_b"]])

    wh = jnp.zeros((3, 3, IN_CH, C_H2H_PAD), jnp.float32)
    wh = wh.at[:, :, :C_HIGH_IN, :C_HIGH_OUT].set(params["h2h_w"])
    bh = jnp.zeros((C_H2H_PAD,), jnp.float32).at[:C_HIGH_OUT].set(params["h2h_b"])

    def pack_w(w_hwio):
        kh, kw, cin, cout = w_hwio.shape
        return w_hwio.reshape(kh, kw * cin, cout).astype(jnp.bfloat16)

    def pack_b(b):
        return b.reshape(1, -1).astype(jnp.float32)

    return {"w_half": pack_w(wf), "b_half": pack_b(bf),
            "w_h2h": pack_w(wh), "b_h2h": pack_b(bh)}


# ------------------------------- forward passes --------------------------------

def frequency_transfer_forward(x_nchw, fused):
    N, C, H, W = x_nchw.shape
    assert C == IN_CH and H % 2 == 0 and W % 2 == 0
    Hp, Wp = H // 2, W // 2

    x = jnp.transpose(x_nchw, (0, 2, 3, 1))                # NHWC [high64|low192]

    # TODO(synk): fold this 2x2 avg-pool into the half-res kernel prologue; it
    # needs stride-2 sublane loads in-kernel, kept in the wrapper prep pass.
    x_pool = avgpool2x2(x)                                 # (N, Hp, Wp, 256)

    # bf16 halo-padded activation tiles (pre-cast halves activation DMA bytes).
    pad = ((0, 0), (1, 1), (1, 1), (0, 0))
    xpad_full = jnp.pad(x, pad).astype(jnp.bfloat16)       # (N, H+2,  W+2,  256)
    xpad_half = jnp.pad(x_pool, pad).astype(jnp.bfloat16)  # (N, Hp+2, Wp+2, 256)

    # 1) fused half-res conv: cols [0:64] = X_l2h, [64:256] = X_l output
    y_half = half_conv(xpad_half, fused["w_half"], fused["b_half"])

    # 2) h2h conv + fused (upsample X_l2h + add) epilogue
    u = build_upsample_matrix(Hp, Wp, H, W)
    y_high = h2h_up_add(xpad_full, fused["w_h2h"], fused["b_h2h"], y_half, u)

    Xh = y_high[:, :C_HIGH_OUT].reshape(N, H, W, C_HIGH_OUT)
    Xl = y_half[:, C_HIGH_OUT:].reshape(N, Hp, Wp, C_LOW_OUT)
    return (jnp.transpose(Xh, (0, 3, 1, 2)),
            jnp.transpose(Xl, (0, 3, 1, 2)))


# ------------------------- reference (literal translation) ---------------------

def bilinear_resize_align_corners(x, out_h, out_w):
    # matches F.interpolate(..., mode='bilinear', align_corners=True)
    N, H, W, C = x.shape

    def coords(out_s, in_s):
        if out_s == 1 or in_s == 1:
            return jnp.zeros((out_s,), jnp.float32)
        return jnp.arange(out_s, dtype=jnp.float32) * ((in_s - 1) / (out_s - 1))

    ys = coords(out_h, H)
    xs = coords(out_w, W)
    y0 = jnp.floor(ys).astype(jnp.int32)
    y1 = jnp.minimum(y0 + 1, H - 1)
    x0 = jnp.floor(xs).astype(jnp.int32)
    x1 = jnp.minimum(x0 + 1, W - 1)
    wy = (ys - y0.astype(jnp.float32))[None, :, None, None]
    wx = (xs - x0.astype(jnp.float32))[None, None, :, None]

    xy0 = x[:, y0]
    xy1 = x[:, y1]
    top = xy0[:, :, x0] * (1.0 - wx) + xy0[:, :, x1] * wx
    bot = xy1[:, :, x0] * (1.0 - wx) + xy1[:, :, x1] * wx
    return top * (1.0 - wy) + bot * wy


def frequency_transfer_reference(x_nchw, params):
    # literal (unfused, full-f32) translation of the PyTorch OctaveConv2 graph
    x = jnp.transpose(x_nchw, (0, 2, 3, 1))
    X_h = x[..., :C_HIGH_IN]
    X_l = x[..., C_HIGH_IN:]
    X_l_p = avgpool2x2(X_l)
    X_h_p = avgpool2x2(X_h)

    def conv(xx, w, b):
        out = jax.lax.conv_general_dilated(
            xx, w, window_strides=(1, 1), padding="SAME",
            dimension_numbers=("NHWC", "HWIO", "NHWC"))
        return out + b

    X_h2h = conv(X_h,   params["h2h_w"], params["h2h_b"])
    X_l2h = conv(X_l_p, params["l2h_w"], params["l2h_b"])
    X_l2l = conv(X_l_p, params["l2l_w"], params["l2l_b"])
    X_h2l = conv(X_h_p, params["h2l_w"], params["h2l_b"])

    Hl, Wl = X_l2h.shape[1], X_l2h.shape[2]
    X_l2h = bilinear_resize_align_corners(X_l2h, 2 * Hl, 2 * Wl)
    if X_l2h.shape[1:3] != X_h2h.shape[1:3]:
        X_l2h = bilinear_resize_align_corners(
            X_l2h, X_h2h.shape[1], X_h2h.shape[2])

    Xh_out = X_l2h + X_h2h
    Xl_out = X_h2l + X_l2l
    return (jnp.transpose(Xh_out, (0, 3, 1, 2)),
            jnp.transpose(Xl_out, (0, 3, 1, 2)))


# ------------------------------------ main --------------------------------------

if __name__ == "__main__":
    key = jax.random.PRNGKey(0)
    k_x, k_p = jax.random.split(key)

    N, C, H, W = 2, 256, 16, 16                  # the module hardcodes 256 ch
    x = jax.random.normal(k_x, (N, C, H, W), jnp.float32)
    params = init_params(k_p)
    fused = prepare_fused_params(params)

    fwd = jax.jit(lambda xx: frequency_transfer_forward(xx, fused))
    Xh, Xl = fwd(x)
    jax.block_until_ready((Xh, Xl))

    assert Xh.shape == (N, C_HIGH_OUT, H, W)
    assert Xl.shape == (N, C_LOW_OUT, H // 2, W // 2)

    # Semantic check against the literal (unfused, f32) OctaveConv2 graph;
    # tolerance covers bf16 operand rounding in the Pallas matmuls.
    Xh_r, Xl_r = frequency_transfer_reference(x, params)
    assert jnp.allclose(Xh, Xh_r, atol=5e-2, rtol=5e-2)
    assert jnp.allclose(Xl, Xl_r, atol=5e-2, rtol=5e-2)

    print("KERNEL_OK")
</pallas_src>

<mosaic_0001>
module attributes {stable_mosaic.version = 11 : i64} {
  func.func private @main(%arg0: i32) attributes {dimension_semantics = [#tpu.dimension_semantics<core_parallel>], iteration_bounds = array<i64: 2>, tpu.core_type = #tpu.core_type<sc_scalar_subcore>, window_params = []} {
    return
  }
}

module attributes {stable_mosaic.version = 11 : i64} {
  func.func private @main(%arg0: i32) attributes {dimension_semantics = [#tpu.dimension_semantics<core_parallel>], iteration_bounds = array<i64: 2>, tpu.core_type = #tpu.core_type<sc_scalar_subcore>, window_params = []} {
    return
  }
}

module attributes {stable_mosaic.version = 11 : i64} {
  func.func @_half_conv_kernel(%arg0: i32, %arg1: memref<2x10x10x256xbf16, #tpu.memory_space<vmem>>, %arg2: memref<3x768x128xbf16, #tpu.memory_space<vmem>>, %arg3: memref<1x128xf32, #tpu.memory_space<vmem>>, %arg4: memref<128x128xf32, #tpu.memory_space<vmem>>, %arg5: memref<128x128xf32, #tpu.memory_space<vmem>>) attributes {dimension_semantics = [#tpu.dimension_semantics<parallel>], iteration_bounds = array<i64: 2>, scalar_prefetch = 0 : i64, scratch_operands = 1 : i64, tpu.core_type = #tpu.core_type<tc>, window_params = [{pipeline_mode = #tpu.pipeline_mode<synchronous>, transform_indices = @transform_0, window_bounds = array<i64: 2, 10, 10, 256>}, {transform_indices = @transform_1, window_bounds = array<i64: 3, 768, 128>}, {transform_indices = @transform_2, window_bounds = array<i64: 1, 128>}, {transform_indices = @transform_3, window_bounds = array<i64: 128, 128>}]} {
    %c0 = arith.constant 0 : index
    %c0_0 = arith.constant 0 : index
    %c0_1 = arith.constant 0 : index
    %c0_2 = arith.constant 0 : index
    %0 = vector.load %arg1[%c0, %c0_0, %c0_1, %c0_2] : memref<2x10x10x256xbf16, #tpu.memory_space<vmem>>, vector<2x10x10x256xbf16>
    %1 = vector.extract_strided_slice %0 {offsets = [0, 0, 0, 0], sizes = [2, 10, 8, 256], strides = [1, 1, 1, 1]} : vector<2x10x10x256xbf16> to vector<2x10x8x256xbf16>
    %2 = vector.extract_strided_slice %0 {offsets = [0, 0, 1, 0], sizes = [2, 10, 8, 256], strides = [1, 1, 1, 1]} : vector<2x10x10x256xbf16> to vector<2x10x8x256xbf16>
    %3 = vector.extract_strided_slice %0 {offsets = [0, 0, 2, 0], sizes = [2, 10, 8, 256], strides = [1, 1, 1, 1]} : vector<2x10x10x256xbf16> to vector<2x10x8x256xbf16>
    %4 = tpu.concatenate %1, %2, %3 in 3 : vector<2x10x8x256xbf16>, vector<2x10x8x256xbf16>, vector<2x10x8x256xbf16> -> vector<2x10x8x768xbf16>
    %5 = vector.extract_strided_slice %4 {offsets = [0, 0, 0, 0], sizes = [2, 8, 8, 768], strides = [1, 1, 1, 1]} : vector<2x10x8x768xbf16> to vector<2x8x8x768xbf16>
    %6 = vector.shape_cast %5 : vector<2x8x8x768xbf16> to vector<128x768xbf16>
    %c0_3 = arith.constant 0 : index
    %c0_4 = arith.constant 0 : index
    %c0_5 = arith.constant 0 : index
    %7 = vector.load %arg2[%c0_3, %c0_4, %c0_5] : memref<3x768x128xbf16, #tpu.memory_space<vmem>>, vector<1x768x128xbf16>
    %8 = vector.shape_cast %7 : vector<1x768x128xbf16> to vector<768x128xbf16>
    %cst = arith.constant dense<0.000000e+00> : vector<128x128xf32>
    %9 = tpu.matmul %6, %8, %cst {dimension_numbers = #tpu.dot_dimension_numbers<[1], [0], [0], [1], [0, 0, 1, 1], [], []>} : vector<128x768xbf16>, vector<768x128xbf16>, vector<128x128xf32> -> vector<128x128xf32>
    %c0_6 = arith.constant 0 : index
    %c0_7 = arith.constant 0 : index
    %10 = vector.load %arg5[%c0_6, %c0_7] : memref<128x128xf32, #tpu.memory_space<vmem>>, vector<128x128xf32>
    tpu.vector_store %arg5[%c0_6, %c0_7], %9 {strides = array<i32>} : memref<128x128xf32, #tpu.memory_space<vmem>>, vector<128x128xf32>,
    %11 = vector.extract_strided_slice %4 {offsets = [0, 1, 0, 0], sizes = [2, 8, 8, 768], strides = [1, 1, 1, 1]} : vector<2x10x8x768xbf16> to vector<2x8x8x768xbf16>
    %12 = vector.shape_cast %11 : vector<2x8x8x768xbf16> to vector<128x768xbf16>
    %c1 = arith.constant 1 : index
    %c0_8 = arith.constant 0 : index
    %c0_9 = arith.constant 0 : index
    %13 = vector.load %arg2[%c1, %c0_8, %c0_9] : memref<3x768x128xbf16, #tpu.memory_space<vmem>>, vector<1x768x128xbf16>
    %14 = vector.shape_cast %13 : vector<1x768x128xbf16> to vector<768x128xbf16>
    %cst_10 = arith.constant dense<0.000000e+00> : vector<128x128xf32>
    %15 = tpu.matmul %12, %14, %cst_10 {dimension_numbers = #tpu.dot_dimension_numbers<[1], [0], [0], [1], [0, 0, 1, 1], [], []>} : vector<128x768xbf16>, vector<768x128xbf16>, vector<128x128xf32> -> vector<128x128xf32>
    %c0_11 = arith.constant 0 : index
    %c0_12 = arith.constant 0 : index
    %16 = vector.load %arg5[%c0_11, %c0_12] : memref<128x128xf32, #tpu.memory_space<vmem>>, vector<128x128xf32>
    %17 = arith.addf %16, %15 : vector<128x128xf32>
    %c0_13 = arith.constant 0 : index
    %c0_14 = arith.constant 0 : index
    %18 = vector.load %arg5[%c0_13, %c0_14] : memref<128x128xf32, #tpu.memory_space<vmem>>, vector<128x128xf32>
    tpu.vector_store %arg5[%c0_13, %c0_14], %17 {strides = array<i32>} : memref<128x128xf32, #tpu.memory_space<vmem>>, vector<128x128xf32>,
    %19 = vector.extract_strided_slice %4 {offsets = [0, 2, 0, 0], sizes = [2, 8, 8, 768], strides = [1, 1, 1, 1]} : vector<2x10x8x768xbf16> to vector<2x8x8x768xbf16>
    %20 = vector.shape_cast %19 : vector<2x8x8x768xbf16> to vector<128x768xbf16>
    %c2 = arith.constant 2 : index
    %c0_15 = arith.constant 0 : index
    %c0_16 = arith.constant 0 : index
    %21 = vector.load %arg2[%c2, %c0_15, %c0_16] : memref<3x768x128xbf16, #tpu.memory_space<vmem>>, vector<1x768x128xbf16>
    %22 = vector.shape_cast %21 : vector<1x768x128xbf16> to vector<768x128xbf16>
    %cst_17 = arith.constant dense<0.000000e+00> : vector<128x128xf32>
    %23 = tpu.matmul %20, %22, %cst_17 {dimension_numbers = #tpu.dot_dimension_numbers<[1], [0], [0], [1], [0, 0, 1, 1], [], []>} : vector<128x768xbf16>, vector<768x128xbf16>, vector<128x128xf32> -> vector<128x128xf32>
    %c0_18 = arith.constant 0 : index
    %c0_19 = arith.constant 0 : index
    %24 = vector.load %arg5[%c0_18, %c0_19] : memref<128x128xf32, #tpu.memory_space<vmem>>, vector<128x128xf32>
    %25 = arith.addf %24, %23 : vector<128x128xf32>
    %c0_20 = arith.constant 0 : index
    %c0_21 = arith.constant 0 : index
    %26 = vector.load %arg5[%c0_20, %c0_21] : memref<128x128xf32, #tpu.memory_space<vmem>>, vector<128x128xf32>
    tpu.vector_store %arg5[%c0_20, %c0_21], %25 {strides = array<i32>} : memref<128x128xf32, #tpu.memory_space<vmem>>, vector<128x128xf32>,
    %c0_22 = arith.constant 0 : index
    %c0_23 = arith.constant 0 : index
    %27 = vector.load %arg5[%c0_22, %c0_23] : memref<128x128xf32, #tpu.memory_space<vmem>>, vector<128x128xf32>
    %c0_24 = arith.constant 0 : index
    %c0_25 = arith.constant 0 : index
    %28 = vector.load %arg3[%c0_24, %c0_25] : memref<1x128xf32, #tpu.memory_space<vmem>>, vector<1x128xf32>
    %29 = vector.broadcast %28 : vector<1x128xf32> to vector<128x128xf32>
    %30 = arith.addf %27, %29 : vector<128x128xf32>
    %c0_26 = arith.constant 0 : index
    %c0_27 = arith.constant 0 : index
    %31 = vector.load %arg4[%c0_26, %c0_27] : memref<128x128xf32, #tpu.memory_space<vmem>>, vector<128x128xf32>
    tpu.vector_store %arg4[%c0_26, %c0_27], %30 {strides = array<i32>} : memref<128x128xf32, #tpu.memory_space<vmem>>, vector<128x128xf32>,
    return
  }
  func.func @transform_0(%arg0: i32) -> (i32, i32, i32, i32) {
    %c0_i32 = arith.constant 0 : i32
    %c0_i32_0 = arith.constant 0 : i32
    %c0_i32_1 = arith.constant 0 : i32
    %c0_i32_2 = arith.constant 0 : i32
    %c0_i32_3 = arith.constant 0 : i32
    return %c0_i32, %c0_i32_0, %c0_i32_1, %c0_i32_2 : i32, i32, i32, i32
  }
  func.func @transform_1(%arg0: i32) -> (i32, i32, i32) {
    %c0_i32 = arith.constant 0 : i32
    %c0_i32_0 = arith.constant 0 : i32
    %c0_i32_1 = arith.constant 0 : i32
    return %c0_i32, %c0_i32_0, %arg0 : i32, i32, i32
  }
  func.func @transform_2(%arg0: i32) -> (i32, i32) {
    %c0_i32 = arith.constant 0 : i32
    %c0_i32_0 = arith.constant 0 : i32
    return %c0_i32, %arg0 : i32, i32
  }
  func.func @transform_3(%arg0: i32) -> (i32, i32) {
    %c0_i32 = arith.constant 0 : i32
    %c0_i32_0 = arith.constant 0 : i32
    return %c0_i32, %arg0 : i32, i32
  }
}

module attributes {stable_mosaic.version = 11 : i64} {
  func.func @_h2h_up_add_kernel(%arg0: i32, %arg1: memref<1x18x18x256xbf16, #tpu.memory_space<vmem>>, %arg2: memref<3x768x128xbf16, #tpu.memory_space<vmem>>, %arg3: memref<1x128xf32, #tpu.memory_space<vmem>>, %arg4: memref<64x128xf32, #tpu.memory_space<vmem>>, %arg5: memref<256x64xf32, #tpu.memory_space<vmem>>, %arg6: memref<256x128xf32, #tpu.memory_space<vmem>>, %arg7: memref<256x128xf32, #tpu.memory_space<vmem>>) attributes {dimension_semantics = [#tpu.dimension_semantics<parallel>], iteration_bounds = array<i64: 2>, scalar_prefetch = 0 : i64, scratch_operands = 1 : i64, tpu.core_type = #tpu.core_type<tc>, window_params = [{transform_indices = @transform_0, window_bounds = array<i64: 1, 18, 18, 256>}, {pipeline_mode = #tpu.pipeline_mode<synchronous>, transform_indices = @transform_1, window_bounds = array<i64: 3, 768, 128>}, {pipeline_mode = #tpu.pipeline_mode<synchronous>, transform_indices = @transform_2, window_bounds = array<i64: 1, 128>}, {transform_indices = @transform_3, window_bounds = array<i64: 64, 128>}, {pipeline_mode = #tpu.pipeline_mode<synchronous>, transform_indices = @transform_4, window_bounds = array<i64: 256, 64>}, {transform_indices = @transform_5, window_bounds = array<i64: 256, 128>}]} {
    %c0 = arith.constant 0 : index
    %c0_0 = arith.constant 0 : index
    %c0_1 = arith.constant 0 : index
    %c0_2 = arith.constant 0 : index
    %0 = vector.load %arg1[%c0, %c0_0, %c0_1, %c0_2] : memref<1x18x18x256xbf16, #tpu.memory_space<vmem>>, vector<1x18x18x256xbf16>
    %1 = vector.extract_strided_slice %0 {offsets = [0, 0, 0, 0], sizes = [1, 18, 16, 256], strides = [1, 1, 1, 1]} : vector<1x18x18x256xbf16> to vector<1x18x16x256xbf16>
    %2 = vector.extract_strided_slice %0 {offsets = [0, 0, 1, 0], sizes = [1, 18, 16, 256], strides = [1, 1, 1, 1]} : vector<1x18x18x256xbf16> to vector<1x18x16x256xbf16>
    %3 = vector.extract_strided_slice %0 {offsets = [0, 0, 2, 0], sizes = [1, 18, 16, 256], strides = [1, 1, 1, 1]} : vector<1x18x18x256xbf16> to vector<1x18x16x256xbf16>
    %4 = tpu.concatenate %1, %2, %3 in 3 : vector<1x18x16x256xbf16>, vector<1x18x16x256xbf16>, vector<1x18x16x256xbf16> -> vector<1x18x16x768xbf16>
    %5 = vector.extract_strided_slice %4 {offsets = [0, 0, 0, 0], sizes = [1, 16, 16, 768], strides = [1, 1, 1, 1]} : vector<1x18x16x768xbf16> to vector<1x16x16x768xbf16>
    %6 = vector.shape_cast %5 : vector<1x16x16x768xbf16> to vector<256x768xbf16>
    %c0_3 = arith.constant 0 : index
    %c0_4 = arith.constant 0 : index
    %c0_5 = arith.constant 0 : index
    %7 = vector.load %arg2[%c0_3, %c0_4, %c0_5] : memref<3x768x128xbf16, #tpu.memory_space<vmem>>, vector<1x768x128xbf16>
    %8 = vector.shape_cast %7 : vector<1x768x128xbf16> to vector<768x128xbf16>
    %cst = arith.constant dense<0.000000e+00> : vector<256x128xf32>
    %9 = tpu.matmul %6, %8, %cst {dimension_numbers = #tpu.dot_dimension_numbers<[1], [0], [0], [1], [0, 0, 1, 1], [], []>} : vector<256x768xbf16>, vector<768x128xbf16>, vector<256x128xf32> -> vector<256x128xf32>
    %c0_6 = arith.constant 0 : index
    %c0_7 = arith.constant 0 : index
    %10 = vector.load %arg7[%c0_6, %c0_7] : memref<256x128xf32, #tpu.memory_space<vmem>>, vector<256x128xf32>
    tpu.vector_store %arg7[%c0_6, %c0_7], %9 {strides = array<i32>} : memref<256x128xf32, #tpu.memory_space<vmem>>, vector<256x128xf32>,
    %11 = vector.extract_strided_slice %4 {offsets = [0, 1, 0, 0], sizes = [1, 16, 16, 768], strides = [1, 1, 1, 1]} : vector<1x18x16x768xbf16> to vector<1x16x16x768xbf16>
    %12 = vector.shape_cast %11 : vector<1x16x16x768xbf16> to vector<256x768xbf16>
    %c1 = arith.constant 1 : index
    %c0_8 = arith.constant 0 : index
    %c0_9 = arith.constant 0 : index
    %13 = vector.load %arg2[%c1, %c0_8, %c0_9] : memref<3x768x128xbf16, #tpu.memory_space<vmem>>, vector<1x768x128xbf16>
    %14 = vector.shape_cast %13 : vector<1x768x128xbf16> to vector<768x128xbf16>
    %cst_10 = arith.constant dense<0.000000e+00> : vector<256x128xf32>
    %15 = tpu.matmul %12, %14, %cst_10 {dimension_numbers = #tpu.dot_dimension_numbers<[1], [0], [0], [1], [0, 0, 1, 1], [], []>} : vector<256x768xbf16>, vector<768x128xbf16>, vector<256x128xf32> -> vector<256x128xf32>
    %c0_11 = arith.constant 0 : index
    %c0_12 = arith.constant 0 : index
    %16 = vector.load %arg7[%c0_11, %c0_12] : memref<256x128xf32, #tpu.memory_space<vmem>>, vector<256x128xf32>
    %17 = arith.addf %16, %15 : vector<256x128xf32>
    %c0_13 = arith.constant 0 : index
    %c0_14 = arith.constant 0 : index
    %18 = vector.load %arg7[%c0_13, %c0_14] : memref<256x128xf32, #tpu.memory_space<vmem>>, vector<256x128xf32>
    tpu.vector_store %arg7[%c0_13, %c0_14], %17 {strides = array<i32>} : memref<256x128xf32, #tpu.memory_space<vmem>>, vector<256x128xf32>,
    %19 = vector.extract_strided_slice %4 {offsets = [0, 2, 0, 0], sizes = [1, 16, 16, 768], strides = [1, 1, 1, 1]} : vector<1x18x16x768xbf16> to vector<1x16x16x768xbf16>
    %20 = vector.shape_cast %19 : vector<1x16x16x768xbf16> to vector<256x768xbf16>
    %c2 = arith.constant 2 : index
    %c0_15 = arith.constant 0 : index
    %c0_16 = arith.constant 0 : index
    %21 = vector.load %arg2[%c2, %c0_15, %c0_16] : memref<3x768x128xbf16, #tpu.memory_space<vmem>>, vector<1x768x128xbf16>
    %22 = vector.shape_cast %21 : vector<1x768x128xbf16> to vector<768x128xbf16>
    %cst_17 = arith.constant dense<0.000000e+00> : vector<256x128xf32>
    %23 = tpu.matmul %20, %22, %cst_17 {dimension_numbers = #tpu.dot_dimension_numbers<[1], [0], [0], [1], [0, 0, 1, 1], [], []>} : vector<256x768xbf16>, vector<768x128xbf16>, vector<256x128xf32> -> vector<256x128xf32>
    %c0_18 = arith.constant 0 : index
    %c0_19 = arith.constant 0 : index
    %24 = vector.load %arg7[%c0_18, %c0_19] : memref<256x128xf32, #tpu.memory_space<vmem>>, vector<256x128xf32>
    %25 = arith.addf %24, %23 : vector<256x128xf32>
    %c0_20 = arith.constant 0 : index
    %c0_21 = arith.constant 0 : index
    %26 = vector.load %arg7[%c0_20, %c0_21] : memref<256x128xf32, #tpu.memory_space<vmem>>, vector<256x128xf32>
    tpu.vector_store %arg7[%c0_20, %c0_21], %25 {strides = array<i32>} : memref<256x128xf32, #tpu.memory_space<vmem>>, vector<256x128xf32>,
    %c0_22 = arith.constant 0 : index
    %c0_23 = arith.constant 0 : index
    %27 = vector.load %arg5[%c0_22, %c0_23] : memref<256x64xf32, #tpu.memory_space<vmem>>, vector<256x64xf32>
    %c0_24 = arith.constant 0 : index
    %c0_25 = arith.constant 0 : index
    %28 = vector.load %arg4[%c0_24, %c0_25] : memref<64x128xf32, #tpu.memory_space<vmem>>, vector<64x128xf32>
    %cst_26 = arith.constant dense<0.000000e+00> : vector<256x128xf32>
    %29 = tpu.matmul %27, %28, %cst_26 {dimension_numbers = #tpu.dot_dimension_numbers<[1], [0], [0], [1], [0, 0, 1, 1], [], []>} : vector<256x64xf32>, vector<64x128xf32>, vector<256x128xf32> -> vector<256x128xf32>
    %c0_27 = arith.constant 0 : index
    %c0_28 = arith.constant 0 : index
    %30 = vector.load %arg7[%c0_27, %c0_28] : memref<256x128xf32, #tpu.memory_space<vmem>>, vector<256x128xf32>
    %c0_29 = arith.constant 0 : index
    %c0_30 = arith.constant 0 : index
    %31 = vector.load %arg3[%c0_29, %c0_30] : memref<1x128xf32, #tpu.memory_space<vmem>>, vector<1x128xf32>
    %32 = vector.broadcast %31 : vector<1x128xf32> to vector<256x128xf32>
    %33 = arith.addf %30, %32 : vector<256x128xf32>
    %34 = arith.addf %33, %29 : vector<256x128xf32>
    %c0_31 = arith.constant 0 : index
    %c0_32 = arith.constant 0 : index
    %35 = vector.load %arg6[%c0_31, %c0_32] : memref<256x128xf32, #tpu.memory_space<vmem>>, vector<256x128xf32>
    tpu.vector_store %arg6[%c0_31, %c0_32], %34 {strides = array<i32>} : memref<256x128xf32, #tpu.memory_space<vmem>>, vector<256x128xf32>,
    return
  }
  func.func @transform_0(%arg0: i32) -> (i32, i32, i32, i32) {
    %c0_i32 = arith.constant 0 : i32
    %c0_i32_0 = arith.constant 0 : i32
    %c0_i32_1 = arith.constant 0 : i32
    %c0_i32_2 = arith.constant 0 : i32
    return %arg0, %c0_i32, %c0_i32_0, %c0_i32_1 : i32, i32, i32, i32
  }
  func.func @transform_1(%arg0: i32) -> (i32, i32, i32) {
    %c0_i32 = arith.constant 0 : i32
    %c0_i32_0 = arith.constant 0 : i32
    %c0_i32_1 = arith.constant 0 : i32
    %c0_i32_2 = arith.constant 0 : i32
    return %c0_i32, %c0_i32_0, %c0_i32_1 : i32, i32, i32
  }
  func.func @transform_2(%arg0: i32) -> (i32, i32) {
    %c0_i32 = arith.constant 0 : i32
    %c0_i32_0 = arith.constant 0 : i32
    %c0_i32_1 = arith.constant 0 : i32
    return %c0_i32, %c0_i32_0 : i32, i32
  }
  func.func @transform_3(%arg0: i32) -> (i32, i32) {
    %c0_i32 = arith.constant 0 : i32
    %c0_i32_0 = arith.constant 0 : i32
    return %arg0, %c0_i32 : i32, i32
  }
  func.func @transform_4(%arg0: i32) -> (i32, i32) {
    %c0_i32 = arith.constant 0 : i32
    %c0_i32_0 = arith.constant 0 : i32
    %c0_i32_1 = arith.constant 0 : i32
    return %c0_i32, %c0_i32_0 : i32, i32
  }
  func.func @transform_5(%arg0: i32) -> (i32, i32) {
    %c0_i32 = arith.constant 0 : i32
    %c0_i32_0 = arith.constant 0 : i32
    return %arg0, %c0_i32 : i32, i32
  }
}

</mosaic_0001>

<bundles_post_ra>
// kernel: _lambda_.2
= control target key start
LH: loop header
LB: loop body
LE: loop exit
PB: predicated region body
PF: predicated region fallthrough
CT: control target
= control target key end

     0   :  { %s5929_s12 = smov 0   ;;  %s5931_s13 = smov 0   ;;  %s7945_s0 = inlined_call_operand.vmem [shape: bf16[2,10,10,256], index: 0, kind: input, shape index: {}]   ;;  %s7946_s1 = inlined_call_operand.vmem [shape: bf16[3,768,256], index: 1, kind: input, shape index: {}]   ;;  %s7947_s2 = inlined_call_operand.vmem [shape: f32[1,256], index: 2, kind: input, shape index: {}]   ;;  %s7948_s3 = inlined_call_operand.vmem [shape: f32[128,256], index: 3, kind: output, shape index: {}]  }
   0x1   :  { %s5933_s14 = smov 0  }
   0x2 LB: > { %s5945_s15 = sadd.s32 4294967295, %s5907_s14   ;;  %s5948_s16 = sadd.s32 1, %s5907_s14   ;;  %s5907_s14 = sphi %s5933_s14, %s8140_s14   ;;  %s5903_s13 = sphi %s5931_s13, %s8139_s13   ;;  %s5899_s12 = sphi %s5929_s12, %s8138_s12  }
   0x3   : > { %s38_s17 = ssub.s32 %s5907_s14, %s5948_s16  ;;  %s41_s18 = sadd.s32 1, %s5903_s13 }
   0x4   : > { %p39_p0 = scmp.eq.s32.totalorder %s38_s17, 0  ;;  %p48_p1 = scmp.ne.s32.totalorder %s5903_s13, %s5899_s12 }
   0x5   : > { %p49_p2 = scmp.eq.s32.totalorder %s5907_s14, 0  ;;  %p104_p3 = scmp.eq.s32.totalorder %s5945_s15, 1 }
   0x6   : > { %s5958_s19 = scalar_select %p39_p0, %s5903_s13, %s41_s18  }
   0x7   : > { %p50_p4 = por %p49_p2, %p48_p1  ;;  %p5960_p5 = por %p104_p3, %p48_p1 }
   0x8   : > { %p4548_p6 = scmp.ge.s32.totalorder %s5907_s14, 2 }
   0xa   : > { %129 = sbr.rel (%p4548_p6) target bundleno = 213 (0xd5), region = 20 }
  0x11   : > { %132 = sbr.rel (!%p50_p4) target bundleno = 213 (0xd5), region = 24  ;;  %s134_s21 = sand.u32 (%p50_p4), 1, %s5903_s13  }
  0x12   : > { %s4549_s22 = sshll.u32 (%p50_p4), %s5907_s14, 2  ;;  %s5633_s23 = smul.u32 (%p50_p4), 1152, %s134_s21 }
  0x13   : > { %s5970_s26 = scalar_lea.vmem (%p50_p4), %s7946_s1, %s4549_s22 }
  0x14   : > { %v154_v0 = vld [vmem:[%s5970_s26] sm:$0xf] (%p50_p4)  ;;  %v156_v1 = vld [vmem:[%s5970_s26 + $0x8] sm:$0xf] (%p50_p4)  ;;  %v158_v2 = vld [vmem:[%s5970_s26 + $0x10] sm:$0xf] (%p50_p4) }
  0x15   : > { %v160_v3 = vld [vmem:[%s5970_s26 + $0x18] sm:$0xf] (%p50_p4)  ;;  %v162_v4 = vld [vmem:[%s5970_s26 + $0x20] sm:$0xf] (%p50_p4)  ;;  %s5977_s27 = scalar_lea.vmem (%p50_p4), [#allocation3], %s5633_s23 }
  0x16   : > { %155 = vst [vmem:[%s5977_s27] sm:$0xf] (%p50_p4), %v154_v0  ;;  %157 = vst [vmem:[%s5977_s27 + $0x4] sm:$0xf] (%p50_p4), %v156_v1  ;;  %v164_v5 = vld [vmem:[%s5970_s26 + $0x28] sm:$0xf] (%p50_p4) }
  0x17   : > { %159 = vst [vmem:[%s5977_s27 + $0x8] sm:$0xf] (%p50_p4), %v158_v2  ;;  %161 = vst [vmem:[%s5977_s27 + $0xc] sm:$0xf] (%p50_p4), %v160_v3  ;;  %v166_v6 = vld [vmem:[%s5970_s26 + $0x30] sm:$0xf] (%p50_p4) }
  0x18   : > { %163 = vst [vmem:[%s5977_s27 + $0x10] sm:$0xf] %v162_v4  ;;  %v168_v7 = vld [vmem:[%s5970_s26 + $0x38] sm:$0xf]  ;;  %165 = vst [vmem:[%s5977_s27 + $0x14] sm:$0xf] %v164_v5 }
  0x19   : > { %167 = vst [vmem:[%s5977_s27 + $0x18] sm:$0xf] %v166_v6  ;;  %169 = vst [vmem:[%s5977_s27 + $0x1c] sm:$0xf] %v168_v7  ;;  %v170_v8 = vld [vmem:[%s5970_s26 + $0x40] sm:$0xf] }
  0x1a   : > { %v172_v9 = vld [vmem:[%s5970_s26 + $0x48] sm:$0xf]  ;;  %v174_v10 = vld [vmem:[%s5970_s26 + $0x50] sm:$0xf]  ;;  %171 = vst [vmem:[%s5977_s27 + $0x20] sm:$0xf] %v170_v8 }
  0x1b   : > { %173 = vst [vmem:[%s5977_s27 + $0x24] sm:$0xf] %v172_v9  ;;  %175 = vst [vmem:[%s5977_s27 + $0x28] sm:$0xf] %v174_v10  ;;  %v176_v11 = vld [vmem:[%s5970_s26 + $0x58] sm:$0xf] }
  0x1c   : > { %v178_v12 = vld [vmem:[%s5970_s26 + $0x60] sm:$0xf]  ;;  %v180_v13 = vld [vmem:[%s5970_s26 + $0x68] sm:$0xf]  ;;  %177 = vst [vmem:[%s5977_s27 + $0x2c] sm:$0xf] %v176_v11 }
  0x1d   : > { %179 = vst [vmem:[%s5977_s27 + $0x30] sm:$0xf] %v178_v12  ;;  %181 = vst [vmem:[%s5977_s27 + $0x34] sm:$0xf] %v180_v13  ;;  %v182_v14 = vld [vmem:[%s5970_s26 + $0x70] sm:$0xf] }
  0x1e   : > { %v184_v15 = vld [vmem:[%s5970_s26 + $0x78] sm:$0xf]  ;;  %v186_v16 = vld [vmem:[%s5970_s26 + $0x80] sm:$0xf]  ;;  %183 = vst [vmem:[%s5977_s27 + $0x38] sm:$0xf] %v182_v14 }
  0x1f   : > { %185 = vst [vmem:[%s5977_s27 + $0x3c] sm:$0xf] %v184_v15  ;;  %187 = vst [vmem:[%s5977_s27 + $0x40] sm:$0xf] %v186_v16  ;;  %v188_v17 = vld [vmem:[%s5970_s26 + $0x88] sm:$0xf] }
  0x20   : > { %v190_v18 = vld [vmem:[%s5970_s26 + $0x90] sm:$0xf]  ;;  %v192_v19 = vld [vmem:[%s5970_s26 + $0x98] sm:$0xf]  ;;  %189 = vst [vmem:[%s5977_s27 + $0x44] sm:$0xf] %v188_v17 }
  0x21   : > { %191 = vst [vmem:[%s5977_s27 + $0x48] sm:$0xf] %v190_v18  ;;  %193 = vst [vmem:[%s5977_s27 + $0x4c] sm:$0xf] %v192_v19  ;;  %v194_v20 = vld [vmem:[%s5970_s26 + $0xa0] sm:$0xf] }
  0x22   : > { %v196_v21 = vld [vmem:[%s5970_s26 + $0xa8] sm:$0xf]  ;;  %v198_v22 = vld [vmem:[%s5970_s26 + $0xb0] sm:$0xf]  ;;  %195 = vst [vmem:[%s5977_s27 + $0x50] sm:$0xf] %v194_v20 }
  0x23   : > { %197 = vst [vmem:[%s5977_s27 + $0x54] sm:$0xf] %v196_v21  ;;  %199 = vst [vmem:[%s5977_s27 + $0x58] sm:$0xf] %v198_v22  ;;  %v200_v23 = vld [vmem:[%s5970_s26 + $0xb8] sm:$0xf] }
  0x24   : > { %v202_v24 = vld [vmem:[%s5970_s26 + $0xc0] sm:$0xf]  ;;  %v204_v25 = vld [vmem:[%s5970_s26 + $0xc8] sm:$0xf]  ;;  %201 = vst [vmem:[%s5977_s27 + $0x5c] sm:$0xf] %v200_v23 }
  0x25   : > { %203 = vst [vmem:[%s5977_s27 + $0x60] sm:$0xf] %v202_v24  ;;  %205 = vst [vmem:[%s5977_s27 + $0x64] sm:$0xf] %v204_v25  ;;  %v206_v26 = vld [vmem:[%s5970_s26 + $0xd0] sm:$0xf] }
  0x26   : > { %v208_v27 = vld [vmem:[%s5970_s26 + $0xd8] sm:$0xf]  ;;  %v210_v28 = vld [vmem:[%s5970_s26 + $0xe0] sm:$0xf]  ;;  %207 = vst [vmem:[%s5977_s27 + $0x68] sm:$0xf] %v206_v26 }
  0x27   : > { %209 = vst [vmem:[%s5977_s27 + $0x6c] sm:$0xf] %v208_v27  ;;  %211 = vst [vmem:[%s5977_s27 + $0x70] sm:$0xf] %v210_v28  ;;  %v212_v29 = vld [vmem:[%s5970_s26 + $0xe8] sm:$0xf] }
  0x28   : > { %v214_v30 = vld [vmem:[%s5970_s26 + $0xf0] sm:$0xf]  ;;  %v216_v31 = vld [vmem:[%s5970_s26 + $0xf8] sm:$0xf]  ;;  %213 = vst [vmem:[%s5977_s27 + $0x74] sm:$0xf] %v212_v29 }
  0x29   : > { %215 = vst [vmem:[%s5977_s27 + $0x78] sm:$0xf] %v214_v30  ;;  %217 = vst [vmem:[%s5977_s27 + $0x7c] sm:$0xf] %v216_v31  ;;  %v218_v32 = vld [vmem:[%s5970_s26 + $0x100] sm:$0xf] }
  0x2a   : > { %v220_v33 = vld [vmem:[%s5970_s26 + $0x108] sm:$0xf]  ;;  %v222_v34 = vld [vmem:[%s5970_s26 + $0x110] sm:$0xf]  ;;  %219 = vst [vmem:[%s5977_s27 + $0x80] sm:$0xf] %v218_v32 }
  0x2b   : > { %221 = vst [vmem:[%s5977_s27 + $0x84] sm:$0xf] %v220_v33  ;;  %223 = vst [vmem:[%s5977_s27 + $0x88] sm:$0xf] %v222_v34  ;;  %v224_v35 = vld [vmem:[%s5970_s26 + $0x118] sm:$0xf] }
  0x2c   : > { %v226_v36 = vld [vmem:[%s5970_s26 + $0x120] sm:$0xf]  ;;  %v228_v37 = vld [vmem:[%s5970_s26 + $0x128] sm:$0xf]  ;;  %225 = vst [vmem:[%s5977_s27 + $0x8c] sm:$0xf] %v224_v35 }
  0x2d   : > { %227 = vst [vmem:[%s5977_s27 + $0x90] sm:$0xf] %v226_v36  ;;  %229 = vst [vmem:[%s5977_s27 + $0x94] sm:$0xf] %v228_v37  ;;  %v230_v38 = vld [vmem:[%s5970_s26 + $0x130] sm:$0xf] }
  0x2e   : > { %v232_v39 = vld [vmem:[%s5970_s26 + $0x138] sm:$0xf]  ;;  %v234_v40 = vld [vmem:[%s5970_s26 + $0x140] sm:$0xf]  ;;  %231 = vst [vmem:[%s5977_s27 + $0x98] sm:$0xf] %v230_v38 }
  0x2f   : > { %233 = vst [vmem:[%s5977_s27 + $0x9c] sm:$0xf] %v232_v39  ;;  %235 = vst [vmem:[%s5977_s27 + $0xa0] sm:$0xf] %v234_v40  ;;  %v236_v41 = vld [vmem:[%s5970_s26 + $0x148] sm:$0xf] }
  0x30   : > { %v238_v42 = vld [vmem:[%s5970_s26 + $0x150] sm:$0xf]  ;;  %v240_v43 = vld [vmem:[%s5970_s26 + $0x158] sm:$0xf]  ;;  %237 = vst [vmem:[%s5977_s27 + $0xa4] sm:$0xf] %v236_v41 }
  0x31   : > { %239 = vst [vmem:[%s5977_s27 + $0xa8] sm:$0xf] %v238_v42  ;;  %241 = vst [vmem:[%s5977_s27 + $0xac] sm:$0xf] %v240_v43  ;;  %v242_v44 = vld [vmem:[%s5970_s26 + $0x160] sm:$0xf] }
  0x32   : > { %v244_v45 = vld [vmem:[%s5970_s26 + $0x168] sm:$0xf]  ;;  %v246_v46 = vld [vmem:[%s5970_s26 + $0x170] sm:$0xf]  ;;  %243 = vst [vmem:[%s5977_s27 + $0xb0] sm:$0xf] %v242_v44 }
  0x33   : > { %245 = vst [vmem:[%s5977_s27 + $0xb4] sm:$0xf] %v244_v45  ;;  %247 = vst [vmem:[%s5977_s27 + $0xb8] sm:$0xf] %v246_v46  ;;  %v248_v47 = vld [vmem:[%s5970_s26 + $0x178] sm:$0xf] }
  0x34   : > { %v250_v48 = vld [vmem:[%s5970_s26 + $0x180] sm:$0xf]  ;;  %v252_v49 = vld [vmem:[%s5970_s26 + $0x188] sm:$0xf]  ;;  %249 = vst [vmem:[%s5977_s27 + $0xbc] sm:$0xf] %v248_v47 }
  0x35   : > { %251 = vst [vmem:[%s5977_s27 + $0xc0] sm:$0xf] %v250_v48  ;;  %253 = vst [vmem:[%s5977_s27 + $0xc4] sm:$0xf] %v252_v49  ;;  %v254_v50 = vld [vmem:[%s5970_s26 + $0x190] sm:$0xf] }
  0x36   : > { %v256_v51 = vld [vmem:[%s5970_s26 + $0x198] sm:$0xf]  ;;  %v258_v52 = vld [vmem:[%s5970_s26 + $0x1a0] sm:$0xf]  ;;  %255 = vst [vmem:[%s5977_s27 + $0xc8] sm:$0xf] %v254_v50 }
  0x37   : > { %257 = vst [vmem:[%s5977_s27 + $0xcc] sm:$0xf] %v256_v51  ;;  %259 = vst [vmem:[%s5977_s27 + $0xd0] sm:$0xf] %v258_v52  ;;  %v260_v53 = vld [vmem:[%s5970_s26 + $0x1a8] sm:$0xf] }
  0x38   : > { %v262_v54 = vld [vmem:[%s5970_s26 + $0x1b0] sm:$0xf]  ;;  %v264_v55 = vld [vmem:[%s5970_s26 + $0x1b8] sm:$0xf]  ;;  %261 = vst [vmem:[%s5977_s27 + $0xd4] sm:$0xf] %v260_v53 }
  0x39   : > { %263 = vst [vmem:[%s5977_s27 + $0xd8] sm:$0xf] %v262_v54  ;;  %265 = vst [vmem:[%s5977_s27 + $0xdc] sm:$0xf] %v264_v55  ;;  %v266_v56 = vld [vmem:[%s5970_s26 + $0x1c0] sm:$0xf] }
  0x3a   : > { %v268_v57 = vld [vmem:[%s5970_s26 + $0x1c8] sm:$0xf]  ;;  %v270_v58 = vld [vmem:[%s5970_s26 + $0x1d0] sm:$0xf]  ;;  %267 = vst [vmem:[%s5977_s27 + $0xe0] sm:$0xf] %v266_v56 }
  0x3b   : > { %269 = vst [vmem:[%s5977_s27 + $0xe4] sm:$0xf] %v268_v57  ;;  %271 = vst [vmem:[%s5977_s27 + $0xe8] sm:$0xf] %v270_v58  ;;  %v272_v59 = vld [vmem:[%s5970_s26 + $0x1d8] sm:$0xf] }
  0x3c   : > { %v274_v60 = vld [vmem:[%s5970_s26 + $0x1e0] sm:$0xf]  ;;  %v276_v61 = vld [vmem:[%s5970_s26 + $0x1e8] sm:$0xf]  ;;  %273 = vst [vmem:[%s5977_s27 + $0xec] sm:$0xf] %v272_v59 }
  0x3d   : > { %275 = vst [vmem:[%s5977_s27 + $0xf0] sm:$0xf] %v274_v60  ;;  %277 = vst [vmem:[%s5977_s27 + $0xf4] sm:$0xf] %v276_v61  ;;  %v278_v62 = vld [vmem:[%s5970_s26 + $0x1f0] sm:$0xf] }
  0x3e   : > { %v280_v63 = vld [vmem:[%s5970_s26 + $0x1f8] sm:$0xf]  ;;  %v282_v0 = vld [vmem:[%s5970_s26 + $0x200] sm:$0xf]  ;;  %279 = vst [vmem:[%s5977_s27 + $0xf8] sm:$0xf] %v278_v62 }
  0x3f   : > { %281 = vst [vmem:[%s5977_s27 + $0xfc] sm:$0xf] %v280_v63  ;;  %283 = vst [vmem:[%s5977_s27 + $0x100] sm:$0xf] %v282_v0  ;;  %v284_v1 = vld [vmem:[%s5970_s26 + $0x208] sm:$0xf] }
  0x40   : > { %v286_v2 = vld [vmem:[%s5970_s26 + $0x210] sm:$0xf]  ;;  %v288_v3 = vld [vmem:[%s5970_s26 + $0x218] sm:$0xf]  ;;  %285 = vst [vmem:[%s5977_s27 + $0x104] sm:$0xf] %v284_v1 }
  0x41   : > { %287 = vst [vmem:[%s5977_s27 + $0x108] sm:$0xf] %v286_v2  ;;  %289 = vst [vmem:[%s5977_s27 + $0x10c] sm:$0xf] %v288_v3  ;;  %v290_v4 = vld [vmem:[%s5970_s26 + $0x220] sm:$0xf] }
  0x42   : > { %v292_v5 = vld [vmem:[%s5970_s26 + $0x228] sm:$0xf]  ;;  %v294_v6 = vld [vmem:[%s5970_s26 + $0x230] sm:$0xf]  ;;  %291 = vst [vmem:[%s5977_s27 + $0x110] sm:$0xf] %v290_v4 }
  0x43   : > { %293 = vst [vmem:[%s5977_s27 + $0x114] sm:$0xf] %v292_v5  ;;  %295 = vst [vmem:[%s5977_s27 + $0x118] sm:$0xf] %v294_v6  ;;  %v296_v7 = vld [vmem:[%s5970_s26 + $0x238] sm:$0xf] }
  0x44   : > { %v298_v8 = vld [vmem:[%s5970_s26 + $0x240] sm:$0xf]  ;;  %v300_v9 = vld [vmem:[%s5970_s26 + $0x248] sm:$0xf]  ;;  %297 = vst [vmem:[%s5977_s27 + $0x11c] sm:$0xf] %v296_v7 }
  0x45   : > { %299 = vst [vmem:[%s5977_s27 + $0x120] sm:$0xf] %v298_v8  ;;  %301 = vst [vmem:[%s5977_s27 + $0x124] sm:$0xf] %v300_v9  ;;  %v302_v10 = vld [vmem:[%s5970_s26 + $0x250] sm:$0xf] }
  0x46   : > { %v304_v11 = vld [vmem:[%s5970_s26 + $0x258] sm:$0xf]  ;;  %v306_v12 = vld [vmem:[%s5970_s26 + $0x260] sm:$0xf]  ;;  %303 = vst [vmem:[%s5977_s27 + $0x128] sm:$0xf] %v302_v10 }
  0x47   : > { %305 = vst [vmem:[%s5977_s27 + $0x12c] sm:$0xf] %v304_v11  ;;  %307 = vst [vmem:[%s5977_s27 + $0x130] sm:$0xf] %v306_v12  ;;  %v308_v13 = vld [vmem:[%s5970_s26 + $0x268] sm:$0xf] }
  0x48   : > { %v310_v14 = vld [vmem:[%s5970_s26 + $0x270] sm:$0xf]  ;;  %v312_v15 = vld [vmem:[%s5970_s26 + $0x278] sm:$0xf]  ;;  %309 = vst [vmem:[%s5977_s27 + $0x134] sm:$0xf] %v308_v13 }
  0x49   : > { %311 = vst [vmem:[%s5977_s27 + $0x138] sm:$0xf] %v310_v14  ;;  %313 = vst [vmem:[%s5977_s27 + $0x13c] sm:$0xf] %v312_v15  ;;  %v314_v16 = vld [vmem:[%s5970_s26 + $0x280] sm:$0xf] }
  0x4a   : > { %v316_v17 = vld [vmem:[%s5970_s26 + $0x288] sm:$0xf]  ;;  %v318_v18 = vld [vmem:[%s5970_s26 + $0x290] sm:$0xf]  ;;  %315 = vst [vmem:[%s5977_s27 + $0x140] sm:$0xf] %v314_v16 }
  0x4b   : > { %317 = vst [vmem:[%s5977_s27 + $0x144] sm:$0xf] %v316_v17  ;;  %319 = vst [vmem:[%s5977_s27 + $0x148] sm:$0xf] %v318_v18  ;;  %v320_v19 = vld [vmem:[%s5970_s26 + $0x298] sm:$0xf] }
  0x4c   : > { %v322_v20 = vld [vmem:[%s5970_s26 + $0x2a0] sm:$0xf]  ;;  %v324_v21 = vld [vmem:[%s5970_s26 + $0x2a8] sm:$0xf]  ;;  %321 = vst [vmem:[%s5977_s27 + $0x14c] sm:$0xf] %v320_v19 }
  0x4d   : > { %323 = vst [vmem:[%s5977_s27 + $0x150] sm:$0xf] %v322_v20  ;;  %325 = vst [vmem:[%s5977_s27 + $0x154] sm:$0xf] %v324_v21  ;;  %v326_v22 = vld [vmem:[%s5970_s26 + $0x2b0] sm:$0xf] }
  0x4e   : > { %v328_v23 = vld [vmem:[%s5970_s26 + $0x2b8] sm:$0xf]  ;;  %v330_v24 = vld [vmem:[%s5970_s26 + $0x2c0] sm:$0xf]  ;;  %327 = vst [vmem:[%s5977_s27 + $0x158] sm:$0xf] %v326_v22 }
  0x4f   : > { %329 = vst [vmem:[%s5977_s27 + $0x15c] sm:$0xf] %v328_v23  ;;  %331 = vst [vmem:[%s5977_s27 + $0x160] sm:$0xf] %v330_v24  ;;  %v332_v25 = vld [vmem:[%s5970_s26 + $0x2c8] sm:$0xf] }
  0x50   : > { %v334_v26 = vld [vmem:[%s5970_s26 + $0x2d0] sm:$0xf]  ;;  %v336_v27 = vld [vmem:[%s5970_s26 + $0x2d8] sm:$0xf]  ;;  %333 = vst [vmem:[%s5977_s27 + $0x164] sm:$0xf] %v332_v25 }
  0x51   : > { %335 = vst [vmem:[%s5977_s27 + $0x168] sm:$0xf] %v334_v26  ;;  %337 = vst [vmem:[%s5977_s27 + $0x16c] sm:$0xf] %v336_v27  ;;  %v338_v28 = vld [vmem:[%s5970_s26 + $0x2e0] sm:$0xf] }
  0x52   : > { %v340_v29 = vld [vmem:[%s5970_s26 + $0x2e8] sm:$0xf]  ;;  %v342_v30 = vld [vmem:[%s5970_s26 + $0x2f0] sm:$0xf]  ;;  %339 = vst [vmem:[%s5977_s27 + $0x170] sm:$0xf] %v338_v28 }
  0x53   : > { %341 = vst [vmem:[%s5977_s27 + $0x174] sm:$0xf] %v340_v29  ;;  %343 = vst [vmem:[%s5977_s27 + $0x178] sm:$0xf] %v342_v30  ;;  %v344_v31 = vld [vmem:[%s5970_s26 + $0x2f8] sm:$0xf] }
  0x54   : > { %v346_v32 = vld [vmem:[%s5970_s26 + $0x300] sm:$0xf]  ;;  %v348_v33 = vld [vmem:[%s5970_s26 + $0x308] sm:$0xf]  ;;  %345 = vst [vmem:[%s5977_s27 + $0x17c] sm:$0xf] %v344_v31 }
  0x55   : > { %347 = vst [vmem:[%s5977_s27 + $0x180] sm:$0xf] %v346_v32  ;;  %349 = vst [vmem:[%s5977_s27 + $0x184] sm:$0xf] %v348_v33  ;;  %v350_v34 = vld [vmem:[%s5970_s26 + $0x310] sm:$0xf] }
  0x56   : > { %v352_v35 = vld [vmem:[%s5970_s26 + $0x318] sm:$0xf]  ;;  %v354_v36 = vld [vmem:[%s5970_s26 + $0x320] sm:$0xf]  ;;  %351 = vst [vmem:[%s5977_s27 + $0x188] sm:$0xf] %v350_v34 }
  0x57   : > { %353 = vst [vmem:[%s5977_s27 + $0x18c] sm:$0xf] %v352_v35  ;;  %355 = vst [vmem:[%s5977_s27 + $0x190] sm:$0xf] %v354_v36  ;;  %v356_v37 = vld [vmem:[%s5970_s26 + $0x328] sm:$0xf] }
  0x58   : > { %v358_v38 = vld [vmem:[%s5970_s26 + $0x330] sm:$0xf]  ;;  %v360_v39 = vld [vmem:[%s5970_s26 + $0x338] sm:$0xf]  ;;  %357 = vst [vmem:[%s5977_s27 + $0x194] sm:$0xf] %v356_v37 }
  0x59   : > { %359 = vst [vmem:[%s5977_s27 + $0x198] sm:$0xf] %v358_v38  ;;  %361 = vst [vmem:[%s5977_s27 + $0x19c] sm:$0xf] %v360_v39  ;;  %v362_v40 = vld [vmem:[%s5970_s26 + $0x340] sm:$0xf] }
  0x5a   : > { %v364_v41 = vld [vmem:[%s5970_s26 + $0x348] sm:$0xf]  ;;  %v366_v42 = vld [vmem:[%s5970_s26 + $0x350] sm:$0xf]  ;;  %363 = vst [vmem:[%s5977_s27 + $0x1a0] sm:$0xf] %v362_v40 }
  0x5b   : > { %365 = vst [vmem:[%s5977_s27 + $0x1a4] sm:$0xf] %v364_v41  ;;  %367 = vst [vmem:[%s5977_s27 + $0x1a8] sm:$0xf] %v366_v42  ;;  %v368_v43 = vld [vmem:[%s5970_s26 + $0x358] sm:$0xf] }
  0x5c   : > { %v370_v44 = vld [vmem:[%s5970_s26 + $0x360] sm:$0xf]  ;;  %v372_v45 = vld [vmem:[%s5970_s26 + $0x368] sm:$0xf]  ;;  %369 = vst [vmem:[%s5977_s27 + $0x1ac] sm:$0xf] %v368_v43 }
  0x5d   : > { %371 = vst [vmem:[%s5977_s27 + $0x1b0] sm:$0xf] %v370_v44  ;;  %373 = vst [vmem:[%s5977_s27 + $0x1b4] sm:$0xf] %v372_v45  ;;  %v374_v46 = vld [vmem:[%s5970_s26 + $0x370] sm:$0xf] }
  0x5e   : > { %v376_v47 = vld [vmem:[%s5970_s26 + $0x378] sm:$0xf]  ;;  %v378_v48 = vld [vmem:[%s5970_s26 + $0x380] sm:$0xf]  ;;  %375 = vst [vmem:[%s5977_s27 + $0x1b8] sm:$0xf] %v374_v46 }
  0x5f   : > { %377 = vst [vmem:[%s5977_s27 + $0x1bc] sm:$0xf] %v376_v47  ;;  %379 = vst [vmem:[%s5977_s27 + $0x1c0] sm:$0xf] %v378_v48  ;;  %v380_v49 = vld [vmem:[%s5970_s26 + $0x388] sm:$0xf] }
  0x60   : > { %v382_v50 = vld [vmem:[%s5970_s26 + $0x390] sm:$0xf]  ;;  %v384_v51 = vld [vmem:[%s5970_s26 + $0x398] sm:$0xf]  ;;  %381 = vst [vmem:[%s5977_s27 + $0x1c4] sm:$0xf] %v380_v49 }
  0x61   : > { %383 = vst [vmem:[%s5977_s27 + $0x1c8] sm:$0xf] %v382_v50  ;;  %385 = vst [vmem:[%s5977_s27 + $0x1cc] sm:$0xf] %v384_v51  ;;  %v386_v52 = vld [vmem:[%s5970_s26 + $0x3a0] sm:$0xf] }
  0x62   : > { %v388_v53 = vld [vmem:[%s5970_s26 + $0x3a8] sm:$0xf]  ;;  %v390_v54 = vld [vmem:[%s5970_s26 + $0x3b0] sm:$0xf]  ;;  %387 = vst [vmem:[%s5977_s27 + $0x1d0] sm:$0xf] %v386_v52 }
  0x63   : > { %389 = vst [vmem:[%s5977_s27 + $0x1d4] sm:$0xf] %v388_v53  ;;  %391 = vst [vmem:[%s5977_s27 + $0x1d8] sm:$0xf] %v390_v54  ;;  %v392_v55 = vld [vmem:[%s5970_s26 + $0x3b8] sm:$0xf] }
  0x64   : > { %v394_v56 = vld [vmem:[%s5970_s26 + $0x3c0] sm:$0xf]  ;;  %v396_v57 = vld [vmem:[%s5970_s26 + $0x3c8] sm:$0xf]  ;;  %393 = vst [vmem:[%s5977_s27 + $0x1dc] sm:$0xf] %v392_v55 }
  0x65   : > { %395 = vst [vmem:[%s5977_s27 + $0x1e0] sm:$0xf] %v394_v56  ;;  %397 = vst [vmem:[%s5977_s27 + $0x1e4] sm:$0xf] %v396_v57  ;;  %v398_v58 = vld [vmem:[%s5970_s26 + $0x3d0] sm:$0xf] }
  0x66   : > { %v400_v59 = vld [vmem:[%s5970_s26 + $0x3d8] sm:$0xf]  ;;  %v402_v60 = vld [vmem:[%s5970_s26 + $0x3e0] sm:$0xf]  ;;  %399 = vst [vmem:[%s5977_s27 + $0x1e8] sm:$0xf] %v398_v58 }
  0x67   : > { %401 = vst [vmem:[%s5977_s27 + $0x1ec] sm:$0xf] %v400_v59  ;;  %403 = vst [vmem:[%s5977_s27 + $0x1f0] sm:$0xf] %v402_v60  ;;  %v404_v61 = vld [vmem:[%s5970_s26 + $0x3e8] sm:$0xf] }
  0x68   : > { %v406_v62 = vld [vmem:[%s5970_s26 + $0x3f0] sm:$0xf]  ;;  %v408_v63 = vld [vmem:[%s5970_s26 + $0x3f8] sm:$0xf]  ;;  %405 = vst [vmem:[%s5977_s27 + $0x1f4] sm:$0xf] %v404_v61 }
  0x69   : > { %407 = vst [vmem:[%s5977_s27 + $0x1f8] sm:$0xf] %v406_v62  ;;  %409 = vst [vmem:[%s5977_s27 + $0x1fc] sm:$0xf] %v408_v63  ;;  %v410_v0 = vld [vmem:[%s5970_s26 + $0x400] sm:$0xf] }
  0x6a   : > { %v412_v1 = vld [vmem:[%s5970_s26 + $0x408] sm:$0xf]  ;;  %v414_v2 = vld [vmem:[%s5970_s26 + $0x410] sm:$0xf]  ;;  %411 = vst [vmem:[%s5977_s27 + $0x200] sm:$0xf] %v410_v0 }
  0x6b   : > { %413 = vst [vmem:[%s5977_s27 + $0x204] sm:$0xf] %v412_v1  ;;  %415 = vst [vmem:[%s5977_s27 + $0x208] sm:$0xf] %v414_v2  ;;  %v416_v3 = vld [vmem:[%s5970_s26 + $0x418] sm:$0xf] }
  0x6c   : > { %v418_v4 = vld [vmem:[%s5970_s26 + $0x420] sm:$0xf]  ;;  %v420_v5 = vld [vmem:[%s5970_s26 + $0x428] sm:$0xf]  ;;  %417 = vst [vmem:[%s5977_s27 + $0x20c] sm:$0xf] %v416_v3 }
  0x6d   : > { %419 = vst [vmem:[%s5977_s27 + $0x210] sm:$0xf] %v418_v4  ;;  %421 = vst [vmem:[%s5977_s27 + $0x214] sm:$0xf] %v420_v5  ;;  %v422_v6 = vld [vmem:[%s5970_s26 + $0x430] sm:$0xf] }
  0x6e   : > { %v424_v7 = vld [vmem:[%s5970_s26 + $0x438] sm:$0xf]  ;;  %v426_v8 = vld [vmem:[%s5970_s26 + $0x440] sm:$0xf]  ;;  %423 = vst [vmem:[%s5977_s27 + $0x218] sm:$0xf] %v422_v6 }
  0x6f   : > { %425 = vst [vmem:[%s5977_s27 + $0x21c] sm:$0xf] %v424_v7  ;;  %427 = vst [vmem:[%s5977_s27 + $0x220] sm:$0xf] %v426_v8  ;;  %v428_v9 = vld [vmem:[%s5970_s26 + $0x448] sm:$0xf] }
  0x70   : > { %v430_v10 = vld [vmem:[%s5970_s26 + $0x450] sm:$0xf]  ;;  %v432_v11 = vld [vmem:[%s5970_s26 + $0x458] sm:$0xf]  ;;  %429 = vst [vmem:[%s5977_s27 + $0x224] sm:$0xf] %v428_v9 }
  0x71   : > { %431 = vst [vmem:[%s5977_s27 + $0x228] sm:$0xf] %v430_v10  ;;  %433 = vst [vmem:[%s5977_s27 + $0x22c] sm:$0xf] %v432_v11  ;;  %v434_v12 = vld [vmem:[%s5970_s26 + $0x460] sm:$0xf] }
  0x72   : > { %v436_v13 = vld [vmem:[%s5970_s26 + $0x468] sm:$0xf]  ;;  %v438_v14 = vld [vmem:[%s5970_s26 + $0x470] sm:$0xf]  ;;  %435 = vst [vmem:[%s5977_s27 + $0x230] sm:$0xf] %v434_v12 }
  0x73   : > { %437 = vst [vmem:[%s5977_s27 + $0x234] sm:$0xf] %v436_v13  ;;  %439 = vst [vmem:[%s5977_s27 + $0x238] sm:$0xf] %v438_v14  ;;  %v440_v15 = vld [vmem:[%s5970_s26 + $0x478] sm:$0xf] }
  0x74   : > { %v442_v16 = vld [vmem:[%s5970_s26 + $0x480] sm:$0xf]  ;;  %v444_v17 = vld [vmem:[%s5970_s26 + $0x488] sm:$0xf]  ;;  %441 = vst [vmem:[%s5977_s27 + $0x23c] sm:$0xf] %v440_v15 }
  0x75   : > { %443 = vst [vmem:[%s5977_s27 + $0x240] sm:$0xf] %v442_v16  ;;  %445 = vst [vmem:[%s5977_s27 + $0x244] sm:$0xf] %v444_v17  ;;  %v446_v18 = vld [vmem:[%s5970_s26 + $0x490] sm:$0xf] }
  0x76   : > { %v448_v19 = vld [vmem:[%s5970_s26 + $0x498] sm:$0xf]  ;;  %v450_v20 = vld [vmem:[%s5970_s26 + $0x4a0] sm:$0xf]  ;;  %447 = vst [vmem:[%s5977_s27 + $0x248] sm:$0xf] %v446_v18 }
  0x77   : > { %449 = vst [vmem:[%s5977_s27 + $0x24c] sm:$0xf] %v448_v19  ;;  %451 = vst [vmem:[%s5977_s27 + $0x250] sm:$0xf] %v450_v20  ;;  %v452_v21 = vld [vmem:[%s5970_s26 + $0x4a8] sm:$0xf] }
  0x78   : > { %v454_v22 = vld [vmem:[%s5970_s26 + $0x4b0] sm:$0xf]  ;;  %v456_v23 = vld [vmem:[%s5970_s26 + $0x4b8] sm:$0xf]  ;;  %453 = vst [vmem:[%s5977_s27 + $0x254] sm:$0xf] %v452_v21 }
  0x79   : > { %455 = vst [vmem:[%s5977_s27 + $0x258] sm:$0xf] %v454_v22  ;;  %457 = vst [vmem:[%s5977_s27 + $0x25c] sm:$0xf] %v456_v23  ;;  %v458_v24 = vld [vmem:[%s5970_s26 + $0x4c0] sm:$0xf] }
  0x7a   : > { %v460_v25 = vld [vmem:[%s5970_s26 + $0x4c8] sm:$0xf]  ;;  %v462_v26 = vld [vmem:[%s5970_s26 + $0x4d0] sm:$0xf]  ;;  %459 = vst [vmem:[%s5977_s27 + $0x260] sm:$0xf] %v458_v24 }
  0x7b   : > { %461 = vst [vmem:[%s5977_s27 + $0x264] sm:$0xf] %v460_v25  ;;  %463 = vst [vmem:[%s5977_s27 + $0x268] sm:$0xf] %v462_v26  ;;  %v464_v27 = vld [vmem:[%s5970_s26 + $0x4d8] sm:$0xf] }
  0x7c   : > { %v466_v28 = vld [vmem:[%s5970_s26 + $0x4e0] sm:$0xf]  ;;  %v468_v29 = vld [vmem:[%s5970_s26 + $0x4e8] sm:$0xf]  ;;  %465 = vst [vmem:[%s5977_s27 + $0x26c] sm:$0xf] %v464_v27 }
  0x7d   : > { %467 = vst [vmem:[%s5977_s27 + $0x270] sm:$0xf] %v466_v28  ;;  %469 = vst [vmem:[%s5977_s27 + $0x274] sm:$0xf] %v468_v29  ;;  %v470_v30 = vld [vmem:[%s5970_s26 + $0x4f0] sm:$0xf] }
  0x7e   : > { %v472_v31 = vld [vmem:[%s5970_s26 + $0x4f8] sm:$0xf]  ;;  %v474_v32 = vld [vmem:[%s5970_s26 + $0x500] sm:$0xf]  ;;  %471 = vst [vmem:[%s5977_s27 + $0x278] sm:$0xf] %v470_v30 }
  0x7f   : > { %473 = vst [vmem:[%s5977_s27 + $0x27c] sm:$0xf] %v472_v31  ;;  %475 = vst [vmem:[%s5977_s27 + $0x280] sm:$0xf] %v474_v32  ;;  %v476_v33 = vld [vmem:[%s5970_s26 + $0x508] sm:$0xf] }
  0x80   : > { %v478_v34 = vld [vmem:[%s5970_s26 + $0x510] sm:$0xf]  ;;  %v480_v35 = vld [vmem:[%s5970_s26 + $0x518] sm:$0xf]  ;;  %477 = vst [vmem:[%s5977_s27 + $0x284] sm:$0xf] %v476_v33 }
  0x81   : > { %479 = vst [vmem:[%s5977_s27 + $0x288] sm:$0xf] %v478_v34  ;;  %481 = vst [vmem:[%s5977_s27 + $0x28c] sm:$0xf] %v480_v35  ;;  %v482_v36 = vld [vmem:[%s5970_s26 + $0x520] sm:$0xf] }
  0x82   : > { %v484_v37 = vld [vmem:[%s5970_s26 + $0x528] sm:$0xf]  ;;  %v486_v38 = vld [vmem:[%s5970_s26 + $0x530] sm:$0xf]  ;;  %483 = vst [vmem:[%s5977_s27 + $0x290] sm:$0xf] %v482_v36 }
  0x83   : > { %485 = vst [vmem:[%s5977_s27 + $0x294] sm:$0xf] %v484_v37  ;;  %487 = vst [vmem:[%s5977_s27 + $0x298] sm:$0xf] %v486_v38  ;;  %v488_v39 = vld [vmem:[%s5970_s26 + $0x538] sm:$0xf] }
  0x84   : > { %v490_v40 = vld [vmem:[%s5970_s26 + $0x540] sm:$0xf]  ;;  %v492_v41 = vld [vmem:[%s5970_s26 + $0x548] sm:$0xf]  ;;  %489 = vst [vmem:[%s5977_s27 + $0x29c] sm:$0xf] %v488_v39 }
  0x85   : > { %491 = vst [vmem:[%s5977_s27 + $0x2a0] sm:$0xf] %v490_v40  ;;  %493 = vst [vmem:[%s5977_s27 + $0x2a4] sm:$0xf] %v492_v41  ;;  %v494_v42 = vld [vmem:[%s5970_s26 + $0x550] sm:$0xf] }
  0x86   : > { %v496_v43 = vld [vmem:[%s5970_s26 + $0x558] sm:$0xf]  ;;  %v498_v44 = vld [vmem:[%s5970_s26 + $0x560] sm:$0xf]  ;;  %495 = vst [vmem:[%s5977_s27 + $0x2a8] sm:$0xf] %v494_v42 }
  0x87   : > { %497 = vst [vmem:[%s5977_s27 + $0x2ac] sm:$0xf] %v496_v43  ;;  %499 = vst [vmem:[%s5977_s27 + $0x2b0] sm:$0xf] %v498_v44  ;;  %v500_v45 = vld [vmem:[%s5970_s26 + $0x568] sm:$0xf] }
  0x88   : > { %v502_v46 = vld [vmem:[%s5970_s26 + $0x570] sm:$0xf]  ;;  %v504_v47 = vld [vmem:[%s5970_s26 + $0x578] sm:$0xf]  ;;  %501 = vst [vmem:[%s5977_s27 + $0x2b4] sm:$0xf] %v500_v45 }
  0x89   : > { %503 = vst [vmem:[%s5977_s27 + $0x2b8] sm:$0xf] %v502_v46  ;;  %505 = vst [vmem:[%s5977_s27 + $0x2bc] sm:$0xf] %v504_v47  ;;  %v506_v48 = vld [vmem:[%s5970_s26 + $0x580] sm:$0xf] }
  0x8a   : > { %v508_v49 = vld [vmem:[%s5970_s26 + $0x588] sm:$0xf]  ;;  %v510_v50 = vld [vmem:[%s5970_s26 + $0x590] sm:$0xf]  ;;  %507 = vst [vmem:[%s5977_s27 + $0x2c0] sm:$0xf] %v506_v48 }
  0x8b   : > { %509 = vst [vmem:[%s5977_s27 + $0x2c4] sm:$0xf] %v508_v49  ;;  %511 = vst [vmem:[%s5977_s27 + $0x2c8] sm:$0xf] %v510_v50  ;;  %v512_v51 = vld [vmem:[%s5970_s26 + $0x598] sm:$0xf] }
  0x8c   : > { %v514_v52 = vld [vmem:[%s5970_s26 + $0x5a0] sm:$0xf]  ;;  %v516_v53 = vld [vmem:[%s5970_s26 + $0x5a8] sm:$0xf]  ;;  %513 = vst [vmem:[%s5977_s27 + $0x2cc] sm:$0xf] %v512_v51 }
  0x8d   : > { %515 = vst [vmem:[%s5977_s27 + $0x2d0] sm:$0xf] %v514_v52  ;;  %517 = vst [vmem:[%s5977_s27 + $0x2d4] sm:$0xf] %v516_v53  ;;  %v518_v54 = vld [vmem:[%s5970_s26 + $0x5b0] sm:$0xf] }
  0x8e   : > { %v520_v55 = vld [vmem:[%s5970_s26 + $0x5b8] sm:$0xf]  ;;  %v522_v56 = vld [vmem:[%s5970_s26 + $0x5c0] sm:$0xf]  ;;  %519 = vst [vmem:[%s5977_s27 + $0x2d8] sm:$0xf] %v518_v54 }
  0x8f   : > { %521 = vst [vmem:[%s5977_s27 + $0x2dc] sm:$0xf] %v520_v55  ;;  %523 = vst [vmem:[%s5977_s27 + $0x2e0] sm:$0xf] %v522_v56  ;;  %v524_v57 = vld [vmem:[%s5970_s26 + $0x5c8] sm:$0xf] }
  0x90   : > { %v526_v58 = vld [vmem:[%s5970_s26 + $0x5d0] sm:$0xf]  ;;  %v528_v59 = vld [vmem:[%s5970_s26 + $0x5d8] sm:$0xf]  ;;  %525 = vst [vmem:[%s5977_s27 + $0x2e4] sm:$0xf] %v524_v57 }
  0x91   : > { %527 = vst [vmem:[%s5977_s27 + $0x2e8] sm:$0xf] %v526_v58  ;;  %529 = vst [vmem:[%s5977_s27 + $0x2ec] sm:$0xf] %v528_v59  ;;  %v530_v60 = vld [vmem:[%s5970_s26 + $0x5e0] sm:$0xf] }
  0x92   : > { %v532_v61 = vld [vmem:[%s5970_s26 + $0x5e8] sm:$0xf]  ;;  %v534_v62 = vld [vmem:[%s5970_s26 + $0x5f0] sm:$0xf]  ;;  %531 = vst [vmem:[%s5977_s27 + $0x2f0] sm:$0xf] %v530_v60 }
  0x93   : > { %533 = vst [vmem:[%s5977_s27 + $0x2f4] sm:$0xf] %v532_v61  ;;  %535 = vst [vmem:[%s5977_s27 + $0x2f8] sm:$0xf] %v534_v62  ;;  %v536_v63 = vld [vmem:[%s5970_s26 + $0x5f8] sm:$0xf] }
  0x94   : > { %v538_v0 = vld [vmem:[%s5970_s26 + $0x600] sm:$0xf]  ;;  %v540_v1 = vld [vmem:[%s5970_s26 + $0x608] sm:$0xf]  ;;  %537 = vst [vmem:[%s5977_s27 + $0x2fc] sm:$0xf] %v536_v63 }
  0x95   : > { %539 = vst [vmem:[%s5977_s27 + $0x300] sm:$0xf] %v538_v0  ;;  %541 = vst [vmem:[%s5977_s27 + $0x304] sm:$0xf] %v540_v1  ;;  %v542_v2 = vld [vmem:[%s5970_s26 + $0x610] sm:$0xf] }
  0x96   : > { %v544_v3 = vld [vmem:[%s5970_s26 + $0x618] sm:$0xf]  ;;  %v546_v4 = vld [vmem:[%s5970_s26 + $0x620] sm:$0xf]  ;;  %543 = vst [vmem:[%s5977_s27 + $0x308] sm:$0xf] %v542_v2 }
  0x97   : > { %545 = vst [vmem:[%s5977_s27 + $0x30c] sm:$0xf] %v544_v3  ;;  %547 = vst [vmem:[%s5977_s27 + $0x310] sm:$0xf] %v546_v4  ;;  %v548_v5 = vld [vmem:[%s5970_s26 + $0x628] sm:$0xf] }
  0x98   : > { %v550_v6 = vld [vmem:[%s5970_s26 + $0x630] sm:$0xf]  ;;  %v552_v7 = vld [vmem:[%s5970_s26 + $0x638] sm:$0xf]  ;;  %549 = vst [vmem:[%s5977_s27 + $0x314] sm:$0xf] %v548_v5 }
  0x99   : > { %551 = vst [vmem:[%s5977_s27 + $0x318] sm:$0xf] %v550_v6  ;;  %553 = vst [vmem:[%s5977_s27 + $0x31c] sm:$0xf] %v552_v7  ;;  %v554_v8 = vld [vmem:[%s5970_s26 + $0x640] sm:$0xf] }
  0x9a   : > { %v556_v9 = vld [vmem:[%s5970_s26 + $0x648] sm:$0xf]  ;;  %v558_v10 = vld [vmem:[%s5970_s26 + $0x650] sm:$0xf]  ;;  %555 = vst [vmem:[%s5977_s27 + $0x320] sm:$0xf] %v554_v8 }
  0x9b   : > { %557 = vst [vmem:[%s5977_s27 + $0x324] sm:$0xf] %v556_v9  ;;  %559 = vst [vmem:[%s5977_s27 + $0x328] sm:$0xf] %v558_v10  ;;  %v560_v11 = vld [vmem:[%s5970_s26 + $0x658] sm:$0xf] }
  0x9c   : > { %v562_v12 = vld [vmem:[%s5970_s26 + $0x660] sm:$0xf]  ;;  %v564_v13 = vld [vmem:[%s5970_s26 + $0x668] sm:$0xf]  ;;  %561 = vst [vmem:[%s5977_s27 + $0x32c] sm:$0xf] %v560_v11 }
  0x9d   : > { %563 = vst [vmem:[%s5977_s27 + $0x330] sm:$0xf] %v562_v12  ;;  %565 = vst [vmem:[%s5977_s27 + $0x334] sm:$0xf] %v564_v13  ;;  %v566_v14 = vld [vmem:[%s5970_s26 + $0x670] sm:$0xf] }
  0x9e   : > { %v568_v15 = vld [vmem:[%s5970_s26 + $0x678] sm:$0xf]  ;;  %v570_v16 = vld [vmem:[%s5970_s26 + $0x680] sm:$0xf]  ;;  %567 = vst [vmem:[%s5977_s27 + $0x338] sm:$0xf] %v566_v14 }
  0x9f   : > { %569 = vst [vmem:[%s5977_s27 + $0x33c] sm:$0xf] %v568_v15  ;;  %571 = vst [vmem:[%s5977_s27 + $0x340] sm:$0xf] %v570_v16  ;;  %v572_v17 = vld [vmem:[%s5970_s26 + $0x688] sm:$0xf] }
  0xa0   : > { %v574_v18 = vld [vmem:[%s5970_s26 + $0x690] sm:$0xf]  ;;  %v576_v19 = vld [vmem:[%s5970_s26 + $0x698] sm:$0xf]  ;;  %573 = vst [vmem:[%s5977_s27 + $0x344] sm:$0xf] %v572_v17 }
  0xa1   : > { %575 = vst [vmem:[%s5977_s27 + $0x348] sm:$0xf] %v574_v18  ;;  %577 = vst [vmem:[%s5977_s27 + $0x34c] sm:$0xf] %v576_v19  ;;  %v578_v20 = vld [vmem:[%s5970_s26 + $0x6a0] sm:$0xf] }
  0xa2   : > { %v580_v21 = vld [vmem:[%s5970_s26 + $0x6a8] sm:$0xf]  ;;  %v582_v22 = vld [vmem:[%s5970_s26 + $0x6b0] sm:$0xf]  ;;  %579 = vst [vmem:[%s5977_s27 + $0x350] sm:$0xf] %v578_v20 }
  0xa3   : > { %581 = vst [vmem:[%s5977_s27 + $0x354] sm:$0xf] %v580_v21  ;;  %583 = vst [vmem:[%s5977_s27 + $0x358] sm:$0xf] %v582_v22  ;;  %v584_v23 = vld [vmem:[%s5970_s26 + $0x6b8] sm:$0xf] }
  0xa4   : > { %v586_v24 = vld [vmem:[%s5970_s26 + $0x6c0] sm:$0xf]  ;;  %v588_v25 = vld [vmem:[%s5970_s26 + $0x6c8] sm:$0xf]  ;;  %585 = vst [vmem:[%s5977_s27 + $0x35c] sm:$0xf] %v584_v23 }
  0xa5   : > { %587 = vst [vmem:[%s5977_s27 + $0x360] sm:$0xf] %v586_v24  ;;  %589 = vst [vmem:[%s5977_s27 + $0x364] sm:$0xf] %v588_v25  ;;  %v590_v26 = vld [vmem:[%s5970_s26 + $0x6d0] sm:$0xf] }
  0xa6   : > { %v592_v27 = vld [vmem:[%s5970_s26 + $0x6d8] sm:$0xf]  ;;  %v594_v28 = vld [vmem:[%s5970_s26 + $0x6e0] sm:$0xf]  ;;  %591 = vst [vmem:[%s5977_s27 + $0x368] sm:$0xf] %v590_v26 }
  0xa7   : > { %593 = vst [vmem:[%s5977_s27 + $0x36c] sm:$0xf] %v592_v27  ;;  %595 = vst [vmem:[%s5977_s27 + $0x370] sm:$0xf] %v594_v28  ;;  %v596_v29 = vld [vmem:[%s5970_s26 + $0x6e8] sm:$0xf] }
  0xa8   : > { %v598_v30 = vld [vmem:[%s5970_s26 + $0x6f0] sm:$0xf]  ;;  %v600_v31 = vld [vmem:[%s5970_s26 + $0x6f8] sm:$0xf]  ;;  %597 = vst [vmem:[%s5977_s27 + $0x374] sm:$0xf] %v596_v29 }
  0xa9   : > { %599 = vst [vmem:[%s5977_s27 + $0x378] sm:$0xf] %v598_v30  ;;  %601 = vst [vmem:[%s5977_s27 + $0x37c] sm:$0xf] %v600_v31  ;;  %v602_v32 = vld [vmem:[%s5970_s26 + $0x700] sm:$0xf] }
  0xaa   : > { %v604_v33 = vld [vmem:[%s5970_s26 + $0x708] sm:$0xf]  ;;  %v606_v34 = vld [vmem:[%s5970_s26 + $0x710] sm:$0xf]  ;;  %603 = vst [vmem:[%s5977_s27 + $0x380] sm:$0xf] %v602_v32 }
  0xab   : > { %605 = vst [vmem:[%s5977_s27 + $0x384] sm:$0xf] %v604_v33  ;;  %607 = vst [vmem:[%s5977_s27 + $0x388] sm:$0xf] %v606_v34  ;;  %v608_v35 = vld [vmem:[%s5970_s26 + $0x718] sm:$0xf] }
  0xac   : > { %v610_v36 = vld [vmem:[%s5970_s26 + $0x720] sm:$0xf]  ;;  %v612_v37 = vld [vmem:[%s5970_s26 + $0x728] sm:$0xf]  ;;  %609 = vst [vmem:[%s5977_s27 + $0x38c] sm:$0xf] %v608_v35 }
  0xad   : > { %611 = vst [vmem:[%s5977_s27 + $0x390] sm:$0xf] %v610_v36  ;;  %613 = vst [vmem:[%s5977_s27 + $0x394] sm:$0xf] %v612_v37  ;;  %v614_v38 = vld [vmem:[%s5970_s26 + $0x730] sm:$0xf] }
  0xae   : > { %v616_v39 = vld [vmem:[%s5970_s26 + $0x738] sm:$0xf]  ;;  %v618_v40 = vld [vmem:[%s5970_s26 + $0x740] sm:$0xf]  ;;  %615 = vst [vmem:[%s5977_s27 + $0x398] sm:$0xf] %v614_v38 }
  0xaf   : > { %617 = vst [vmem:[%s5977_s27 + $0x39c] sm:$0xf] %v616_v39  ;;  %619 = vst [vmem:[%s5977_s27 + $0x3a0] sm:$0xf] %v618_v40  ;;  %v620_v41 = vld [vmem:[%s5970_s26 + $0x748] sm:$0xf] }
  0xb0   : > { %v622_v42 = vld [vmem:[%s5970_s26 + $0x750] sm:$0xf]  ;;  %v624_v43 = vld [vmem:[%s5970_s26 + $0x758] sm:$0xf]  ;;  %621 = vst [vmem:[%s5977_s27 + $0x3a4] sm:$0xf] %v620_v41 }
  0xb1   : > { %623 = vst [vmem:[%s5977_s27 + $0x3a8] sm:$0xf] %v622_v42  ;;  %625 = vst [vmem:[%s5977_s27 + $0x3ac] sm:$0xf] %v624_v43  ;;  %v626_v44 = vld [vmem:[%s5970_s26 + $0x760] sm:$0xf] }
  0xb2   : > { %v628_v45 = vld [vmem:[%s5970_s26 + $0x768] sm:$0xf]  ;;  %v630_v46 = vld [vmem:[%s5970_s26 + $0x770] sm:$0xf]  ;;  %627 = vst [vmem:[%s5977_s27 + $0x3b0] sm:$0xf] %v626_v44 }
  0xb3   : > { %629 = vst [vmem:[%s5977_s27 + $0x3b4] sm:$0xf] %v628_v45  ;;  %631 = vst [vmem:[%s5977_s27 + $0x3b8] sm:$0xf] %v630_v46  ;;  %v632_v47 = vld [vmem:[%s5970_s26 + $0x778] sm:$0xf] }
  0xb4   : > { %v634_v48 = vld [vmem:[%s5970_s26 + $0x780] sm:$0xf]  ;;  %v636_v49 = vld [vmem:[%s5970_s26 + $0x788] sm:$0xf]  ;;  %633 = vst [vmem:[%s5977_s27 + $0x3bc] sm:$0xf] %v632_v47 }
  0xb5   : > { %635 = vst [vmem:[%s5977_s27 + $0x3c0] sm:$0xf] %v634_v48  ;;  %637 = vst [vmem:[%s5977_s27 + $0x3c4] sm:$0xf] %v636_v49  ;;  %v638_v50 = vld [vmem:[%s5970_s26 + $0x790] sm:$0xf] }
  0xb6   : > { %v640_v51 = vld [vmem:[%s5970_s26 + $0x798] sm:$0xf]  ;;  %v642_v52 = vld [vmem:[%s5970_s26 + $0x7a0] sm:$0xf]  ;;  %639 = vst [vmem:[%s5977_s27 + $0x3c8] sm:$0xf] %v638_v50 }
  0xb7   : > { %641 = vst [vmem:[%s5977_s27 + $0x3cc] sm:$0xf] %v640_v51  ;;  %643 = vst [vmem:[%s5977_s27 + $0x3d0] sm:$0xf] %v642_v52  ;;  %v644_v53 = vld [vmem:[%s5970_s26 + $0x7a8] sm:$0xf] }
  0xb8   : > { %v646_v54 = vld [vmem:[%s5970_s26 + $0x7b0] sm:$0xf]  ;;  %v648_v55 = vld [vmem:[%s5970_s26 + $0x7b8] sm:$0xf]  ;;  %645 = vst [vmem:[%s5977_s27 + $0x3d4] sm:$0xf] %v644_v53 }
  0xb9   : > { %647 = vst [vmem:[%s5977_s27 + $0x3d8] sm:$0xf] %v646_v54  ;;  %649 = vst [vmem:[%s5977_s27 + $0x3dc] sm:$0xf] %v648_v55  ;;  %v650_v56 = vld [vmem:[%s5970_s26 + $0x7c0] sm:$0xf] }
  0xba   : > { %v652_v57 = vld [vmem:[%s5970_s26 + $0x7c8] sm:$0xf]  ;;  %v654_v58 = vld [vmem:[%s5970_s26 + $0x7d0] sm:$0xf]  ;;  %651 = vst [vmem:[%s5977_s27 + $0x3e0] sm:$0xf] %v650_v56 }
  0xbb   : > { %653 = vst [vmem:[%s5977_s27 + $0x3e4] sm:$0xf] %v652_v57  ;;  %655 = vst [vmem:[%s5977_s27 + $0x3e8] sm:$0xf] %v654_v58  ;;  %v656_v59 = vld [vmem:[%s5970_s26 + $0x7d8] sm:$0xf] }
  0xbc   : > { %v658_v60 = vld [vmem:[%s5970_s26 + $0x7e0] sm:$0xf]  ;;  %v660_v61 = vld [vmem:[%s5970_s26 + $0x7e8] sm:$0xf]  ;;  %657 = vst [vmem:[%s5977_s27 + $0x3ec] sm:$0xf] %v656_v59 }
  0xbd   : > { %659 = vst [vmem:[%s5977_s27 + $0x3f0] sm:$0xf] %v658_v60  ;;  %661 = vst [vmem:[%s5977_s27 + $0x3f4] sm:$0xf] %v660_v61  ;;  %v662_v62 = vld [vmem:[%s5970_s26 + $0x7f0] sm:$0xf] }
  0xbe   : > { %v664_v63 = vld [vmem:[%s5970_s26 + $0x7f8] sm:$0xf]  ;;  %v666_v0 = vld [vmem:[%s5970_s26 + $0x800] sm:$0xf]  ;;  %663 = vst [vmem:[%s5977_s27 + $0x3f8] sm:$0xf] %v662_v62 }
  0xbf   : > { %665 = vst [vmem:[%s5977_s27 + $0x3fc] sm:$0xf] %v664_v63  ;;  %667 = vst [vmem:[%s5977_s27 + $0x400] sm:$0xf] %v666_v0  ;;  %v668_v1 = vld [vmem:[%s5970_s26 + $0x808] sm:$0xf] }
  0xc0   : > { %v670_v2 = vld [vmem:[%s5970_s26 + $0x810] sm:$0xf]  ;;  %v672_v3 = vld [vmem:[%s5970_s26 + $0x818] sm:$0xf]  ;;  %669 = vst [vmem:[%s5977_s27 + $0x404] sm:$0xf] %v668_v1 }
  0xc1   : > { %671 = vst [vmem:[%s5977_s27 + $0x408] sm:$0xf] %v670_v2  ;;  %673 = vst [vmem:[%s5977_s27 + $0x40c] sm:$0xf] %v672_v3  ;;  %v674_v4 = vld [vmem:[%s5970_s26 + $0x820] sm:$0xf] }
  0xc2   : > { %v676_v5 = vld [vmem:[%s5970_s26 + $0x828] sm:$0xf]  ;;  %v678_v6 = vld [vmem:[%s5970_s26 + $0x830] sm:$0xf]  ;;  %675 = vst [vmem:[%s5977_s27 + $0x410] sm:$0xf] %v674_v4 }
  0xc3   : > { %677 = vst [vmem:[%s5977_s27 + $0x414] sm:$0xf] %v676_v5  ;;  %679 = vst [vmem:[%s5977_s27 + $0x418] sm:$0xf] %v678_v6  ;;  %v680_v7 = vld [vmem:[%s5970_s26 + $0x838] sm:$0xf] }
  0xc4   : > { %v682_v8 = vld [vmem:[%s5970_s26 + $0x840] sm:$0xf]  ;;  %v684_v9 = vld [vmem:[%s5970_s26 + $0x848] sm:$0xf]  ;;  %681 = vst [vmem:[%s5977_s27 + $0x41c] sm:$0xf] %v680_v7 }
  0xc5   : > { %683 = vst [vmem:[%s5977_s27 + $0x420] sm:$0xf] %v682_v8  ;;  %685 = vst [vmem:[%s5977_s27 + $0x424] sm:$0xf] %v684_v9  ;;  %v686_v10 = vld [vmem:[%s5970_s26 + $0x850] sm:$0xf] }
  0xc6   : > { %v688_v11 = vld [vmem:[%s5970_s26 + $0x858] sm:$0xf]  ;;  %v690_v12 = vld [vmem:[%s5970_s26 + $0x860] sm:$0xf]  ;;  %687 = vst [vmem:[%s5977_s27 + $0x428] sm:$0xf] %v686_v10 }
  0xc7   : > { %689 = vst [vmem:[%s5977_s27 + $0x42c] sm:$0xf] %v688_v11  ;;  %691 = vst [vmem:[%s5977_s27 + $0x430] sm:$0xf] %v690_v12  ;;  %v692_v13 = vld [vmem:[%s5970_s26 + $0x868] sm:$0xf] }
  0xc8   : > { %v694_v14 = vld [vmem:[%s5970_s26 + $0x870] sm:$0xf]  ;;  %v696_v15 = vld [vmem:[%s5970_s26 + $0x878] sm:$0xf]  ;;  %693 = vst [vmem:[%s5977_s27 + $0x434] sm:$0xf] %v692_v13 }
  0xc9   : > { %695 = vst [vmem:[%s5977_s27 + $0x438] sm:$0xf] %v694_v14  ;;  %697 = vst [vmem:[%s5977_s27 + $0x43c] sm:$0xf] %v696_v15  ;;  %v698_v16 = vld [vmem:[%s5970_s26 + $0x880] sm:$0xf] }
  0xca   : > { %v700_v17 = vld [vmem:[%s5970_s26 + $0x888] sm:$0xf]  ;;  %v702_v18 = vld [vmem:[%s5970_s26 + $0x890] sm:$0xf]  ;;  %699 = vst [vmem:[%s5977_s27 + $0x440] sm:$0xf] %v698_v16 }
  0xcb   : > { %701 = vst [vmem:[%s5977_s27 + $0x444] sm:$0xf] %v700_v17  ;;  %703 = vst [vmem:[%s5977_s27 + $0x448] sm:$0xf] %v702_v18  ;;  %v704_v19 = vld [vmem:[%s5970_s26 + $0x898] sm:$0xf] }
  0xcc   : > { %v706_v20 = vld [vmem:[%s5970_s26 + $0x8a0] sm:$0xf]  ;;  %v708_v21 = vld [vmem:[%s5970_s26 + $0x8a8] sm:$0xf]  ;;  %705 = vst [vmem:[%s5977_s27 + $0x44c] sm:$0xf] %v704_v19 }
  0xcd   : > { %707 = vst [vmem:[%s5977_s27 + $0x450] sm:$0xf] %v706_v20  ;;  %709 = vst [vmem:[%s5977_s27 + $0x454] sm:$0xf] %v708_v21  ;;  %v710_v22 = vld [vmem:[%s5970_s26 + $0x8b0] sm:$0xf] }
  0xce   : > { %v712_v23 = vld [vmem:[%s5970_s26 + $0x8b8] sm:$0xf]  ;;  %v714_v24 = vld [vmem:[%s5970_s26 + $0x8c0] sm:$0xf]  ;;  %711 = vst [vmem:[%s5977_s27 + $0x458] sm:$0xf] %v710_v22 }
  0xcf   : > { %713 = vst [vmem:[%s5977_s27 + $0x45c] sm:$0xf] %v712_v23  ;;  %715 = vst [vmem:[%s5977_s27 + $0x460] sm:$0xf] %v714_v24  ;;  %v716_v25 = vld [vmem:[%s5970_s26 + $0x8c8] sm:$0xf] }
  0xd0   : > { %v718_v26 = vld [vmem:[%s5970_s26 + $0x8d0] sm:$0xf]  ;;  %v720_v27 = vld [vmem:[%s5970_s26 + $0x8d8] sm:$0xf]  ;;  %717 = vst [vmem:[%s5977_s27 + $0x464] sm:$0xf] %v716_v25 }
  0xd1   : > { %719 = vst [vmem:[%s5977_s27 + $0x468] sm:$0xf] %v718_v26  ;;  %721 = vst [vmem:[%s5977_s27 + $0x46c] sm:$0xf] %v720_v27  ;;  %v722_v28 = vld [vmem:[%s5970_s26 + $0x8e0] sm:$0xf] }
  0xd2   : > { %v724_v29 = vld [vmem:[%s5970_s26 + $0x8e8] sm:$0xf]  ;;  %v726_v30 = vld [vmem:[%s5970_s26 + $0x8f0] sm:$0xf]  ;;  %723 = vst [vmem:[%s5977_s27 + $0x470] sm:$0xf] %v722_v28 }
  0xd3   : > { %725 = vst [vmem:[%s5977_s27 + $0x474] sm:$0xf] %v724_v29  ;;  %727 = vst [vmem:[%s5977_s27 + $0x478] sm:$0xf] %v726_v30  ;;  %v728_v31 = vld [vmem:[%s5970_s26 + $0x8f8] sm:$0xf] }
  0xd4   : > { %729 = vst [vmem:[%s5977_s27 + $0x47c] sm:$0xf] %v728_v31 }
  0xd5 PF: > { %p4550_p7 = scmp.ge.s32.totalorder %s5907_s14, 1  ;;  %p1333_p8 = scmp.lt.s32.totalorder %s5907_s14, 3 }
  0xd7   : > { %p1334_p9 = pnand %p4550_p7, %p1333_p8 }
  0xd9   : > { %1337 = sbr.rel (%p1334_p9) target bundleno = 775 (0x307), region = 69 }
  0xe0   : > { %s1340_s28 = sand.u32 1, %s5899_s12   ;;  %v6556_v32 = vld [vmem:[%s7945_s0] sm:$0xff]  ;;  %v6561_v33 = vld [vmem:[%s7945_s0 + $0x10] sm:$0xff]  ;;  %v1370_v0 = vld [vmem:[%s7945_s0 + $0x8] sm:$0x11]  ;;  %p1365_p10 = scmp.lt.s32.totalorder %s5945_s15, 1 }
  0xe1   : > { %s5634_s6 = smul.u32 1152, %s1340_s28  ;;  %v4593_v34 = vcombine.high %v6556_v32, %v6561_v33  ;;  %v6570_v35 = vld [vmem:[%s7945_s0 + $0xa0] sm:$0xff]  ;;  %v6575_v36 = vld [vmem:[%s7945_s0 + $0xb0] sm:$0xff]  ;;  %v4592_v2 = vcombine.low %v6556_v32, %v6561_v33  ;;  %v6654_v12 = vcombine.low %v6556_v32, %v1370_v0  ;;  %v1390_v14 = vld [vmem:[%s7945_s0 + $0xa8] sm:$0x11]  ;;  %v6662_v16 = vcombine.high %v6556_v32, %v1370_v0  ;;  %s4551_s30 = sshll.u32 %s1340_s28, 7 }
  0xe2   : > { %v4617_v37 = vcombine.high %v6570_v35, %v6575_v36  ;;  %v6582_v38 = vld [vmem:[%s7945_s0 + $0x20] sm:$0xff]  ;;  %v6590_v40 = vld [vmem:[%s7945_s0 + $0x30] sm:$0xff]  ;;  %v4616_v3 = vcombine.low %v6570_v35, %v6575_v36  ;;  %v6695_v27 = vcombine.high %v6570_v35, %v1390_v14  ;;  %v1374_v49 = vld [vmem:[%s7945_s0 + $0x28] sm:$0x11]  ;;  %s1366_s25 = scalar_select %p1365_p10, %s5945_s15, 1 }
  0xe3   : > { %2465 = vmatprep.mubr.bf16.mxu0 %v4593_v34  ;;  %s6584_s17 = scalar_lea.vmem [#allocation3], %s5634_s6  ;;  %v6595_v41 = vld [vmem:[%s7945_s0 + $0x40] sm:$0xff]  ;;  %v6633_v1 = vld [vmem:[%s7945_s0 + $0xd0] sm:$0xff]  ;;  %v6647_v10 = vcombine.high %v6582_v38, %v6590_v40  ;;  %v1572_v21 = vshll.u32 %v6654_v12, 16  ;;  %v6681_v22 = vcombine.low %v6582_v38, %v6590_v40  ;;  %v1570_v25 = vshrl.u32 %v6654_v12, 16  ;;  %s7852_s12 = scalar_lea.vmem [#allocation4], %s4551_s30 }
  0xe4   : > { %v5659_v39 = vld [vmem:[%s6584_s17 + $0x40] sm:$0xff]   ;;  %2497 = vmatprep.mubr.bf16.mxu1 %v4617_v37  ;;  %v5661_v45 = vld [vmem:[%s6584_s17 + $0x48] sm:$0xff]   ;;  %v5663_v48 = vld [vmem:[%s6584_s17 + $0x50] sm:$0xff]   ;;  %v1579_v29 = vshll.u32 %v6662_v16, 16  ;;  %v1849_v30 = vrot.slane %v6654_v12, 1  ;;  %s1367_s29 = scalar_lea.vmem %s7947_s2, %s1366_s25  ;;  %s5038_s28 = sshll.u32 (%p5960_p5), %s5945_s15, 3 }
  0xe5   : > { %v5660_v42 = vld [vmem:[%s6584_s17] sm:$0xff]   ;;  %5041 = vmatprep.subr.bf16.mxu0 %v5659_v39  ;;  %5617 = vmatprep.subr.bf16.mxu1 %v5659_v39  ;;  %v5662_v46 = vld [vmem:[%s6584_s17 + $0x8] sm:$0xff]   ;;  %v5664_v50 = vld [vmem:[%s6584_s17 + $0x10] sm:$0xff]   ;;  %8000 = vst [vmem:[#allocation5_spill] sm:$0xff] %v6647_v10  ;;  %s4387_s6 = scalar_lea.vmem (%p5960_p5), %s7948_s3, %s5038_s28 }
  0xe6   : > { %5042 = vmatpush3.bf16.msra.mxu0 %v5660_v42  ;;  %5625 = vmatpush3.bf16.msra.mxu1 %v5660_v42  ;;  %v5665_v51 = vld [vmem:[%s6584_s17 + $0x58] sm:$0xff]   ;;  %v5667_v53 = vld [vmem:[%s6584_s17 + $0x60] sm:$0xff]   ;;  %v5669_v55 = vld [vmem:[%s6584_s17 + $0x68] sm:$0xff]   ;;  %8003 = vst [vmem:[#allocation8_spill] sm:$0xff] %v6681_v22  ;;  %v1577_v42 = vshrl.u32 %v6662_v16, 16 }
  0xe7   : > { %5043 = vmatprep.subr.bf16.mxu0 %v5661_v45  ;;  %5618 = vmatprep.subr.bf16.mxu1 %v5661_v45  ;;  %v5666_v52 = vld [vmem:[%s6584_s17 + $0x18] sm:$0xff]   ;;  %v5668_v54 = vld [vmem:[%s6584_s17 + $0x20] sm:$0xff]   ;;  %v5670_v56 = vld [vmem:[%s6584_s17 + $0x28] sm:$0xff]   ;;  %v6716_v45 = vrot.slane %v1572_v21, 1 }
  0xe8   : > { %v5671_v57 = vld [vmem:[%s6584_s17 + $0x70] sm:$0xff]   ;;  %v5673_v59 = vld [vmem:[%s6584_s17 + $0x78] sm:$0xff]   ;;  %v5683_v61 = vld [vmem:[%s6584_s17 + $0xc0] sm:$0xff]  }
  0xe9   : > { %v5672_v58 = vld [vmem:[%s6584_s17 + $0x30] sm:$0xff]   ;;  %v5674_v60 = vld [vmem:[%s6584_s17 + $0x38] sm:$0xff]   ;;  %v5684_v62 = vld [vmem:[%s6584_s17 + $0x140] sm:$0xff]  }
  0xea   : > { %5044 = vmatpush3.bf16.msra.mxu0 %v5662_v46  ;;  %5626 = vmatpush3.bf16.msra.mxu1 %v5662_v46  ;;  %v6625_v63 = vld [vmem:[%s7945_s0 + $0xc0] sm:$0xff]  ;;  %v5687_v6 = vld [vmem:[%s6584_s17 + $0xc8] sm:$0xff]   ;;  %v5695_v13 = vld [vmem:[%s6584_s17 + $0xd0] sm:$0xff]  }
  0xeb   : > { %5045 = vmatprep.subr.bf16.mxu0 %v5663_v48  ;;  %5619 = vmatprep.subr.bf16.mxu1 %v5663_v48  ;;  %v5685_v4 = vld [vmem:[%s6584_s17 + $0x80] sm:$0xff]   ;;  %v5688_v7 = vld [vmem:[%s6584_s17 + $0x148] sm:$0xff]   ;;  %v6651_v11 = vcombine.high %v6625_v63, %v6633_v1  ;;  %v5696_v15 = vld [vmem:[%s6584_s17 + $0x150] sm:$0xff]   ;;  %v6685_v23 = vcombine.low %v6625_v63, %v6633_v1  ;;  %v6820_v48 = vor.u32 %v6716_v45, %v1570_v25 }
  0xec   : > { %v5686_v5 = vld [vmem:[%s6584_s17 + $0x100] sm:$0xff]   ;;  %v5689_v8 = vld [vmem:[%s6584_s17 + $0x88] sm:$0xff]   ;;  %v6667_v17 = vld [vmem:[%s7945_s0 + $0x50] sm:$0xff]  ;;  %v6833_v25 = vcombine.low %v6582_v38, %v1374_v49 }
  0xed   : > { %v5690_v9 = vld [vmem:[%s6584_s17 + $0x108] sm:$0xff]   ;;  %8001 = vst [vmem:[#allocation6_spill] sm:$0xff] %v6651_v11  ;;  %8002 = vst [vmem:[#allocation7_spill] sm:$0xff] %v6667_v17  ;;  %v5697_v18 = vld [vmem:[%s6584_s17 + $0x90] sm:$0xff]   ;;  %v6704_v34 = vcombine.high %v6595_v41, %v6667_v17 }
  0xee   : > { %5046 = vmatpush3.bf16.msra.mxu0 %v5664_v50  ;;  %5627 = vmatpush3.bf16.msra.mxu1 %v5664_v50  ;;  %v5698_v19 = vld [vmem:[%s6584_s17 + $0x110] sm:$0xff]   ;;  %v6676_v20 = vld [vmem:[%s7945_s0 + $0xe0] sm:$0xff]  ;;  %8004 = vst [vmem:[#allocation9_spill] sm:$0xff] %v6685_v23  ;;  %v5699_v26 = vld [vmem:[%s6584_s17 + $0xd8] sm:$0xff]  }
  0xef   : > { %5047 = vmatprep.subr.bf16.mxu0 %v5665_v51  ;;  %5620 = vmatprep.subr.bf16.mxu1 %v5665_v51  ;;  %v6690_v24 = vld [vmem:[%s7945_s0 + $0xf0] sm:$0xff]  ;;  %v5700_v28 = vld [vmem:[%s6584_s17 + $0x158] sm:$0xff]   ;;  %8006 = vst [vmem:[#allocation11_spill] sm:$0xff] %v6704_v34  ;;  %v6713_v39 = vld [vmem:[%s7945_s0 + $0x60] sm:$0xff]  ;;  %v1850_v51 = vrot.slane %v6662_v16, 1 }
  0xf0   : > { %8005 = vst [vmem:[#allocation10_spill] sm:$0xff] %v6690_v24  ;;  %v5701_v31 = vld [vmem:[%s6584_s17 + $0x98] sm:$0xff]   ;;  %v6708_v37 = vcombine.high %v6676_v20, %v6690_v24  ;;  %8008 = vst [vmem:[#allocation13_spill] sm:$0xff] %v6713_v39  ;;  %v5707_v46 = vld [vmem:[%s6584_s17 + $0xe0] sm:$0xff]  }
  0xf1   : > { %v5702_v32 = vld [vmem:[%s6584_s17 + $0x118] sm:$0xff]   ;;  %v6726_v50 = vld [vmem:[%s7945_s0 + $0x100] sm:$0xff]  ;;  %v6760_v0 = vld [vmem:[%s7945_s0 + $0x110] sm:$0xff] }
  0xf2   : > { %5048 = vmatpush3.bf16.msra.mxu0 %v5666_v52  ;;  %5628 = vmatpush3.bf16.msra.mxu1 %v5666_v52  ;;  %8007 = vst [vmem:[#allocation12_spill] sm:$0xff] %v6708_v37  ;;  %v5725_v45 = vld [vmem:[%s6584_s17 + $0xb8] sm:$0xff]   ;;  %v5731_v43 = vld [vmem:[%s6584_s17 + $0x240] sm:$0xff]  }
  0xf3   : > { %5049 = vmatprep.subr.bf16.mxu0 %v5667_v53  ;;  %5621 = vmatprep.subr.bf16.mxu1 %v5667_v53  ;;  %v6732_v53 = vcombine.low %v6570_v35, %v1390_v14  ;;  %v5710_v35 = vld [vmem:[%s6584_s17 + $0x120] sm:$0xff]   ;;  %v5714_v14 = vld [vmem:[%s6584_s17 + $0x128] sm:$0xff]  }
  0xf6   : > { %5050 = vmatpush3.bf16.msra.mxu0 %v5668_v54  ;;  %5629 = vmatpush3.bf16.msra.mxu1 %v5668_v54  ;;  %v5708_v54 = vld [vmem:[%s6584_s17 + $0x160] sm:$0xff]  }
  0xf7   : > { %5051 = vmatprep.subr.bf16.mxu0 %v5669_v55  ;;  %5622 = vmatprep.subr.bf16.mxu1 %v5669_v55  ;;  %v1581_v55 = vrot.slane %v1579_v29, 1  ;;  %v5720_v29 = vld [vmem:[%s6584_s17 + $0x170] sm:$0xff]  }
  0xfa   : > { %5052 = vmatpush3.bf16.msra.mxu0 %v5670_v56  ;;  %5630 = vmatpush3.bf16.msra.mxu1 %v5670_v56  ;;  %v1582_v56 = vor.u32 %v1581_v55, %v1577_v42  ;;  %v1376_v42 = vld [vmem:[%s7945_s0 + $0x38] sm:$0x11]  ;;  %v6830_v55 = vcombine.high %v6582_v38, %v1374_v49 }
  0xfb   : > { %5053 = vmatprep.subr.bf16.mxu0 %v5671_v57  ;;  %5623 = vmatprep.subr.bf16.mxu1 %v5671_v57  ;;  %v5724_v57 = vld [vmem:[%s6584_s17 + $0x178] sm:$0xff]  }
  0xfc   : > { %v5726_v49 = vld [vmem:[%s6584_s17 + $0x138] sm:$0xff]   ;;  %v7951_v16 = vrot.slane %v6830_v55, 1 }
  0xfe   : > { %5054 = vmatpush3.bf16.msra.mxu0 %v5672_v58  ;;  %5631 = vmatpush3.bf16.msra.mxu1 %v5672_v58  ;;  %v5709_v58 = vld [vmem:[%s6584_s17 + $0xa0] sm:$0xff]  }
  0xff   : > { %5055 = vmatprep.subr.bf16.mxu0 %v5673_v59  ;;  %5624 = vmatprep.subr.bf16.mxu1 %v5673_v59  ;;  %v6746_v59 = vld [vmem:[%s7945_s0 + $0x70] sm:$0xff] }
 0x102   : > { %5056 = vmatpush3.bf16.msra.mxu0 %v5674_v60  ;;  %5632 = vmatpush3.bf16.msra.mxu1 %v5674_v60  ;;  %v1719_v60 = vshll.u32 %v6695_v27, 16 }
 0x103   : > { %5105 = vmatprep.subr.bf16.mxu1 %v5683_v61  ;;  %5169 = vmatprep.subr.bf16.mxu0 %v5684_v62  ;;  %v6751_v61 = vcombine.low %v6595_v41, %v6667_v17  ;;  %v6755_v62 = vcombine.low %v6676_v20, %v6690_v24 }
 0x105   : > { %2466 = vmatmul.mubr.bf16.vlgmr.msra.gmra.mrb[0].mxu0 %v4592_v2  ;;  %2498 = vmatmul.mubr.bf16.vlgmr.msra.gmra.mrb[0].mxu1 %v4616_v3  ;;  %8009 = vst [vmem:[#allocation14_spill] sm:$0xff] %v6751_v61  ;;  %8010 = vst [vmem:[#allocation15_spill] sm:$0xff] %v6755_v62  ;;  %v5711_v3 = vld [vmem:[%s6584_s17 + $0xe8] sm:$0xff]  }
 0x106   : > { %5106 = vmatpush3.bf16.msra.mxu1 %v5685_v4  ;;  %5170 = vmatpush3.bf16.msra.mxu0 %v5686_v5  ;;  %v5712_v5 = vld [vmem:[%s6584_s17 + $0x168] sm:$0xff]   ;;  %v1853_v4 = vrot.slane %v6833_v25, 1 }
 0x107   : > { %5107 = vmatprep.subr.bf16.mxu1 %v5687_v6  ;;  %5171 = vmatprep.subr.bf16.mxu0 %v5688_v7  ;;  %v1712_v6 = vshll.u32 %v6732_v53, 16  ;;  %v5713_v7 = vld [vmem:[%s6584_s17 + $0xa8] sm:$0xff]  }
 0x108   : > { %2473 = vmatprep.mubr.bf16.mxu0 %v6647_v10  ;;  %2505 = vmatprep.mubr.bf16.mxu1 %v6651_v11  ;;  %v5740_v2 = vld [vmem:[%s6584_s17 + $0x208] sm:$0xff]  }
 0x10a   : > { %5108 = vmatpush3.bf16.msra.mxu1 %v5689_v8  ;;  %5172 = vmatpush3.bf16.msra.mxu0 %v5690_v9  ;;  %v6770_v8 = vcombine.high %v6713_v39, %v6746_v59  ;;  %v6774_v9 = vcombine.high %v6726_v50, %v6760_v0 }
 0x10b   : > { %5109 = vmatprep.subr.bf16.mxu1 %v5695_v13  ;;  %5173 = vmatprep.subr.bf16.mxu0 %v5696_v15  ;;  %v6776_v13 = vrot.slane %v1719_v60, 1  ;;  %v1372_v15 = vld [vmem:[%s7945_s0 + $0x18] sm:$0x11]  ;;  %v6808_v60 = vcombine.low %v6726_v50, %v6760_v0 }
 0x10c   : > { %8011 = vst [vmem:[#allocation16_spill] sm:$0xff] %v6770_v8  ;;  %8012 = vst [vmem:[#allocation17_spill] sm:$0xff] %v6774_v9  ;;  %v6787_v21 = vcombine.low %v6561_v33, %v1372_v15 }
 0x10d   : > { %2474 = vmatmul.mubr.bf16.gmra.mrb[4].mxu0 %v6681_v22  ;;  %2506 = vmatmul.mubr.bf16.gmra.mrb[4].mxu1 %v6685_v23  ;;  %8014 = vst [vmem:[#allocation19_spill] sm:$0xff] %v6808_v60 }
 0x10e   : > { %5110 = vmatpush3.bf16.msra.mxu1 %v5697_v18  ;;  %5174 = vmatpush3.bf16.msra.mxu0 %v5698_v19  ;;  %v5719_v19 = vld [vmem:[%s6584_s17 + $0xf0] sm:$0xff]  }
 0x10f   : > { %5111 = vmatprep.subr.bf16.mxu1 %v5699_v26  ;;  %5175 = vmatprep.subr.bf16.mxu0 %v5700_v28  ;;  %v6790_v26 = vcombine.high %v6561_v33, %v1372_v15  ;;  %v1586_v15 = vshll.u32 %v6787_v21, 16  ;;  %v5730_v28 = vld [vmem:[%s6584_s17 + $0x180] sm:$0xff]  }
 0x110   : > { %2481 = vmatprep.mubr.bf16.mxu0 %v6704_v34  ;;  %2513 = vmatprep.mubr.bf16.mxu1 %v6708_v37  ;;  %v5755_v37 = vld [vmem:[%s6584_s17 + $0x258] sm:$0xff]   ;;  %v5760_v34 = vld [vmem:[%s6584_s17 + $0x1a0] sm:$0xff]  }
 0x111   : > { %v1588_v47 = vrot.slane %v1586_v15, 1  ;;  %v5729_v15 = vld [vmem:[%s6584_s17 + $0x1c0] sm:$0xff]  }
 0x112   : > { %5112 = vmatpush3.bf16.msra.mxu1 %v5701_v31  ;;  %5176 = vmatpush3.bf16.msra.mxu0 %v5702_v32  ;;  %v6794_v31 = vrot.slane %v1712_v6, 1  ;;  %v5721_v32 = vld [vmem:[%s6584_s17 + $0xb0] sm:$0xff]   ;;  %v1584_v6 = vshrl.u32 %v6787_v21, 16 }
 0x113   : > { %5113 = vmatprep.subr.bf16.mxu1 %v5707_v46  ;;  %5177 = vmatprep.subr.bf16.mxu0 %v5708_v54  ;;  %v1591_v46 = vshrl.u32 %v6790_v26, 16  ;;  %v1593_v54 = vshll.u32 %v6790_v26, 16 }
 0x115   : > { %2482 = vmatmul.mubr.bf16.gmra.mrb[8].mxu0 %v6751_v61  ;;  %2514 = vmatmul.mubr.bf16.gmra.mrb[8].mxu1 %v6755_v62  ;;  %v1595_v52 = vrot.slane %v1593_v54, 1  ;;  %v6851_v54 = vor.u32 %v1588_v47, %v1584_v6 }
 0x116   : > { %5114 = vmatpush3.bf16.msra.mxu1 %v5709_v58  ;;  %5178 = vmatpush3.bf16.msra.mxu0 %v5710_v35  ;;  %v7949_v58 = vrot.slane %v6790_v26, 1  ;;  %v6804_v35 = vcombine.low %v6713_v39, %v6746_v59 }
 0x117   : > { %5115 = vmatprep.subr.bf16.mxu1 %v5711_v3  ;;  %5179 = vmatprep.subr.bf16.mxu0 %v5712_v5  ;;  %v5722_v3 = vld [vmem:[%s6584_s17 + $0x130] sm:$0xff]   ;;  %v5723_v5 = vld [vmem:[%s6584_s17 + $0xf8] sm:$0xff]  }
 0x118   : > { %2489 = vmatprep.mubr.bf16.mxu0 %v6770_v8  ;;  %2521 = vmatprep.mubr.bf16.mxu1 %v6774_v9  ;;  %8013 = vst [vmem:[#allocation18_spill] sm:$0xff] %v6804_v35  ;;  %v5746_v8 = vld [vmem:[%s6584_s17 + $0x190] sm:$0xff]  }
 0x11a   : > { %5116 = vmatpush3.bf16.msra.mxu1 %v5713_v7  ;;  %5180 = vmatpush3.bf16.msra.mxu0 %v5714_v14  ;;  %v1851_v7 = vrot.slane %v6787_v21, 1  ;;  %v6836_v14 = vor.u32 %v1595_v52, %v1591_v46  ;;  %v6843_v21 = vcombine.high %v6590_v40, %v1376_v42  ;;  %v1605_v52 = vshrl.u32 %v6830_v55, 16 }
 0x11b   : > { %5117 = vmatprep.subr.bf16.mxu1 %v5719_v19  ;;  %5181 = vmatprep.subr.bf16.mxu0 %v5720_v29  ;;  %v4597_v19 = vcombine.low %v1850_v51, %v7949_v58  ;;  %v6846_v29 = vcombine.low %v6590_v40, %v1376_v42  ;;  %v1607_v46 = vshll.u32 %v6830_v55, 16 }
 0x11c   : > { %v4595_v51 = vcombine.low %v1582_v56, %v6836_v14  ;;  %v1619_v42 = vshrl.u32 %v6843_v21, 16  ;;  %v1621_v44 = vshll.u32 %v6843_v21, 16  ;;  %v7950_v47 = vrot.slane %v6843_v21, 1 }
 0x11d   : > { %2490 = vmatmul.mubr.bf16.gmra.mrb[12].mxu0 %v6804_v35  ;;  %2522 = vmatmul.mubr.bf16.gmra.mrb[12].mxu1 %v6808_v60  ;;  %v4596_v6 = vcombine.low %v1849_v30, %v1851_v7  ;;  %v1609_v58 = vrot.slane %v1607_v46, 1  ;;  %v4594_v56 = vcombine.low %v6820_v48, %v6851_v54  ;;  %v1614_v12 = vshll.u32 %v6846_v29, 16  ;;  %v5732_v30 = vld [vmem:[%s6584_s17 + $0x200] sm:$0xff]   ;;  %v1378_v48 = vld [vmem:[%s7945_s0 + $0x48] sm:$0x11] }
 0x11e   : > { %5118 = vmatpush3.bf16.msra.mxu1 %v5721_v32  ;;  %5182 = vmatpush3.bf16.msra.mxu0 %v5722_v3  ;;  %v1598_v32 = vshrl.u32 %v6833_v25, 16  ;;  %v1600_v3 = vshll.u32 %v6833_v25, 16  ;;  %v1623_v18 = vrot.slane %v1621_v44, 1  ;;  %v5737_v25 = vld [vmem:[%s6584_s17 + $0x1c8] sm:$0xff]  }
 0x11f   : > { %5119 = vmatprep.subr.bf16.mxu1 %v5723_v5  ;;  %5183 = vmatprep.subr.bf16.mxu0 %v5724_v57  ;;  %v1612_v57 = vshrl.u32 %v6846_v29, 16  ;;  %v6872_v5 = vor.u32 %v1609_v58, %v1605_v52  ;;  %v6885_v58 = vcombine.low %v7951_v16, %v7950_v47  ;;  %v5739_v52 = vld [vmem:[%s6584_s17 + $0x248] sm:$0xff]  }
 0x120   : > { %2562 = vmatprep.mubr.bf16.mxu1 %v4595_v51  ;;  %2659 = vmatprep.mubr.bf16.mxu0 %v4597_v19  ;;  %v1602_v46 = vrot.slane %v1600_v3, 1  ;;  %v7952_v51 = vrot.slane %v6846_v29, 1  ;;  %v6879_v44 = vor.u32 %v1623_v18, %v1619_v42  ;;  %v1616_v19 = vrot.slane %v1614_v12, 1  ;;  %v1380_v3 = vld [vmem:[%s7945_s0 + $0x58] sm:$0x11]  ;;  %v5738_v16 = vld [vmem:[%s6584_s17 + $0x188] sm:$0xff]  }
 0x121   : > { %8015 = vst [vmem:[#allocation20_spill] sm:$0xff] %v6885_v58  ;;  %v6900_v42 = vcombine.low %v6595_v41, %v1378_v48 }
 0x122   : > { %5120 = vmatpush3.bf16.msra.mxu1 %v5725_v45  ;;  %5184 = vmatpush3.bf16.msra.mxu0 %v5726_v49  ;;  %v6893_v45 = vcombine.high %v6595_v41, %v1378_v48  ;;  %v6895_v18 = vor.u32 %v1602_v46, %v1598_v32  ;;  %v6897_v49 = vcombine.low %v1851_v7, %v1853_v4  ;;  %v5745_v48 = vld [vmem:[%s6584_s17 + $0x1d0] sm:$0xff]   ;;  %v1382_v46 = vld [vmem:[%s7945_s0 + $0x68] sm:$0x11] }
 0x123   : > { %5233 = vmatprep.subr.bf16.mxu1 %v5729_v15  ;;  %5297 = vmatprep.subr.bf16.mxu0 %v5731_v43  ;;  %v6904_v12 = vcombine.low %v6872_v5, %v6879_v44  ;;  %v6906_v47 = vor.u32 %v1616_v19, %v1612_v57  ;;  %v6911_v15 = vcombine.high %v6667_v17, %v1380_v3 }
 0x124   : > { %8016 = vst [vmem:[#allocation21_spill] sm:$0xff] %v6897_v49  ;;  %v1633_v43 = vshrl.u32 %v6893_v45, 16  ;;  %v6916_v7 = vcombine.low %v1853_v4, %v7952_v51  ;;  %v1635_v32 = vshll.u32 %v6893_v45, 16  ;;  %v6921_v57 = vcombine.low %v6667_v17, %v1380_v3  ;;  %v5747_v51 = vld [vmem:[%s6584_s17 + $0x250] sm:$0xff]   ;;  %v1384_v4 = vld [vmem:[%s7945_s0 + $0x78] sm:$0x11] }
 0x125   : > { %8017 = vst [vmem:[#allocation22_spill] sm:$0xff] %v6904_v12  ;;  %2563 = vmatmul.mubr.bf16.vlgmr.msra.gmra.mrb[16].mxu1 %v4594_v56  ;;  %2660 = vmatmul.mubr.bf16.vlgmr.msra.gmra.mrb[16].mxu0 %v4596_v6  ;;  %v6926_v19 = vcombine.low %v6895_v18, %v6906_v47  ;;  %v1647_v6 = vshrl.u32 %v6911_v15, 16  ;;  %v1649_v56 = vshll.u32 %v6911_v15, 16  ;;  %v1628_v3 = vshll.u32 %v6900_v42, 16  ;;  %v5762_v49 = vld [vmem:[%s6584_s17 + $0x220] sm:$0xff]  }
 0x126   : > { %8018 = vst [vmem:[#allocation23_spill] sm:$0xff] %v6916_v7  ;;  %5234 = vmatpush3.bf16.msra.mxu1 %v5730_v28  ;;  %5298 = vmatpush3.bf16.msra.mxu0 %v5732_v30  ;;  %v1637_v28 = vrot.slane %v1635_v32, 1  ;;  %v1626_v30 = vshrl.u32 %v6900_v42, 16  ;;  %v1640_v60 = vshrl.u32 %v6921_v57, 16  ;;  %v8021_v62 = vrot.slane %v6893_v45, 1 }
 0x127   : > { %8019 = vst [vmem:[#allocation24_spill] sm:$0xff] %v6926_v19  ;;  %2570 = vmatprep.mubr.bf16.mxu1 %v6904_v12  ;;  %2667 = vmatprep.mubr.bf16.mxu0 %v6885_v58  ;;  %v1651_v9 = vrot.slane %v1649_v56, 1  ;;  %v8020_v12 = vrot.slane %v6911_v15, 1  ;;  %v1642_v32 = vshll.u32 %v6921_v57, 16  ;;  %v1630_v11 = vrot.slane %v1628_v3, 1 }
 0x128   : > { %5235 = vmatprep.subr.bf16.mxu1 %v5737_v25  ;;  %5299 = vmatprep.subr.bf16.mxu0 %v5739_v52  ;;  %v6951_v23 = vor.u32 %v1637_v28, %v1633_v43  ;;  %v6956_v25 = vcombine.high %v6713_v39, %v1382_v46  ;;  %v6962_v56 = vcombine.high %v6746_v59, %v1384_v4 }
 0x129   : > { %v6947_v58 = vcombine.low %v8021_v62, %v8020_v12  ;;  %v6958_v52 = vor.u32 %v1651_v9, %v1647_v6  ;;  %v1644_v62 = vrot.slane %v1642_v32, 1  ;;  %v5748_v12 = vld [vmem:[%s6584_s17 + $0x210] sm:$0xff]   ;;  %v6965_v43 = vcombine.low %v6713_v39, %v1382_v46  ;;  %v5753_v32 = vld [vmem:[%s6584_s17 + $0x1d8] sm:$0xff]  }
 0x12a   : > { %5236 = vmatpush3.bf16.msra.mxu1 %v5738_v16  ;;  %5300 = vmatpush3.bf16.msra.mxu0 %v5740_v2  ;;  %v6967_v28 = vor.u32 %v1630_v11, %v1626_v30  ;;  %v1661_v16 = vshrl.u32 %v6956_v25, 16  ;;  %v1663_v2 = vshll.u32 %v6956_v25, 16  ;;  %v1675_v3 = vshrl.u32 %v6962_v56, 16 }
 0x12b   : > { %8022 = vst [vmem:[#allocation25_spill] sm:$0xff] %v6947_v58  ;;  %8023 = vst [vmem:[#allocation26_spill] sm:$0xff] %v6958_v52  ;;  %5237 = vmatprep.subr.bf16.mxu1 %v5745_v48  ;;  %5301 = vmatprep.subr.bf16.mxu0 %v5747_v51  ;;  %v6973_v9 = vcombine.low %v6951_v23, %v6958_v52  ;;  %v6975_v6 = vor.u32 %v1644_v62, %v1640_v60  ;;  %v1677_v46 = vshll.u32 %v6962_v56, 16  ;;  %v5754_v48 = vld [vmem:[%s6584_s17 + $0x198] sm:$0xff]  }
 0x12c   : > { %v1665_v11 = vrot.slane %v1663_v2, 1  ;;  %v6984_v51 = vcombine.low %v6746_v59, %v1384_v4  ;;  %v1392_v60 = vld [vmem:[%s7945_s0 + $0xb8] sm:$0x11]  ;;  %v1656_v2 = vshll.u32 %v6965_v43, 16  ;;  %v8026_v59 = vrot.slane %v6921_v57, 1 }
 0x12d   : > { %8024 = vst [vmem:[#allocation27_spill] sm:$0xff] %v6973_v9  ;;  %8025 = vst [vmem:[#allocation28_spill] sm:$0xff] %v6975_v6  ;;  %2571 = vmatmul.mubr.bf16.gmra.mrb[20].mxu1 %v6926_v19  ;;  %2668 = vmatmul.mubr.bf16.gmra.mrb[20].mxu0 %v6916_v7  ;;  %v1679_v30 = vrot.slane %v1677_v46, 1  ;;  %v8027_v4 = vrot.slane %v6900_v42, 1  ;;  %v7007_v62 = vcombine.low %v6967_v28, %v6975_v6  ;;  %v1654_v19 = vshrl.u32 %v6965_v43, 16  ;;  %v5770_v6 = vld [vmem:[%s6584_s17 + $0x228] sm:$0xff]  }
 0x12e   : > { %2578 = vmatprep.mubr.bf16.mxu1 %v6973_v9  ;;  %2675 = vmatprep.mubr.bf16.mxu0 %v6947_v58  ;;  %v7001_v9 = vor.u32 %v1665_v11, %v1661_v16  ;;  %v1670_v46 = vshll.u32 %v6984_v51, 16  ;;  %v5756_v58 = vld [vmem:[%s6584_s17 + $0x218] sm:$0xff]   ;;  %v1668_v61 = vshrl.u32 %v6984_v51, 16  ;;  %v1658_v16 = vrot.slane %v1656_v2, 1  ;;  %v1394_v2 = vld [vmem:[%s7945_s0 + $0xc8] sm:$0x11] }
 0x12f   : > { %v6999_v7 = vcombine.low %v8027_v4, %v8026_v59  ;;  %5238 = vmatpush3.bf16.msra.mxu1 %v5746_v8  ;;  %5302 = vmatpush3.bf16.msra.mxu0 %v5748_v12  ;;  %8030 = vst [vmem:[#allocation31_spill] sm:$0xff] %v7007_v62  ;;  %v7009_v35 = vor.u32 %v1679_v30, %v1675_v3  ;;  %v5759_v8 = vld [vmem:[%s6584_s17 + $0x1e0] sm:$0xff]   ;;  %v8033_v30 = vrot.slane %v6962_v56, 1 }
 0x130   : > { %8029 = vst [vmem:[#allocation30_spill] sm:$0xff] %v7001_v9  ;;  %5239 = vmatprep.subr.bf16.mxu1 %v5753_v32  ;;  %5303 = vmatprep.subr.bf16.mxu0 %v5755_v37  ;;  %v5761_v12 = vld [vmem:[%s6584_s17 + $0x260] sm:$0xff]   ;;  %v1672_v11 = vrot.slane %v1670_v46, 1  ;;  %v7016_v59 = vcombine.high %v6575_v36, %v1392_v60  ;;  %v7019_v4 = vcombine.low %v6575_v36, %v1392_v60  ;;  %v8034_v37 = vrot.slane %v6956_v25, 1  ;;  %v1396_v36 = vld [vmem:[%s7945_s0 + $0xd8] sm:$0x11] }
 0x131   : > { %8028 = vst [vmem:[#allocation29_spill] sm:$0xff] %v6999_v7  ;;  %8031 = vst [vmem:[#allocation32_spill] sm:$0xff] %v7009_v35  ;;  %v7024_v3 = vcombine.low %v7001_v9, %v7009_v35  ;;  %v7046_v35 = vcombine.high %v6625_v63, %v1394_v2 }
 0x132   : > { %v7030_v32 = vcombine.low %v8034_v37, %v8033_v30  ;;  %v1731_v46 = vshrl.u32 %v7016_v59, 16  ;;  %v1733_v22 = vshll.u32 %v7016_v59, 16  ;;  %v1726_v10 = vshll.u32 %v7019_v4, 16 }
 0x133   : > { %8032 = vst [vmem:[#allocation33_spill] sm:$0xff] %v7024_v3  ;;  %5240 = vmatpush3.bf16.msra.mxu1 %v5754_v48  ;;  %5304 = vmatpush3.bf16.msra.mxu0 %v5756_v58  ;;  %v5767_v48 = vld [vmem:[%s6584_s17 + $0x1e8] sm:$0xff]   ;;  %v7051_v58 = vor.u32 %v1658_v16, %v1654_v19  ;;  %v7053_v60 = vor.u32 %v1672_v11, %v1668_v61 }
 0x134   : > { %8035 = vst [vmem:[#allocation34_spill] sm:$0xff] %v7030_v32  ;;  %5241 = vmatprep.subr.bf16.mxu1 %v5759_v8  ;;  %5305 = vmatprep.subr.bf16.mxu0 %v5761_v12  ;;  %v1735_v30 = vrot.slane %v1733_v22, 1  ;;  %v7056_v37 = vcombine.high %v6633_v1, %v1396_v36  ;;  %v5769_v8 = vld [vmem:[%s6584_s17 + $0x268] sm:$0xff]   ;;  %v8038_v12 = vshrl.u32 %v6695_v27, 16  ;;  %v1747_v22 = vshll.u32 %v7046_v35, 16 }
 0x135   : > { %2579 = vmatmul.mubr.bf16.gmra.mrb[24].mxu1 %v7007_v62  ;;  %2676 = vmatmul.mubr.bf16.gmra.mrb[24].mxu0 %v6999_v7  ;;  %8036 = vst [vmem:[#allocation35_spill] sm:$0xff] %v7051_v58  ;;  %8037 = vst [vmem:[#allocation36_spill] sm:$0xff] %v7053_v60  ;;  %v1724_v7 = vshrl.u32 %v7019_v4, 16  ;;  %v5768_v19 = vld [vmem:[%s6584_s17 + $0x1a8] sm:$0xff]   ;;  %v1728_v11 = vrot.slane %v1726_v10, 1  ;;  %v5775_v10 = vld [vmem:[%s6584_s17 + $0x1f0] sm:$0xff]  }
 0x136   : > { %2586 = vmatprep.mubr.bf16.mxu1 %v7024_v3  ;;  %2683 = vmatprep.mubr.bf16.mxu0 %v7030_v32  ;;  %v1722_v62 = vor.u32 %v6776_v13, %v8038_v12  ;;  %v7068_v16 = vor.u32 %v1735_v30, %v1731_v46  ;;  %v1745_v3 = vshrl.u32 %v7046_v35, 16  ;;  %v1761_v32 = vshll.u32 %v7056_v37, 16  ;;  %v5777_v30 = vld [vmem:[%s6584_s17 + $0x270] sm:$0xff]  }
 0x137   : > { %5242 = vmatpush3.bf16.msra.mxu1 %v5760_v34  ;;  %5306 = vmatpush3.bf16.msra.mxu0 %v5762_v49  ;;  %v8040_v13 = vrot.slane %v6984_v51, 1  ;;  %v8041_v12 = vrot.slane %v6965_v43, 1  ;;  %v1759_v61 = vshrl.u32 %v7056_v37, 16  ;;  %v7081_v46 = vcombine.low %v6625_v63, %v1394_v2  ;;  %v1398_v63 = vld [vmem:[%s7945_s0 + $0xe8] sm:$0x11] }
 0x138   : > { %8039 = vst [vmem:[#allocation37_spill] sm:$0xff] %v7068_v16  ;;  %5243 = vmatprep.subr.bf16.mxu1 %v5767_v48  ;;  %5307 = vmatprep.subr.bf16.mxu0 %v5769_v8  ;;  %v7086_v34 = vcombine.low %v7051_v58, %v7053_v60  ;;  %v1749_v49 = vrot.slane %v1747_v22, 1  ;;  %v1400_v2 = vld [vmem:[%s7945_s0 + $0xf8] sm:$0x11]  ;;  %v4619_v48 = vcombine.low %v1722_v62, %v7068_v16  ;;  %v8044_v8 = vrot.slane %v7016_v59, 1  ;;  %v5776_v62 = vld [vmem:[%s6584_s17 + $0x1b0] sm:$0xff]  }
 0x139   : > { %v7077_v39 = vcombine.low %v8041_v12, %v8040_v13  ;;  %v7090_v13 = vcombine.low %v6633_v1, %v1396_v36  ;;  %v8045_v22 = vrot.slane %v6695_v27, 1  ;;  %v1763_v60 = vrot.slane %v1761_v32, 1  ;;  %v5778_v16 = vld [vmem:[%s6584_s17 + $0x230] sm:$0xff]  }
 0x13a   : > { %8043 = vst [vmem:[#allocation39_spill] sm:$0xff] %v7086_v34  ;;  %v8046_v1 = vshrl.u32 %v6732_v53, 16  ;;  %v7107_v58 = vor.u32 %v1728_v11, %v1724_v7  ;;  %v1740_v17 = vshll.u32 %v7081_v46, 16  ;;  %v1738_v27 = vshrl.u32 %v7081_v46, 16 }
 0x13b   : > { %8042 = vst [vmem:[#allocation38_spill] sm:$0xff] %v7077_v39  ;;  %v4621_v12 = vcombine.low %v8045_v22, %v8044_v8  ;;  %v1754_v52 = vshll.u32 %v7090_v13, 16  ;;  %5244 = vmatpush3.bf16.msra.mxu1 %v5768_v19  ;;  %5308 = vmatpush3.bf16.msra.mxu0 %v5770_v6  ;;  %v7116_v32 = vcombine.high %v6676_v20, %v1398_v63  ;;  %v1752_v6 = vshrl.u32 %v7090_v13, 16 }
 0x13c   : > { %v1715_v36 = vor.u32 %v6794_v31, %v8046_v1  ;;  %8047 = vst [vmem:[#allocation40_spill] sm:$0xff] %v7107_v58  ;;  %v7119_v31 = vcombine.high %v6690_v24, %v1400_v2  ;;  %5245 = vmatprep.subr.bf16.mxu1 %v5775_v10  ;;  %5309 = vmatprep.subr.bf16.mxu0 %v5777_v30  ;;  %v1742_v22 = vrot.slane %v1740_v17, 1  ;;  %v5783_v1 = vld [vmem:[%s6584_s17 + $0x1f8] sm:$0xff]   ;;  %v1402_v17 = vld [vmem:[%s7945_s0 + $0x108] sm:$0x11]  ;;  %v8051_v19 = vrot.slane %v7056_v37, 1 }
 0x13d   : > { %2587 = vmatmul.mubr.bf16.gmra.mrb[28].mxu1 %v7086_v34  ;;  %2684 = vmatmul.mubr.bf16.gmra.mrb[28].mxu0 %v7077_v39  ;;  %v7123_v7 = vor.u32 %v1749_v49, %v1745_v3  ;;  %v7128_v11 = vcombine.low %v6676_v20, %v1398_v63  ;;  %v7130_v8 = vor.u32 %v1763_v60, %v1759_v61  ;;  %v1775_v30 = vshll.u32 %v7116_v32, 16 }
 0x13e   : > { %2594 = vmatprep.mubr.bf16.mxu1 %v4619_v48  ;;  %2691 = vmatprep.mubr.bf16.mxu0 %v4621_v12  ;;  %v1756_v3 = vrot.slane %v1754_v52, 1  ;;  %v1773_v49 = vshrl.u32 %v7116_v32, 16  ;;  %v1787_v9 = vshrl.u32 %v7119_v31, 16  ;;  %v1789_v20 = vshll.u32 %v7119_v31, 16 }
 0x13f   : > { %8048 = vst [vmem:[#allocation41_spill] sm:$0xff] %v7130_v8  ;;  %5246 = vmatpush3.bf16.msra.mxu1 %v5776_v62  ;;  %5310 = vmatpush3.bf16.msra.mxu0 %v5778_v16  ;;  %v4618_v60 = vcombine.low %v1715_v36, %v7107_v58  ;;  %v8049_v61 = vrot.slane %v7019_v4, 1  ;;  %v8050_v63 = vrot.slane %v6732_v53, 1  ;;  %v7148_v12 = vcombine.low %v6690_v24, %v1400_v2  ;;  %v1404_v16 = vld [vmem:[%s7945_s0 + $0x118] sm:$0x11] }
 0x140   : > { %5247 = vmatprep.subr.bf16.mxu1 %v5783_v1  ;;  %v5784_v62 = vld [vmem:[%s6584_s17 + $0x1b8] sm:$0xff]   ;;  %v8052_v36 = vrot.slane %v7046_v35, 1  ;;  %v1777_v39 = vrot.slane %v1775_v30, 1  ;;  %v7167_v1 = vor.u32 %v1742_v22, %v1738_v27  ;;  %v1791_v48 = vrot.slane %v1789_v20, 1  ;;  %v5789_v20 = vld [vmem:[%s6584_s17 + $0x2c0] sm:$0xff]  }
 0x141   : > { %v4620_v52 = vcombine.low %v8050_v63, %v8049_v61  ;;  %v1768_v61 = vshll.u32 %v7128_v11, 16  ;;  %v5785_v2 = vld [vmem:[%s6584_s17 + $0x278] sm:$0xff]   ;;  %v7165_v63 = vcombine.low %v7123_v7, %v7130_v8  ;;  %v1782_v34 = vshll.u32 %v7148_v12, 16 }
 0x142   : > { %v7158_v10 = vcombine.low %v8052_v36, %v8051_v19  ;;  %v7170_v24 = vor.u32 %v1756_v3, %v1752_v6  ;;  %v1766_v19 = vshrl.u32 %v7128_v11, 16  ;;  %v1780_v30 = vshrl.u32 %v7148_v12, 16  ;;  %5311 = vmatprep.subr.bf16.mxu0 %v5785_v2  ;;  %v5786_v27 = vld [vmem:[%s6584_s17 + $0x238] sm:$0xff]  }
 0x143   : > { %8054 = vst [vmem:[#allocation43_spill] sm:$0xff] %v7165_v63  ;;  %v7175_v36 = vcombine.high %v6726_v50, %v1402_v17  ;;  %5248 = vmatpush3.bf16.msra.mxu1 %v5784_v62  ;;  %v1770_v53 = vrot.slane %v1768_v61, 1  ;;  %v7178_v8 = vcombine.high %v6760_v0, %v1404_v16  ;;  %v1784_v22 = vrot.slane %v1782_v34, 1  ;;  %5312 = vmatpush3.bf16.msra.mxu0 %v5786_v27 }
 0x144   : > { %8053 = vst [vmem:[#allocation42_spill] sm:$0xff] %v7158_v10  ;;  %8055 = vst [vmem:[#allocation44_spill] sm:$0xff] %v7170_v24  ;;  %v7184_v6 = vor.u32 %v1777_v39, %v1773_v49  ;;  %v7186_v3 = vor.u32 %v1791_v48, %v1787_v9  ;;  %v7192_v2 = vcombine.low %v7167_v1, %v7170_v24  ;;  %v8057_v34 = vrot.slane %v7090_v13, 1 }
 0x145   : > { %2595 = vmatmul.mubr.bf16.gmra.mrb[32].mxu1 %v4618_v60  ;;  %2692 = vmatmul.mubr.bf16.gmra.mrb[32].mxu0 %v4620_v52  ;;  %v1803_v62 = vshll.u32 %v7175_v36, 16  ;;  %v1817_v61 = vshll.u32 %v7178_v8, 16  ;;  %v8058_v60 = vrot.slane %v7081_v46, 1  ;;  %v7201_v39 = vor.u32 %v1770_v53, %v1766_v19 }
 0x146   : > { %2602 = vmatprep.mubr.bf16.mxu1 %v7165_v63  ;;  %2699 = vmatprep.mubr.bf16.mxu0 %v7158_v10  ;;  %8056 = vst [vmem:[#allocation45_spill] sm:$0xff] %v7192_v2  ;;  %v1877_v10 = vrot.slane %v7128_v11, 1  ;;  %v1879_v9 = vrot.slane %v7148_v12, 1  ;;  %v4584_v49 = vcombine.low %v6726_v50, %v1402_v17  ;;  %v7206_v48 = vcombine.low %v6760_v0, %v1404_v16  ;;  %v5791_v63 = vld [vmem:[%s6584_s17 + $0x340] sm:$0xff]  }
 0x147   : > { %v7198_v52 = vcombine.low %v8058_v60, %v8057_v34  ;;  %5361 = vmatprep.subr.bf16.mxu1 %v5789_v20  ;;  %v7209_v24 = vor.u32 %v1784_v22, %v1780_v30  ;;  %v1801_v58 = vshrl.u32 %v7175_v36, 16  ;;  %v1805_v34 = vrot.slane %v1803_v62, 1  ;;  %5425 = vmatprep.subr.bf16.mxu0 %v5791_v63 }
 0x148   : > { %v1815_v60 = vshrl.u32 %v7178_v8, 16  ;;  %v7215_v11 = vcombine.low %v7184_v6, %v7186_v3  ;;  %v8061_v53 = vrot.slane %v7119_v31, 1  ;;  %v8062_v12 = vrot.slane %v7116_v32, 1 }
 0x149   : > { %8059 = vst [vmem:[#allocation46_spill] sm:$0xff] %v7198_v52  ;;  %v1819_v0 = vrot.slane %v1817_v61, 1  ;;  %v1882_v16 = vrot.slane %v7175_v36, 1  ;;  %v1794_v30 = vshrl.u32 %v4584_v49, 16  ;;  %v7225_v27 = vcombine.low %v1877_v10, %v1879_v9 }
 0x14a   : > { %8060 = vst [vmem:[#allocation47_spill] sm:$0xff] %v7215_v11  ;;  %v7221_v17 = vcombine.low %v8062_v12, %v8061_v53  ;;  %v7231_v22 = vcombine.low %v7201_v39, %v7209_v24  ;;  %v7233_v20 = vor.u32 %v1805_v34, %v1801_v58  ;;  %v1796_v62 = vshll.u32 %v4584_v49, 16 }
 0x14b   : > { %v1810_v61 = vshll.u32 %v7206_v48, 16  ;;  %v7238_v63 = vor.u32 %v1819_v0, %v1815_v60  ;;  %v1808_v36 = vshrl.u32 %v7206_v48, 16  ;;  %v8064_v53 = vrot.slane %v6830_v55, 1 }
 0x14c   : > { %8063 = vst [vmem:[#allocation48_spill] sm:$0xff] %v7221_v17  ;;  %v8065_v12 = vrot.slane %v6790_v26, 1  ;;  %v8066_v58 = vrot.slane %v6893_v45, 1  ;;  %v8067_v34 = vrot.slane %v6843_v21, 1  ;;  %v8069_v60 = vrot.slane %v6846_v29, 1 }
 0x14d   : > { %2603 = vmatmul.mubr.bf16.gmra.mrb[36].mxu1 %v7192_v2  ;;  %2700 = vmatmul.mubr.bf16.gmra.mrb[36].mxu0 %v7198_v52  ;;  %v1881_v2 = vrot.slane %v4584_v49, 1  ;;  %v8071_v55 = vrot.slane %v6911_v15, 1  ;;  %v8073_v45 = vrot.slane %v6921_v57, 1  ;;  %v8074_v49 = vrot.slane %v7046_v35, 1 }
 0x14e   : > { %2610 = vmatprep.mubr.bf16.mxu1 %v7215_v11  ;;  %2707 = vmatprep.mubr.bf16.mxu0 %v7221_v17  ;;  %v7245_v19 = vcombine.low %v8065_v12, %v8064_v53  ;;  %v7251_v52 = vcombine.low %v8067_v34, %v8066_v58  ;;  %v8068_v11 = vrot.slane %v6900_v42, 1  ;;  %v8070_v17 = vrot.slane %v6956_v25, 1 }
 0x14f   : > { %v8072_v53 = vrot.slane %v6965_v43, 1  ;;  %v8075_v42 = vrot.slane %v7016_v59, 1  ;;  %v8076_v29 = vrot.slane %v7081_v46, 1  ;;  %v8077_v25 = vrot.slane %v7019_v4, 1 }
 0x150   : > { %v7257_v0 = vcombine.low %v8069_v60, %v8068_v11  ;;  %v7263_v26 = vcombine.low %v8071_v55, %v8070_v17  ;;  %v8078_v15 = vrot.slane %v7116_v32, 1  ;;  %v8079_v43 = vrot.slane %v7056_v37, 1 }
 0x151   : > { %v7269_v21 = vcombine.low %v8073_v45, %v8072_v53  ;;  %v7275_v12 = vcombine.low %v8075_v42, %v8074_v49  ;;  %v7281_v11 = vcombine.low %v8077_v25, %v8076_v29  ;;  %v8080_v57 = vrot.slane %v7090_v13, 1  ;;  %v5790_v29 = vld [vmem:[%s6584_s17 + $0x280] sm:$0xff]  }
 0x152   : > { %v7287_v17 = vcombine.low %v8079_v43, %v8078_v15  ;;  %v1798_v35 = vrot.slane %v1796_v62, 1  ;;  %v1812_v59 = vrot.slane %v1810_v61, 1  ;;  %v8081_v34 = vrot.slane %v7119_v31, 1  ;;  %v5792_v25 = vld [vmem:[%s6584_s17 + $0x300] sm:$0xff]   ;;  %v5795_v43 = vld [vmem:[%s6584_s17 + $0x2c8] sm:$0xff]  }
 0x153   : > { %v7291_v58 = vcombine.low %v8080_v57, %v1877_v10  ;;  %v7297_v46 = vcombine.low %v1879_v9, %v1881_v2  ;;  %v7301_v4 = vcombine.low %v7233_v20, %v7238_v63  ;;  %v8082_v37 = vrot.slane %v7178_v8, 1  ;;  %v7311_v10 = vld [vmem:[%s7945_s0 + $0x80] sm:$0xff]  ;;  %v5797_v57 = vld [vmem:[%s6584_s17 + $0x348] sm:$0xff]  }
 0x154   : > { %v7295_v60 = vcombine.low %v8081_v34, %v1882_v16  ;;  %v1883_v13 = vrot.slane %v7206_v48, 1  ;;  %v7315_v31 = vor.u32 %v1798_v35, %v1794_v30  ;;  %v7317_v9 = vor.u32 %v1812_v59, %v1808_v36  ;;  %v5798_v35 = vld [vmem:[%s6584_s17 + $0x308] sm:$0xff]   ;;  %v5879_v48 = vld [vmem:[%s7945_s0 + $0x70] sm:$0xff] }
 0x155   : > { %v7305_v32 = vcombine.low %v1882_v16, %v8082_v37  ;;  %2611 = vmatmul.mubr.bf16.gmra.mrb[40].mxu1 %v7231_v22  ;;  %2708 = vmatmul.mubr.bf16.gmra.mrb[40].mxu0 %v7225_v27  ;;  %v1386_v16 = vld [vmem:[%s7945_s0 + $0x88] sm:$0x11]  ;;  %v4787_v55 = vcombine.low %v6836_v14, %v6872_v5  ;;  %v8083_v49 = vrot.slane %v6962_v56, 1  ;;  %v8085_v5 = vcombine.high %v6561_v33, %v6582_v38  ;;  %v5802_v37 = vld [vmem:[%s6584_s17 + $0x290] sm:$0xff]  }
 0x156   : > { %2618 = vmatprep.mubr.bf16.mxu1 %v7301_v4  ;;  %v7325_v62 = vcombine.high %v7311_v10, %v1386_v16  ;;  %v7329_v61 = vcombine.low %v7315_v31, %v7317_v9  ;;  %v7333_v30 = vcombine.low %v1881_v2, %v1883_v13  ;;  %v7336_v36 = vcombine.low %v7311_v10, %v1386_v16  ;;  %v5804_v16 = vld [vmem:[%s6584_s17 + $0x310] sm:$0xff]  }
 0x157   : > { %2715 = vmatprep.mubr.bf16.mxu0 %v7305_v32  ;;  %v8084_v2 = vrot.slane %v6984_v51, 1  ;;  %v4786_v56 = vcombine.low %v6851_v54, %v6895_v18  ;;  %v4793_v15 = vcombine.low %v6879_v44, %v6951_v23  ;;  %v5796_v51 = vld [vmem:[%s6584_s17 + $0x288] sm:$0xff]   ;;  %v8086_v59 = vcombine.low %v6561_v33, %v6582_v38  ;;  %v7376_v18 = vld [vmem:[%s7945_s0 + $0x120] sm:$0xff]  ;;  %v5801_v33 = vld [vmem:[%s6584_s17 + $0x2d0] sm:$0xff]  }
 0x158   : > { %v1866_v53 = vrot.slane %v7325_v62, 1  ;;  %v1865_v45 = vrot.slane %v7336_v36, 1  ;;  %v1691_v54 = vshll.u32 %v7325_v62, 16  ;;  %v1406_v23 = vld [vmem:[%s7945_s0 + $0x128] sm:$0x11]  ;;  %v8087_v44 = vcombine.high %v6590_v40, %v6595_v41  ;;  %v5803_v38 = vld [vmem:[%s6584_s17 + $0x350] sm:$0xff]  }
 0x159   : > { %v4792_v34 = vcombine.low %v6906_v47, %v6967_v28  ;;  %v5809_v47 = vld [vmem:[%s6584_s17 + $0x2d8] sm:$0xff]  }
 0x15a   : > { %v7346_v42 = vcombine.low %v8083_v49, %v1866_v53  ;;  %v7354_v14 = vcombine.low %v8084_v2, %v1865_v45  ;;  %v1693_v49 = vrot.slane %v1691_v54, 1  ;;  %v7392_v2 = vcombine.high %v7376_v18, %v1406_v23 }
 0x15c   : > { %v1886_v28 = vrot.slane %v7392_v2, 1 }
 0x15d   : > { %2619 = vmatmul.mubr.bf16.gmra.mrb[44].mxu1 %v7329_v61  ;;  %2716 = vmatmul.mubr.bf16.gmra.mrb[44].mxu0 %v7333_v30 }
 0x15e   : > { %3261 = vmatprep.mubr.bf16.mxu1 %v8085_v5  ;;  %3358 = vmatprep.mubr.bf16.mxu0 %v4787_v55  ;;  %v1689_v55 = vshrl.u32 %v7325_v62, 16  ;;  %v8088_v5 = vld [vmem:[#allocation30_spill] sm:$0xff] }
 0x165   : > { %3262 = vmatmul.mubr.bf16.vlgmr.msra.gmra.mrb[48].mxu1 %v8086_v59  ;;  %3359 = vmatmul.mubr.bf16.vlgmr.msra.gmra.mrb[48].mxu0 %v4786_v56  ;;  %v8089_v56 = vld [vmem:[#allocation26_spill] sm:$0xff]  ;;  %v8091_v59 = vrot.slane %v7178_v8, 1  ;;  %v5815_v8 = vld [vmem:[%s6584_s17 + $0x2e0] sm:$0xff]  }
 0x166   : > { %5362 = vmatpush3.bf16.msra.mxu1 %v5790_v29  ;;  %5426 = vmatpush3.bf16.msra.mxu0 %v5792_v25  ;;  %v4799_v29 = vcombine.low %v8089_v56, %v8088_v5  ;;  %v7397_v25 = vcombine.low %v7376_v18, %v1406_v23  ;;  %v8092_v23 = vld [vmem:[#allocation7_spill] sm:$0xff]  ;;  %v8096_v56 = vld [vmem:[#allocation28_spill] sm:$0xff] }
 0x167   : > { %3269 = vmatprep.mubr.bf16.mxu1 %v8087_v44  ;;  %3366 = vmatprep.mubr.bf16.mxu0 %v4793_v15  ;;  %v5811_v15 = vld [vmem:[%s6584_s17 + $0x358] sm:$0xff]   ;;  %v7412_v54 = vcombine.low %v8091_v59, %v1886_v28  ;;  %v8093_v44 = vld [vmem:[#allocation13_spill] sm:$0xff]  ;;  %v8095_v5 = vld [vmem:[#allocation35_spill] sm:$0xff] }
 0x168   : > { %5363 = vmatprep.subr.bf16.mxu1 %v5795_v43  ;;  %5427 = vmatprep.subr.bf16.mxu0 %v5797_v57  ;;  %v1885_v43 = vrot.slane %v7397_v25, 1  ;;  %v8090_v57 = vcombine.low %v6590_v40, %v6595_v41  ;;  %v5812_v40 = vld [vmem:[%s6584_s17 + $0x318] sm:$0xff]   ;;  %v8098_v59 = vcombine.low %v8092_v23, %v8093_v44 }
 0x16a   : > { %5364 = vmatpush3.bf16.msra.mxu1 %v5796_v51  ;;  %5428 = vmatpush3.bf16.msra.mxu0 %v5798_v35  ;;  %v1684_v51 = vshll.u32 %v7336_v36, 16  ;;  %v5810_v35 = vld [vmem:[%s6584_s17 + $0x298] sm:$0xff]   ;;  %v7424_v41 = vcombine.low %v1883_v13, %v1885_v43  ;;  %v4803_v13 = vcombine.high %v5879_v48, %v7311_v10 }
 0x16b   : > { %5365 = vmatprep.subr.bf16.mxu1 %v5801_v33  ;;  %5429 = vmatprep.subr.bf16.mxu0 %v5803_v38  ;;  %v8094_v33 = vcombine.high %v8092_v23, %v8093_v44  ;;  %v7417_v38 = vor.u32 %v1693_v49, %v1689_v55  ;;  %v4798_v55 = vcombine.low %v8096_v56, %v8095_v5  ;;  %v1682_v49 = vshrl.u32 %v7336_v36, 16  ;;  %v5822_v5 = vld [vmem:[%s6584_s17 + $0x2a8] sm:$0xff]   ;;  %v8099_v44 = vld [vmem:[#allocation36_spill] sm:$0xff]  ;;  %v5828_v56 = vld [vmem:[%s6584_s17 + $0x2b0] sm:$0xff]  }
 0x16c   : > { %v4802_v23 = vcombine.low %v5879_v48, %v7311_v10  ;;  %v5830_v48 = vld [vmem:[%s6584_s17 + $0x330] sm:$0xff]   ;;  %v8133_v36 = vld [vmem:[#allocation42_spill] sm:$0xff] }
 0x16d   : > { %3270 = vmatmul.mubr.bf16.gmra.mrb[52].mxu1 %v8090_v57  ;;  %3367 = vmatmul.mubr.bf16.gmra.mrb[52].mxu0 %v4792_v34  ;;  %v5817_v34 = vld [vmem:[%s6584_s17 + $0x360] sm:$0xff]   ;;  %v5821_v57 = vld [vmem:[%s6584_s17 + $0x2e8] sm:$0xff]  }
 0x16e   : > { %3277 = vmatprep.mubr.bf16.mxu1 %v8094_v33  ;;  %3374 = vmatprep.mubr.bf16.mxu0 %v4799_v29  ;;  %v1686_v29 = vrot.slane %v1684_v51, 1  ;;  %v5823_v51 = vld [vmem:[%s6584_s17 + $0x368] sm:$0xff]  }
 0x16f   : > { %5366 = vmatpush3.bf16.msra.mxu1 %v5802_v37  ;;  %5430 = vmatpush3.bf16.msra.mxu0 %v5804_v16  ;;  %v8097_v37 = vld [vmem:[#allocation32_spill] sm:$0xff] }
 0x170   : > { %5367 = vmatprep.subr.bf16.mxu1 %v5809_v47  ;;  %5431 = vmatprep.subr.bf16.mxu0 %v5811_v15  ;;  %v4805_v16 = vcombine.low %v8097_v37, %v7417_v38  ;;  %v5816_v47 = vld [vmem:[%s6584_s17 + $0x2a0] sm:$0xff]   ;;  %v7444_v33 = vor.u32 %v1686_v29, %v1682_v49 }
 0x171   : > { %v5818_v15 = vld [vmem:[%s6584_s17 + $0x320] sm:$0xff]  }
 0x172   : > { %v5881_v49 = vld [vmem:[%s7945_s0 + $0xc0] sm:$0xff] }
 0x173   : > { %5368 = vmatpush3.bf16.msra.mxu1 %v5810_v35  ;;  %5432 = vmatpush3.bf16.msra.mxu0 %v5812_v40  ;;  %v5824_v35 = vld [vmem:[%s6584_s17 + $0x328] sm:$0xff]   ;;  %v5827_v40 = vld [vmem:[%s6584_s17 + $0x2f0] sm:$0xff]  }
 0x174   : > { %5369 = vmatprep.subr.bf16.mxu1 %v5815_v8  ;;  %5433 = vmatprep.subr.bf16.mxu0 %v5817_v34  ;;  %v5829_v8 = vld [vmem:[%s6584_s17 + $0x370] sm:$0xff]   ;;  %v4804_v34 = vcombine.low %v8099_v44, %v7444_v33  ;;  %v8102_v44 = vld [vmem:[#allocation41_spill] sm:$0xff] }
 0x175   : > { %3278 = vmatmul.mubr.bf16.gmra.mrb[56].mxu1 %v8098_v59  ;;  %3375 = vmatmul.mubr.bf16.gmra.mrb[56].mxu0 %v4798_v55  ;;  %v5880_v55 = vld [vmem:[%s7945_s0 + $0xb0] sm:$0xff] }
 0x176   : > { %3285 = vmatprep.mubr.bf16.mxu1 %v4803_v13  ;;  %3382 = vmatprep.mubr.bf16.mxu0 %v4805_v16  ;;  %v4809_v29 = vcombine.high %v5880_v55, %v5881_v49  ;;  %v8100_v13 = vld [vmem:[#allocation37_spill] sm:$0xff]  ;;  %v5835_v16 = vld [vmem:[%s6584_s17 + $0x2f8] sm:$0xff]   ;;  %v4808_v59 = vcombine.low %v5880_v55, %v5881_v49 }
 0x177   : > { %5370 = vmatpush3.bf16.msra.mxu1 %v5816_v47  ;;  %5434 = vmatpush3.bf16.msra.mxu0 %v5818_v15  ;;  %v4811_v37 = vcombine.low %v8100_v13, %v7123_v7  ;;  %v5837_v47 = vld [vmem:[%s6584_s17 + $0x378] sm:$0xff]   ;;  %v5841_v7 = vld [vmem:[%s6584_s17 + $0x440] sm:$0xff]   ;;  %v1829_v13 = vshrl.u32 %v7392_v2, 16 }
 0x178   : > { %5371 = vmatprep.subr.bf16.mxu1 %v5821_v57  ;;  %5435 = vmatprep.subr.bf16.mxu0 %v5823_v51  ;;  %v5836_v15 = vld [vmem:[%s6584_s17 + $0x2b8] sm:$0xff]   ;;  %v5839_v51 = vld [vmem:[%s6584_s17 + $0x3c0] sm:$0xff]  }
 0x179   : > { %v5838_v57 = vld [vmem:[%s6584_s17 + $0x338] sm:$0xff]  }
 0x17a   : > { %v8103_v55 = vld [vmem:[#allocation44_spill] sm:$0xff] }
 0x17b   : > { %5372 = vmatpush3.bf16.msra.mxu1 %v5822_v5  ;;  %5436 = vmatpush3.bf16.msra.mxu0 %v5824_v35  ;;  %v8101_v5 = vld [vmem:[#allocation40_spill] sm:$0xff]  ;;  %v4816_v49 = vcombine.low %v8103_v55, %v7201_v39  ;;  %v4822_v39 = vcombine.low %v7209_v24, %v7315_v31  ;;  %v5850_v55 = vld [vmem:[%s6584_s17 + $0x410] sm:$0xff]  }
 0x17c   : > { %5373 = vmatprep.subr.bf16.mxu1 %v5827_v40  ;;  %5437 = vmatprep.subr.bf16.mxu0 %v5829_v8  ;;  %v4810_v35 = vcombine.low %v8101_v5, %v7167_v1  ;;  %v5882_v40 = vld [vmem:[%s7945_s0 + $0xd0] sm:$0xff]  ;;  %v5883_v8 = vld [vmem:[%s7945_s0 + $0xe0] sm:$0xff]  ;;  %v1831_v1 = vshll.u32 %v7392_v2, 16 }
 0x17d   : > { %3286 = vmatmul.mubr.bf16.gmra.mrb[60].mxu1 %v4802_v23  ;;  %3383 = vmatmul.mubr.bf16.gmra.mrb[60].mxu0 %v4804_v34  ;;  %v4815_v23 = vcombine.high %v5882_v40, %v5883_v8  ;;  %v4817_v34 = vcombine.low %v8102_v44, %v7184_v6  ;;  %v5842_v5 = vld [vmem:[%s6584_s17 + $0x400] sm:$0xff]   ;;  %v5846_v44 = vld [vmem:[%s6584_s17 + $0x408] sm:$0xff]  }
 0x17e   : > { %3293 = vmatprep.mubr.bf16.mxu1 %v4809_v29  ;;  %3390 = vmatprep.mubr.bf16.mxu0 %v4811_v37  ;;  %v4823_v29 = vcombine.low %v7186_v3, %v7233_v20  ;;  %v1833_v6 = vrot.slane %v1831_v1, 1  ;;  %v1824_v37 = vshll.u32 %v7397_v25, 16  ;;  %v5884_v20 = vld [vmem:[%s7945_s0 + $0x110] sm:$0xff] }
 0x17f   : > { %5374 = vmatpush3.bf16.msra.mxu1 %v5828_v56  ;;  %5438 = vmatpush3.bf16.msra.mxu0 %v5830_v48  ;;  %v4814_v56 = vcombine.low %v5882_v40, %v5883_v8  ;;  %v8104_v48 = vld [vmem:[#allocation10_spill] sm:$0xff]  ;;  %v4826_v31 = vcombine.low %v5884_v20, %v7376_v18  ;;  %v8108_v8 = vld [vmem:[#allocation21_spill] sm:$0xff]  ;;  %v5849_v1 = vld [vmem:[%s6584_s17 + $0x450] sm:$0xff]  }
 0x180   : > { %5375 = vmatprep.subr.bf16.mxu1 %v5835_v16  ;;  %5439 = vmatprep.subr.bf16.mxu0 %v5837_v47  ;;  %v8105_v16 = vcombine.high %v8104_v48, %v6726_v50  ;;  %v7489_v47 = vor.u32 %v1833_v6, %v1829_v13  ;;  %v1826_v3 = vrot.slane %v1824_v37, 1  ;;  %v5845_v40 = vld [vmem:[%s6584_s17 + $0x448] sm:$0xff]   ;;  %v8112_v13 = vld [vmem:[#allocation16_spill] sm:$0xff]  ;;  %v7533_v6 = vld [vmem:[%s7945_s0 + $0x90] sm:$0xff] }
 0x181   : > { %v5856_v37 = vld [vmem:[%s6584_s17 + $0x398] sm:$0xff]  }
 0x183   : > { %5376 = vmatpush3.bf16.msra.mxu1 %v5836_v15  ;;  %5440 = vmatpush3.bf16.msra.mxu0 %v5838_v57  ;;  %v1822_v15 = vshrl.u32 %v7397_v25, 16  ;;  %v4827_v57 = vcombine.high %v5884_v20, %v7376_v18  ;;  %v5865_v20 = vld [vmem:[%s6584_s17 + $0x468] sm:$0xff]  }
 0x184   : > { %5489 = vmatprep.subr.bf16.mxu1 %v5839_v51  ;;  %5553 = vmatprep.subr.bf16.mxu0 %v5841_v7  ;;  %v4829_v51 = vcombine.low %v7238_v63, %v7489_v47  ;;  %v8106_v7 = vcombine.low %v8104_v48, %v6726_v50  ;;  %v8107_v50 = vld [vmem:[#allocation5_spill] sm:$0xff]  ;;  %v5858_v48 = vld [vmem:[%s6584_s17 + $0x418] sm:$0xff]  }
 0x185   : > { %3294 = vmatmul.mubr.bf16.gmra.mrb[64].mxu1 %v4808_v59  ;;  %3391 = vmatmul.mubr.bf16.gmra.mrb[64].mxu0 %v4810_v35  ;;  %v7503_v24 = vor.u32 %v1826_v3, %v1822_v15  ;;  %v5840_v63 = vld [vmem:[%s6584_s17 + $0x380] sm:$0xff]   ;;  %v5843_v35 = vld [vmem:[%s6584_s17 + $0x3c8] sm:$0xff]  }
 0x186   : > { %3301 = vmatprep.mubr.bf16.mxu1 %v4815_v23  ;;  %3398 = vmatprep.mubr.bf16.mxu0 %v4817_v34  ;;  %v8109_v23 = vld [vmem:[#allocation8_spill] sm:$0xff]  ;;  %v5847_v34 = vld [vmem:[%s6584_s17 + $0x3d0] sm:$0xff]   ;;  %v5862_v15 = vld [vmem:[%s6584_s17 + $0x420] sm:$0xff]  }
 0x187   : > { %v4828_v59 = vcombine.low %v7317_v9, %v7503_v24  ;;  %v5844_v9 = vld [vmem:[%s6584_s17 + $0x388] sm:$0xff]  }
 0x188   : > { %v5863_v3 = vld [vmem:[%s6584_s17 + $0x3e8] sm:$0xff]  }
 0x18d   : > { %3302 = vmatmul.mubr.bf16.gmra.mrb[68].mxu1 %v4814_v56  ;;  %3399 = vmatmul.mubr.bf16.gmra.mrb[68].mxu0 %v4816_v49  ;;  %v5848_v56 = vld [vmem:[%s6584_s17 + $0x390] sm:$0xff]   ;;  %v5855_v49 = vld [vmem:[%s6584_s17 + $0x3d8] sm:$0xff]  }
 0x18e   : > { %3309 = vmatprep.mubr.bf16.mxu1 %v8105_v16  ;;  %3406 = vmatprep.mubr.bf16.mxu0 %v4823_v29  ;;  %v5857_v29 = vld [vmem:[%s6584_s17 + $0x458] sm:$0xff]   ;;  %v5861_v16 = vld [vmem:[%s6584_s17 + $0x460] sm:$0xff]  }
 0x195   : > { %3310 = vmatmul.mubr.bf16.gmra.mrb[72].mxu1 %v8106_v7  ;;  %3407 = vmatmul.mubr.bf16.gmra.mrb[72].mxu0 %v4822_v39  ;;  %v5860_v39 = vld [vmem:[%s6584_s17 + $0x3a0] sm:$0xff]   ;;  %v5866_v7 = vld [vmem:[%s6584_s17 + $0x428] sm:$0xff]  }
 0x196   : > { %3317 = vmatprep.mubr.bf16.mxu1 %v4827_v57  ;;  %3414 = vmatprep.mubr.bf16.mxu0 %v4829_v51  ;;  %v8113_v57 = vld [vmem:[#allocation18_spill] sm:$0xff] }
 0x197   : > { %v5864_v51 = vld [vmem:[%s6584_s17 + $0x3a8] sm:$0xff]  }
 0x19d   : > { %3318 = vmatmul.mubr.bf16.gmra.mrb[76].mxu1 %v4826_v31  ;;  %3415 = vmatmul.mubr.bf16.gmra.mrb[76].mxu0 %v4828_v59  ;;  %v5867_v31 = vld [vmem:[%s6584_s17 + $0x3f0] sm:$0xff]  }
 0x19e   : > { %3455 = vmatprep.mubr.bf16.mxu1 %v7245_v19  ;;  %4017 = vmatprep.mubr.bf16.mxu0 %v8107_v50  ;;  %v8110_v19 = vld [vmem:[#allocation11_spill] sm:$0xff] }
 0x19f   : > { %v5869_v59 = vld [vmem:[%s6584_s17 + $0x470] sm:$0xff]  }
 0x1a0   : > { %v5868_v50 = vld [vmem:[%s6584_s17 + $0x3b0] sm:$0xff]  }
 0x1a5   : > { %3456 = vmatmul.mubr.bf16.vlgmr.msra.gmra.mrb[80].mxu1 %v8108_v8  ;;  %4018 = vmatmul.mubr.bf16.vlgmr.msra.gmra.mrb[80].mxu0 %v8109_v23  ;;  %v8115_v8 = vld [vmem:[#allocation9_spill] sm:$0xff] }
 0x1a6   : > { %5490 = vmatpush3.bf16.msra.mxu1 %v5840_v63  ;;  %5554 = vmatpush3.bf16.msra.mxu0 %v5842_v5  ;;  %v5875_v63 = vld [vmem:[%s6584_s17 + $0x3f8] sm:$0xff]   ;;  %v8118_v23 = vld [vmem:[#allocation17_spill] sm:$0xff] }
 0x1a7   : > { %3463 = vmatprep.mubr.bf16.mxu1 %v7251_v52  ;;  %4025 = vmatprep.mubr.bf16.mxu0 %v8110_v19  ;;  %v8111_v52 = vld [vmem:[#allocation14_spill] sm:$0xff]  ;;  %v5877_v5 = vld [vmem:[%s6584_s17 + $0x478] sm:$0xff]  }
 0x1a8   : > { %5491 = vmatprep.subr.bf16.mxu1 %v5843_v35  ;;  %5555 = vmatprep.subr.bf16.mxu0 %v5845_v40  ;;  %v8114_v35 = vld [vmem:[#allocation6_spill] sm:$0xff]  ;;  %v5876_v40 = vld [vmem:[%s6584_s17 + $0x3b8] sm:$0xff]  }
 0x1aa   : > { %5492 = vmatpush3.bf16.msra.mxu1 %v5844_v9  ;;  %5556 = vmatpush3.bf16.msra.mxu0 %v5846_v44  ;;  %v7574_v9 = vld [vmem:[%s7945_s0 + $0x130] sm:$0xff] }
 0x1ab   : > { %5493 = vmatprep.subr.bf16.mxu1 %v5847_v34  ;;  %5557 = vmatprep.subr.bf16.mxu0 %v5849_v1  ;;  %v4982_v34 = vcombine.low %v7376_v18, %v7574_v9 }
 0x1ad   : > { %3464 = vmatmul.mubr.bf16.gmra.mrb[84].mxu1 %v7257_v0  ;;  %4026 = vmatmul.mubr.bf16.gmra.mrb[84].mxu0 %v8111_v52  ;;  %v5859_v0 = vld [vmem:[%s6584_s17 + $0x3e0] sm:$0xff]  }
 0x1ae   : > { %3471 = vmatprep.mubr.bf16.mxu1 %v7263_v26  ;;  %4033 = vmatprep.mubr.bf16.mxu0 %v8112_v13  ;;  %v4977_v26 = vcombine.high %v7311_v10, %v7533_v6 }
 0x1af   : > { %5494 = vmatpush3.bf16.msra.mxu1 %v5848_v56  ;;  %5558 = vmatpush3.bf16.msra.mxu0 %v5850_v55 }
 0x1b0   : > { %5495 = vmatprep.subr.bf16.mxu1 %v5855_v49  ;;  %5559 = vmatprep.subr.bf16.mxu0 %v5857_v29 }
 0x1b3   : > { %5496 = vmatpush3.bf16.msra.mxu1 %v5856_v37  ;;  %5560 = vmatpush3.bf16.msra.mxu0 %v5858_v48  ;;  %v8121_v37 = vld [vmem:[#allocation20_spill] sm:$0xff] }
 0x1b4   : > { %5497 = vmatprep.subr.bf16.mxu1 %v5859_v0  ;;  %5561 = vmatprep.subr.bf16.mxu0 %v5861_v16 }
 0x1b5   : > { %3472 = vmatmul.mubr.bf16.gmra.mrb[88].mxu1 %v7269_v21  ;;  %4034 = vmatmul.mubr.bf16.gmra.mrb[88].mxu0 %v8113_v57  ;;  %v4976_v21 = vcombine.low %v7311_v10, %v7533_v6  ;;  %v5878_v10 = vld [vmem:[%s6584_s17 + $0x438] sm:$0xff]  }
 0x1b6   : > { %3479 = vmatprep.mubr.bf16.mxu1 %v7346_v42  ;;  %4041 = vmatprep.mubr.bf16.mxu0 %v4977_v26  ;;  %v5870_v42 = vld [vmem:[%s6584_s17 + $0x430] sm:$0xff]  }
 0x1b7   : > { %5498 = vmatpush3.bf16.msra.mxu1 %v5860_v39  ;;  %5562 = vmatpush3.bf16.msra.mxu0 %v5862_v15 }
 0x1b8   : > { %5499 = vmatprep.subr.bf16.mxu1 %v5863_v3  ;;  %5563 = vmatprep.subr.bf16.mxu0 %v5865_v20 }
 0x1bb   : > { %5500 = vmatpush3.bf16.msra.mxu1 %v5864_v51  ;;  %5564 = vmatpush3.bf16.msra.mxu0 %v5866_v7 }
 0x1bc   : > { %5501 = vmatprep.subr.bf16.mxu1 %v5867_v31  ;;  %5565 = vmatprep.subr.bf16.mxu0 %v5869_v59  ;;  %v8122_v59 = vld [vmem:[#allocation24_spill] sm:$0xff] }
 0x1bd   : > { %3480 = vmatmul.mubr.bf16.gmra.mrb[92].mxu1 %v7354_v14  ;;  %4042 = vmatmul.mubr.bf16.gmra.mrb[92].mxu0 %v4976_v21  ;;  %v8116_v14 = vld [vmem:[#allocation12_spill] sm:$0xff]  ;;  %v8123_v21 = vld [vmem:[#allocation23_spill] sm:$0xff] }
 0x1be   : > { %3487 = vmatprep.mubr.bf16.mxu1 %v7275_v12  ;;  %4049 = vmatprep.mubr.bf16.mxu0 %v8114_v35  ;;  %v8117_v12 = vld [vmem:[#allocation15_spill] sm:$0xff] }
 0x1bf   : > { %5502 = vmatpush3.bf16.msra.mxu1 %v5868_v50  ;;  %5566 = vmatpush3.bf16.msra.mxu0 %v5870_v42  ;;  %v8124_v50 = vld [vmem:[#allocation27_spill] sm:$0xff]  ;;  %v8125_v42 = vld [vmem:[#allocation25_spill] sm:$0xff] }
 0x1c0   : > { %5503 = vmatprep.subr.bf16.mxu1 %v5875_v63  ;;  %5567 = vmatprep.subr.bf16.mxu0 %v5877_v5 }
 0x1c3   : > { %5504 = vmatpush3.bf16.msra.mxu1 %v5876_v40  ;;  %5568 = vmatpush3.bf16.msra.mxu0 %v5878_v10 }
 0x1c5   : > { %3488 = vmatmul.mubr.bf16.gmra.mrb[96].mxu1 %v7281_v11  ;;  %4050 = vmatmul.mubr.bf16.gmra.mrb[96].mxu0 %v8115_v8  ;;  %v4983_v11 = vcombine.high %v7376_v18, %v7574_v9  ;;  %v1388_v18 = vld [vmem:[%s7945_s0 + $0x98] sm:$0x11] }
 0x1c6   : > { %3495 = vmatprep.mubr.bf16.mxu1 %v7287_v17  ;;  %4057 = vmatprep.mubr.bf16.mxu0 %v8116_v14  ;;  %v8119_v17 = vld [vmem:[#allocation19_spill] sm:$0xff]  ;;  %v4571_v39 = vcombine.high %v7533_v6, %v1388_v18  ;;  %v4570_v40 = vcombine.low %v7533_v6, %v1388_v18 }
 0x1c8   : > { %v1705_v63 = vshll.u32 %v4571_v39, 16  ;;  %v1698_v6 = vshll.u32 %v4570_v40, 16 }
 0x1cd   : > { %3496 = vmatmul.mubr.bf16.gmra.mrb[100].mxu1 %v7291_v58  ;;  %4058 = vmatmul.mubr.bf16.gmra.mrb[100].mxu0 %v8117_v12 }
 0x1ce   : > { %3503 = vmatprep.mubr.bf16.mxu1 %v7295_v60  ;;  %4065 = vmatprep.mubr.bf16.mxu0 %v8118_v23 }
 0x1d5   : > { %3504 = vmatmul.mubr.bf16.gmra.mrb[104].mxu1 %v7297_v46  ;;  %4066 = vmatmul.mubr.bf16.gmra.mrb[104].mxu0 %v8119_v17  ;;  %v1703_v17 = vshrl.u32 %v4571_v39, 16 }
 0x1d6   : > { %3511 = vmatprep.mubr.bf16.mxu1 %v7412_v54  ;;  %4073 = vmatprep.mubr.bf16.mxu0 %v4983_v11  ;;  %v8120_v54 = vld [vmem:[#allocation22_spill] sm:$0xff] }
 0x1d8   : > { %v5057_v58 = vpop.f32.mrb[0].mxu0  ;;  %v5081_v44 = vpop.f32.mrb[0].mxu1 }
 0x1d9   : > { %v5058_v60 = vpop.f32.mrb[1].mxu0  ;;  %v5082_v19 = vpop.f32.mrb[1].mxu1 }
 0x1da   : > { %v7583_v1 = vadd.f32 %v5058_v60, %v5057_v58  ;;  %v7585_v56 = vadd.f32 %v5082_v19, %v5081_v44  ;;  %v5060_v55 = vpop.f32.mrb[2].mxu0  ;;  %v5084_v49 = vpop.f32.mrb[2].mxu1  ;;  %v1707_v58 = vrot.slane %v1705_v63, 1 }
 0x1db   : > { %v5061_v29 = vpop.f32.mrb[3].mxu0  ;;  %v5085_v46 = vpop.f32.mrb[3].mxu1 }
 0x1dc   : > { %v7587_v52 = vadd.f32 %v5061_v29, %v5060_v55  ;;  %v7589_v13 = vadd.f32 %v5085_v46, %v5084_v49  ;;  %v8126_v55 = vld [vmem:[#allocation31_spill] sm:$0xff]  ;;  %v8127_v49 = vld [vmem:[#allocation29_spill] sm:$0xff]  ;;  %v8129_v46 = vld [vmem:[#allocation34_spill] sm:$0xff] }
 0x1dd   : > { %3512 = vmatmul.mubr.bf16.gmra.mrb[108].mxu1 %v7424_v41  ;;  %4074 = vmatmul.mubr.bf16.gmra.mrb[108].mxu0 %v4982_v34  ;;  %v8128_v29 = vld [vmem:[#allocation33_spill] sm:$0xff] }
 0x1de   : > { %4114 = vmatprep.mubr.bf16.mxu1 %v8120_v54  ;;  %4211 = vmatprep.mubr.bf16.mxu0 %v8121_v37  ;;  %v1708_v54 = vor.u32 %v1707_v58, %v1703_v17  ;;  %v1868_v37 = vrot.slane %v4571_v39, 1 }
 0x1e0   : > { %v5063_v48 = vpop.f32.mrb[4].mxu0  ;;  %v5087_v0 = vpop.f32.mrb[4].mxu1 }
 0x1e1   : > { %v5064_v16 = vpop.f32.mrb[5].mxu0  ;;  %v5088_v26 = vpop.f32.mrb[5].mxu1 }
 0x1e2   : > { %v7598_v15 = vadd.f32 %v5064_v16, %v5063_v48  ;;  %v7600_v3 = vadd.f32 %v5088_v26, %v5087_v0  ;;  %v5066_v41 = vpop.f32.mrb[6].mxu0  ;;  %v5090_v20 = vpop.f32.mrb[6].mxu1  ;;  %v1696_v26 = vshrl.u32 %v4570_v40, 16 }
 0x1e3   : > { %v5067_v57 = vpop.f32.mrb[7].mxu0  ;;  %v5091_v51 = vpop.f32.mrb[7].mxu1 }
 0x1e4   : > { %v7602_v7 = vadd.f32 %v5067_v57, %v5066_v41  ;;  %v7604_v31 = vadd.f32 %v5091_v51, %v5090_v20  ;;  %v1700_v41 = vrot.slane %v1698_v6, 1 }
 0x1e5   : > { %4115 = vmatmul.mubr.bf16.vlgmr.msra.gmra.mrb[112].mxu1 %v8122_v59  ;;  %4212 = vmatmul.mubr.bf16.vlgmr.msra.gmra.mrb[112].mxu0 %v8123_v21  ;;  %v4979_v21 = vcombine.low %v7417_v38, %v1708_v54 }
 0x1e6   : > { %4122 = vmatprep.mubr.bf16.mxu1 %v8124_v50  ;;  %4219 = vmatprep.mubr.bf16.mxu0 %v8125_v42  ;;  %v4981_v50 = vcombine.low %v1866_v53, %v1868_v37 }
 0x1e8   : > { %v5069_v5 = vpop.f32.mrb[8].mxu0  ;;  %v5093_v35 = vpop.f32.mrb[8].mxu1 }
 0x1e9   : > { %v5070_v10 = vpop.f32.mrb[9].mxu0  ;;  %v5094_v8 = vpop.f32.mrb[9].mxu1 }
 0x1ea   : > { %v7611_v14 = vadd.f32 %v5070_v10, %v5069_v5  ;;  %v7613_v12 = vadd.f32 %v5094_v8, %v5093_v35  ;;  %v5072_v23 = vpop.f32.mrb[10].mxu0  ;;  %v5096_v11 = vpop.f32.mrb[10].mxu1  ;;  %v8130_v35 = vld [vmem:[#allocation39_spill] sm:$0xff]  ;;  %v8131_v10 = vld [vmem:[#allocation38_spill] sm:$0xff]  ;;  %v1701_v8 = vor.u32 %v1700_v41, %v1696_v26 }
 0x1eb   : > { %v5073_v44 = vpop.f32.mrb[11].mxu0  ;;  %v5097_v60 = vpop.f32.mrb[11].mxu1 }
 0x1ec   : > { %v7615_v19 = vadd.f32 %v5073_v44, %v5072_v23  ;;  %v7617_v34 = vadd.f32 %v5097_v60, %v5096_v11  ;;  %v1867_v23 = vrot.slane %v4570_v40, 1  ;;  %v4978_v62 = vcombine.low %v7444_v33, %v1701_v8  ;;  %v8132_v33 = vld [vmem:[#allocation43_spill] sm:$0xff]  ;;  %v8134_v8 = vld [vmem:[#allocation45_spill] sm:$0xff] }
 0x1ed   : > { %4123 = vmatmul.mubr.bf16.gmra.mrb[116].mxu1 %v8126_v55  ;;  %4220 = vmatmul.mubr.bf16.gmra.mrb[116].mxu0 %v8127_v49 }
 0x1ee   : > { %4130 = vmatprep.mubr.bf16.mxu1 %v8128_v29  ;;  %4227 = vmatprep.mubr.bf16.mxu0 %v8129_v46  ;;  %v4980_v53 = vcombine.low %v1865_v45, %v1867_v23  ;;  %v1408_v45 = vld [vmem:[%s7945_s0 + $0x138] sm:$0x11]  ;;  %v8135_v23 = vld [vmem:[#allocation46_spill] sm:$0xff] }
 0x1ef   : > { %v4591_v41 = vcombine.high %v7574_v9, %v1408_v45 }
 0x1f0   : > { %v5075_v18 = vpop.f32.mrb[12].mxu0  ;;  %v5099_v48 = vpop.f32.mrb[12].mxu1 }
 0x1f1   : > { %v5076_v0 = vpop.f32.mrb[13].mxu0  ;;  %v5100_v16 = vpop.f32.mrb[13].mxu1 }
 0x1f2   : > { %v7623_v20 = vadd.f32 %v5076_v0, %v5075_v18  ;;  %v7625_v57 = vadd.f32 %v5100_v16, %v5099_v48  ;;  %v5078_v51 = vpop.f32.mrb[14].mxu0  ;;  %v5102_v59 = vpop.f32.mrb[14].mxu1 }
 0x1f3   : > { %v5079_v42 = vpop.f32.mrb[15].mxu0  ;;  %v5103_v63 = vpop.f32.mrb[15].mxu1 }
 0x1f4   : > { %v7630_v39 = vadd.f32 %v5079_v42, %v5078_v51  ;;  %v7632_v5 = vadd.f32 %v5103_v63, %v5102_v59 }
 0x1f5   : > { %4131 = vmatmul.mubr.bf16.gmra.mrb[120].mxu1 %v8130_v35  ;;  %4228 = vmatmul.mubr.bf16.gmra.mrb[120].mxu0 %v8131_v10 }
 0x1f6   : > { %4138 = vmatprep.mubr.bf16.mxu1 %v4979_v21  ;;  %4235 = vmatprep.mubr.bf16.mxu0 %v4981_v50 }
 0x1f8   : > { %v5121_v11 = vpop.f32.mrb[16].mxu1  ;;  %v5185_v17 = vpop.f32.mrb[16].mxu0 }
 0x1f9   : > { %v5122_v38 = vpop.f32.mrb[17].mxu1  ;;  %v5186_v58 = vpop.f32.mrb[17].mxu0 }
 0x1fa   : > { %v5123_v44 = vadd.f32 %v5122_v38, %v5121_v11  ;;  %v5187_v60 = vadd.f32 %v5186_v58, %v5185_v17  ;;  %v5124_v55 = vpop.f32.mrb[18].mxu1  ;;  %v5188_v49 = vpop.f32.mrb[18].mxu0  ;;  %v8136_v38 = vld [vmem:[#allocation47_spill] sm:$0xff]  ;;  %v8137_v58 = vld [vmem:[#allocation48_spill] sm:$0xff] }
 0x1fb   : > { %v5125_v6 = vpop.f32.mrb[19].mxu1  ;;  %v5189_v29 = vpop.f32.mrb[19].mxu0 }
 0x1fc   : > { %v2565_v46 = vadd.f32 %v5123_v44, %v7583_v1  ;;  %v5126_v40 = vadd.f32 %v5125_v6, %v5124_v55  ;;  %v5190_v54 = vadd.f32 %v5189_v29, %v5188_v49 }
 0x1fd   : > { %4139 = vmatmul.mubr.bf16.gmra.mrb[124].mxu1 %v4978_v62  ;;  %4236 = vmatmul.mubr.bf16.gmra.mrb[124].mxu0 %v4980_v53  ;;  %v1845_v62 = vshll.u32 %v4591_v41, 16 }
 0x1fe   : > { %v7640_v37 = vadd.f32 %v5187_v60, %v2565_v46  ;;  %v2568_v18 = vadd.f32 %v5126_v40, %v7587_v52  ;;  %4146 = vmatprep.mubr.bf16.mxu1 %v8132_v33  ;;  %4243 = vmatprep.mubr.bf16.mxu0 %v8133_v36 }
 0x200   : > { %v7648_v48 = vadd.f32 %v5190_v54, %v2568_v18  ;;  %v5127_v0 = vpop.f32.mrb[20].mxu1  ;;  %v5191_v1 = vpop.f32.mrb[20].mxu0  ;;  %v1843_v54 = vshrl.u32 %v4591_v41, 16  ;;  %v1847_v18 = vrot.slane %v1845_v62, 1 }
 0x201   : > { %v5128_v16 = vpop.f32.mrb[21].mxu1  ;;  %v5192_v26 = vpop.f32.mrb[21].mxu0 }
 0x202   : > { %v5129_v51 = vadd.f32 %v5128_v16, %v5127_v0  ;;  %v5193_v59 = vadd.f32 %v5192_v26, %v5191_v1  ;;  %v5130_v21 = vpop.f32.mrb[22].mxu1  ;;  %v5194_v52 = vpop.f32.mrb[22].mxu0  ;;  %v1848_v26 = vor.u32 %v1847_v18, %v1843_v54 }
 0x203   : > { %v5131_v50 = vpop.f32.mrb[23].mxu1  ;;  %v5195_v42 = vpop.f32.mrb[23].mxu0 }
 0x204   : > { %v2573_v63 = vadd.f32 %v5129_v51, %v7598_v15  ;;  %v5132_v35 = vadd.f32 %v5131_v50, %v5130_v21  ;;  %v5196_v10 = vadd.f32 %v5195_v42, %v5194_v52  ;;  %v4590_v15 = vcombine.low %v7574_v9, %v1408_v45 }
 0x205   : > { %4147 = vmatmul.mubr.bf16.gmra.mrb[128].mxu1 %v8134_v8  ;;  %4244 = vmatmul.mubr.bf16.gmra.mrb[128].mxu0 %v8135_v23  ;;  %v1888_v51 = vrot.slane %v4591_v41, 1 }
 0x206   : > { %v7654_v11 = vadd.f32 %v5193_v59, %v2573_v63  ;;  %v2576_v17 = vadd.f32 %v5132_v35, %v7602_v7  ;;  %4154 = vmatprep.mubr.bf16.mxu1 %v8136_v38  ;;  %4251 = vmatprep.mubr.bf16.mxu0 %v8137_v58  ;;  %v1838_v16 = vshll.u32 %v4590_v15, 16  ;;  %v1887_v58 = vrot.slane %v4590_v15, 1 }
 0x208   : > { %v7659_v53 = vadd.f32 %v5196_v10, %v2576_v17  ;;  %v5133_v44 = vpop.f32.mrb[24].mxu1  ;;  %v5197_v60 = vpop.f32.mrb[24].mxu0  ;;  %v1840_v42 = vrot.slane %v1838_v16, 1 }
 0x209   : > { %v5134_v55 = vpop.f32.mrb[25].mxu1  ;;  %v5198_v49 = vpop.f32.mrb[25].mxu0 }
 0x20a   : > { %v5135_v6 = vadd.f32 %v5134_v55, %v5133_v44  ;;  %v5199_v29 = vadd.f32 %v5198_v49, %v5197_v60  ;;  %v5136_v46 = vpop.f32.mrb[26].mxu1  ;;  %v5200_v40 = vpop.f32.mrb[26].mxu0 }
 0x20b   : > { %v5137_v7 = vpop.f32.mrb[27].mxu1  ;;  %v5201_v33 = vpop.f32.mrb[27].mxu0 }
 0x20c   : > { %v2581_v36 = vadd.f32 %v5135_v6, %v7611_v14  ;;  %v5138_v0 = vadd.f32 %v5137_v7, %v5136_v46  ;;  %v5202_v1 = vadd.f32 %v5201_v33, %v5200_v40 }
 0x20d   : > { %4155 = vmatmul.mubr.bf16.gmra.mrb[132].mxu1 %v7231_v22  ;;  %4252 = vmatmul.mubr.bf16.gmra.mrb[132].mxu0 %v7225_v27  ;;  %v1836_v22 = vshrl.u32 %v4590_v15, 16 }
 0x20e   : > { %v7665_v9 = vadd.f32 %v5199_v29, %v2581_v36  ;;  %v2584_v45 = vadd.f32 %v5138_v0, %v7615_v19  ;;  %4162 = vmatprep.mubr.bf16.mxu1 %v7301_v4  ;;  %4259 = vmatprep.mubr.bf16.mxu0 %v7305_v32  ;;  %v4985_v19 = vcombine.low %v7489_v47, %v1848_v26 }
 0x20f   : > { %v4987_v4 = vcombine.low %v1886_v28, %v1888_v51  ;;  %v1841_v38 = vor.u32 %v1840_v42, %v1836_v22 }
 0x210   : > { %v7670_v59 = vadd.f32 %v5202_v1, %v2584_v45  ;;  %v5139_v14 = vpop.f32.mrb[28].mxu1  ;;  %v5203_v21 = vpop.f32.mrb[28].mxu0 }
 0x211   : > { %v5140_v52 = vpop.f32.mrb[29].mxu1  ;;  %v5204_v50 = vpop.f32.mrb[29].mxu0  ;;  %v4984_v55 = vcombine.low %v7503_v24, %v1841_v38 }
 0x212   : > { %v5141_v27 = vadd.f32 %v5140_v52, %v5139_v14  ;;  %v5205_v63 = vadd.f32 %v5204_v50, %v5203_v21  ;;  %v5142_v35 = vpop.f32.mrb[30].mxu1  ;;  %v5206_v10 = vpop.f32.mrb[30].mxu0 }
 0x213   : > { %v5143_v32 = vpop.f32.mrb[31].mxu1  ;;  %v5207_v8 = vpop.f32.mrb[31].mxu0 }
 0x214   : > { %v2589_v41 = vadd.f32 %v5141_v27, %v7623_v20  ;;  %v5144_v23 = vadd.f32 %v5143_v32, %v5142_v35  ;;  %v5208_v17 = vadd.f32 %v5207_v8, %v5206_v10 }
 0x215   : > { %4163 = vmatmul.mubr.bf16.gmra.mrb[136].mxu1 %v7329_v61  ;;  %4260 = vmatmul.mubr.bf16.gmra.mrb[136].mxu0 %v7333_v30  ;;  %v4986_v61 = vcombine.low %v1885_v43, %v1887_v58 }
 0x216   : > { %v7678_v62 = vadd.f32 %v5205_v63, %v2589_v41  ;;  %v2592_v44 = vadd.f32 %v5144_v23, %v7630_v39  ;;  %4170 = vmatprep.mubr.bf16.mxu1 %v4985_v19  ;;  %4267 = vmatprep.mubr.bf16.mxu0 %v4987_v4 }
 0x218   : > { %v7681_v2 = vadd.f32 %v5208_v17, %v2592_v44  ;;  %v5145_v28 = vpop.f32.mrb[32].mxu1  ;;  %v5209_v47 = vpop.f32.mrb[32].mxu0 }
 0x219   : > { %v5146_v60 = vpop.f32.mrb[33].mxu1  ;;  %v5210_v20 = vpop.f32.mrb[33].mxu0 }
 0x21a   : > { %v5147_v30 = vadd.f32 %v5146_v60, %v5145_v28  ;;  %v5211_v49 = vadd.f32 %v5210_v20, %v5209_v47  ;;  %v5148_v15 = vpop.f32.mrb[34].mxu1  ;;  %v5212_v6 = vpop.f32.mrb[34].mxu0 }
 0x21b   : > { %v5149_v29 = vpop.f32.mrb[35].mxu1  ;;  %v5213_v46 = vpop.f32.mrb[35].mxu0 }
 0x21c   : > { %v2597_v39 = vadd.f32 %v5147_v30, %v7585_v56  ;;  %v5150_v40 = vadd.f32 %v5149_v29, %v5148_v15  ;;  %v5214_v54 = vadd.f32 %v5213_v46, %v5212_v6 }
 0x21d   : > { %4171 = vmatmul.mubr.bf16.gmra.mrb[140].mxu1 %v4984_v55  ;;  %4268 = vmatmul.mubr.bf16.gmra.mrb[140].mxu0 %v4986_v61 }
 0x21e   : > { %v7687_v18 = vadd.f32 %v5211_v49, %v2597_v39  ;;  %v2600_v7 = vadd.f32 %v5150_v40, %v7589_v13 }
 0x220   : > { %v7690_v24 = vadd.f32 %v5214_v54, %v2600_v7  ;;  %v5151_v25 = vpop.f32.mrb[36].mxu1  ;;  %v5215_v43 = vpop.f32.mrb[36].mxu0 }
 0x221   : > { %v5152_v33 = vpop.f32.mrb[37].mxu1  ;;  %v5216_v36 = vpop.f32.mrb[37].mxu0 }
 0x222   : > { %v5153_v0 = vadd.f32 %v5152_v33, %v5151_v25  ;;  %v5217_v1 = vadd.f32 %v5216_v36, %v5215_v43  ;;  %v5154_v16 = vpop.f32.mrb[38].mxu1  ;;  %v5218_v45 = vpop.f32.mrb[38].mxu0 }
 0x223   : > { %v5155_v26 = vpop.f32.mrb[39].mxu1  ;;  %v5219_v56 = vpop.f32.mrb[39].mxu0 }
 0x224   : > { %v2605_v51 = vadd.f32 %v5153_v0, %v7600_v3  ;;  %v5156_v14 = vadd.f32 %v5155_v26, %v5154_v16  ;;  %v5220_v21 = vadd.f32 %v5219_v56, %v5218_v45 }
 0x226   : > { %v7693_v52 = vadd.f32 %v5217_v1, %v2605_v51  ;;  %v2608_v13 = vadd.f32 %v5156_v14, %v7604_v31 }
 0x228   : > { %v7696_v50 = vadd.f32 %v5220_v21, %v2608_v13  ;;  %v5157_v22 = vpop.f32.mrb[40].mxu1  ;;  %v5221_v42 = vpop.f32.mrb[40].mxu0 }
 0x229   : > { %v5158_v27 = vpop.f32.mrb[41].mxu1  ;;  %v5222_v63 = vpop.f32.mrb[41].mxu0 }
 0x22a   : > { %v5159_v35 = vadd.f32 %v5158_v27, %v5157_v22  ;;  %v5223_v10 = vadd.f32 %v5222_v63, %v5221_v42  ;;  %v5160_v19 = vpop.f32.mrb[42].mxu1  ;;  %v5224_v4 = vpop.f32.mrb[42].mxu0 }
 0x22b   : > { %v5161_v32 = vpop.f32.mrb[43].mxu1  ;;  %v5225_v8 = vpop.f32.mrb[43].mxu0 }
 0x22c   : > { %v2613_v3 = vadd.f32 %v5159_v35, %v7613_v12  ;;  %v5162_v41 = vadd.f32 %v5161_v32, %v5160_v19  ;;  %v5226_v23 = vadd.f32 %v5225_v8, %v5224_v4 }
 0x22e   : > { %v7699_v17 = vadd.f32 %v5223_v10, %v2613_v3  ;;  %v2616_v31 = vadd.f32 %v5162_v41, %v7617_v34 }
 0x230   : > { %v7702_v38 = vadd.f32 %v5226_v23, %v2616_v31  ;;  %v5163_v58 = vpop.f32.mrb[44].mxu1  ;;  %v5227_v44 = vpop.f32.mrb[44].mxu0 }
 0x231   : > { %v5164_v28 = vpop.f32.mrb[45].mxu1  ;;  %v5228_v47 = vpop.f32.mrb[45].mxu0 }
 0x232   : > { %v5165_v60 = vadd.f32 %v5164_v28, %v5163_v58  ;;  %v5229_v20 = vadd.f32 %v5228_v47, %v5227_v44  ;;  %v5166_v55 = vpop.f32.mrb[46].mxu1  ;;  %v5230_v61 = vpop.f32.mrb[46].mxu0 }
 0x233   : > { %v5167_v30 = vpop.f32.mrb[47].mxu1  ;;  %v5231_v49 = vpop.f32.mrb[47].mxu0 }
 0x234   : > { %v2621_v12 = vadd.f32 %v5165_v60, %v7625_v57  ;;  %v5168_v15 = vadd.f32 %v5167_v30, %v5166_v55  ;;  %v5232_v6 = vadd.f32 %v5231_v49, %v5230_v61 }
 0x236   : > { %v7705_v29 = vadd.f32 %v5229_v20, %v2621_v12  ;;  %v2624_v34 = vadd.f32 %v5168_v15, %v7632_v5 }
 0x238   : > { %v7708_v46 = vadd.f32 %v5232_v6, %v2624_v34  ;;  %v5249_v39 = vpop.f32.mrb[48].mxu1  ;;  %v5313_v40 = vpop.f32.mrb[48].mxu0 }
 0x239   : > { %v5250_v54 = vpop.f32.mrb[49].mxu1  ;;  %v5314_v7 = vpop.f32.mrb[49].mxu0 }
 0x23a   : > { %v5251_v25 = vadd.f32 %v5250_v54, %v5249_v39  ;;  %v5315_v43 = vadd.f32 %v5314_v7, %v5313_v40  ;;  %v5252_v33 = vpop.f32.mrb[50].mxu1  ;;  %v5316_v36 = vpop.f32.mrb[50].mxu0 }
 0x23b   : > { %v5253_v0 = vpop.f32.mrb[51].mxu1  ;;  %v5317_v1 = vpop.f32.mrb[51].mxu0 }
 0x23c   : > { %v7710_v16 = vadd.f32 %v5315_v43, %v5251_v25  ;;  %v5254_v57 = vadd.f32 %v5253_v0, %v5252_v33  ;;  %v5318_v45 = vadd.f32 %v5317_v1, %v5316_v36 }
 0x23e   : > { %v7712_v26 = vadd.f32 %v5318_v45, %v5254_v57 }
 0x240   : > { %v5255_v56 = vpop.f32.mrb[52].mxu1  ;;  %v5319_v5 = vpop.f32.mrb[52].mxu0 }
 0x241   : > { %v5256_v51 = vpop.f32.mrb[53].mxu1  ;;  %v5320_v14 = vpop.f32.mrb[53].mxu0 }
 0x242   : > { %v5257_v21 = vadd.f32 %v5256_v51, %v5255_v56  ;;  %v5321_v13 = vadd.f32 %v5320_v14, %v5319_v5  ;;  %v5258_v22 = vpop.f32.mrb[54].mxu1  ;;  %v5322_v42 = vpop.f32.mrb[54].mxu0 }
 0x243   : > { %v5259_v27 = vpop.f32.mrb[55].mxu1  ;;  %v5323_v63 = vpop.f32.mrb[55].mxu0 }
 0x244   : > { %v7714_v35 = vadd.f32 %v5321_v13, %v5257_v21  ;;  %v5260_v10 = vadd.f32 %v5259_v27, %v5258_v22  ;;  %v5324_v19 = vadd.f32 %v5323_v63, %v5322_v42 }
 0x246   : > { %v7716_v4 = vadd.f32 %v5324_v19, %v5260_v10 }
 0x248   : > { %v5261_v32 = vpop.f32.mrb[56].mxu1  ;;  %v5325_v8 = vpop.f32.mrb[56].mxu0 }
 0x249   : > { %v5262_v3 = vpop.f32.mrb[57].mxu1  ;;  %v5326_v41 = vpop.f32.mrb[57].mxu0 }
 0x24a   : > { %v5263_v23 = vadd.f32 %v5262_v3, %v5261_v32  ;;  %v5327_v31 = vadd.f32 %v5326_v41, %v5325_v8  ;;  %v5264_v58 = vpop.f32.mrb[58].mxu1  ;;  %v5328_v44 = vpop.f32.mrb[58].mxu0 }
 0x24b   : > { %v5265_v28 = vpop.f32.mrb[59].mxu1  ;;  %v5329_v47 = vpop.f32.mrb[59].mxu0 }
 0x24c   : > { %v7718_v60 = vadd.f32 %v5327_v31, %v5263_v23  ;;  %v5266_v20 = vadd.f32 %v5265_v28, %v5264_v58  ;;  %v5330_v55 = vadd.f32 %v5329_v47, %v5328_v44 }
 0x24e   : > { %v7720_v61 = vadd.f32 %v5330_v55, %v5266_v20 }
 0x250   : > { %v5267_v30 = vpop.f32.mrb[60].mxu1  ;;  %v5331_v49 = vpop.f32.mrb[60].mxu0 }
 0x251   : > { %v5268_v12 = vpop.f32.mrb[61].mxu1  ;;  %v5332_v15 = vpop.f32.mrb[61].mxu0 }
 0x252   : > { %v5269_v6 = vadd.f32 %v5268_v12, %v5267_v30  ;;  %v5333_v34 = vadd.f32 %v5332_v15, %v5331_v49  ;;  %v5270_v39 = vpop.f32.mrb[62].mxu1  ;;  %v5334_v40 = vpop.f32.mrb[62].mxu0 }
 0x253   : > { %v5271_v54 = vpop.f32.mrb[63].mxu1  ;;  %v5335_v7 = vpop.f32.mrb[63].mxu0 }
 0x254   : > { %v7722_v25 = vadd.f32 %v5333_v34, %v5269_v6  ;;  %v5272_v43 = vadd.f32 %v5271_v54, %v5270_v39  ;;  %v5336_v33 = vadd.f32 %v5335_v7, %v5334_v40 }
 0x256   : > { %v7724_v36 = vadd.f32 %v5336_v33, %v5272_v43 }
 0x258   : > { %v5273_v0 = vpop.f32.mrb[64].mxu1  ;;  %v5337_v1 = vpop.f32.mrb[64].mxu0 }
 0x259   : > { %v5274_v57 = vpop.f32.mrb[65].mxu1  ;;  %v5338_v45 = vpop.f32.mrb[65].mxu0 }
 0x25a   : > { %v5275_v56 = vadd.f32 %v5274_v57, %v5273_v0  ;;  %v5339_v5 = vadd.f32 %v5338_v45, %v5337_v1  ;;  %v5276_v51 = vpop.f32.mrb[66].mxu1  ;;  %v5340_v14 = vpop.f32.mrb[66].mxu0 }
 0x25b   : > { %v5277_v21 = vpop.f32.mrb[67].mxu1  ;;  %v5341_v13 = vpop.f32.mrb[67].mxu0 }
 0x25c   : > { %v7726_v22 = vadd.f32 %v5339_v5, %v5275_v56  ;;  %v5278_v42 = vadd.f32 %v5277_v21, %v5276_v51  ;;  %v5342_v27 = vadd.f32 %v5341_v13, %v5340_v14 }
 0x25e   : > { %v7728_v63 = vadd.f32 %v5342_v27, %v5278_v42 }
 0x260   : > { %v5279_v10 = vpop.f32.mrb[68].mxu1  ;;  %v5343_v19 = vpop.f32.mrb[68].mxu0 }
 0x261   : > { %v5280_v32 = vpop.f32.mrb[69].mxu1  ;;  %v5344_v8 = vpop.f32.mrb[69].mxu0 }
 0x262   : > { %v5281_v3 = vadd.f32 %v5280_v32, %v5279_v10  ;;  %v5345_v41 = vadd.f32 %v5344_v8, %v5343_v19  ;;  %v5282_v23 = vpop.f32.mrb[70].mxu1  ;;  %v5346_v31 = vpop.f32.mrb[70].mxu0 }
 0x263   : > { %v5283_v58 = vpop.f32.mrb[71].mxu1  ;;  %v5347_v44 = vpop.f32.mrb[71].mxu0 }
 0x264   : > { %v7730_v28 = vadd.f32 %v5345_v41, %v5281_v3  ;;  %v5284_v47 = vadd.f32 %v5283_v58, %v5282_v23  ;;  %v5348_v20 = vadd.f32 %v5347_v44, %v5346_v31 }
 0x266   : > { %v7732_v55 = vadd.f32 %v5348_v20, %v5284_v47 }
 0x268   : > { %v5285_v30 = vpop.f32.mrb[72].mxu1  ;;  %v5349_v49 = vpop.f32.mrb[72].mxu0 }
 0x269   : > { %v5286_v12 = vpop.f32.mrb[73].mxu1  ;;  %v5350_v15 = vpop.f32.mrb[73].mxu0 }
 0x26a   : > { %v5287_v6 = vadd.f32 %v5286_v12, %v5285_v30  ;;  %v5351_v34 = vadd.f32 %v5350_v15, %v5349_v49  ;;  %v5288_v39 = vpop.f32.mrb[74].mxu1  ;;  %v5352_v40 = vpop.f32.mrb[74].mxu0 }
 0x26b   : > { %v5289_v54 = vpop.f32.mrb[75].mxu1  ;;  %v5353_v7 = vpop.f32.mrb[75].mxu0 }
 0x26c   : > { %v7734_v43 = vadd.f32 %v5351_v34, %v5287_v6  ;;  %v5290_v33 = vadd.f32 %v5289_v54, %v5288_v39  ;;  %v5354_v0 = vadd.f32 %v5353_v7, %v5352_v40 }
 0x26e   : > { %v7736_v1 = vadd.f32 %v5354_v0, %v5290_v33 }
 0x270   : > { %v5291_v57 = vpop.f32.mrb[76].mxu1  ;;  %v5355_v45 = vpop.f32.mrb[76].mxu0 }
 0x271   : > { %v5292_v56 = vpop.f32.mrb[77].mxu1  ;;  %v5356_v5 = vpop.f32.mrb[77].mxu0 }
 0x272   : > { %v5293_v51 = vadd.f32 %v5292_v56, %v5291_v57  ;;  %v5357_v14 = vadd.f32 %v5356_v5, %v5355_v45  ;;  %v5294_v21 = vpop.f32.mrb[78].mxu1  ;;  %v5358_v13 = vpop.f32.mrb[78].mxu0 }
 0x273   : > { %v5295_v42 = vpop.f32.mrb[79].mxu1  ;;  %v5359_v27 = vpop.f32.mrb[79].mxu0 }
 0x274   : > { %v7738_v10 = vadd.f32 %v5357_v14, %v5293_v51  ;;  %v5296_v19 = vadd.f32 %v5295_v42, %v5294_v21  ;;  %v5360_v32 = vadd.f32 %v5359_v27, %v5358_v13 }
 0x276   : > { %v7740_v8 = vadd.f32 %v5360_v32, %v5296_v19 }
 0x278   : > { %v5377_v3 = vpop.f32.mrb[80].mxu1  ;;  %v5441_v41 = vpop.f32.mrb[80].mxu0 }
 0x279   : > { %v5378_v23 = vpop.f32.mrb[81].mxu1  ;;  %v5442_v31 = vpop.f32.mrb[81].mxu0 }
 0x27a   : > { %v5379_v58 = vadd.f32 %v5378_v23, %v5377_v3  ;;  %v7742_v44 = vadd.f32 %v5442_v31, %v5441_v41  ;;  %v5380_v47 = vpop.f32.mrb[82].mxu1  ;;  %v5444_v20 = vpop.f32.mrb[82].mxu0 }
 0x27b   : > { %v5381_v30 = vpop.f32.mrb[83].mxu1  ;;  %v5445_v49 = vpop.f32.mrb[83].mxu0 }
 0x27c   : > { %v3458_v12 = vadd.f32 %v5379_v58, %v7710_v16  ;;  %v5382_v15 = vadd.f32 %v5381_v30, %v5380_v47  ;;  %v7745_v6 = vadd.f32 %v5445_v49, %v5444_v20 }
 0x27e   : > { %v7748_v34 = vadd.f32 %v3458_v12, %v7640_v37  ;;  %v3461_v39 = vadd.f32 %v5382_v15, %v7712_v26 }
 0x280   : > { %v7752_v40 = vadd.f32 %v3461_v39, %v7648_v48  ;;  %v5383_v54 = vpop.f32.mrb[84].mxu1  ;;  %v5447_v7 = vpop.f32.mrb[84].mxu0 }
 0x281   : > { %v5384_v33 = vpop.f32.mrb[85].mxu1  ;;  %v5448_v0 = vpop.f32.mrb[85].mxu0 }
 0x282   : > { %v5385_v57 = vadd.f32 %v5384_v33, %v5383_v54  ;;  %v7754_v45 = vadd.f32 %v5448_v0, %v5447_v7  ;;  %v5386_v56 = vpop.f32.mrb[86].mxu1  ;;  %v5450_v16 = vpop.f32.mrb[86].mxu0 }
 0x283   : > { %v5387_v5 = vpop.f32.mrb[87].mxu1  ;;  %v5451_v51 = vpop.f32.mrb[87].mxu0 }
 0x284   : > { %v3466_v14 = vadd.f32 %v5385_v57, %v7714_v35  ;;  %v5388_v37 = vadd.f32 %v5387_v5, %v5386_v56  ;;  %v7757_v21 = vadd.f32 %v5451_v51, %v5450_v16 }
 0x286   : > { %v7760_v26 = vadd.f32 %v3466_v14, %v7654_v11  ;;  %v3469_v48 = vadd.f32 %v5388_v37, %v7716_v4 }
 0x288   : > { %v7764_v13 = vadd.f32 %v3469_v48, %v7659_v53  ;;  %v5389_v42 = vpop.f32.mrb[88].mxu1  ;;  %v5453_v27 = vpop.f32.mrb[88].mxu0 }
 0x289   : > { %v5390_v19 = vpop.f32.mrb[89].mxu1  ;;  %v5454_v32 = vpop.f32.mrb[89].mxu0 }
 0x28a   : > { %v5391_v3 = vadd.f32 %v5390_v19, %v5389_v42  ;;  %v7766_v41 = vadd.f32 %v5454_v32, %v5453_v27  ;;  %v5392_v23 = vpop.f32.mrb[90].mxu1  ;;  %v5456_v35 = vpop.f32.mrb[90].mxu0 }
 0x28b   : > { %v5393_v31 = vpop.f32.mrb[91].mxu1  ;;  %v5457_v58 = vpop.f32.mrb[91].mxu0 }
 0x28c   : > { %v3474_v47 = vadd.f32 %v5391_v3, %v7718_v60  ;;  %v5394_v11 = vadd.f32 %v5393_v31, %v5392_v23  ;;  %v7769_v20 = vadd.f32 %v5457_v58, %v5456_v35 }
 0x28e   : > { %v7772_v4 = vadd.f32 %v3474_v47, %v7665_v9  ;;  %v3477_v53 = vadd.f32 %v5394_v11, %v7720_v61 }
 0x290   : > { %v7776_v30 = vadd.f32 %v3477_v53, %v7670_v59  ;;  %v5395_v49 = vpop.f32.mrb[92].mxu1  ;;  %v5459_v12 = vpop.f32.mrb[92].mxu0 }
 0x291   : > { %v5396_v15 = vpop.f32.mrb[93].mxu1  ;;  %v5460_v39 = vpop.f32.mrb[93].mxu0 }
 0x292   : > { %v5397_v54 = vadd.f32 %v5396_v15, %v5395_v49  ;;  %v7778_v7 = vadd.f32 %v5460_v39, %v5459_v12  ;;  %v5398_v33 = vpop.f32.mrb[94].mxu1  ;;  %v5462_v60 = vpop.f32.mrb[94].mxu0 }
 0x293   : > { %v5399_v0 = vpop.f32.mrb[95].mxu1  ;;  %v5463_v57 = vpop.f32.mrb[95].mxu0 }
 0x294   : > { %v3482_v56 = vadd.f32 %v5397_v54, %v7722_v25  ;;  %v5400_v9 = vadd.f32 %v5399_v0, %v5398_v33  ;;  %v7781_v16 = vadd.f32 %v5463_v57, %v5462_v60 }
 0x296   : > { %v7784_v61 = vadd.f32 %v3482_v56, %v7678_v62  ;;  %v3485_v59 = vadd.f32 %v5400_v9, %v7724_v36 }
 0x298   : > { %v7788_v5 = vadd.f32 %v3485_v59, %v7681_v2  ;;  %v5401_v51 = vpop.f32.mrb[96].mxu1  ;;  %v5465_v14 = vpop.f32.mrb[96].mxu0 }
 0x299   : > { %v5402_v37 = vpop.f32.mrb[97].mxu1  ;;  %v5466_v48 = vpop.f32.mrb[97].mxu0 }
 0x29a   : > { %v5403_v42 = vadd.f32 %v5402_v37, %v5401_v51  ;;  %v7790_v27 = vadd.f32 %v5466_v48, %v5465_v14  ;;  %v5404_v19 = vpop.f32.mrb[98].mxu1  ;;  %v5468_v25 = vpop.f32.mrb[98].mxu0 }
 0x29b   : > { %v5405_v32 = vpop.f32.mrb[99].mxu1  ;;  %v5469_v3 = vpop.f32.mrb[99].mxu0 }
 0x29c   : > { %v3490_v23 = vadd.f32 %v5403_v42, %v7726_v22  ;;  %v5406_v62 = vadd.f32 %v5405_v32, %v5404_v19  ;;  %v7793_v35 = vadd.f32 %v5469_v3, %v5468_v25 }
 0x29e   : > { %v7796_v36 = vadd.f32 %v3490_v23, %v7687_v18  ;;  %v3493_v2 = vadd.f32 %v5406_v62, %v7728_v63 }
 0x2a0   : > { %v7800_v31 = vadd.f32 %v3493_v2, %v7690_v24  ;;  %v5407_v58 = vpop.f32.mrb[100].mxu1  ;;  %v5471_v47 = vpop.f32.mrb[100].mxu0 }
 0x2a1   : > { %v5408_v11 = vpop.f32.mrb[101].mxu1  ;;  %v5472_v53 = vpop.f32.mrb[101].mxu0 }
 0x2a2   : > { %v5409_v49 = vadd.f32 %v5408_v11, %v5407_v58  ;;  %v7802_v12 = vadd.f32 %v5472_v53, %v5471_v47  ;;  %v5410_v15 = vpop.f32.mrb[102].mxu1  ;;  %v5474_v22 = vpop.f32.mrb[102].mxu0 }
 0x2a3   : > { %v5411_v39 = vpop.f32.mrb[103].mxu1  ;;  %v5475_v54 = vpop.f32.mrb[103].mxu0 }
 0x2a4   : > { %v3498_v33 = vadd.f32 %v5409_v49, %v7730_v28  ;;  %v5412_v18 = vadd.f32 %v5411_v39, %v5410_v15  ;;  %v7805_v60 = vadd.f32 %v5475_v54, %v5474_v22 }
 0x2a6   : > { %v7808_v63 = vadd.f32 %v3498_v33, %v7693_v52  ;;  %v3501_v24 = vadd.f32 %v5412_v18, %v7732_v55 }
 0x2a8   : > { %v7812_v0 = vadd.f32 %v3501_v24, %v7696_v50  ;;  %v5413_v57 = vpop.f32.mrb[104].mxu1  ;;  %v5477_v56 = vpop.f32.mrb[104].mxu0 }
 0x2a9   : > { %v5414_v9 = vpop.f32.mrb[105].mxu1  ;;  %v5478_v59 = vpop.f32.mrb[105].mxu0 }
 0x2aa   : > { %v5415_v51 = vadd.f32 %v5414_v9, %v5413_v57  ;;  %v7814_v14 = vadd.f32 %v5478_v59, %v5477_v56  ;;  %v5416_v37 = vpop.f32.mrb[106].mxu1  ;;  %v5480_v28 = vpop.f32.mrb[106].mxu0 }
 0x2ab   : > { %v5417_v48 = vpop.f32.mrb[107].mxu1  ;;  %v5481_v42 = vpop.f32.mrb[107].mxu0 }
 0x2ac   : > { %v3506_v19 = vadd.f32 %v5415_v51, %v7734_v43  ;;  %v5418_v52 = vadd.f32 %v5417_v48, %v5416_v37  ;;  %v7817_v25 = vadd.f32 %v5481_v42, %v5480_v28  ;;  %v7847_v48 = vld [vmem:[%s1367_s29] ss:$0 sm:$0xff] }
 0x2ae   : > { %v7820_v55 = vadd.f32 %v3506_v19, %v7699_v17  ;;  %v3509_v50 = vadd.f32 %v5418_v52, %v7736_v1 }
 0x2b0   : > { %v7824_v32 = vadd.f32 %v3509_v50, %v7702_v38  ;;  %v5419_v3 = vpop.f32.mrb[108].mxu1  ;;  %v5483_v23 = vpop.f32.mrb[108].mxu0 }
 0x2b1   : > { %v5420_v62 = vpop.f32.mrb[109].mxu1  ;;  %v5484_v2 = vpop.f32.mrb[109].mxu0 }
 0x2b2   : > { %v5421_v58 = vadd.f32 %v5420_v62, %v5419_v3  ;;  %v7826_v47 = vadd.f32 %v5484_v2, %v5483_v23  ;;  %v5422_v43 = vpop.f32.mrb[110].mxu1  ;;  %v5486_v11 = vpop.f32.mrb[110].mxu0 }
 0x2b3   : > { %v5423_v53 = vpop.f32.mrb[111].mxu1  ;;  %v5487_v49 = vpop.f32.mrb[111].mxu0 }
 0x2b4   : > { %v3514_v17 = vadd.f32 %v5421_v58, %v7738_v10  ;;  %v5424_v15 = vadd.f32 %v5423_v53, %v5422_v43  ;;  %v7829_v22 = vadd.f32 %v5487_v49, %v5486_v11 }
 0x2b6   : > { %v7833_v38 = vadd.f32 %v3514_v17, %v7705_v29  ;;  %v3517_v1 = vadd.f32 %v5424_v15, %v7740_v8 }
 0x2b8   : > { %v7837_v39 = vadd.f32 %v3517_v1, %v7708_v46  ;;  %v5505_v54 = vpop.f32.mrb[112].mxu1  ;;  %v5569_v33 = vpop.f32.mrb[112].mxu0 }
 0x2b9   : > { %v5506_v18 = vpop.f32.mrb[113].mxu1  ;;  %v5570_v24 = vpop.f32.mrb[113].mxu0 }
 0x2ba   : > { %v5507_v57 = vadd.f32 %v5506_v18, %v5505_v54  ;;  %v5571_v10 = vadd.f32 %v5570_v24, %v5569_v33  ;;  %v5508_v56 = vpop.f32.mrb[114].mxu1  ;;  %v5572_v9 = vpop.f32.mrb[114].mxu0 }
 0x2bb   : > { %v5509_v59 = vpop.f32.mrb[115].mxu1  ;;  %v5573_v51 = vpop.f32.mrb[115].mxu0 }
 0x2bc   : > { %v4117_v29 = vadd.f32 %v5507_v57, %v7742_v44  ;;  %v5510_v46 = vadd.f32 %v5509_v59, %v5508_v56  ;;  %v5574_v8 = vadd.f32 %v5573_v51, %v5572_v9 }
 0x2be   : > { %v4214_v37 = vadd.f32 %v5571_v10, %v4117_v29  ;;  %v4120_v28 = vadd.f32 %v5510_v46, %v7745_v6 }
 0x2c0   : > { %v4292_v42 = vadd.f32 %v4214_v37, %v7748_v34  ;;  %v4217_v19 = vadd.f32 %v5574_v8, %v4120_v28  ;;  %v5511_v52 = vpop.f32.mrb[116].mxu1  ;;  %v5575_v50 = vpop.f32.mrb[116].mxu0 }
 0x2c1   : > { %v5512_v3 = vpop.f32.mrb[117].mxu1  ;;  %v5576_v44 = vpop.f32.mrb[117].mxu0 }
 0x2c2   : > { %v4347_v23 = vadd.f32 %v7847_v48, %v4292_v42  ;;  %v4293_v62 = vadd.f32 %v4217_v19, %v7752_v40  ;;  %v5513_v2 = vadd.f32 %v5512_v3, %v5511_v52  ;;  %v5577_v58 = vadd.f32 %v5576_v44, %v5575_v50  ;;  %v5514_v43 = vpop.f32.mrb[118].mxu1  ;;  %v5578_v11 = vpop.f32.mrb[118].mxu0 }
 0x2c3   : > { %v5515_v53 = vpop.f32.mrb[119].mxu1  ;;  %v5579_v49 = vpop.f32.mrb[119].mxu0 }
 0x2c4   : > { %4363 = vst [vmem:[%s7852_s12] sm:$0xff] %v4347_v23  ;;  %v4348_v6 = vadd.f32 %v7847_v48, %v4293_v62  ;;  %v4125_v34 = vadd.f32 %v5513_v2, %v7754_v45  ;;  %v5516_v17 = vadd.f32 %v5515_v53, %v5514_v43  ;;  %v5580_v15 = vadd.f32 %v5579_v49, %v5578_v11 }
 0x2c6   : > { %4364 = vst [vmem:[%s7852_s12 + $0x8] sm:$0xff] %v4348_v6  ;;  %v4222_v1 = vadd.f32 %v5577_v58, %v4125_v34  ;;  %v4128_v40 = vadd.f32 %v5516_v17, %v7757_v21 }
 0x2c8   : > { %v4294_v54 = vadd.f32 %v4222_v1, %v7760_v26  ;;  %v4225_v33 = vadd.f32 %v5580_v15, %v4128_v40  ;;  %v5517_v18 = vpop.f32.mrb[120].mxu1  ;;  %v5581_v24 = vpop.f32.mrb[120].mxu0 }
 0x2c9   : > { %v5518_v57 = vpop.f32.mrb[121].mxu1  ;;  %v5582_v10 = vpop.f32.mrb[121].mxu0 }
 0x2ca   : > { %v4349_v56 = vadd.f32 %v7847_v48, %v4294_v54  ;;  %v4295_v9 = vadd.f32 %v4225_v33, %v7764_v13  ;;  %v5519_v45 = vadd.f32 %v5518_v57, %v5517_v18  ;;  %v5583_v59 = vadd.f32 %v5582_v10, %v5581_v24  ;;  %v5520_v51 = vpop.f32.mrb[122].mxu1  ;;  %v5584_v29 = vpop.f32.mrb[122].mxu0 }
 0x2cb   : > { %v5521_v46 = vpop.f32.mrb[123].mxu1  ;;  %v5585_v8 = vpop.f32.mrb[123].mxu0 }
 0x2cc   : > { %4365 = vst [vmem:[%s7852_s12 + $0x10] sm:$0xff] %v4349_v56  ;;  %v4350_v21 = vadd.f32 %v7847_v48, %v4295_v9  ;;  %v4133_v26 = vadd.f32 %v5519_v45, %v7766_v41  ;;  %v5522_v37 = vadd.f32 %v5521_v46, %v5520_v51  ;;  %v5586_v28 = vadd.f32 %v5585_v8, %v5584_v29 }
 0x2ce   : > { %4366 = vst [vmem:[%s7852_s12 + $0x18] sm:$0xff] %v4350_v21  ;;  %v4230_v42 = vadd.f32 %v5583_v59, %v4133_v26  ;;  %v4136_v19 = vadd.f32 %v5522_v37, %v7769_v20 }
 0x2d0   : > { %v4296_v13 = vadd.f32 %v4230_v42, %v7772_v4  ;;  %v4233_v52 = vadd.f32 %v5586_v28, %v4136_v19  ;;  %v5523_v50 = vpop.f32.mrb[124].mxu1  ;;  %v5587_v3 = vpop.f32.mrb[124].mxu0 }
 0x2d1   : > { %v5524_v44 = vpop.f32.mrb[125].mxu1  ;;  %v5588_v23 = vpop.f32.mrb[125].mxu0 }
 0x2d2   : > { %v4351_v62 = vadd.f32 %v7847_v48, %v4296_v13  ;;  %v4297_v2 = vadd.f32 %v4233_v52, %v7776_v30  ;;  %v5525_v41 = vadd.f32 %v5524_v44, %v5523_v50  ;;  %v5589_v58 = vadd.f32 %v5588_v23, %v5587_v3  ;;  %v5526_v43 = vpop.f32.mrb[126].mxu1  ;;  %v5590_v11 = vpop.f32.mrb[126].mxu0 }
 0x2d3   : > { %v5527_v53 = vpop.f32.mrb[127].mxu1  ;;  %v5591_v49 = vpop.f32.mrb[127].mxu0 }
 0x2d4   : > { %4367 = vst [vmem:[%s7852_s12 + $0x20] sm:$0xff] %v4351_v62  ;;  %v4352_v20 = vadd.f32 %v7847_v48, %v4297_v2  ;;  %v4141_v4 = vadd.f32 %v5525_v41, %v7778_v7  ;;  %v5528_v6 = vadd.f32 %v5527_v53, %v5526_v43  ;;  %v5592_v34 = vadd.f32 %v5591_v49, %v5590_v11 }
 0x2d6   : > { %4368 = vst [vmem:[%s7852_s12 + $0x28] sm:$0xff] %v4352_v20  ;;  %v4238_v17 = vadd.f32 %v5589_v58, %v4141_v4  ;;  %v4144_v15 = vadd.f32 %v5528_v6, %v7781_v16 }
 0x2d8   : > { %v4298_v30 = vadd.f32 %v4238_v17, %v7784_v61  ;;  %v4241_v1 = vadd.f32 %v5592_v34, %v4144_v15  ;;  %v5529_v40 = vpop.f32.mrb[128].mxu1  ;;  %v5593_v54 = vpop.f32.mrb[128].mxu0 }
 0x2d9   : > { %v5530_v33 = vpop.f32.mrb[129].mxu1  ;;  %v5594_v18 = vpop.f32.mrb[129].mxu0 }
 0x2da   : > { %v4353_v24 = vadd.f32 %v7847_v48, %v4298_v30  ;;  %v4299_v57 = vadd.f32 %v4241_v1, %v7788_v5  ;;  %v5531_v7 = vadd.f32 %v5530_v33, %v5529_v40  ;;  %v5595_v10 = vadd.f32 %v5594_v18, %v5593_v54  ;;  %v5532_v56 = vpop.f32.mrb[130].mxu1  ;;  %v5596_v9 = vpop.f32.mrb[130].mxu0 }
 0x2db   : > { %v5533_v45 = vpop.f32.mrb[131].mxu1  ;;  %v5597_v59 = vpop.f32.mrb[131].mxu0 }
 0x2dc   : > { %4369 = vst [vmem:[%s7852_s12 + $0x30] sm:$0xff] %v4353_v24  ;;  %v4354_v16 = vadd.f32 %v7847_v48, %v4299_v57  ;;  %v4149_v61 = vadd.f32 %v5531_v7, %v7790_v27  ;;  %v5534_v51 = vadd.f32 %v5533_v45, %v5532_v56  ;;  %v5598_v29 = vadd.f32 %v5597_v59, %v5596_v9 }
 0x2de   : > { %4370 = vst [vmem:[%s7852_s12 + $0x38] sm:$0xff] %v4354_v16  ;;  %v4246_v46 = vadd.f32 %v5595_v10, %v4149_v61  ;;  %v4152_v8 = vadd.f32 %v5534_v51, %v7793_v35 }
 0x2e0   : > { %v4300_v5 = vadd.f32 %v4246_v46, %v7796_v36  ;;  %v4249_v21 = vadd.f32 %v5598_v29, %v4152_v8  ;;  %v5535_v26 = vpop.f32.mrb[132].mxu1  ;;  %v5599_v37 = vpop.f32.mrb[132].mxu0 }
 0x2e1   : > { %v5536_v28 = vpop.f32.mrb[133].mxu1  ;;  %v5600_v42 = vpop.f32.mrb[133].mxu0 }
 0x2e2   : > { %v4355_v19 = vadd.f32 %v7847_v48, %v4300_v5  ;;  %v4301_v13 = vadd.f32 %v4249_v21, %v7800_v31  ;;  %v5537_v27 = vadd.f32 %v5536_v28, %v5535_v26  ;;  %v5601_v52 = vadd.f32 %v5600_v42, %v5599_v37  ;;  %v5538_v50 = vpop.f32.mrb[134].mxu1  ;;  %v5602_v3 = vpop.f32.mrb[134].mxu0 }
 0x2e3   : > { %v5539_v44 = vpop.f32.mrb[135].mxu1  ;;  %v5603_v23 = vpop.f32.mrb[135].mxu0 }
 0x2e4   : > { %4371 = vst [vmem:[%s7852_s12 + $0x40] sm:$0xff] %v4355_v19  ;;  %v4356_v35 = vadd.f32 %v7847_v48, %v4301_v13  ;;  %v4157_v36 = vadd.f32 %v5537_v27, %v7802_v12  ;;  %v5540_v62 = vadd.f32 %v5539_v44, %v5538_v50  ;;  %v5604_v2 = vadd.f32 %v5603_v23, %v5602_v3  ;;  %v4455_v19 = vld [vmem:[%s7852_s12 + $0x28] sm:$0xff] (%p5960_p5)  ;;  %v4457_v13 = vld [vmem:[%s7852_s12 + $0x30] sm:$0xff] (%p5960_p5) }
 0x2e5   : > { %4456 = vst [vmem:[%s4387_s6 + $0x50] sm:$0xff] (%p5960_p5), %v4455_v19  ;;  %v4459_v27 = vld [vmem:[%s7852_s12 + $0x38] sm:$0xff] (%p5960_p5)  ;;  %4458 = vst [vmem:[%s4387_s6 + $0x60] sm:$0xff] (%p5960_p5), %v4457_v13 }
 0x2e6   : > { %4372 = vst [vmem:[%s7852_s12 + $0x48] sm:$0xff] %v4356_v35  ;;  %v4254_v41 = vadd.f32 %v5601_v52, %v4157_v36  ;;  %v4160_v58 = vadd.f32 %v5540_v62, %v7805_v60  ;;  %4460 = vst [vmem:[%s4387_s6 + $0x70] sm:$0xff] (%p5960_p5), %v4459_v27 }
 0x2e8   : > { %v4302_v31 = vadd.f32 %v4254_v41, %v7808_v63  ;;  %v4257_v43 = vadd.f32 %v5604_v2, %v4160_v58  ;;  %v5541_v11 = vpop.f32.mrb[136].mxu1  ;;  %v5605_v53 = vpop.f32.mrb[136].mxu0 }
 0x2e9   : > { %v5542_v49 = vpop.f32.mrb[137].mxu1  ;;  %v5606_v20 = vpop.f32.mrb[137].mxu0 }
 0x2ea   : > { %v4357_v4 = vadd.f32 %v7847_v48, %v4302_v31  ;;  %v4303_v6 = vadd.f32 %v4257_v43, %v7812_v0  ;;  %v5543_v12 = vadd.f32 %v5542_v49, %v5541_v11  ;;  %v5607_v34 = vadd.f32 %v5606_v20, %v5605_v53  ;;  %v5544_v17 = vpop.f32.mrb[138].mxu1  ;;  %v5608_v15 = vpop.f32.mrb[138].mxu0 }
 0x2eb   : > { %v5545_v30 = vpop.f32.mrb[139].mxu1  ;;  %v5609_v1 = vpop.f32.mrb[139].mxu0  ;;  %v4461_v52 = vld [vmem:[%s7852_s12 + $0x40] sm:$0xff] (%p5960_p5) }
 0x2ec   : > { %4373 = vst [vmem:[%s7852_s12 + $0x50] sm:$0xff] %v4357_v4  ;;  %v4358_v60 = vadd.f32 %v7847_v48, %v4303_v6  ;;  %v4165_v63 = vadd.f32 %v5543_v12, %v7814_v14  ;;  %v5546_v40 = vadd.f32 %v5545_v30, %v5544_v17  ;;  %v5610_v54 = vadd.f32 %v5609_v1, %v5608_v15 }
 0x2ed   : > { %4462 = vst [vmem:[%s4387_s6 + $0x80] sm:$0xff] (%p5960_p5), %v4461_v52  ;;  %v4463_v50 = vld [vmem:[%s7852_s12 + $0x48] sm:$0xff] (%p5960_p5) }
 0x2ee   : > { %4374 = vst [vmem:[%s7852_s12 + $0x58] sm:$0xff] %v4358_v60  ;;  %v4262_v33 = vadd.f32 %v5607_v34, %v4165_v63  ;;  %v4168_v18 = vadd.f32 %v5546_v40, %v7817_v25  ;;  %4464 = vst [vmem:[%s4387_s6 + $0x90] sm:$0xff] (%p5960_p5), %v4463_v50 }
 0x2f0   : > { %v4304_v0 = vadd.f32 %v4262_v33, %v7820_v55  ;;  %v4265_v24 = vadd.f32 %v5610_v54, %v4168_v18  ;;  %v5547_v57 = vpop.f32.mrb[140].mxu1  ;;  %v5611_v7 = vpop.f32.mrb[140].mxu0 }
 0x2f1   : > { %v5548_v10 = vpop.f32.mrb[141].mxu1  ;;  %v5612_v56 = vpop.f32.mrb[141].mxu0 }
 0x2f2   : > { %v4359_v9 = vadd.f32 %v7847_v48, %v4304_v0  ;;  %v4305_v45 = vadd.f32 %v4265_v24, %v7824_v32  ;;  %v5549_v14 = vadd.f32 %v5548_v10, %v5547_v57  ;;  %v5613_v59 = vadd.f32 %v5612_v56, %v5611_v7  ;;  %v5550_v16 = vpop.f32.mrb[142].mxu1  ;;  %v5614_v61 = vpop.f32.mrb[142].mxu0 }
 0x2f3   : > { %v5551_v51 = vpop.f32.mrb[143].mxu1  ;;  %v5615_v25 = vpop.f32.mrb[143].mxu0  ;;  %v4465_v3 = vld [vmem:[%s7852_s12 + $0x50] sm:$0xff] (%p5960_p5) }
 0x2f4   : > { %4375 = vst [vmem:[%s7852_s12 + $0x60] sm:$0xff] %v4359_v9  ;;  %v4360_v55 = vadd.f32 %v7847_v48, %v4305_v45  ;;  %v4173_v29 = vadd.f32 %v5549_v14, %v7826_v47  ;;  %v5552_v46 = vadd.f32 %v5551_v51, %v5550_v16  ;;  %v5616_v8 = vadd.f32 %v5615_v25, %v5614_v61  ;;  %v4445_v47 = vld [vmem:[%s7852_s12] sm:$0xff] (%p5960_p5) }
 0x2f5   : > { %4446 = vst [vmem:[%s4387_s6] sm:$0xff] (%p5960_p5), %v4445_v47  ;;  %v4467_v44 = vld [vmem:[%s7852_s12 + $0x58] sm:$0xff] (%p5960_p5)  ;;  %4466 = vst [vmem:[%s4387_s6 + $0xa0] sm:$0xff] (%p5960_p5), %v4465_v3 }
 0x2f6   : > { %4376 = vst [vmem:[%s7852_s12 + $0x68] sm:$0xff] %v4360_v55  ;;  %v4270_v5 = vadd.f32 %v5613_v59, %v4173_v29  ;;  %v4176_v21 = vadd.f32 %v5552_v46, %v7829_v22  ;;  %v4447_v22 = vld [vmem:[%s7852_s12 + $0x8] sm:$0xff] (%p5960_p5)  ;;  %4468 = vst [vmem:[%s4387_s6 + $0xb0] sm:$0xff] (%p5960_p5), %v4467_v44 }
 0x2f7   : > { %4448 = vst [vmem:[%s4387_s6 + $0x10] sm:$0xff] (%p5960_p5), %v4447_v22 }
 0x2f8   : > { %v4306_v32 = vadd.f32 %v4270_v5, %v7833_v38  ;;  %v4273_v26 = vadd.f32 %v5616_v8, %v4176_v21  ;;  %4385 = sbr.rel (!%p5960_p5) target bundleno = 775 (0x307), region = 77  ;;  %v4449_v38 = vld [vmem:[%s7852_s12 + $0x10] sm:$0xff] (%p5960_p5) }
 0x2f9   : > { %4450 = vst [vmem:[%s4387_s6 + $0x20] sm:$0xff] (%p5960_p5), %v4449_v38 }
 0x2fa   : > { %v4361_v37 = vadd.f32 %v7847_v48, %v4306_v32  ;;  %v4307_v28 = vadd.f32 %v4273_v26, %v7837_v39  ;;  %v4451_v39 = vld [vmem:[%s7852_s12 + $0x18] sm:$0xff] (%p5960_p5) }
 0x2fb   : > { %4452 = vst [vmem:[%s4387_s6 + $0x30] sm:$0xff] (%p5960_p5), %v4451_v39  ;;  %v4469_v23 = vld [vmem:[%s7852_s12 + $0x60] sm:$0xff] (%p5960_p5) }
 0x2fc   : > { %4377 = vst [vmem:[%s7852_s12 + $0x70] sm:$0xff] %v4361_v37  ;;  %v4362_v42 = vadd.f32 %v7847_v48, %v4307_v28  ;;  %v4453_v48 = vld [vmem:[%s7852_s12 + $0x20] sm:$0xff] (%p5960_p5)  ;;  %4470 = vst [vmem:[%s4387_s6 + $0xc0] sm:$0xff] (%p5960_p5), %v4469_v23 }
 0x2fd   : > { %4454 = vst [vmem:[%s4387_s6 + $0x40] sm:$0xff] (%p5960_p5), %v4453_v48  ;;  %v4471_v35 = vld [vmem:[%s7852_s12 + $0x68] sm:$0xff] (%p5960_p5) }
 0x2fe   : > { %4378 = vst [vmem:[%s7852_s12 + $0x78] sm:$0xff] %v4362_v42  ;;  %4472 = vst [vmem:[%s4387_s6 + $0xd0] sm:$0xff] (%p5960_p5), %v4471_v35 }
 0x303   : > { %v4473_v36 = vld [vmem:[%s7852_s12 + $0x70] sm:$0xff] }
 0x304   : > { %4474 = vst [vmem:[%s4387_s6 + $0xe0] sm:$0xff] %v4473_v36 }
 0x305   : > { %v4475_v62 = vld [vmem:[%s7852_s12 + $0x78] sm:$0xff] }
 0x306   : > { %4476 = vst [vmem:[%s4387_s6 + $0xf0] sm:$0xff] %v4475_v62 }
 0x307 PF: > { %p10_p11 = scmp.ge.s32.totalorder %s5948_s16, 4   ;;  %s8138_s12 = smov %s5903_s13 }
 0x308   : > { %s8139_s13 = smov %s5958_s19  ;;  %s8140_s14 = smov %s5948_s16 }
 0x309   :  { %12 = sbr.rel (!%p10_p11) target bundleno = 2 (0x2), region = 151 }

// kernel: _lambda_.3
= control target key start
LH: loop header
LB: loop body
LE: loop exit
PB: predicated region body
PF: predicated region fallthrough
CT: control target
= control target key end

     0   :  { %10 = vsyncpa [#allocation5], 0  ;;  %s9302_s0 = inlined_call_operand.vmem [shape: bf16[2,18,18,256], index: 0, kind: input, shape index: {}]   ;;  %s9303_s1 = inlined_call_operand.vmem [shape: bf16[3,768,128], index: 1, kind: input, shape index: {}]   ;;  %s9304_s2 = inlined_call_operand.vmem [shape: f32[1,128], index: 2, kind: input, shape index: {}]   ;;  %s9305_s3 = inlined_call_operand.vmem [shape: f32[128,256], index: 3, kind: input, shape index: {}]   ;;  %s9306_s4 = inlined_call_operand.vmem [shape: f32[256,64], index: 4, kind: input, shape index: {}]   ;;  %s9307_s5 = inlined_call_operand.hbm [shape: f32[512,128], index: 5, kind: output, shape index: {}]  }
   0x1   :  { %12 = vsyncpa [#allocation5 + $0x1], 0  ;;  %s6697_s18 = smov 0   ;;  %s6699_s19 = smov 0  }
   0x2   :  { %s6701_s20 = smov 0   ;;  %s6703_s21 = smov 0  }
   0x3 LB: > { %s6718_s22 = sadd.s32 4294967295, %s6662_s21   ;;  %s4666_s23 = sadd.s32 4294967294, %s6662_s21   ;;  %s6662_s21 = sphi %s6703_s21, %s9719_s21   ;;  %s6658_s20 = sphi %s6701_s20, %s9718_s20   ;;  %s6654_s19 = sphi %s6699_s19, %s9717_s19   ;;  %s6650_s18 = sphi %s6697_s18, %s9716_s18  }
   0x4   : > { %s6722_s24 = sadd.s32 1, %s6662_s21   ;;  %s93_s25 = sadd.s32 1, %s6658_s20 }
   0x5   : > { %s90_s26 = ssub.s32 %s6662_s21, %s6722_s24  ;;  %p100_p0 = scmp.ne.s32.totalorder %s6658_s20, %s6654_s19 }
   0x6   : > { %p91_p1 = scmp.eq.s32.totalorder %s90_s26, 0  ;;  %p101_p2 = scmp.eq.s32.totalorder %s6662_s21, 0 }
   0x7   : > { %p151_p3 = scmp.eq.s32.totalorder %s6718_s22, 1  ;;  %p156_p4 = scmp.ne.s32.totalorder %s6654_s19, %s6650_s18 }
   0x8   : > { %s6734_s27 = scalar_select %p91_p1, %s6658_s20, %s93_s25  }
   0x9   : > { %p102_p5 = por %p101_p2, %p100_p0  ;;  %p6736_p6 = por %p151_p3, %p100_p0 }
   0xa   : > { %p157_p7 = scmp.eq.s32.totalorder %s4666_s23, 1  ;;  %p4668_p9 = scmp.ge.s32.totalorder %s6662_s21, 2 }
   0xc   : > { %p6740_p8 = por %p157_p7, %p156_p4  ;;  %182 = sbr.rel (%p4668_p9) target bundleno = 27 (0x1b), region = 28 }
  0x13   : > { %193 = sbr.rel (!%p102_p5) target bundleno = 27 (0x1b), region = 36  ;;  %s195_s30 = sand.u32 (%p102_p5), 1, %s6658_s20  }
  0x14   : > { %s5124_s6 = sshll.u32 (%p102_p5), %s6662_s21, 7  ;;  %s4669_s7 = sshll.u32 (%p102_p5), %s195_s30, 6 }
  0x15   : > { %s201_s10 = scalar_lea.vmem (%p102_p5), %s9305_s3, %s5124_s6  ;;  %s197_s11 = scalar_lea.vmem (%p102_p5), [#allocation3], %s4669_s7 }
  0x16   : > { %v243_v0 = vld [vmem:[%s201_s10] sm:$0xff] (%p102_p5)  ;;  %v245_v1 = vld [vmem:[%s201_s10 + $0x10] sm:$0xff] (%p102_p5) }
  0x17   : > { %v247_v2 = vld [vmem:[%s201_s10 + $0x20] sm:$0xff] (%p102_p5)  ;;  %244 = vst [vmem:[%s197_s11] sm:$0xff] (%p102_p5), %v243_v0  ;;  %246 = vst [vmem:[%s197_s11 + $0x8] sm:$0xff] (%p102_p5), %v245_v1  ;;  %v249_v3 = vld [vmem:[%s201_s10 + $0x30] sm:$0xff] (%p102_p5) }
  0x18   : > { %248 = vst [vmem:[%s197_s11 + $0x10] sm:$0xff] (%p102_p5), %v247_v2  ;;  %v251_v4 = vld [vmem:[%s201_s10 + $0x40] sm:$0xff] (%p102_p5)  ;;  %v253_v5 = vld [vmem:[%s201_s10 + $0x50] sm:$0xff] (%p102_p5)  ;;  %250 = vst [vmem:[%s197_s11 + $0x18] sm:$0xff] (%p102_p5), %v249_v3 }
  0x19   : > { %252 = vst [vmem:[%s197_s11 + $0x20] sm:$0xff] (%p102_p5), %v251_v4  ;;  %254 = vst [vmem:[%s197_s11 + $0x28] sm:$0xff] (%p102_p5), %v253_v5  ;;  %v255_v6 = vld [vmem:[%s201_s10 + $0x60] sm:$0xff] (%p102_p5)  ;;  %v257_v7 = vld [vmem:[%s201_s10 + $0x70] sm:$0xff] (%p102_p5) }
  0x1a   : > { %256 = vst [vmem:[%s197_s11 + $0x30] sm:$0xff] %v255_v6  ;;  %258 = vst [vmem:[%s197_s11 + $0x38] sm:$0xff] %v257_v7 }
  0x1b PF: > { %p4673_p10 = scmp.ge.s32.totalorder %s6662_s21, 1  ;;  %p263_p11 = scmp.lt.s32.totalorder %s6662_s21, 3 }
  0x1d   : > { %p264_p12 = pnand %p4673_p10, %p263_p11 }
  0x1f   : > { %267 = sbr.rel (%p264_p12) target bundleno = 911 (0x38f), region = 74 }
  0x26   : > { %v6312_v8 = vld [vmem:[%s9303_s1 + $0x40] sm:$0xff]   ;;  %p302_p13 = scmp.lt.s32.totalorder %s6718_s22, 1  ;;  %v6314_v10 = vld [vmem:[%s9303_s1 + $0x48] sm:$0xff]   ;;  %v6316_v12 = vld [vmem:[%s9303_s1 + $0x50] sm:$0xff]   ;;  %vm634_vm0 = vsmask.f32 7424 }
  0x27   : > { %v6313_v9 = vld [vmem:[%s9303_s1] sm:$0xff]   ;;  %5126 = vmatprep.subr.bf16.mxu0 %v6312_v8  ;;  %6254 = vmatprep.subr.bf16.mxu1 %v6312_v8  ;;  %v6315_v11 = vld [vmem:[%s9303_s1 + $0x8] sm:$0xff]   ;;  %v6317_v13 = vld [vmem:[%s9303_s1 + $0x10] sm:$0xff]   ;;  %vm1103_vm1 = vcmask 1046528   ;;  %s8076_s8 = sand.u32 1, %s6654_s19   ;;  %vm4115_vm2 = vcmask 523264  }
  0x28   : > { %5127 = vmatpush3.bf16.msra.mxu0 %v6313_v9  ;;  %6262 = vmatpush3.bf16.msra.mxu1 %v6313_v9  ;;  %s303_s6 = scalar_select %p302_p13, %s6718_s22, 1  ;;  %v6318_v14 = vld [vmem:[%s9303_s1 + $0x58] sm:$0xff]   ;;  %v6320_v16 = vld [vmem:[%s9303_s1 + $0x60] sm:$0xff]   ;;  %v6322_v18 = vld [vmem:[%s9303_s1 + $0x68] sm:$0xff]  }
  0x29   : > { %5128 = vmatprep.subr.bf16.mxu0 %v6314_v10  ;;  %6255 = vmatprep.subr.bf16.mxu1 %v6314_v10  ;;  %v6319_v15 = vld [vmem:[%s9303_s1 + $0x18] sm:$0xff]   ;;  %v6321_v17 = vld [vmem:[%s9303_s1 + $0x20] sm:$0xff]   ;;  %v6323_v21 = vld [vmem:[%s9303_s1 + $0x28] sm:$0xff]   ;;  %s4675_s13 = sshll.u32 %s8076_s8, 8  ;;  %s5125_s17 = sshll.u32 %s6718_s22, 12 }
  0x2a   : > { %s6270_s11 = smul.u32 432, %s303_s6  ;;  %v6324_v22 = vld [vmem:[%s9303_s1 + $0x70] sm:$0xff]   ;;  %v6326_v24 = vld [vmem:[%s9303_s1 + $0x78] sm:$0xff]   ;;  %v6334_v26 = vld [vmem:[%s9303_s1 + $0xc0] sm:$0xff]   ;;  %s9132_s16 = scalar_lea.vmem [#allocation4], %s4675_s13 }
  0x2b   : > { %v6325_v23 = vld [vmem:[%s9303_s1 + $0x30] sm:$0xff]   ;;  %v6327_v25 = vld [vmem:[%s9303_s1 + $0x38] sm:$0xff]   ;;  %v6335_v29 = vld [vmem:[%s9303_s1 + $0x140] sm:$0xff]   ;;  %s4586_s26 = sshll.u32 %s9132_s16, 4  ;;  %s9254_s7 = scalar_lea.hbm %s9307_s5, %s5125_s17  ;;  %s9256_s26 = int_to_ptr.vmem [resolvable:$true] %s4586_s26 }
  0x2c   : > { %5129 = vmatpush3.bf16.msra.mxu0 %v6315_v11  ;;  %6263 = vmatpush3.bf16.msra.mxu1 %v6315_v11  ;;  %s6786_s23 = scalar_lea.vmem %s9302_s0, %s6270_s11  ;;  %v6336_v30 = vld [vmem:[%s9303_s1 + $0x80] sm:$0xff]   ;;  %v6338_v32 = vld [vmem:[%s9303_s1 + $0xc8] sm:$0xff]   ;;  %v6346_v40 = vld [vmem:[%s9303_s1 + $0xd0] sm:$0xff]   ;;  %s4674_s11 = sshll.u32 %s8076_s8, 6 }
  0x2d   : > { %5130 = vmatprep.subr.bf16.mxu0 %v6316_v12  ;;  %6256 = vmatprep.subr.bf16.mxu1 %v6316_v12  ;;  %v6795_v19 = vld [vmem:[%s6786_s23 + $0x4] ss:$8 sps:$4 sm:$0xff]   ;;  %v6821_v27 = vld [vmem:[%s6786_s23] ss:$8 sps:$4 sm:$0xff]   ;;  %v6347_v41 = vld [vmem:[%s9303_s1 + $0x90] sm:$0xff]   ;;  %s8106_s25 = scalar_lea.vmem [#allocation3], %s4674_s11 }
  0x2e   : > { %v6798_v20 = vld [vmem:[%s6786_s23 + $0x124] ss:$8 sps:$4 sm:$0xff]   ;;  %1664 = vmatprep.mubr.bf16.mxu0 %v6795_v19  ;;  %v6824_v28 = vld [vmem:[%s6786_s23 + $0x120] ss:$8 sps:$4 sm:$0xff]   ;;  %v6348_v42 = vld [vmem:[%s9303_s1 + $0xd8] sm:$0xff]   ;;  %v650_v51 = vshll.u32 %v6795_v19, 16 }
  0x2f   : > { %1760 = vmatprep.mubr.bf16.mxu1 %v6798_v20  ;;  %v6337_v31 = vld [vmem:[%s9303_s1 + $0x100] sm:$0xff]   ;;  %v6349_v35 = vld [vmem:[%s9303_s1 + $0x148] sm:$0xff]   ;;  %v6868_v43 = vld [vmem:[%s6786_s23 + $0x34] ss:$8 sps:$4 sm:$0xff]   ;;  %v648_v57 = vshrl.u32 %v6795_v19, 16  ;;  %v638_v59 = vshll.u32 %v6821_v27, 16 }
  0x30   : > { %5131 = vmatpush3.bf16.msra.mxu0 %v6317_v13  ;;  %6264 = vmatpush3.bf16.msra.mxu1 %v6317_v13  ;;  %v6839_v33 = vld [vmem:[%s6786_s23 + $0x1c] ss:$8 sps:$4 sm:$0xff]   ;;  %v6339_v36 = vld [vmem:[%s9303_s1 + $0x88] sm:$0xff]   ;;  %v6855_v38 = vld [vmem:[%s6786_s23 + $0x18] ss:$8 sps:$4 sm:$0xff]   ;;  %v652_v58 = vrot.slane %v650_v51, 1 }
  0x31   : > { %5132 = vmatprep.subr.bf16.mxu0 %v6318_v14  ;;  %6257 = vmatprep.subr.bf16.mxu1 %v6318_v14  ;;  %v6342_v34 = vld [vmem:[%s6786_s23 + $0x13c] ss:$8 sps:$4 sm:$0xff]   ;;  %v6351_v37 = vld [vmem:[%s9303_s1 + $0x108] sm:$0xff]   ;;  %v6345_v39 = vld [vmem:[%s6786_s23 + $0x138] ss:$8 sps:$4 sm:$0xff]   ;;  %v674_v5 = vshll.u32 %v6839_v33, 16 }
  0x32   : > { %v6354_v44 = vld [vmem:[%s6786_s23 + $0x154] ss:$8 sps:$4 sm:$0xff]   ;;  %v6358_v46 = vld [vmem:[%s9303_s1 + $0xe0] sm:$0xff]   ;;  %v6880_v47 = vld [vmem:[%s6786_s23 + $0x30] ss:$8 sps:$4 sm:$0xff]   ;;  %v653_v6 = vor.u32 %v652_v58, %v648_v57  ;;  %v636_v7 = vshrl.u32 %v6821_v27, 16 }
  0x33   : > { %v6350_v45 = vld [vmem:[%s9303_s1 + $0x98] sm:$0xff]   ;;  %v6369_v49 = vld [vmem:[%s9303_s1 + $0x150] sm:$0xff]   ;;  %v6359_v50 = vld [vmem:[%s9303_s1 + $0xa0] sm:$0xff]   ;;  %v640_v8 = vrot.slane %v638_v59, 1  ;;  %v662_v12 = vshll.u32 %v6855_v38, 16  ;;  %s4573_s9 = scalar_lea.sflag [#allocation5], %s8076_s8 }
  0x34   : > { %5133 = vmatpush3.bf16.msra.mxu0 %v6319_v15  ;;  %6265 = vmatpush3.bf16.msra.mxu1 %v6319_v15  ;;  %v6357_v48 = vld [vmem:[%s6786_s23 + $0x150] ss:$8 sps:$4 sm:$0xff]   ;;  %v6360_v52 = vld [vmem:[%s9303_s1 + $0xe8] sm:$0xff]   ;;  %s6600_s10 = scalar_lea.vmem %s9256_s26, 4096  ;;  %s6664_s22 = smov [#allocation4]  }
  0x35   : > { %5134 = vmatprep.subr.bf16.mxu0 %v6320_v16  ;;  %6258 = vmatprep.subr.bf16.mxu1 %v6320_v16  ;;  %v6371_v53 = vld [vmem:[%s9303_s1 + $0x110] sm:$0xff]   ;;  %v6361_v60 = vld [vmem:[%s9303_s1 + $0xa8] sm:$0xff]   ;;  %v6379_v63 = vld [vmem:[%s9303_s1 + $0x158] sm:$0xff]   ;;  %p6601_p0 = scmp.ne.s32.totalorder %s9256_s26, %s6600_s10 }
  0x36   : > { %v6897_v54 = vld [vmem:[%s6786_s23 + $0x4c] ss:$8 sps:$4 sm:$0xff]   ;;  %v6916_v0 = vld [vmem:[%s6786_s23 + $0x48] ss:$8 sps:$4 sm:$0xff]   ;;  %v6380_v4 = vld [vmem:[%s9303_s1 + $0x118] sm:$0xff]  }
  0x37   : > { %v6364_v55 = vld [vmem:[%s6786_s23 + $0x16c] ss:$8 sps:$4 sm:$0xff]   ;;  %v6367_v1 = vld [vmem:[%s6786_s23 + $0x168] ss:$8 sps:$4 sm:$0xff]   ;;  %v6372_v16 = vld [vmem:[%s9303_s1 + $0xf8] sm:$0xff]   ;;  %p6602_p1 = pnand %p6601_p0, %p6736_p6 }
  0x38   : > { %5135 = vmatpush3.bf16.msra.mxu0 %v6321_v17  ;;  %6266 = vmatpush3.bf16.msra.mxu1 %v6321_v17  ;;  %v312_v56 = vld [vmem:[%s6786_s23 + $0x10] sm:$0x11]  ;;  %v6929_v9 = vld [vmem:[%s6786_s23 + $0x64] ss:$8 sps:$4 sm:$0xff]   ;;  %v672_v17 = vshrl.u32 %v6839_v33, 16 }
  0x39   : > { %5136 = vmatprep.subr.bf16.mxu0 %v6322_v18  ;;  %6259 = vmatprep.subr.bf16.mxu1 %v6322_v18  ;;  %v6907_v61 = vcombine.high %v312_v56, %v312_v56  ;;  %v6910_v62 = vcombine.low %v312_v56, %v312_v56  ;;  %v6368_v2 = vld [vmem:[%s9303_s1 + $0xf0] sm:$0xff]   ;;  %v315_v11 = vld [vmem:[%s6786_s23 + $0x28] sm:$0x11]  ;;  %v676_v18 = vrot.slane %v674_v5, 1  ;;  %v686_v56 = vshll.u32 %v6880_v47, 16  ;;  %p6603_p2 = pneg %p6602_p1 }
  0x3a   : > { %v6370_v13 = vld [vmem:[%s9303_s1 + $0xb0] sm:$0xff]   ;;  %v6937_v15 = vcombine.high %v315_v11, %v315_v11  ;;  %v6395_v51 = vld [vmem:[%s9303_s1 + $0x1c8] sm:$0xff]   ;;  %v684_v5 = vshrl.u32 %v6880_v47, 16 }
  0x3b   : > { %v655_v3 = vshll.u32 %v6907_v61, 16  ;;  %v643_v14 = vshll.u32 %v6910_v62, 16  ;;  %v6403_v57 = vld [vmem:[%s9303_s1 + $0x128] sm:$0xff]  }
  0x3c   : > { %5137 = vmatpush3.bf16.msra.mxu0 %v6323_v21  ;;  %6267 = vmatpush3.bf16.msra.mxu1 %v6323_v21 }
  0x3d   : > { %5138 = vmatprep.subr.bf16.mxu0 %v6324_v22  ;;  %6260 = vmatprep.subr.bf16.mxu1 %v6324_v22  ;;  %v657_v10 = vrot.slane %v655_v3, 1  ;;  %v679_v22 = vshll.u32 %v6937_v15, 16 }
  0x3f   : > { %v658_v21 = vsel %vm634_vm0, %v653_v6, %v657_v10  ;;  %v6409_v6 = vld [vmem:[%s9303_s1 + $0x1d0] sm:$0xff]   ;;  %v688_v10 = vrot.slane %v686_v56, 1  ;;  %v6425_v56 = vld [vmem:[%s9303_s1 + $0x1d8] sm:$0xff]  }
  0x40   : > { %5139 = vmatpush3.bf16.msra.mxu0 %v6325_v23  ;;  %6268 = vmatpush3.bf16.msra.mxu1 %v6325_v23  ;;  %v660_v23 = vshrl.u32 %v6855_v38, 16 }
  0x41   : > { %5140 = vmatprep.subr.bf16.mxu0 %v6326_v24  ;;  %6261 = vmatprep.subr.bf16.mxu1 %v6326_v24  ;;  %v318_v24 = vld [vmem:[%s6786_s23 + $0x40] sm:$0x11] }
  0x44   : > { %5141 = vmatpush3.bf16.msra.mxu0 %v6327_v25  ;;  %6269 = vmatpush3.bf16.msra.mxu1 %v6327_v25  ;;  %v6373_v25 = vld [vmem:[%s9303_s1 + $0xb8] sm:$0xff]  }
  0x45   : > { %5238 = vmatprep.subr.bf16.mxu1 %v6334_v26  ;;  %5350 = vmatprep.subr.bf16.mxu0 %v6335_v29  ;;  %v6951_v26 = vcombine.low %v315_v11, %v315_v11  ;;  %v698_v29 = vshll.u32 %v6868_v43, 16  ;;  %v720_v11 = vshrl.u32 %v6897_v54, 16 }
  0x47   : > { %1665 = vmatmul.mubr.bf16.vlgmr.msra.gmra.mrb[0].mxu0 %v6821_v27  ;;  %1761 = vmatmul.mubr.bf16.vlgmr.msra.gmra.mrb[0].mxu1 %v6824_v28 }
  0x48   : > { %5239 = vmatpush3.bf16.msra.mxu1 %v6336_v30  ;;  %5351 = vmatpush3.bf16.msra.mxu0 %v6337_v31  ;;  %v641_v30 = vor.u32 %v640_v8, %v636_v7  ;;  %v645_v31 = vrot.slane %v643_v14, 1  ;;  %v7009_v7 = vld [vmem:[%s6786_s23 + $0x78] ss:$8 sps:$4 sm:$0xff]   ;;  %v7012_v8 = vld [vmem:[%s6786_s23 + $0x94] ss:$8 sps:$4 sm:$0xff]  }
  0x49   : > { %5240 = vmatprep.subr.bf16.mxu1 %v6338_v32  ;;  %1672 = vmatprep.mubr.bf16.mxu0 %v6839_v33  ;;  %v664_v32 = vrot.slane %v662_v12, 1 }
  0x4a   : > { %1768 = vmatprep.mubr.bf16.mxu1 %v6342_v34  ;;  %5352 = vmatprep.subr.bf16.mxu0 %v6349_v35  ;;  %v6955_v34 = vcombine.high %v318_v24, %v318_v24  ;;  %v6393_v35 = vld [vmem:[%s9303_s1 + $0x160] sm:$0xff]  }
  0x4b   : > { %v665_v58 = vor.u32 %v664_v32, %v660_v23  ;;  %v6417_v23 = vld [vmem:[%s9303_s1 + $0x130] sm:$0xff]  }
  0x4c   : > { %5241 = vmatpush3.bf16.msra.mxu1 %v6339_v36  ;;  %5353 = vmatpush3.bf16.msra.mxu0 %v6351_v37  ;;  %v6394_v36 = vld [vmem:[%s9303_s1 + $0x120] sm:$0xff]  }
  0x4d   : > { %5242 = vmatprep.subr.bf16.mxu1 %v6346_v40  ;;  %5354 = vmatprep.subr.bf16.mxu0 %v6369_v49  ;;  %v6381_v37 = vld [vmem:[%s9303_s1 + $0x1c0] sm:$0xff]   ;;  %v681_v40 = vrot.slane %v679_v22, 1  ;;  %v646_v49 = vsel %vm634_vm0, %v641_v30, %v645_v31  ;;  %v6416_v22 = vld [vmem:[%s9303_s1 + $0x170] sm:$0xff]   ;;  %v710_v30 = vshll.u32 %v6916_v0, 16 }
  0x4e   : > { %v7041_v31 = vld [vmem:[%s6786_s23 + $0x90] ss:$8 sps:$4 sm:$0xff]  }
  0x4f   : > { %1673 = vmatmul.mubr.bf16.gmra.mrb[4].mxu0 %v6855_v38  ;;  %1769 = vmatmul.mubr.bf16.gmra.mrb[4].mxu1 %v6345_v39  ;;  %v677_v39 = vor.u32 %v676_v18, %v672_v17  ;;  %v324_v18 = vld [vmem:[%s6786_s23 + $0x70] sm:$0x11] }
  0x50   : > { %5243 = vmatpush3.bf16.msra.mxu1 %v6347_v41  ;;  %1680 = vmatprep.mubr.bf16.mxu0 %v6868_v43  ;;  %v6967_v41 = vld [vmem:[%s6786_s23 + $0x60] ss:$8 sps:$4 sm:$0xff]  }
  0x51   : > { %5244 = vmatprep.subr.bf16.mxu1 %v6348_v42  ;;  %1776 = vmatprep.mubr.bf16.mxu1 %v6354_v44  ;;  %v696_v42 = vshrl.u32 %v6868_v43, 16  ;;  %v6971_v44 = vld [vmem:[%s6786_s23 + $0x7c] ss:$8 sps:$4 sm:$0xff]  }
  0x52   : > { %5355 = vmatpush3.bf16.msra.mxu0 %v6371_v53  ;;  %v321_v53 = vld [vmem:[%s6786_s23 + $0x58] sm:$0x11] }
  0x53   : > { %5356 = vmatprep.subr.bf16.mxu0 %v6379_v63  ;;  %v722_v63 = vshll.u32 %v6897_v54, 16  ;;  %v6999_v3 = vcombine.high %v321_v53, %v321_v53 }
  0x54   : > { %5245 = vmatpush3.bf16.msra.mxu1 %v6350_v45  ;;  %v6385_v45 = vld [vmem:[%s9303_s1 + $0x180] sm:$0xff]  }
  0x55   : > { %5246 = vmatprep.subr.bf16.mxu1 %v6358_v46  ;;  %v667_v46 = vshll.u32 %v6951_v26, 16  ;;  %v724_v14 = vrot.slane %v722_v63, 1  ;;  %v727_v17 = vshll.u32 %v6999_v3, 16 }
  0x56   : > { %5357 = vmatpush3.bf16.msra.mxu0 %v6380_v4  ;;  %v6399_v4 = vld [vmem:[%s9303_s1 + $0x188] sm:$0xff]  }
  0x57   : > { %1681 = vmatmul.mubr.bf16.gmra.mrb[8].mxu0 %v6880_v47  ;;  %1777 = vmatmul.mubr.bf16.gmra.mrb[8].mxu1 %v6357_v48  ;;  %v700_v48 = vrot.slane %v698_v29, 1  ;;  %v669_v59 = vrot.slane %v667_v46, 1  ;;  %v7037_v29 = vcombine.low %v321_v53, %v321_v53  ;;  %v725_v32 = vor.u32 %v724_v14, %v720_v11 }
  0x58   : > { %5247 = vmatpush3.bf16.msra.mxu1 %v6359_v50  ;;  %1688 = vmatprep.mubr.bf16.mxu0 %v6897_v54  ;;  %v703_v50 = vshll.u32 %v6955_v34, 16  ;;  %v770_v11 = vshll.u32 %v6971_v44, 16  ;;  %v1108_v14 = vrot.slane %v6907_v61, 1 }
  0x59   : > { %5248 = vmatprep.subr.bf16.mxu1 %v6360_v52  ;;  %1784 = vmatprep.mubr.bf16.mxu1 %v6364_v55  ;;  %v6983_v52 = vsel %vm634_vm0, %v677_v39, %v681_v40  ;;  %v6402_v55 = vld [vmem:[%s9303_s1 + $0x168] sm:$0xff]   ;;  %v7016_v12 = vsel %vm634_vm0, %v665_v58, %v669_v59  ;;  %v6423_v40 = vld [vmem:[%s9303_s1 + $0x178] sm:$0xff]   ;;  %v734_v58 = vshll.u32 %v6967_v41, 16 }
  0x5a   : > { %5358 = vmatprep.subr.bf16.mxu0 %v6393_v35  ;;  %9406 = vst [vmem:[#allocation7_spill] sm:$0xff] %v6983_v52  ;;  %9407 = vst [vmem:[#allocation8_spill] sm:$0xff] %v7016_v12  ;;  %v729_v35 = vrot.slane %v727_v17, 1  ;;  %v7047_v39 = vld [vmem:[%s6786_s23 + $0xac] ss:$8 sps:$4 sm:$0xff]   ;;  %v6429_v59 = vld [vmem:[%s9303_s1 + $0x198] sm:$0xff]  }
  0x5b   : > { %5359 = vmatpush3.bf16.msra.mxu0 %v6394_v36  ;;  %v7043_v36 = vcombine.high %v324_v18, %v324_v18  ;;  %v1104_v17 = vrot.slane %v6821_v27, 1  ;;  %v6436_v27 = vld [vmem:[%s9303_s1 + $0x1e0] sm:$0xff]  }
  0x5c   : > { %5249 = vmatpush3.bf16.msra.mxu1 %v6361_v60  ;;  %v6996_v60 = vcombine.low %v318_v24, %v318_v24  ;;  %5360 = vmatprep.subr.bf16.mxu0 %v6402_v55  ;;  %v689_v24 = vor.u32 %v688_v10, %v684_v5 }
  0x5d   : > { %5250 = vmatprep.subr.bf16.mxu1 %v6368_v2  ;;  %v705_v2 = vrot.slane %v703_v50, 1  ;;  %v7061_v50 = vsel %vm634_vm0, %v725_v32, %v729_v35  ;;  %v751_v55 = vshll.u32 %v7043_v36, 16  ;;  %v772_v32 = vrot.slane %v770_v11, 1 }
  0x5e   : > { %9410 = vst [vmem:[#allocation11_spill] sm:$0xff] %v7061_v50  ;;  %v792_v11 = vshrl.u32 %v7012_v8, 16 }
  0x5f   : > { %1689 = vmatmul.mubr.bf16.gmra.mrb[12].mxu0 %v6916_v0  ;;  %1785 = vmatmul.mubr.bf16.gmra.mrb[12].mxu1 %v6367_v1  ;;  %v701_v1 = vor.u32 %v700_v48, %v696_v42  ;;  %v708_v42 = vshrl.u32 %v6916_v0, 16  ;;  %v712_v48 = vrot.slane %v710_v30, 1 }
  0x60   : > { %5251 = vmatpush3.bf16.msra.mxu1 %v6370_v13  ;;  %1696 = vmatprep.mubr.bf16.mxu0 %v6929_v9  ;;  %v691_v13 = vshll.u32 %v6996_v60, 16 }
  0x61   : > { %5252 = vmatprep.subr.bf16.mxu1 %v6372_v16  ;;  %1825 = vmatprep.mubr.bf16.mxu1 %v658_v21  ;;  %v7020_v16 = vsel %vm634_vm0, %v701_v1, %v705_v2  ;;  %v6413_v21 = vld [vmem:[%s9303_s1 + $0x190] sm:$0xff]   ;;  %v713_v63 = vor.u32 %v712_v48, %v708_v42  ;;  %v7077_v2 = vcombine.low %v324_v18, %v324_v18  ;;  %v6434_v18 = vld [vmem:[%s9303_s1 + $0x240] sm:$0xff]   ;;  %v758_v48 = vshll.u32 %v7009_v7, 16 }
  0x62   : > { %5361 = vmatpush3.bf16.msra.mxu0 %v6403_v57  ;;  %9408 = vst [vmem:[#allocation9_spill] sm:$0xff] %v7020_v16  ;;  %v327_v57 = vld [vmem:[%s6786_s23 + $0x88] sm:$0x11]  ;;  %v330_v42 = vld [vmem:[%s6786_s23 + $0xa0] sm:$0x11] }
  0x63   : > { %5362 = vmatprep.subr.bf16.mxu0 %v6416_v22  ;;  %v7080_v10 = vcombine.high %v327_v57, %v327_v57  ;;  %v768_v22 = vshrl.u32 %v6971_v44, 16 }
  0x64   : > { %5253 = vmatpush3.bf16.msra.mxu1 %v6373_v25  ;;  %v693_v25 = vrot.slane %v691_v13, 1  ;;  %v732_v13 = vshrl.u32 %v6967_v41, 16 }
  0x65   : > { %5462 = vmatprep.subr.bf16.mxu1 %v6381_v37  ;;  %v746_v37 = vshll.u32 %v6929_v9, 16  ;;  %v775_v35 = vshll.u32 %v7080_v10, 16 }
  0x66   : > { %5363 = vmatpush3.bf16.msra.mxu0 %v6417_v23  ;;  %v7057_v46 = vsel %vm634_vm0, %v689_v24, %v693_v25  ;;  %v7097_v24 = vld [vmem:[%s6786_s23 + $0xc4] ss:$8 sps:$4 sm:$0xff]   ;;  %v739_v25 = vshll.u32 %v7077_v2, 16 }
  0x67   : > { %1697 = vmatmul.mubr.bf16.gmra.mrb[16].mxu0 %v6967_v41  ;;  %1826 = vmatmul.mubr.bf16.vlgmr.msra.gmra.mrb[16].mxu1 %v646_v49  ;;  %9409 = vst [vmem:[#allocation10_spill] sm:$0xff] %v7057_v46  ;;  %v715_v49 = vshll.u32 %v7037_v29, 16  ;;  %v748_v53 = vrot.slane %v746_v37, 1  ;;  %v1105_v37 = vrot.slane %v6910_v62, 1 }
  0x68   : > { %1704 = vmatprep.mubr.bf16.mxu0 %v6971_v44  ;;  %1833 = vmatprep.mubr.bf16.mxu1 %v6983_v52 }
  0x69   : > { %5463 = vmatpush3.bf16.msra.mxu1 %v6385_v45  ;;  %v6424_v45 = vld [vmem:[%s9303_s1 + $0x138] sm:$0xff]   ;;  %5364 = vmatprep.subr.bf16.mxu0 %v6423_v40  ;;  %v717_v1 = vrot.slane %v715_v49, 1  ;;  %v6438_v40 = vld [vmem:[%s9303_s1 + $0x1a0] sm:$0xff]   ;;  %v7121_v49 = vsel %vm1103_vm1, %v1104_v17, %v1105_v37  ;;  %v938_v37 = vshll.u32 %v6798_v20, 16 }
  0x6a   : > { %5464 = vmatprep.subr.bf16.mxu1 %v6395_v51  ;;  %v744_v51 = vshrl.u32 %v6929_v9, 16  ;;  %5365 = vmatpush3.bf16.msra.mxu0 %v6424_v45  ;;  %v7117_v45 = vcombine.low %v327_v57, %v327_v57  ;;  %v794_v57 = vshll.u32 %v7012_v8, 16 }
  0x6b   : > { %v7094_v23 = vsel %vm634_vm0, %v713_v63, %v717_v1  ;;  %5574 = vmatprep.subr.bf16.mxu0 %v6434_v18  ;;  %v6444_v63 = vld [vmem:[%s9303_s1 + $0x1e8] sm:$0xff]   ;;  %v760_v1 = vrot.slane %v758_v48, 1  ;;  %v782_v48 = vshll.u32 %v7041_v31, 16 }
  0x6c   : > { %v749_v5 = vor.u32 %v748_v53, %v744_v51  ;;  %9411 = vst [vmem:[#allocation12_spill] sm:$0xff] %v7094_v23  ;;  %v741_v51 = vrot.slane %v739_v25, 1  ;;  %v773_v53 = vor.u32 %v772_v32, %v768_v22  ;;  %v796_v17 = vrot.slane %v794_v57, 1 }
  0x6d   : > { %5465 = vmatpush3.bf16.msra.mxu1 %v6399_v4  ;;  %v1107_v4 = vrot.slane %v6795_v19, 1  ;;  %v7090_v19 = vld [vmem:[%s6786_s23 + $0xa8] ss:$8 sps:$4 sm:$0xff]  }
  0x6e   : > { %5466 = vmatprep.subr.bf16.mxu1 %v6409_v6  ;;  %v753_v6 = vrot.slane %v751_v55, 1  ;;  %v777_v55 = vrot.slane %v775_v35, 1 }
  0x6f   : > { %1705 = vmatmul.mubr.bf16.gmra.mrb[20].mxu0 %v7009_v7  ;;  %1834 = vmatmul.mubr.bf16.gmra.mrb[20].mxu1 %v7016_v12  ;;  %v7101_v61 = vsel %vm1103_vm1, %v1107_v4, %v1108_v14  ;;  %v763_v4 = vshll.u32 %v7117_v45, 16 }
  0x70   : > { %1712 = vmatprep.mubr.bf16.mxu0 %v7012_v8  ;;  %1841 = vmatprep.mubr.bf16.mxu1 %v7020_v16  ;;  %v7107_v30 = vsel %vm634_vm0, %v749_v5, %v753_v6  ;;  %v7140_v6 = vld [vmem:[%s6786_s23 + $0xdc] ss:$8 sps:$4 sm:$0xff]   ;;  %v7147_v14 = vsel %vm634_vm0, %v773_v53, %v777_v55  ;;  %v797_v53 = vor.u32 %v796_v17, %v792_v11 }
  0x71   : > { %5467 = vmatpush3.bf16.msra.mxu1 %v6413_v21  ;;  %v736_v21 = vrot.slane %v734_v58, 1  ;;  %9412 = vst [vmem:[#allocation13_spill] sm:$0xff] %v7107_v30  ;;  %v7129_v58 = vld [vmem:[%s6786_s23 + $0xc0] ss:$8 sps:$4 sm:$0xff]   ;;  %9415 = vst [vmem:[#allocation16_spill] sm:$0xff] %v7140_v6  ;;  %v765_v35 = vrot.slane %v763_v4, 1 }
  0x72   : > { %5468 = vmatprep.subr.bf16.mxu1 %v6425_v56  ;;  %v7125_v56 = vcombine.high %v330_v42, %v330_v42  ;;  %9413 = vst [vmem:[#allocation14_spill] sm:$0xff] %v7129_v58  ;;  %9416 = vst [vmem:[#allocation17_spill] sm:$0xff] %v7147_v14  ;;  %v7182_v17 = vld [vmem:[%s6786_s23 + $0xf4] ss:$8 sps:$4 sm:$0xff]   ;;  %v342_v16 = vld [vmem:[%s6786_s23 + $0x100] sm:$0x11] }
  0x73   : > { %v737_v62 = vor.u32 %v736_v21, %v732_v13  ;;  %v6446_v13 = vld [vmem:[%s9303_s1 + $0x1a8] sm:$0xff]   ;;  %v333_v21 = vld [vmem:[%s6786_s23 + $0xb8] sm:$0x11]  ;;  %9420 = vst [vmem:[#allocation21_spill] sm:$0xff] %v7182_v17 }
  0x74   : > { %v799_v18 = vshll.u32 %v7125_v56, 16  ;;  %v7166_v57 = vcombine.high %v333_v21, %v333_v21 }
  0x75   : > { %5469 = vmatpush3.bf16.msra.mxu1 %v6429_v59  ;;  %v756_v59 = vshrl.u32 %v7009_v7, 16  ;;  %v7137_v5 = vsel %vm634_vm0, %v737_v62, %v741_v51  ;;  %v818_v62 = vshll.u32 %v7047_v39, 16  ;;  %v7164_v51 = vld [vmem:[%s6786_s23 + $0xd8] ss:$8 sps:$4 sm:$0xff]  }
  0x76   : > { %5470 = vmatprep.subr.bf16.mxu1 %v6436_v27  ;;  %9414 = vst [vmem:[#allocation15_spill] sm:$0xff] %v7137_v5  ;;  %9417 = vst [vmem:[#allocation18_spill] sm:$0xff] %v7164_v51  ;;  %v801_v55 = vrot.slane %v799_v18, 1  ;;  %v780_v18 = vshrl.u32 %v7041_v31, 16  ;;  %v784_v27 = vrot.slane %v782_v48, 1 }
  0x77   : > { %1713 = vmatmul.mubr.bf16.gmra.mrb[24].mxu0 %v7041_v31  ;;  %1842 = vmatmul.mubr.bf16.gmra.mrb[24].mxu1 %v7057_v46  ;;  %v761_v32 = vor.u32 %v760_v1, %v756_v59  ;;  %9418 = vst [vmem:[#allocation19_spill] sm:$0xff] %v7166_v57  ;;  %v336_v59 = vld [vmem:[%s6786_s23 + $0xd0] sm:$0x11]  ;;  %v816_v1 = vshrl.u32 %v7047_v39, 16  ;;  %v820_v25 = vrot.slane %v818_v62, 1  ;;  %v804_v62 = vshrl.u32 %v7090_v19, 16 }
  0x78   : > { %1720 = vmatprep.mubr.bf16.mxu0 %v7047_v39  ;;  %1849 = vmatprep.mubr.bf16.mxu1 %v7061_v50  ;;  %v7190_v22 = vsel %vm634_vm0, %v797_v53, %v801_v55  ;;  %v806_v53 = vshll.u32 %v7090_v19, 16  ;;  %v339_v55 = vld [vmem:[%s6786_s23 + $0xe8] sm:$0x11]  ;;  %v7210_v48 = vld [vmem:[%s6786_s23 + $0xf0] ss:$8 sps:$4 sm:$0xff]  }
  0x79   : > { %5471 = vmatpush3.bf16.msra.mxu1 %v6438_v40  ;;  %v7159_v40 = vcombine.low %v330_v42, %v330_v42  ;;  %v6452_v42 = vld [vmem:[%s9303_s1 + $0x1f0] sm:$0xff]   ;;  %v7179_v11 = vsel %vm634_vm0, %v761_v32, %v765_v35  ;;  %9421 = vst [vmem:[#allocation22_spill] sm:$0xff] %v7190_v22  ;;  %v823_v32 = vshll.u32 %v7166_v57, 16  ;;  %v7193_v35 = vcombine.low %v333_v21, %v333_v21 }
  0x7a   : > { %5472 = vmatprep.subr.bf16.mxu1 %v6444_v63  ;;  %9419 = vst [vmem:[#allocation20_spill] sm:$0xff] %v7179_v11  ;;  %v7185_v63 = vrot.slane %v938_v37, 1  ;;  %v785_v21 = vor.u32 %v784_v27, %v780_v18  ;;  %v7207_v37 = vcombine.low %v336_v59, %v336_v59  ;;  %v840_v27 = vshrl.u32 %v7097_v24, 16 }
  0x7b   : > { %v787_v4 = vshll.u32 %v7159_v40, 16  ;;  %9422 = vst [vmem:[#allocation23_spill] sm:$0xff] %v7193_v35  ;;  %v7231_v46 = vcombine.low %v339_v55, %v339_v55 }
  0x7c   : > { %9424 = vst [vmem:[#allocation25_spill] sm:$0xff] %v7207_v37  ;;  %v835_v50 = vshll.u32 %v7207_v37, 16  ;;  %v345_v37 = vld [vmem:[%s6786_s23 + $0x118] sm:$0x11] }
  0x7d   : > { %5473 = vmatpush3.bf16.msra.mxu1 %v6446_v13  ;;  %v6454_v13 = vld [vmem:[%s9303_s1 + $0x1b0] sm:$0xff]   ;;  %9427 = vst [vmem:[#allocation28_spill] sm:$0xff] %v7231_v46 }
  0x7e   : > { %5474 = vmatprep.subr.bf16.mxu1 %v6452_v42  ;;  %v789_v42 = vrot.slane %v787_v4, 1  ;;  %v7221_v4 = vcombine.high %v339_v55, %v339_v55 }
  0x7f   : > { %1721 = vmatmul.mubr.bf16.gmra.mrb[28].mxu0 %v7090_v19  ;;  %1850 = vmatmul.mubr.bf16.gmra.mrb[28].mxu1 %v7094_v23  ;;  %v6460_v23 = vld [vmem:[%s9303_s1 + $0x1f8] sm:$0xff]  }
  0x80   : > { %1728 = vmatprep.mubr.bf16.mxu0 %v7097_v24  ;;  %1857 = vmatprep.mubr.bf16.mxu1 %v7107_v30  ;;  %v811_v30 = vshll.u32 %v7193_v35, 16  ;;  %9425 = vst [vmem:[#allocation26_spill] sm:$0xff] %v7221_v4  ;;  %v7228_v18 = vsel %vm634_vm0, %v785_v21, %v789_v42  ;;  %v866_v21 = vshll.u32 %v7140_v6, 16  ;;  %v871_v55 = vshll.u32 %v7221_v4, 16 }
  0x81   : > { %5475 = vmatpush3.bf16.msra.mxu1 %v6454_v13  ;;  %v842_v13 = vshll.u32 %v7097_v24, 16  ;;  %9426 = vst [vmem:[#allocation27_spill] sm:$0xff] %v7228_v18  ;;  %v7247_v42 = vcombine.high %v342_v16, %v342_v16  ;;  %v859_v4 = vshll.u32 %v7231_v46, 16 }
  0x82   : > { %5476 = vmatprep.subr.bf16.mxu1 %v6460_v23  ;;  %v813_v12 = vrot.slane %v811_v30, 1  ;;  %v6466_v23 = vld [vmem:[%s9303_s1 + $0x2c0] sm:$0xff]   ;;  %v864_v30 = vshrl.u32 %v7140_v6, 16  ;;  %v873_v35 = vrot.slane %v871_v55, 1  ;;  %v888_v55 = vshrl.u32 %v7182_v17, 16 }
  0x83   : > { %9429 = vst [vmem:[#allocation30_spill] sm:$0xff] %v7247_v42 }
  0x87   : > { %1729 = vmatmul.mubr.bf16.gmra.mrb[32].mxu0 %v7129_v58  ;;  %1858 = vmatmul.mubr.bf16.gmra.mrb[32].mxu1 %v7137_v5  ;;  %v821_v5 = vor.u32 %v820_v25, %v816_v1  ;;  %v6462_v25 = vld [vmem:[%s9303_s1 + $0x1b8] sm:$0xff]   ;;  %v830_v1 = vshll.u32 %v7129_v58, 16 }
  0x88   : > { %1736 = vmatprep.mubr.bf16.mxu0 %v7140_v6  ;;  %1865 = vmatprep.mubr.bf16.mxu1 %v7147_v14  ;;  %v7195_v14 = vcombine.high %v336_v59, %v336_v59  ;;  %v808_v59 = vrot.slane %v806_v53, 1  ;;  %v828_v53 = vshrl.u32 %v7129_v58, 16  ;;  %v7254_v58 = vld [vmem:[%s6786_s23 + $0x108] ss:$8 sps:$4 sm:$0xff]   ;;  %v7258_v6 = vcombine.low %v342_v16, %v342_v16 }
  0x89   : > { %5477 = vmatpush3.bf16.msra.mxu1 %v6462_v25  ;;  %v837_v25 = vrot.slane %v835_v50, 1  ;;  %v7271_v16 = vrot.slane %v859_v4, 1 }
  0x8a   : > { %9423 = vst [vmem:[#allocation24_spill] sm:$0xff] %v7195_v14  ;;  %v847_v19 = vshll.u32 %v7195_v14, 16  ;;  %9430 = vst [vmem:[#allocation31_spill] sm:$0xff] %v7258_v6  ;;  %5686 = vmatprep.subr.bf16.mxu1 %v6466_v23  ;;  %v868_v14 = vrot.slane %v866_v21, 1  ;;  %v878_v23 = vshll.u32 %v7210_v48, 16 }
  0x8b   : > { %v348_v21 = vld [vmem:[%s6786_s23 + $0x130] sm:$0x11] }
  0x8c   : > { %v849_v52 = vrot.slane %v847_v19, 1  ;;  %v7299_v4 = vcombine.low %v348_v21, %v348_v21 }
  0x8e   : > { %9436 = vst [vmem:[#allocation37_spill] sm:$0xff] %v7299_v4 }
  0x8f   : > { %1737 = vmatmul.mubr.bf16.gmra.mrb[36].mxu0 %v7164_v51  ;;  %1866 = vmatmul.mubr.bf16.gmra.mrb[36].mxu1 %v7179_v11  ;;  %v825_v11 = vrot.slane %v823_v32, 1  ;;  %v844_v32 = vrot.slane %v842_v13, 1  ;;  %v809_v13 = vor.u32 %v808_v59, %v804_v62  ;;  %v7263_v59 = vcombine.high %v345_v37, %v345_v37 }
  0x90   : > { %1744 = vmatprep.mubr.bf16.mxu0 %v7182_v17  ;;  %1873 = vmatprep.mubr.bf16.mxu1 %v7190_v22  ;;  %v7218_v22 = vld [vmem:[%s6786_s23 + $0x10c] ss:$8 sps:$4 sm:$0xff]   ;;  %v883_v62 = vshll.u32 %v7258_v6, 16 }
  0x91   : > { %v7235_v24 = vsel %vm634_vm0, %v821_v5, %v825_v11  ;;  %v832_v5 = vrot.slane %v830_v1, 1  ;;  %v854_v11 = vshll.u32 %v7164_v51, 16  ;;  %v845_v19 = vor.u32 %v844_v32, %v840_v27  ;;  %9431 = vst [vmem:[#allocation32_spill] sm:$0xff] %v7263_v59  ;;  %v351_v6 = vld [vmem:[%s6786_s23 + $0x148] sm:$0x11] }
  0x92   : > { %9428 = vst [vmem:[#allocation29_spill] sm:$0xff] %v7235_v24  ;;  %v1114_v1 = vrot.slane %v6937_v15, 1  ;;  %v895_v27 = vshll.u32 %v7247_v42, 16  ;;  %v7266_v32 = vsel %vm634_vm0, %v809_v13, %v813_v12  ;;  %v914_v12 = vshll.u32 %v7218_v22, 16 }
  0x93   : > { %v856_v50 = vrot.slane %v854_v11, 1  ;;  %9432 = vst [vmem:[#allocation33_spill] sm:$0xff] %v7266_v32  ;;  %v7269_v15 = vsel %vm634_vm0, %v845_v19, %v849_v52  ;;  %v7280_v13 = vcombine.low %v345_v37, %v345_v37  ;;  %v7288_v19 = vcombine.high %v348_v21, %v348_v21 }
  0x94   : > { %9433 = vst [vmem:[#allocation34_spill] sm:$0xff] %v7269_v15  ;;  %v7284_v52 = vrot.slane %v895_v27, 1  ;;  %v833_v42 = vor.u32 %v832_v5, %v828_v53  ;;  %v7292_v11 = vrot.slane %v878_v23, 1  ;;  %v902_v53 = vshll.u32 %v7254_v58, 16  ;;  %v6442_v5 = vld [vmem:[%s9303_s1 + $0x248] sm:$0xff]  }
  0x95   : > { %9434 = vst [vmem:[#allocation35_spill] sm:$0xff] %v7280_v13  ;;  %9435 = vst [vmem:[#allocation36_spill] sm:$0xff] %v7288_v19  ;;  %v943_v23 = vshll.u32 %v7288_v19, 16  ;;  %v7316_v21 = vcombine.high %v351_v6, %v351_v6  ;;  %v931_v19 = vshll.u32 %v7299_v4, 16 }
  0x97   : > { %1745 = vmatmul.mubr.bf16.gmra.mrb[40].mxu0 %v7210_v48  ;;  %1874 = vmatmul.mubr.bf16.gmra.mrb[40].mxu1 %v7228_v18  ;;  %v890_v18 = vshll.u32 %v7182_v17, 16  ;;  %v869_v17 = vor.u32 %v868_v14, %v864_v30  ;;  %v907_v14 = vshll.u32 %v7280_v13, 16  ;;  %v7328_v13 = vld [vmem:[%s6786_s23 + $0x120] ss:$8 sps:$4 sm:$0xff]   ;;  %v967_v57 = vshll.u32 %v7316_v21, 16 }
  0x98   : > { %1752 = vmatprep.mubr.bf16.mxu0 %v7218_v22  ;;  %1881 = vmatprep.mubr.bf16.mxu1 %v7235_v24  ;;  %v852_v24 = vshrl.u32 %v7164_v51, 16  ;;  %9440 = vst [vmem:[#allocation40_spill] sm:$0xff] %v7328_v13  ;;  %v7336_v51 = vld [vmem:[%s6786_s23 + $0x13c] ss:$8 sps:$4 sm:$0xff]  }
  0x99   : > { %v892_v46 = vrot.slane %v890_v18, 1  ;;  %v919_v18 = vshll.u32 %v7263_v59, 16  ;;  %v7304_v59 = vrot.slane %v914_v12, 1  ;;  %v7319_v12 = vsel %vm634_vm0, %v833_v42, %v837_v25 }
  0x9a   : > { %9437 = vst [vmem:[#allocation38_spill] sm:$0xff] %v7319_v12  ;;  %v962_v42 = vshll.u32 %v7336_v51, 16  ;;  %v7339_v25 = vcombine.low %v351_v6, %v351_v6  ;;  %v7347_v37 = vrot.slane %v907_v14, 1  ;;  %v857_v6 = vor.u32 %v856_v50, %v852_v24 }
  0x9b   : > { %v7312_v30 = vrot.slane %v919_v18, 1  ;;  %v926_v18 = vshll.u32 %v7328_v13, 16  ;;  %v893_v4 = vor.u32 %v892_v46, %v888_v55  ;;  %v7353_v13 = vrot.slane %v943_v23, 1 }
  0x9c   : > { %v7370_v24 = vrot.slane %v931_v19, 1  ;;  %v955_v55 = vshll.u32 %v7339_v25, 16  ;;  %v9443_v23 = vrot.slane %v6951_v26, 1 }
  0x9d   : > { %v7409_v26 = vsel %vm634_vm0, %v893_v4, %v7284_v52  ;;  %v7426_v52 = vld [vmem:[%s6786_s23 + $0x150] ss:$8 sps:$4 sm:$0xff]   ;;  %v9449_v4 = vshrl.u32 %v7210_v48, 16 }
  0x9e   : > { %9445 = vst [vmem:[#allocation43_spill] sm:$0xff] %v7409_v26 }
  0x9f   : > { %1753 = vmatmul.mubr.bf16.gmra.mrb[44].mxu0 %v7254_v58  ;;  %1882 = vmatmul.mubr.bf16.gmra.mrb[44].mxu1 %v7266_v32  ;;  %v7296_v32 = vrot.slane %v883_v62, 1  ;;  %v7332_v62 = vsel %vm634_vm0, %v869_v17, %v873_v35  ;;  %v6450_v35 = vld [vmem:[%s9303_s1 + $0x250] sm:$0xff]   ;;  %v7364_v17 = vld [vmem:[%s6786_s23 + $0x138] ss:$8 sps:$4 sm:$0xff]  }
  0xa0   : > { %1889 = vmatprep.mubr.bf16.mxu1 %v7269_v15  ;;  %1986 = vmatprep.mubr.bf16.mxu0 %v7101_v61  ;;  %v6435_v15 = vld [vmem:[%s9303_s1 + $0x200] sm:$0xff]   ;;  %v9438_v61 = vrot.slane %v6839_v33, 1  ;;  %9441 = vst [vmem:[#allocation41_spill] sm:$0xff] %v7332_v62  ;;  %v950_v46 = vshll.u32 %v7364_v17, 16 }
  0xa1   : > { %v354_v33 = vld [vmem:[%s6786_s23 + $0x160] sm:$0x11] }
  0xa2   : > { %v7324_v27 = vsel %vm1103_vm1, %v9438_v61, %v1114_v1  ;;  %v6443_v1 = vld [vmem:[%s9303_s1 + $0x208] sm:$0xff]   ;;  %v7345_v61 = vrot.slane %v902_v53, 1  ;;  %v7357_v53 = vrot.slane %v926_v18, 1  ;;  %v9444_v18 = vrot.slane %v6855_v38, 1 }
  0xa3   : > { %9439 = vst [vmem:[#allocation39_spill] sm:$0xff] %v7324_v27  ;;  %v9446_v38 = vrot.slane %v6955_v34, 1  ;;  %v7448_v50 = vcombine.low %v354_v33, %v354_v33 }
  0xa4   : > { %v7381_v14 = vsel %vm1103_vm1, %v9444_v18, %v9443_v23  ;;  %v7398_v23 = vsel %vm634_vm0, %v857_v6, %v7271_v16  ;;  %v7400_v18 = vrot.slane %v950_v46, 1  ;;  %v9447_v16 = vrot.slane %v6868_v43, 1  ;;  %v6459_v43 = vld [vmem:[%s9303_s1 + $0x218] sm:$0xff]  }
  0xa5   : > { %v7418_v6 = vrot.slane %v955_v55, 1 }
  0xa7   : > { %1890 = vmatmul.mubr.bf16.gmra.mrb[48].mxu1 %v7319_v12  ;;  %1987 = vmatmul.mubr.bf16.vlgmr.msra.gmra.mrb[48].mxu0 %v7121_v49  ;;  %v7367_v49 = vcombine.high %v354_v33, %v354_v33  ;;  %v7385_v12 = vld [vmem:[%s6786_s23 + $0x154] ss:$8 sps:$4 sm:$0xff]  }
  0xa8   : > { %5575 = vmatpush3.bf16.msra.mxu0 %v6435_v15  ;;  %1897 = vmatprep.mubr.bf16.mxu1 %v7332_v62  ;;  %v7373_v15 = vrot.slane %v962_v42, 1  ;;  %v986_v19 = vshll.u32 %v7385_v12, 16  ;;  %v7391_v42 = vrot.slane %v967_v57, 1  ;;  %v6458_v57 = vld [vmem:[%s9303_s1 + $0x258] sm:$0xff]  }
  0xa9   : > { %9442 = vst [vmem:[#allocation42_spill] sm:$0xff] %v7367_v49  ;;  %1994 = vmatprep.mubr.bf16.mxu0 %v7324_v27  ;;  %5576 = vmatprep.subr.bf16.mxu0 %v6442_v5  ;;  %v6451_v5 = vld [vmem:[%s9303_s1 + $0x210] sm:$0xff]   ;;  %v991_v27 = vshll.u32 %v7367_v49, 16  ;;  %v9452_v49 = vrot.slane %v6880_v47, 1 }
  0xaa   : > { %v7421_v62 = vrot.slane %v986_v19, 1  ;;  %v974_v19 = vshll.u32 %v7426_v52, 16 }
  0xab   : > { %v7439_v55 = vrot.slane %v991_v27, 1 }
  0xac   : > { %5577 = vmatpush3.bf16.msra.mxu0 %v6443_v1  ;;  %v7416_v1 = vsel %vm1103_vm1, %v9447_v16, %v9446_v38  ;;  %v6464_v38 = vld [vmem:[%s9303_s1 + $0x260] sm:$0xff]   ;;  %v9450_v16 = vshrl.u32 %v7218_v22, 16  ;;  %v7480_v47 = vrot.slane %v974_v19, 1  ;;  %v6472_v19 = vld [vmem:[%s9303_s1 + $0x270] sm:$0xff]  }
  0xad   : > { %9448 = vst [vmem:[#allocation44_spill] sm:$0xff] %v7416_v1  ;;  %5578 = vmatprep.subr.bf16.mxu0 %v6450_v35  ;;  %v881_v35 = vor.u32 %v7292_v11, %v9449_v4  ;;  %v6465_v11 = vld [vmem:[%s9303_s1 + $0x220] sm:$0xff]   ;;  %v9451_v4 = vrot.slane %v6996_v60, 1 }
  0xae   : > { %v917_v34 = vor.u32 %v7304_v59, %v9450_v16  ;;  %v6468_v59 = vld [vmem:[%s9303_s1 + $0x268] sm:$0xff]  }
  0xaf   : > { %1898 = vmatmul.mubr.bf16.gmra.mrb[52].mxu1 %v7398_v23  ;;  %1995 = vmatmul.mubr.bf16.gmra.mrb[52].mxu0 %v7381_v14  ;;  %v7455_v27 = vsel %vm634_vm0, %v881_v35, %v7296_v32  ;;  %v7462_v46 = vsel %vm1103_vm1, %v9452_v49, %v9451_v4  ;;  %v9455_v32 = vrot.slane %v6897_v54, 1  ;;  %v979_v49 = vshll.u32 %v7448_v50, 16  ;;  %v6469_v54 = vld [vmem:[%s9303_s1 + $0x228] sm:$0xff]   ;;  %v6473_v4 = vld [vmem:[%s9303_s1 + $0x230] sm:$0xff]  }
  0xb0   : > { %1905 = vmatprep.mubr.bf16.mxu1 %v7409_v26  ;;  %2002 = vmatprep.mubr.bf16.mxu0 %v7416_v1  ;;  %v7469_v33 = vsel %vm634_vm0, %v917_v34, %v7312_v30  ;;  %v1140_v30 = vrot.slane %v7041_v31, 1 }
  0xb1   : > { %5579 = vmatpush3.bf16.msra.mxu0 %v6451_v5  ;;  %9453 = vst [vmem:[#allocation45_spill] sm:$0xff] %v7469_v33  ;;  %v9454_v5 = vrot.slane %v6999_v3, 1  ;;  %v9457_v3 = vshrl.u32 %v7254_v58, 16 }
  0xb2   : > { %5580 = vmatprep.subr.bf16.mxu0 %v6458_v57  ;;  %v1141_v57 = vrot.slane %v7159_v40, 1 }
  0xb3   : > { %v7476_v60 = vsel %vm1103_vm1, %v9455_v32, %v9454_v5  ;;  %v905_v34 = vor.u32 %v7345_v61, %v9457_v3  ;;  %v9459_v5 = vrot.slane %v7037_v29, 1  ;;  %v9460_v32 = vrot.slane %v6916_v0, 1 }
  0xb4   : > { %9456 = vst [vmem:[#allocation46_spill] sm:$0xff] %v7476_v60  ;;  %v1149_v0 = vrot.slane %v7047_v39, 1 }
  0xb5   : > { %5581 = vmatpush3.bf16.msra.mxu0 %v6459_v43  ;;  %v7494_v43 = vld [vmem:[%s6786_s23 + $0x16c] ss:$8 sps:$4 sm:$0xff]   ;;  %v7508_v61 = vsel %vm634_vm0, %v905_v34, %v7347_v37  ;;  %v7515_v3 = vsel %vm1103_vm1, %v9460_v32, %v9459_v5  ;;  %v981_v37 = vrot.slane %v979_v49, 1  ;;  %v357_v34 = vld [vmem:[%s6786_s23 + $0x178] sm:$0x11]  ;;  %v6480_v49 = vld [vmem:[%s9303_s1 + $0x340] sm:$0xff]  }
  0xb6   : > { %5582 = vmatprep.subr.bf16.mxu0 %v6464_v38  ;;  %v1008_v35 = vshrl.u32 %v7494_v43, 16  ;;  %v9458_v38 = vshrl.u32 %v6798_v20, 16  ;;  %9461 = vst [vmem:[#allocation47_spill] sm:$0xff] %v7515_v3  ;;  %v1010_v29 = vshll.u32 %v7494_v43, 16 }
  0xb7   : > { %1906 = vmatmul.mubr.bf16.gmra.mrb[56].mxu1 %v7455_v27  ;;  %2003 = vmatmul.mubr.bf16.gmra.mrb[56].mxu0 %v7462_v46 }
  0xb8   : > { %1913 = vmatprep.mubr.bf16.mxu1 %v7469_v33  ;;  %2010 = vmatprep.mubr.bf16.mxu0 %v7476_v60  ;;  %v941_v16 = vor.u32 %v7185_v63, %v9458_v38  ;;  %v9463_v63 = vrot.slane %v7043_v36, 1  ;;  %v9466_v36 = vshrl.u32 %v6824_v28, 16  ;;  %v7550_v38 = vcombine.high %v357_v34, %v357_v34 }
  0xb9   : > { %5583 = vmatpush3.bf16.msra.mxu0 %v6465_v11  ;;  %v9464_v11 = vrot.slane %v6929_v9, 1  ;;  %v6477_v9 = vld [vmem:[%s9303_s1 + $0x238] sm:$0xff]   ;;  %v9468_v28 = vrot.slane %v7077_v2, 1 }
  0xba   : > { %5584 = vmatprep.subr.bf16.mxu0 %v6468_v59  ;;  %v7519_v20 = vsel %vm634_vm0, %v941_v16, %v7353_v13  ;;  %v6476_v13 = vld [vmem:[%s9303_s1 + $0x278] sm:$0xff]   ;;  %v929_v39 = vor.u32 %v7357_v53, %v9466_v36  ;;  %v9469_v53 = vrot.slane %v6967_v41, 1  ;;  %v1012_v41 = vrot.slane %v1010_v29, 1 }
  0xbb   : > { %9462 = vst [vmem:[#allocation48_spill] sm:$0xff] %v7519_v20  ;;  %v7526_v59 = vsel %vm1103_vm1, %v9464_v11, %v9463_v63  ;;  %v1015_v2 = vshll.u32 %v7550_v38, 16  ;;  %v7590_v36 = vcombine.low %v357_v34, %v357_v34 }
  0xbc   : > { %9465 = vst [vmem:[#allocation49_spill] sm:$0xff] %v7526_v59  ;;  %v7554_v16 = vsel %vm634_vm0, %v929_v39, %v7370_v24  ;;  %v7561_v5 = vsel %vm1103_vm1, %v9469_v53, %v9468_v28  ;;  %v9472_v24 = vld [vmem:[#allocation19_spill] sm:$0xff]  ;;  %v9477_v28 = vrot.slane %v7125_v56, 1 }
  0xbd   : > { %5585 = vmatpush3.bf16.msra.mxu0 %v6469_v54  ;;  %v9467_v54 = vshrl.u32 %v7336_v51, 16  ;;  %v1150_v11 = vrot.slane %v9472_v24, 1 }
  0xbe   : > { %5586 = vmatprep.subr.bf16.mxu0 %v6472_v19 }
  0xbf   : > { %1914 = vmatmul.mubr.bf16.gmra.mrb[60].mxu1 %v7508_v61  ;;  %2011 = vmatmul.mubr.bf16.gmra.mrb[60].mxu0 %v7515_v3  ;;  %v965_v19 = vor.u32 %v7373_v15, %v9467_v54  ;;  %v9470_v15 = vrot.slane %v7080_v10, 1  ;;  %v9476_v54 = vrot.slane %v7009_v7, 1  ;;  %v1003_v7 = vshll.u32 %v7590_v36, 16 }
  0xc0   : > { %1921 = vmatprep.mubr.bf16.mxu1 %v7519_v20  ;;  %2018 = vmatprep.mubr.bf16.mxu0 %v7526_v59  ;;  %v7637_v24 = vsel %vm1103_vm1, %v1149_v0, %v1150_v11 }
  0xc1   : > { %5587 = vmatpush3.bf16.msra.mxu0 %v6473_v4  ;;  %v7565_v32 = vsel %vm634_vm0, %v965_v19, %v7391_v42  ;;  %v9471_v4 = vrot.slane %v6971_v44, 1  ;;  %v7579_v42 = vld [vmem:[%s6786_s23 + $0x168] ss:$8 sps:$4 sm:$0xff]   ;;  %v9473_v44 = vshrl.u32 %v7364_v17, 16  ;;  %9480 = vst [vmem:[#allocation19_spill] sm:$0xff] %v7637_v24  ;;  %v1005_v31 = vrot.slane %v1003_v7, 1 }
  0xc2   : > { %5588 = vmatprep.subr.bf16.mxu0 %v6476_v13  ;;  %v998_v10 = vshll.u32 %v7579_v42, 16  ;;  %v996_v53 = vshrl.u32 %v7579_v42, 16 }
  0xc3   : > { %v7572_v63 = vsel %vm1103_vm1, %v9471_v4, %v9470_v15  ;;  %v953_v13 = vor.u32 %v7400_v18, %v9473_v44  ;;  %v7631_v4 = vsel %vm1103_vm1, %v1140_v30, %v1141_v57  ;;  %v9481_v57 = vld [vmem:[#allocation23_spill] sm:$0xff] }
  0xc5   : > { %5589 = vmatpush3.bf16.msra.mxu0 %v6477_v9  ;;  %v9474_v9 = vshrl.u32 %v7385_v12, 16  ;;  %v7594_v39 = vsel %vm634_vm0, %v953_v13, %v7418_v6  ;;  %v1017_v6 = vrot.slane %v1015_v2, 1 }
  0xc6   : > { %5798 = vmatprep.subr.bf16.mxu0 %v6480_v49  ;;  %v9475_v49 = vrot.slane %v7117_v45, 1  ;;  %v1000_v45 = vrot.slane %v998_v10, 1 }
  0xc7   : > { %1922 = vmatmul.mubr.bf16.gmra.mrb[64].mxu1 %v7554_v16  ;;  %2019 = vmatmul.mubr.bf16.gmra.mrb[64].mxu0 %v7561_v5  ;;  %v989_v29 = vor.u32 %v7421_v62, %v9474_v9  ;;  %v9478_v62 = vrot.slane %v7012_v8, 1  ;;  %v9479_v8 = vshrl.u32 %v7426_v52, 16  ;;  %v6555_v9 = vld [vmem:[%s6786_s23 + $0x1c] ss:$8 sps:$4 sm:$0xff]  }
  0xc8   : > { %1929 = vmatprep.mubr.bf16.mxu1 %v7565_v32  ;;  %2026 = vmatprep.mubr.bf16.mxu0 %v7572_v63  ;;  %v7601_v19 = vsel %vm1103_vm1, %v9476_v54, %v9475_v49  ;;  %v1001_v40 = vor.u32 %v1000_v45, %v996_v53  ;;  %v9484_v54 = vld [vmem:[#allocation25_spill] sm:$0xff]  ;;  %v9486_v53 = vld [vmem:[#allocation26_spill] sm:$0xff] }
  0xc9   : > { %v7605_v18 = vsel %vm634_vm0, %v989_v29, %v7439_v55  ;;  %v7612_v34 = vsel %vm1103_vm1, %v9478_v62, %v9477_v28  ;;  %v977_v56 = vor.u32 %v7480_v47, %v9479_v8  ;;  %v1013_v55 = vor.u32 %v1012_v41, %v1008_v35  ;;  %v7644_v47 = vld [vmem:[%s6786_s23 + $0xa8] ss:$8 sps:$4 sm:$0xff]   ;;  %v9483_v29 = vld [vmem:[#allocation14_spill] sm:$0xff] }
  0xca   : > { %v1146_v30 = vrot.slane %v7644_v47, 1  ;;  %v1147_v35 = vrot.slane %v9481_v57, 1  ;;  %v9482_v41 = vld [vmem:[#allocation24_spill] sm:$0xff]  ;;  %v7654_v10 = vsel %vm634_vm0, %v1001_v40, %v1005_v31  ;;  %v1152_v49 = vrot.slane %v9483_v29, 1  ;;  %v6556_v40 = vld [vmem:[%s6786_s23 + $0x18] ss:$8 sps:$4 sm:$0xff]  }
  0xcb   : > { %v7624_v15 = vsel %vm634_vm0, %v977_v56, %v981_v37  ;;  %v7634_v2 = vsel %vm634_vm0, %v1013_v55, %v1017_v6  ;;  %v7649_v37 = vld [vmem:[%s6786_s23 + $0xc4] ss:$8 sps:$4 sm:$0xff]   ;;  %v1156_v11 = vrot.slane %v9482_v41, 1  ;;  %v1153_v28 = vrot.slane %v9484_v54, 1  ;;  %v7686_v31 = vld [vmem:[%s6786_s23 + $0x34] ss:$8 sps:$4 sm:$0xff]  }
  0xcc   : > { %v1155_v0 = vrot.slane %v7649_v37, 1  ;;  %v7657_v44 = vsel %vm1103_vm1, %v1146_v30, %v1147_v35  ;;  %v9485_v62 = vld [vmem:[#allocation16_spill] sm:$0xff]  ;;  %v1162_v45 = vrot.slane %v9486_v53, 1  ;;  %v6467_v56 = vld [vmem:[%s9303_s1 + $0x280] sm:$0xff]   ;;  %9488 = vst [vmem:[#allocation24_spill] sm:$0xff] %v7686_v31  ;;  %v9489_v30 = vld [vmem:[#allocation18_spill] sm:$0xff] }
  0xcd   : > { %v1161_v6 = vrot.slane %v9485_v62, 1  ;;  %v7671_v7 = vsel %vm1103_vm1, %v1152_v49, %v1153_v28  ;;  %v6470_v55 = vld [vmem:[%s9303_s1 + $0x2c8] sm:$0xff]   ;;  %v1158_v57 = vrot.slane %v9489_v30, 1  ;;  %v9491_v41 = vld [vmem:[#allocation21_spill] sm:$0xff]  ;;  %v6478_v53 = vld [vmem:[%s9303_s1 + $0x2d8] sm:$0xff]  }
  0xce   : > { %v7660_v13 = vsel %vm1103_vm1, %v1155_v0, %v1156_v11  ;;  %v9490_v35 = vld [vmem:[#allocation28_spill] sm:$0xff]  ;;  %v1167_v11 = vrot.slane %v9491_v41, 1  ;;  %v6474_v54 = vld [vmem:[%s9303_s1 + $0x2d0] sm:$0xff]   ;;  %v6479_v41 = vld [vmem:[%s9303_s1 + $0x298] sm:$0xff]  }
  0xcf   : > { %1930 = vmatmul.mubr.bf16.gmra.mrb[68].mxu1 %v7594_v39  ;;  %2027 = vmatmul.mubr.bf16.gmra.mrb[68].mxu0 %v7601_v19  ;;  %v7674_v8 = vsel %vm1103_vm1, %v1161_v6, %v1162_v45  ;;  %v1159_v0 = vrot.slane %v9490_v35, 1  ;;  %v6471_v49 = vld [vmem:[%s9303_s1 + $0x288] sm:$0xff]   ;;  %v6475_v6 = vld [vmem:[%s9303_s1 + $0x290] sm:$0xff]  }
  0xd0   : > { %1937 = vmatprep.mubr.bf16.mxu1 %v7605_v18  ;;  %2034 = vmatprep.mubr.bf16.mxu0 %v7612_v34  ;;  %9487 = vst [vmem:[#allocation23_spill] sm:$0xff] %v7674_v8  ;;  %v7713_v45 = vld [vmem:[%s6786_s23 + $0x30] ss:$8 sps:$4 sm:$0xff]   ;;  %v9498_v35 = vld [vmem:[#allocation32_spill] sm:$0xff] }
  0xd1   : > { %v7700_v28 = vsel %vm1103_vm1, %v1158_v57, %v1159_v0  ;;  %9495 = vst [vmem:[#allocation16_spill] sm:$0xff] %v7713_v45  ;;  %v1173_v57 = vrot.slane %v7218_v22, 1  ;;  %v1174_v0 = vrot.slane %v9498_v35, 1  ;;  %v6483_v22 = vld [vmem:[%s9303_s1 + $0x2a0] sm:$0xff]  }
  0xd2   : > { %9493 = vst [vmem:[#allocation14_spill] sm:$0xff] %v7700_v28 }
  0xd7   : > { %1938 = vmatmul.mubr.bf16.gmra.mrb[72].mxu1 %v7624_v15  ;;  %2035 = vmatmul.mubr.bf16.gmra.mrb[72].mxu0 %v7631_v4 }
  0xd8   : > { %1945 = vmatprep.mubr.bf16.mxu1 %v7634_v2  ;;  %2042 = vmatprep.mubr.bf16.mxu0 %v7637_v24 }
  0xdf   : > { %1946 = vmatmul.mubr.bf16.gmra.mrb[76].mxu1 %v7654_v10  ;;  %2043 = vmatmul.mubr.bf16.gmra.mrb[76].mxu0 %v7657_v44 }
  0xe0   : > { %2050 = vmatprep.mubr.bf16.mxu0 %v7660_v13  ;;  %2564 = vmatprep.mubr.bf16.mxu1 %v6555_v9  ;;  %v9492_v9 = vld [vmem:[#allocation30_spill] sm:$0xff] }
  0xe1   : > { %v1168_v29 = vrot.slane %v9492_v9, 1  ;;  %v7735_v9 = vsel %vm1103_vm1, %v1173_v57, %v1174_v0  ;;  %v9504_v57 = vld [vmem:[#allocation36_spill] sm:$0xff] }
  0xe2   : > { %9500 = vst [vmem:[#allocation28_spill] sm:$0xff] %v7735_v9  ;;  %v1180_v35 = vrot.slane %v9504_v57, 1  ;;  %v6487_v0 = vld [vmem:[%s9303_s1 + $0x2a8] sm:$0xff]   ;;  %v9509_v57 = vld [vmem:[#allocation37_spill] sm:$0xff] }
  0xe3   : > { %v7703_v62 = vsel %vm1103_vm1, %v1167_v11, %v1168_v29  ;;  %v6482_v11 = vld [vmem:[%s9303_s1 + $0x2e0] sm:$0xff]   ;;  %v6486_v29 = vld [vmem:[%s9303_s1 + $0x2e8] sm:$0xff]  }
  0xe4   : > { %9494 = vst [vmem:[#allocation25_spill] sm:$0xff] %v7703_v62 }
  0xe7   : > { %2051 = vmatmul.mubr.bf16.gmra.mrb[80].mxu0 %v7671_v7  ;;  %2565 = vmatmul.mubr.bf16.vlgmr.msra.gmra.mrb[80].mxu1 %v6556_v40  ;;  %v9497_v40 = vld [vmem:[#allocation31_spill] sm:$0xff] }
  0xe8   : > { %2058 = vmatprep.mubr.bf16.mxu0 %v7674_v8  ;;  %2572 = vmatprep.mubr.bf16.mxu1 %v7686_v31  ;;  %v1165_v30 = vrot.slane %v9497_v40, 1  ;;  %v7756_v40 = vld [vmem:[%s6786_s23 + $0x124] ss:$8 sps:$4 sm:$0xff]  }
  0xe9   : > { %5687 = vmatpush3.bf16.msra.mxu1 %v6467_v56  ;;  %v7718_v56 = vld [vmem:[%s6786_s23 + $0x4c] ss:$8 sps:$4 sm:$0xff]   ;;  %v9542_v8 = vld [vmem:[#allocation39_spill] sm:$0xff] }
  0xea   : > { %5688 = vmatprep.subr.bf16.mxu1 %v6470_v55  ;;  %9496 = vst [vmem:[#allocation26_spill] sm:$0xff] %v7718_v56  ;;  %v1164_v55 = vrot.slane %v7210_v48, 1 }
  0xec   : > { %v7732_v48 = vsel %vm1103_vm1, %v1164_v55, %v1165_v30  ;;  %v1179_v30 = vrot.slane %v7756_v40, 1 }
  0xed   : > { %5689 = vmatpush3.bf16.msra.mxu1 %v6471_v49  ;;  %9499 = vst [vmem:[#allocation18_spill] sm:$0xff] %v7732_v48  ;;  %v7745_v49 = vld [vmem:[%s6786_s23 + $0x48] ss:$8 sps:$4 sm:$0xff]  }
  0xee   : > { %5690 = vmatprep.subr.bf16.mxu1 %v6474_v54  ;;  %9501 = vst [vmem:[#allocation21_spill] sm:$0xff] %v7745_v49  ;;  %v7750_v54 = vld [vmem:[%s6786_s23 + $0x64] ss:$8 sps:$4 sm:$0xff]  }
  0xef   : > { %2059 = vmatmul.mubr.bf16.gmra.mrb[84].mxu0 %v7700_v28  ;;  %2573 = vmatmul.mubr.bf16.gmra.mrb[84].mxu1 %v7713_v45  ;;  %9502 = vst [vmem:[#allocation30_spill] sm:$0xff] %v7750_v54 }
  0xf0   : > { %2066 = vmatprep.mubr.bf16.mxu0 %v7703_v62  ;;  %2580 = vmatprep.mubr.bf16.mxu1 %v7718_v56 }
  0xf1   : > { %5691 = vmatpush3.bf16.msra.mxu1 %v6475_v6  ;;  %v1170_v6 = vrot.slane %v7254_v58, 1  ;;  %v6490_v58 = vld [vmem:[%s9303_s1 + $0x2f0] sm:$0xff]  }
  0xf2   : > { %5692 = vmatprep.subr.bf16.mxu1 %v6478_v53  ;;  %v9503_v53 = vld [vmem:[#allocation35_spill] sm:$0xff] }
  0xf3   : > { %v1171_v55 = vrot.slane %v9503_v53, 1  ;;  %v7780_v53 = vld [vmem:[%s6786_s23 + $0x60] ss:$8 sps:$4 sm:$0xff]  }
  0xf4   : > { %9507 = vst [vmem:[#allocation35_spill] sm:$0xff] %v7780_v53 }
  0xf5   : > { %5693 = vmatpush3.bf16.msra.mxu1 %v6479_v41  ;;  %v7767_v41 = vsel %vm1103_vm1, %v1170_v6, %v1171_v55  ;;  %v6564_v6 = vld [vmem:[%s6786_s23 + $0x7c] ss:$8 sps:$4 sm:$0xff]   ;;  %v9508_v55 = vld [vmem:[#allocation40_spill] sm:$0xff] }
  0xf6   : > { %5694 = vmatprep.subr.bf16.mxu1 %v6482_v11  ;;  %9505 = vst [vmem:[#allocation31_spill] sm:$0xff] %v7767_v41  ;;  %v7770_v11 = vsel %vm1103_vm1, %v1179_v30, %v1180_v35  ;;  %v1176_v30 = vrot.slane %v9508_v55, 1  ;;  %v1177_v35 = vrot.slane %v9509_v57, 1  ;;  %v1191_v57 = vrot.slane %v7385_v12, 1 }
  0xf7   : > { %2067 = vmatmul.mubr.bf16.gmra.mrb[88].mxu0 %v7732_v48  ;;  %2581 = vmatmul.mubr.bf16.gmra.mrb[88].mxu1 %v7745_v49  ;;  %9506 = vst [vmem:[#allocation32_spill] sm:$0xff] %v7770_v11 }
  0xf8   : > { %2074 = vmatprep.mubr.bf16.mxu0 %v7735_v9  ;;  %2588 = vmatprep.mubr.bf16.mxu1 %v7750_v54  ;;  %v9523_v54 = vld [vmem:[#allocation9_spill] sm:$0xff] }
  0xf9   : > { %5695 = vmatpush3.bf16.msra.mxu1 %v6483_v22  ;;  %v6491_v22 = vld [vmem:[%s9303_s1 + $0x2b0] sm:$0xff]  }
  0xfa   : > { %5696 = vmatprep.subr.bf16.mxu1 %v6486_v29  ;;  %v6494_v29 = vld [vmem:[%s9303_s1 + $0x2f8] sm:$0xff]  }
  0xfd   : > { %5697 = vmatpush3.bf16.msra.mxu1 %v6487_v0  ;;  %v1185_v0 = vrot.slane %v7336_v51, 1 }
  0xfe   : > { %5698 = vmatprep.subr.bf16.mxu1 %v6490_v58  ;;  %v1186_v58 = vrot.slane %v7316_v21, 1  ;;  %v6565_v21 = vld [vmem:[%s6786_s23 + $0x78] ss:$8 sps:$4 sm:$0xff]  }
  0xff   : > { %2075 = vmatmul.mubr.bf16.gmra.mrb[92].mxu0 %v7767_v41  ;;  %2589 = vmatmul.mubr.bf16.gmra.mrb[92].mxu1 %v7780_v53  ;;  %v6497_v41 = vld [vmem:[%s9303_s1 + $0x2b8] sm:$0xff]  }
 0x100   : > { %2082 = vmatprep.mubr.bf16.mxu0 %v7770_v11  ;;  %2596 = vmatprep.mubr.bf16.mxu1 %v6564_v6  ;;  %v6501_v11 = vld [vmem:[%s9303_s1 + $0x3c0] sm:$0xff]   ;;  %v7796_v6 = vsel %vm1103_vm1, %v1176_v30, %v1177_v35  ;;  %v7799_v53 = vsel %vm1103_vm1, %v1185_v0, %v1186_v58  ;;  %v1183_v30 = vrot.slane %v7339_v25, 1  ;;  %v9512_v35 = vld [vmem:[#allocation42_spill] sm:$0xff]  ;;  %v1188_v25 = vrot.slane %v7426_v52, 1 }
 0x101   : > { %5699 = vmatpush3.bf16.msra.mxu1 %v6491_v22  ;;  %9510 = vst [vmem:[#allocation36_spill] sm:$0xff] %v7796_v6  ;;  %9511 = vst [vmem:[#allocation40_spill] sm:$0xff] %v7799_v53  ;;  %v6566_v22 = vld [vmem:[%s6786_s23 + $0x94] ss:$8 sps:$4 sm:$0xff]   ;;  %v1192_v0 = vrot.slane %v9512_v35, 1  ;;  %v1197_v35 = vrot.slane %v7494_v43, 1 }
 0x102   : > { %5700 = vmatprep.subr.bf16.mxu1 %v6494_v29  ;;  %v1182_v29 = vrot.slane %v7364_v17, 1  ;;  %v6567_v58 = vld [vmem:[%s6786_s23 + $0x90] ss:$8 sps:$4 sm:$0xff]  }
 0x105   : > { %5701 = vmatpush3.bf16.msra.mxu1 %v6497_v41  ;;  %v7810_v41 = vsel %vm1103_vm1, %v1182_v29, %v1183_v30  ;;  %v1198_v29 = vrot.slane %v7550_v38, 1 }
 0x106   : > { %5910 = vmatprep.subr.bf16.mxu1 %v6501_v11  ;;  %9513 = vst [vmem:[#allocation37_spill] sm:$0xff] %v7810_v41  ;;  %v7813_v11 = vsel %vm1103_vm1, %v1191_v57, %v1192_v0  ;;  %v1195_v0 = vrot.slane %v7590_v36, 1  ;;  %v6569_v36 = vld [vmem:[%s6786_s23 + $0xc0] ss:$8 sps:$4 sm:$0xff]  }
 0x107   : > { %2083 = vmatmul.mubr.bf16.gmra.mrb[96].mxu0 %v7796_v6  ;;  %2597 = vmatmul.mubr.bf16.gmra.mrb[96].mxu1 %v6565_v21  ;;  %9514 = vst [vmem:[#allocation42_spill] sm:$0xff] %v7813_v11  ;;  %v6568_v21 = vld [vmem:[%s6786_s23 + $0xac] ss:$8 sps:$4 sm:$0xff]   ;;  %v7827_v57 = vsel %vm1103_vm1, %v1197_v35, %v1198_v29 }
 0x108   : > { %2090 = vmatprep.mubr.bf16.mxu0 %v7799_v53  ;;  %2604 = vmatprep.mubr.bf16.mxu1 %v6566_v22  ;;  %v1189_v22 = vrot.slane %v7448_v50, 1  ;;  %9516 = vst [vmem:[#allocation51_spill] sm:$0xff] %v7827_v57  ;;  %v1194_v50 = vrot.slane %v7579_v42, 1  ;;  %v6570_v53 = vld [vmem:[%s6786_s23 + $0xdc] ss:$8 sps:$4 sm:$0xff]  }
 0x10a   : > { %v7824_v30 = vsel %vm1103_vm1, %v1188_v25, %v1189_v22 }
 0x10b   : > { %9515 = vst [vmem:[#allocation50_spill] sm:$0xff] %v7824_v30 }
 0x10f   : > { %2091 = vmatmul.mubr.bf16.gmra.mrb[100].mxu0 %v7810_v41  ;;  %2605 = vmatmul.mubr.bf16.gmra.mrb[100].mxu1 %v6567_v58 }
 0x110   : > { %2098 = vmatprep.mubr.bf16.mxu0 %v7813_v11  ;;  %2612 = vmatprep.mubr.bf16.mxu1 %v6568_v21 }
 0x117   : > { %2099 = vmatmul.mubr.bf16.gmra.mrb[104].mxu0 %v7824_v30  ;;  %2613 = vmatmul.mubr.bf16.gmra.mrb[104].mxu1 %v7644_v47  ;;  %v7840_v47 = vsel %vm1103_vm1, %v1194_v50, %v1195_v0 }
 0x118   : > { %2106 = vmatprep.mubr.bf16.mxu0 %v7827_v57  ;;  %2620 = vmatprep.mubr.bf16.mxu1 %v7649_v37  ;;  %9517 = vst [vmem:[#allocation52_spill] sm:$0xff] %v7840_v47 }
 0x11a   : > { %v5142_v38 = vpop.f32.mrb[0].mxu0  ;;  %v5214_v58 = vpop.f32.mrb[0].mxu1 }
 0x11b   : > { %v5143_v21 = vpop.f32.mrb[1].mxu0  ;;  %v5215_v25 = vpop.f32.mrb[1].mxu1 }
 0x11c   : > { %v7835_v22 = vadd.f32 %v5143_v21, %v5142_v38  ;;  %v5145_v35 = vpop.f32.mrb[2].mxu0  ;;  %v7837_v29 = vadd.f32 %v5215_v25, %v5214_v58  ;;  %v5217_v57 = vpop.f32.mrb[2].mxu1  ;;  %v9519_v38 = vld [vmem:[#allocation7_spill] sm:$0xff] }
 0x11d   : > { %v5146_v37 = vpop.f32.mrb[3].mxu0  ;;  %v5218_v30 = vpop.f32.mrb[3].mxu1 }
 0x11e   : > { %v7842_v11 = vadd.f32 %v5146_v37, %v5145_v35  ;;  %v7844_v41 = vadd.f32 %v5218_v30, %v5217_v57  ;;  %v6481_v57 = vld [vmem:[%s9303_s1 + $0x300] sm:$0xff]  }
 0x11f   : > { %2107 = vmatmul.mubr.bf16.gmra.mrb[108].mxu0 %v7840_v47  ;;  %2621 = vmatmul.mubr.bf16.gmra.mrb[108].mxu1 %v6569_v36 }
 0x120   : > { %9518 = vst [vmem:[#allocation53_spill] sm:$0xff] %v7844_v41  ;;  %2628 = vmatprep.mubr.bf16.mxu1 %v6570_v53  ;;  %2725 = vmatprep.mubr.bf16.mxu0 %v9519_v38  ;;  %v6484_v38 = vld [vmem:[%s9303_s1 + $0x348] sm:$0xff]  }
 0x122   : > { %v5148_v58 = vpop.f32.mrb[4].mxu0  ;;  %v5220_v21 = vpop.f32.mrb[4].mxu1 }
 0x123   : > { %v5149_v50 = vpop.f32.mrb[5].mxu0  ;;  %v5221_v0 = vpop.f32.mrb[5].mxu1 }
 0x124   : > { %v7850_v25 = vadd.f32 %v5149_v50, %v5148_v58  ;;  %v5151_v35 = vpop.f32.mrb[6].mxu0  ;;  %v7852_v37 = vadd.f32 %v5221_v0, %v5220_v21  ;;  %v5223_v30 = vpop.f32.mrb[6].mxu1  ;;  %v6571_v58 = vld [vmem:[%s6786_s23 + $0xd8] ss:$8 sps:$4 sm:$0xff]   ;;  %v9522_v50 = vld [vmem:[#allocation8_spill] sm:$0xff] }
 0x125   : > { %v5152_v36 = vpop.f32.mrb[7].mxu0  ;;  %v5224_v53 = vpop.f32.mrb[7].mxu1  ;;  %v6572_v21 = vld [vmem:[%s6786_s23 + $0xf4] ss:$8 sps:$4 sm:$0xff]   ;;  %v6485_v0 = vld [vmem:[%s9303_s1 + $0x308] sm:$0xff]  }
 0x126   : > { %9520 = vst [vmem:[#allocation7_spill] sm:$0xff] %v7852_v37  ;;  %v7860_v47 = vadd.f32 %v5152_v36, %v5151_v35  ;;  %v7862_v6 = vadd.f32 %v5224_v53, %v5223_v30  ;;  %v6488_v35 = vld [vmem:[%s9303_s1 + $0x350] sm:$0xff]  }
 0x127   : > { %2629 = vmatmul.mubr.bf16.gmra.mrb[112].mxu1 %v6571_v58  ;;  %2726 = vmatmul.mubr.bf16.vlgmr.msra.gmra.mrb[112].mxu0 %v9522_v50 }
 0x128   : > { %9521 = vst [vmem:[#allocation54_spill] sm:$0xff] %v7862_v6  ;;  %5799 = vmatpush3.bf16.msra.mxu0 %v6481_v57  ;;  %2636 = vmatprep.mubr.bf16.mxu1 %v6572_v21 }
 0x129   : > { %2733 = vmatprep.mubr.bf16.mxu0 %v9523_v54  ;;  %5800 = vmatprep.subr.bf16.mxu0 %v6484_v38  ;;  %v6489_v38 = vld [vmem:[%s9303_s1 + $0x310] sm:$0xff]  }
 0x12a   : > { %v5154_v30 = vpop.f32.mrb[8].mxu0  ;;  %v5226_v36 = vpop.f32.mrb[8].mxu1 }
 0x12b   : > { %v5155_v53 = vpop.f32.mrb[9].mxu0  ;;  %v5227_v58 = vpop.f32.mrb[9].mxu1 }
 0x12c   : > { %v7874_v57 = vadd.f32 %v5155_v53, %v5154_v30  ;;  %v5157_v50 = vpop.f32.mrb[10].mxu0  ;;  %v7876_v21 = vadd.f32 %v5227_v58, %v5226_v36  ;;  %v5229_v9 = vpop.f32.mrb[10].mxu1  ;;  %5801 = vmatpush3.bf16.msra.mxu0 %v6485_v0  ;;  %v6492_v30 = vld [vmem:[%s9303_s1 + $0x358] sm:$0xff]   ;;  %v6574_v0 = vld [vmem:[%s6786_s23 + $0x10c] ss:$8 sps:$4 sm:$0xff]   ;;  %v9527_v58 = vld [vmem:[#allocation11_spill] sm:$0xff] }
 0x12d   : > { %v5158_v49 = vpop.f32.mrb[11].mxu0  ;;  %v5230_v54 = vpop.f32.mrb[11].mxu1  ;;  %5802 = vmatprep.subr.bf16.mxu0 %v6488_v35  ;;  %v6573_v53 = vld [vmem:[%s6786_s23 + $0xf0] ss:$8 sps:$4 sm:$0xff]  }
 0x12e   : > { %9524 = vst [vmem:[#allocation8_spill] sm:$0xff] %v7876_v21  ;;  %v7881_v48 = vadd.f32 %v5158_v49, %v5157_v50  ;;  %v7883_v56 = vadd.f32 %v5230_v54, %v5229_v9  ;;  %v9526_v36 = vld [vmem:[#allocation10_spill] sm:$0xff]  ;;  %v6499_v54 = vld [vmem:[%s9303_s1 + $0x360] sm:$0xff]  }
 0x12f   : > { %2637 = vmatmul.mubr.bf16.gmra.mrb[116].mxu1 %v6573_v53  ;;  %2734 = vmatmul.mubr.bf16.gmra.mrb[116].mxu0 %v9526_v36  ;;  %v6493_v49 = vld [vmem:[%s9303_s1 + $0x318] sm:$0xff]  }
 0x130   : > { %9525 = vst [vmem:[#allocation55_spill] sm:$0xff] %v7883_v56  ;;  %2644 = vmatprep.mubr.bf16.mxu1 %v6574_v0  ;;  %2741 = vmatprep.mubr.bf16.mxu0 %v9527_v58 }
 0x131   : > { %5803 = vmatpush3.bf16.msra.mxu0 %v6489_v38 }
 0x132   : > { %v5160_v35 = vpop.f32.mrb[12].mxu0  ;;  %v5232_v9 = vpop.f32.mrb[12].mxu1  ;;  %5804 = vmatprep.subr.bf16.mxu0 %v6492_v30  ;;  %v6500_v30 = vld [vmem:[%s9303_s1 + $0x320] sm:$0xff]  }
 0x133   : > { %v5161_v50 = vpop.f32.mrb[13].mxu0  ;;  %v5233_v53 = vpop.f32.mrb[13].mxu1 }
 0x134   : > { %v7898_v36 = vadd.f32 %v5161_v50, %v5160_v35  ;;  %v5163_v0 = vpop.f32.mrb[14].mxu0  ;;  %v7900_v56 = vadd.f32 %v5233_v53, %v5232_v9  ;;  %v5235_v38 = vpop.f32.mrb[14].mxu1  ;;  %v6503_v35 = vld [vmem:[%s9303_s1 + $0x368] sm:$0xff]  }
 0x135   : > { %v5164_v58 = vpop.f32.mrb[15].mxu0  ;;  %v5236_v21 = vpop.f32.mrb[15].mxu1  ;;  %5805 = vmatpush3.bf16.msra.mxu0 %v6493_v49  ;;  %v6575_v50 = vld [vmem:[%s6786_s23 + $0x108] ss:$8 sps:$4 sm:$0xff]  }
 0x136   : > { %9528 = vst [vmem:[#allocation56_spill] sm:$0xff] %v7900_v56  ;;  %v7905_v62 = vadd.f32 %v5164_v58, %v5163_v0  ;;  %v7907_v6 = vadd.f32 %v5236_v21, %v5235_v38  ;;  %5806 = vmatprep.subr.bf16.mxu0 %v6499_v54  ;;  %v9530_v9 = vld [vmem:[#allocation12_spill] sm:$0xff]  ;;  %v9531_v49 = vld [vmem:[#allocation13_spill] sm:$0xff] }
 0x137   : > { %2645 = vmatmul.mubr.bf16.gmra.mrb[120].mxu1 %v6575_v50  ;;  %2742 = vmatmul.mubr.bf16.gmra.mrb[120].mxu0 %v9530_v9  ;;  %v6504_v58 = vld [vmem:[%s9303_s1 + $0x328] sm:$0xff]   ;;  %v6507_v54 = vld [vmem:[%s9303_s1 + $0x370] sm:$0xff]  }
 0x138   : > { %9529 = vst [vmem:[#allocation57_spill] sm:$0xff] %v7907_v6  ;;  %2652 = vmatprep.mubr.bf16.mxu1 %v7756_v40  ;;  %2749 = vmatprep.mubr.bf16.mxu0 %v9531_v49  ;;  %v6508_v56 = vld [vmem:[%s9303_s1 + $0x330] sm:$0xff]  }
 0x139   : > { %5807 = vmatpush3.bf16.msra.mxu0 %v6500_v30 }
 0x13a   : > { %v5166_v21 = vpop.f32.mrb[16].mxu0  ;;  %v5254_v53 = vpop.f32.mrb[16].mxu1  ;;  %5808 = vmatprep.subr.bf16.mxu0 %v6503_v35 }
 0x13b   : > { %v5167_v0 = vpop.f32.mrb[17].mxu0  ;;  %v5255_v38 = vpop.f32.mrb[17].mxu1 }
 0x13c   : > { %v7922_v50 = vadd.f32 %v5167_v0, %v5166_v21  ;;  %v5256_v9 = vadd.f32 %v5255_v38, %v5254_v53  ;;  %v5169_v40 = vpop.f32.mrb[18].mxu0  ;;  %v5257_v6 = vpop.f32.mrb[18].mxu1  ;;  %v6511_v21 = vld [vmem:[%s9303_s1 + $0x378] sm:$0xff]   ;;  %v9532_v53 = vld [vmem:[#allocation15_spill] sm:$0xff] }
 0x13d   : > { %v5170_v49 = vpop.f32.mrb[19].mxu0  ;;  %v5258_v30 = vpop.f32.mrb[19].mxu1  ;;  %5809 = vmatpush3.bf16.msra.mxu0 %v6504_v58  ;;  %v9533_v58 = vld [vmem:[#allocation17_spill] sm:$0xff] }
 0x13e   : > { %v7927_v45 = vadd.f32 %v5170_v49, %v5169_v40  ;;  %v5259_v35 = vadd.f32 %v5258_v30, %v5257_v6  ;;  %v7930_v28 = vadd.f32 %v5256_v9, %v7835_v22  ;;  %5810 = vmatprep.subr.bf16.mxu0 %v6507_v54  ;;  %v6512_v6 = vld [vmem:[%s9303_s1 + $0x338] sm:$0xff]  }
 0x13f   : > { %2653 = vmatmul.mubr.bf16.gmra.mrb[124].mxu1 %v9508_v55  ;;  %2750 = vmatmul.mubr.bf16.gmra.mrb[124].mxu0 %v9532_v53  ;;  %v6517_v55 = vld [vmem:[%s9303_s1 + $0x440] sm:$0xff]  }
 0x140   : > { %2660 = vmatprep.mubr.bf16.mxu1 %v7336_v51  ;;  %2757 = vmatprep.mubr.bf16.mxu0 %v9533_v58  ;;  %v7940_v49 = vadd.f32 %v5259_v35, %v7842_v11 }
 0x141   : > { %5811 = vmatpush3.bf16.msra.mxu0 %v6508_v56 }
 0x142   : > { %v5172_v22 = vpop.f32.mrb[20].mxu0  ;;  %v5260_v9 = vpop.f32.mrb[20].mxu1  ;;  %5812 = vmatprep.subr.bf16.mxu0 %v6511_v21  ;;  %v9534_v21 = vld [vmem:[#allocation20_spill] sm:$0xff] }
 0x143   : > { %v5173_v54 = vpop.f32.mrb[21].mxu0  ;;  %v5261_v0 = vpop.f32.mrb[21].mxu1 }
 0x144   : > { %v7948_v51 = vadd.f32 %v5173_v54, %v5172_v22  ;;  %v5262_v38 = vadd.f32 %v5261_v0, %v5260_v9  ;;  %v5175_v40 = vpop.f32.mrb[22].mxu0  ;;  %v5263_v11 = vpop.f32.mrb[22].mxu1  ;;  %v9535_v22 = vld [vmem:[#allocation22_spill] sm:$0xff] }
 0x145   : > { %v5176_v30 = vpop.f32.mrb[23].mxu0  ;;  %v5264_v56 = vpop.f32.mrb[23].mxu1  ;;  %5813 = vmatpush3.bf16.msra.mxu0 %v6512_v6 }
 0x146   : > { %v7950_v35 = vadd.f32 %v5176_v30, %v5175_v40  ;;  %v5265_v58 = vadd.f32 %v5264_v56, %v5263_v11  ;;  %v7953_v53 = vadd.f32 %v5262_v38, %v7850_v25  ;;  %6022 = vmatprep.subr.bf16.mxu0 %v6517_v55 }
 0x147   : > { %2661 = vmatmul.mubr.bf16.gmra.mrb[128].mxu1 %v7364_v17  ;;  %2758 = vmatmul.mubr.bf16.gmra.mrb[128].mxu0 %v9534_v21 }
 0x148   : > { %2668 = vmatprep.mubr.bf16.mxu1 %v7385_v12  ;;  %2765 = vmatprep.mubr.bf16.mxu0 %v9535_v22  ;;  %v7960_v9 = vadd.f32 %v5265_v58, %v7860_v47  ;;  %v9536_v47 = vld [vmem:[#allocation27_spill] sm:$0xff]  ;;  %v9537_v58 = vld [vmem:[#allocation29_spill] sm:$0xff] }
 0x14a   : > { %v5178_v54 = vpop.f32.mrb[24].mxu0  ;;  %v5266_v6 = vpop.f32.mrb[24].mxu1 }
 0x14b   : > { %v5179_v0 = vpop.f32.mrb[25].mxu0  ;;  %v5267_v40 = vpop.f32.mrb[25].mxu1 }
 0x14c   : > { %v7962_v11 = vadd.f32 %v5179_v0, %v5178_v54  ;;  %v5268_v25 = vadd.f32 %v5267_v40, %v5266_v6  ;;  %v5181_v38 = vpop.f32.mrb[26].mxu0  ;;  %v5269_v55 = vpop.f32.mrb[26].mxu1 }
 0x14d   : > { %v5182_v30 = vpop.f32.mrb[27].mxu0  ;;  %v5270_v17 = vpop.f32.mrb[27].mxu1 }
 0x14e   : > { %v7964_v56 = vadd.f32 %v5182_v30, %v5181_v38  ;;  %v5271_v12 = vadd.f32 %v5270_v17, %v5269_v55  ;;  %v7967_v22 = vadd.f32 %v5268_v25, %v7874_v57 }
 0x14f   : > { %2669 = vmatmul.mubr.bf16.gmra.mrb[132].mxu1 %v7426_v52  ;;  %2766 = vmatmul.mubr.bf16.gmra.mrb[132].mxu0 %v9536_v47  ;;  %v7979_v52 = vld [vmem:[%s6786_s23 + $0x184] ss:$8 sps:$4 sm:$0xff]  }
 0x150   : > { %2676 = vmatprep.mubr.bf16.mxu1 %v7494_v43  ;;  %2773 = vmatprep.mubr.bf16.mxu0 %v9537_v58  ;;  %v7974_v54 = vadd.f32 %v5271_v12, %v7881_v48  ;;  %v9538_v12 = vld [vmem:[#allocation33_spill] sm:$0xff] }
 0x152   : > { %v5184_v6 = vpop.f32.mrb[28].mxu0  ;;  %v5272_v0 = vpop.f32.mrb[28].mxu1 }
 0x153   : > { %v5185_v40 = vpop.f32.mrb[29].mxu0  ;;  %v5273_v38 = vpop.f32.mrb[29].mxu1 }
 0x154   : > { %v7976_v30 = vadd.f32 %v5185_v40, %v5184_v6  ;;  %v5274_v55 = vadd.f32 %v5273_v38, %v5272_v0  ;;  %v5187_v57 = vpop.f32.mrb[30].mxu0  ;;  %v5275_v25 = vpop.f32.mrb[30].mxu1  ;;  %v9539_v6 = vld [vmem:[#allocation34_spill] sm:$0xff] }
 0x155   : > { %v5188_v17 = vpop.f32.mrb[31].mxu0  ;;  %v5276_v47 = vpop.f32.mrb[31].mxu1 }
 0x156   : > { %v7981_v43 = vadd.f32 %v5188_v17, %v5187_v57  ;;  %v5277_v58 = vadd.f32 %v5276_v47, %v5275_v25  ;;  %v7984_v48 = vadd.f32 %v5274_v55, %v7898_v36  ;;  %v7994_v17 = vld [vmem:[%s6786_s23 + $0x180] ss:$8 sps:$4 sm:$0xff]  }
 0x157   : > { %2677 = vmatmul.mubr.bf16.gmra.mrb[136].mxu1 %v7579_v42  ;;  %2774 = vmatmul.mubr.bf16.gmra.mrb[136].mxu0 %v9538_v12 }
 0x158   : > { %2684 = vmatprep.mubr.bf16.mxu1 %v7979_v52  ;;  %2781 = vmatprep.mubr.bf16.mxu0 %v9539_v6  ;;  %v7991_v0 = vadd.f32 %v5277_v58, %v7905_v62  ;;  %v9540_v62 = vld [vmem:[#allocation38_spill] sm:$0xff]  ;;  %v9541_v58 = vld [vmem:[#allocation41_spill] sm:$0xff] }
 0x15a   : > { %v5190_v40 = vpop.f32.mrb[32].mxu0  ;;  %v5278_v38 = vpop.f32.mrb[32].mxu1 }
 0x15b   : > { %v5191_v21 = vpop.f32.mrb[33].mxu0  ;;  %v5279_v57 = vpop.f32.mrb[33].mxu1 }
 0x15c   : > { %v7996_v47 = vadd.f32 %v5191_v21, %v5190_v40  ;;  %v5280_v36 = vadd.f32 %v5279_v57, %v5278_v38  ;;  %v5193_v55 = vpop.f32.mrb[34].mxu0  ;;  %v5281_v42 = vpop.f32.mrb[34].mxu1 }
 0x15d   : > { %v5194_v25 = vpop.f32.mrb[35].mxu0  ;;  %v5282_v12 = vpop.f32.mrb[35].mxu1 }
 0x15e   : > { %v7998_v37 = vadd.f32 %v5194_v25, %v5193_v55  ;;  %v5283_v31 = vadd.f32 %v5282_v12, %v5281_v42  ;;  %v8001_v6 = vadd.f32 %v5280_v36, %v7922_v50 }
 0x15f   : > { %2685 = vmatmul.mubr.bf16.gmra.mrb[140].mxu1 %v7994_v17  ;;  %2782 = vmatmul.mubr.bf16.gmra.mrb[140].mxu0 %v9540_v62 }
 0x160   : > { %2789 = vmatprep.mubr.bf16.mxu0 %v9541_v58  ;;  %2886 = vmatprep.mubr.bf16.mxu1 %v9542_v8  ;;  %v8008_v21 = vadd.f32 %v5283_v31, %v7927_v45  ;;  %v6502_v58 = vld [vmem:[%s9303_s1 + $0x380] sm:$0xff]   ;;  %v6505_v31 = vld [vmem:[%s9303_s1 + $0x3c8] sm:$0xff]  }
 0x162   : > { %v5196_v40 = vpop.f32.mrb[36].mxu0  ;;  %v5284_v38 = vpop.f32.mrb[36].mxu1 }
 0x163   : > { %v5197_v57 = vpop.f32.mrb[37].mxu0  ;;  %v5285_v55 = vpop.f32.mrb[37].mxu1 }
 0x164   : > { %v8010_v25 = vadd.f32 %v5197_v57, %v5196_v40  ;;  %v5286_v12 = vadd.f32 %v5285_v55, %v5284_v38  ;;  %v5199_v50 = vpop.f32.mrb[38].mxu0  ;;  %v5287_v36 = vpop.f32.mrb[38].mxu1 }
 0x165   : > { %v5200_v42 = vpop.f32.mrb[39].mxu0  ;;  %v5288_v41 = vpop.f32.mrb[39].mxu1 }
 0x166   : > { %v8015_v62 = vadd.f32 %v5200_v42, %v5199_v50  ;;  %v5289_v8 = vadd.f32 %v5288_v41, %v5287_v36  ;;  %v8021_v45 = vadd.f32 %v5286_v12, %v7948_v51  ;;  %v6506_v41 = vld [vmem:[%s9303_s1 + $0x388] sm:$0xff]   ;;  %v6509_v51 = vld [vmem:[%s9303_s1 + $0x3d0] sm:$0xff]  }
 0x167   : > { %2790 = vmatmul.mubr.bf16.gmra.mrb[144].mxu0 %v7398_v23  ;;  %2887 = vmatmul.mubr.bf16.vlgmr.msra.gmra.mrb[144].mxu1 %v7381_v14 }
 0x168   : > { %2797 = vmatprep.mubr.bf16.mxu0 %v7409_v26  ;;  %2894 = vmatprep.mubr.bf16.mxu1 %v7416_v1  ;;  %v8028_v40 = vadd.f32 %v5289_v8, %v7950_v35  ;;  %v6510_v8 = vld [vmem:[%s9303_s1 + $0x390] sm:$0xff]   ;;  %v6513_v26 = vld [vmem:[%s9303_s1 + $0x3d8] sm:$0xff]  }
 0x169   : > { %5911 = vmatpush3.bf16.msra.mxu1 %v6502_v58 }
 0x16a   : > { %v5202_v38 = vpop.f32.mrb[40].mxu0  ;;  %v5290_v57 = vpop.f32.mrb[40].mxu1  ;;  %5912 = vmatprep.subr.bf16.mxu1 %v6505_v31 }
 0x16b   : > { %v5203_v14 = vpop.f32.mrb[41].mxu0  ;;  %v5291_v55 = vpop.f32.mrb[41].mxu1 }
 0x16c   : > { %v8036_v12 = vadd.f32 %v5203_v14, %v5202_v38  ;;  %v5292_v50 = vadd.f32 %v5291_v55, %v5290_v57  ;;  %v5205_v36 = vpop.f32.mrb[42].mxu0  ;;  %v5293_v35 = vpop.f32.mrb[42].mxu1  ;;  %v6515_v57 = vld [vmem:[%s9303_s1 + $0x398] sm:$0xff]  }
 0x16d   : > { %v5206_v42 = vpop.f32.mrb[43].mxu0  ;;  %v5294_v58 = vpop.f32.mrb[43].mxu1  ;;  %5913 = vmatpush3.bf16.msra.mxu1 %v6506_v41 }
 0x16e   : > { %v8041_v1 = vadd.f32 %v5206_v42, %v5205_v36  ;;  %v5295_v31 = vadd.f32 %v5294_v58, %v5293_v35  ;;  %5914 = vmatprep.subr.bf16.mxu1 %v6509_v51  ;;  %v8047_v38 = vadd.f32 %v5292_v50, %v7962_v11  ;;  %v6519_v11 = vld [vmem:[%s9303_s1 + $0x3e0] sm:$0xff]  }
 0x16f   : > { %2798 = vmatmul.mubr.bf16.gmra.mrb[148].mxu0 %v7455_v27  ;;  %2895 = vmatmul.mubr.bf16.gmra.mrb[148].mxu1 %v7462_v46 }
 0x170   : > { %2805 = vmatprep.mubr.bf16.mxu0 %v7469_v33  ;;  %2902 = vmatprep.mubr.bf16.mxu1 %v7476_v60  ;;  %v8054_v41 = vadd.f32 %v5295_v31, %v7964_v56  ;;  %v6520_v31 = vld [vmem:[%s9303_s1 + $0x3a0] sm:$0xff]  }
 0x171   : > { %5915 = vmatpush3.bf16.msra.mxu1 %v6510_v8 }
 0x172   : > { %v5208_v51 = vpop.f32.mrb[44].mxu0  ;;  %v5296_v14 = vpop.f32.mrb[44].mxu1  ;;  %5916 = vmatprep.subr.bf16.mxu1 %v6513_v26 }
 0x173   : > { %v5209_v55 = vpop.f32.mrb[45].mxu0  ;;  %v5297_v50 = vpop.f32.mrb[45].mxu1 }
 0x174   : > { %v8062_v36 = vadd.f32 %v5209_v55, %v5208_v51  ;;  %v5298_v35 = vadd.f32 %v5297_v50, %v5296_v14  ;;  %v5211_v56 = vpop.f32.mrb[46].mxu0  ;;  %v5299_v42 = vpop.f32.mrb[46].mxu1  ;;  %v6523_v51 = vld [vmem:[%s9303_s1 + $0x3e8] sm:$0xff]   ;;  %v6527_v55 = vld [vmem:[%s9303_s1 + $0x3f0] sm:$0xff]  }
 0x175   : > { %v5212_v58 = vpop.f32.mrb[47].mxu0  ;;  %v5300_v8 = vpop.f32.mrb[47].mxu1  ;;  %5917 = vmatpush3.bf16.msra.mxu1 %v6515_v57 }
 0x176   : > { %v8067_v26 = vadd.f32 %v5212_v58, %v5211_v56  ;;  %v5301_v60 = vadd.f32 %v5300_v8, %v5299_v42  ;;  %5918 = vmatprep.subr.bf16.mxu1 %v6519_v11  ;;  %v8070_v33 = vadd.f32 %v5298_v35, %v7976_v30  ;;  %v6524_v30 = vld [vmem:[%s9303_s1 + $0x3a8] sm:$0xff]  }
 0x177   : > { %2806 = vmatmul.mubr.bf16.gmra.mrb[152].mxu0 %v7508_v61  ;;  %2903 = vmatmul.mubr.bf16.gmra.mrb[152].mxu1 %v7515_v3 }
 0x178   : > { %2813 = vmatprep.mubr.bf16.mxu0 %v7519_v20  ;;  %2910 = vmatprep.mubr.bf16.mxu1 %v7526_v59  ;;  %v8083_v57 = vadd.f32 %v5301_v60, %v7981_v43 }
 0x179   : > { %5919 = vmatpush3.bf16.msra.mxu1 %v6520_v31  ;;  %v6528_v31 = vld [vmem:[%s9303_s1 + $0x3b0] sm:$0xff]  }
 0x17a   : > { %v5302_v14 = vpop.f32.mrb[48].mxu1  ;;  %v5366_v11 = vpop.f32.mrb[48].mxu0  ;;  %5920 = vmatprep.subr.bf16.mxu1 %v6523_v51 }
 0x17b   : > { %v5303_v50 = vpop.f32.mrb[49].mxu1  ;;  %v5367_v35 = vpop.f32.mrb[49].mxu0 }
 0x17c   : > { %v5304_v56 = vadd.f32 %v5303_v50, %v5302_v14  ;;  %v5368_v42 = vadd.f32 %v5367_v35, %v5366_v11  ;;  %v5305_v58 = vpop.f32.mrb[50].mxu1  ;;  %v5369_v60 = vpop.f32.mrb[50].mxu0  ;;  %v6531_v14 = vld [vmem:[%s9303_s1 + $0x3f8] sm:$0xff]  }
 0x17d   : > { %v5306_v43 = vpop.f32.mrb[51].mxu1  ;;  %v5370_v8 = vpop.f32.mrb[51].mxu0  ;;  %5921 = vmatpush3.bf16.msra.mxu1 %v6524_v30  ;;  %v4108_v30 = vld [vmem:[%s8106_s25 + $0x8] sm:$0xff] }
 0x17e   : > { %v8096_v59 = vadd.f32 %v5304_v56, %v7996_v47  ;;  %v8099_v51 = vadd.f32 %v5368_v42, %v7930_v28  ;;  %v5307_v20 = vadd.f32 %v5306_v43, %v5305_v58  ;;  %v5371_v3 = vadd.f32 %v5370_v8, %v5369_v60  ;;  %5922 = vmatprep.subr.bf16.mxu1 %v6527_v55  ;;  %v4107_v47 = vld [vmem:[%s8106_s25] sm:$0xff]  ;;  %v6532_v55 = vld [vmem:[%s9303_s1 + $0x3b8] sm:$0xff]  }
 0x17f   : > { %2814 = vmatmul.mubr.bf16.gmra.mrb[156].mxu0 %v7554_v16  ;;  %2911 = vmatmul.mubr.bf16.gmra.mrb[156].mxu1 %v7561_v5  ;;  %v8121_v56 = vpack.c.bf16 %v4108_v30, %v4107_v47 }
 0x180   : > { %9543 = vst [vmem:[#allocation39_spill] sm:$0xff] %v8099_v51  ;;  %v8111_v28 = vadd.f32 %v5307_v20, %v7998_v37  ;;  %v8114_v11 = vadd.f32 %v5371_v3, %v7940_v49  ;;  %2821 = vmatprep.mubr.bf16.mxu0 %v7565_v32  ;;  %2918 = vmatprep.mubr.bf16.mxu1 %v7572_v63 }
 0x181   : > { %5923 = vmatpush3.bf16.msra.mxu1 %v6528_v31 }
 0x182   : > { %9544 = vst [vmem:[#allocation58_spill] sm:$0xff] %v8114_v11  ;;  %v5308_v50 = vpop.f32.mrb[52].mxu1  ;;  %v5372_v35 = vpop.f32.mrb[52].mxu0  ;;  %5924 = vmatprep.subr.bf16.mxu1 %v6531_v14  ;;  %v360_v14 = vld [vmem:[%s6786_s23 + $0x190] sm:$0x11] }
 0x183   : > { %v5309_v20 = vpop.f32.mrb[53].mxu1  ;;  %v5373_v37 = vpop.f32.mrb[53].mxu0 }
 0x184   : > { %v5310_v42 = vadd.f32 %v5309_v20, %v5308_v50  ;;  %v5374_v3 = vadd.f32 %v5373_v37, %v5372_v35  ;;  %v5311_v49 = vpop.f32.mrb[54].mxu1  ;;  %v5375_v58 = vpop.f32.mrb[54].mxu0 }
 0x185   : > { %v5312_v60 = vpop.f32.mrb[55].mxu1  ;;  %v5376_v43 = vpop.f32.mrb[55].mxu0  ;;  %5925 = vmatpush3.bf16.msra.mxu1 %v6532_v55 }
 0x186   : > { %v8124_v8 = vadd.f32 %v5310_v42, %v8010_v25  ;;  %v8127_v31 = vadd.f32 %v5374_v3, %v7953_v53  ;;  %v5313_v11 = vadd.f32 %v5312_v60, %v5311_v49  ;;  %v5377_v51 = vadd.f32 %v5376_v43, %v5375_v58  ;;  %6239 = vmatprep.subr.bf16.mxu1 %v8121_v56 }
 0x187   : > { %2822 = vmatmul.mubr.bf16.gmra.mrb[160].mxu0 %v7594_v39  ;;  %2919 = vmatmul.mubr.bf16.gmra.mrb[160].mxu1 %v7601_v19  ;;  %v8141_v53 = vcombine.high %v360_v14, %v360_v14  ;;  %v1034_v25 = vshll.u32 %v7979_v52, 16 }
 0x188   : > { %9545 = vst [vmem:[#allocation59_spill] sm:$0xff] %v8127_v31  ;;  %v8134_v47 = vadd.f32 %v5313_v11, %v8015_v62  ;;  %v8137_v30 = vadd.f32 %v5377_v51, %v7960_v9  ;;  %2829 = vmatprep.mubr.bf16.mxu0 %v7605_v18  ;;  %2926 = vmatprep.mubr.bf16.mxu1 %v7612_v34  ;;  %v1032_v9 = vshrl.u32 %v7979_v52, 16 }
 0x189   : > { %v1036_v51 = vrot.slane %v1034_v25, 1  ;;  %v1039_v58 = vshll.u32 %v8141_v53, 16 }
 0x18a   : > { %9546 = vst [vmem:[#allocation60_spill] sm:$0xff] %v8137_v30  ;;  %v5314_v55 = vpop.f32.mrb[56].mxu1  ;;  %v5378_v50 = vpop.f32.mrb[56].mxu0 }
 0x18b   : > { %v5315_v35 = vpop.f32.mrb[57].mxu1  ;;  %v5379_v20 = vpop.f32.mrb[57].mxu0  ;;  %v1037_v25 = vor.u32 %v1036_v51, %v1032_v9 }
 0x18c   : > { %v5316_v37 = vadd.f32 %v5315_v35, %v5314_v55  ;;  %v5380_v42 = vadd.f32 %v5379_v20, %v5378_v50  ;;  %v5317_v3 = vpop.f32.mrb[58].mxu1  ;;  %v5381_v62 = vpop.f32.mrb[58].mxu0  ;;  %v1041_v35 = vrot.slane %v1039_v58, 1 }
 0x18d   : > { %v5318_v11 = vpop.f32.mrb[59].mxu1  ;;  %v5382_v49 = vpop.f32.mrb[59].mxu0 }
 0x18e   : > { %v8147_v60 = vadd.f32 %v5316_v37, %v8036_v12  ;;  %v8150_v43 = vadd.f32 %v5380_v42, %v7967_v22  ;;  %v5319_v30 = vadd.f32 %v5318_v11, %v5317_v3  ;;  %v5383_v31 = vadd.f32 %v5382_v49, %v5381_v62 }
 0x18f   : > { %2830 = vmatmul.mubr.bf16.gmra.mrb[164].mxu0 %v7624_v15  ;;  %2927 = vmatmul.mubr.bf16.gmra.mrb[164].mxu1 %v7631_v4  ;;  %v8162_v12 = vcombine.low %v360_v14, %v360_v14  ;;  %v1022_v22 = vshll.u32 %v7994_v17, 16 }
 0x190   : > { %9547 = vst [vmem:[#allocation61_spill] sm:$0xff] %v8150_v43  ;;  %v8155_v55 = vadd.f32 %v5319_v30, %v8041_v1  ;;  %v8158_v50 = vadd.f32 %v5383_v31, %v7974_v54  ;;  %2837 = vmatprep.mubr.bf16.mxu0 %v7634_v2  ;;  %2934 = vmatprep.mubr.bf16.mxu1 %v7637_v24  ;;  %v1020_v1 = vshrl.u32 %v7994_v17, 16 }
 0x191   : > { %v1024_v11 = vrot.slane %v1022_v22, 1  ;;  %v1027_v49 = vshll.u32 %v8162_v12, 16  ;;  %v8168_v43 = vsel %vm634_vm0, %v1037_v25, %v1041_v35 }
 0x192   : > { %9548 = vst [vmem:[#allocation62_spill] sm:$0xff] %v8158_v50  ;;  %v5320_v20 = vpop.f32.mrb[60].mxu1  ;;  %v5384_v37 = vpop.f32.mrb[60].mxu0 }
 0x193   : > { %v5321_v42 = vpop.f32.mrb[61].mxu1  ;;  %v5385_v3 = vpop.f32.mrb[61].mxu0  ;;  %v1029_v25 = vrot.slane %v1027_v49, 1  ;;  %v9551_v49 = vld [vmem:[#allocation53_spill] sm:$0xff] }
 0x194   : > { %v5322_v30 = vadd.f32 %v5321_v42, %v5320_v20  ;;  %v5386_v62 = vadd.f32 %v5385_v3, %v5384_v37  ;;  %v5323_v54 = vpop.f32.mrb[62].mxu1  ;;  %v5387_v31 = vpop.f32.mrb[62].mxu0 }
 0x195   : > { %v5324_v50 = vpop.f32.mrb[63].mxu1  ;;  %v5388_v14 = vpop.f32.mrb[63].mxu0 }
 0x196   : > { %v8171_v9 = vadd.f32 %v5322_v30, %v8062_v36  ;;  %v8174_v51 = vadd.f32 %v5386_v62, %v7984_v48  ;;  %v5325_v58 = vadd.f32 %v5324_v50, %v5323_v54  ;;  %v5389_v24 = vadd.f32 %v5388_v14, %v5387_v31 }
 0x197   : > { %2838 = vmatmul.mubr.bf16.gmra.mrb[168].mxu0 %v7654_v10  ;;  %2935 = vmatmul.mubr.bf16.gmra.mrb[168].mxu1 %v7657_v44  ;;  %v1025_v36 = vor.u32 %v1024_v11, %v1020_v1 }
 0x198   : > { %v8179_v22 = vadd.f32 %v5325_v58, %v8067_v26  ;;  %v8182_v20 = vadd.f32 %v5389_v24, %v7991_v0  ;;  %2845 = vmatprep.mubr.bf16.mxu0 %v8168_v43  ;;  %2942 = vmatprep.mubr.bf16.mxu1 %v7660_v13 }
 0x199   : > { %v8187_v26 = vsel %vm634_vm0, %v1025_v36, %v1029_v25  ;;  %v9553_v36 = vld [vmem:[#allocation23_spill] sm:$0xff]  ;;  %v9554_v25 = vld [vmem:[#allocation24_spill] sm:$0xff] }
 0x19a   : > { %9549 = vst [vmem:[#allocation63_spill] sm:$0xff] %v8182_v20  ;;  %v5326_v48 = vpop.f32.mrb[64].mxu1  ;;  %v5390_v35 = vpop.f32.mrb[64].mxu0 }
 0x19b   : > { %v5327_v50 = vpop.f32.mrb[65].mxu1  ;;  %v5391_v37 = vpop.f32.mrb[65].mxu0 }
 0x19c   : > { %v5328_v42 = vadd.f32 %v5327_v50, %v5326_v48  ;;  %v5392_v3 = vadd.f32 %v5391_v37, %v5390_v35  ;;  %v5329_v30 = vpop.f32.mrb[66].mxu1  ;;  %v5393_v62 = vpop.f32.mrb[66].mxu0 }
 0x19d   : > { %v5330_v54 = vpop.f32.mrb[67].mxu1  ;;  %v5394_v24 = vpop.f32.mrb[67].mxu0 }
 0x19e   : > { %v8190_v0 = vadd.f32 %v5328_v42, %v7837_v29  ;;  %v8193_v31 = vadd.f32 %v5392_v3, %v8001_v6  ;;  %v5331_v1 = vadd.f32 %v5330_v54, %v5329_v30  ;;  %v5395_v11 = vadd.f32 %v5394_v24, %v5393_v62  ;;  %v6518_v30 = vld [vmem:[%s9303_s1 + $0x400] sm:$0xff]  }
 0x19f   : > { %2846 = vmatmul.mubr.bf16.gmra.mrb[172].mxu0 %v8187_v26  ;;  %2943 = vmatmul.mubr.bf16.gmra.mrb[172].mxu1 %v7671_v7  ;;  %v9555_v24 = vld [vmem:[#allocation7_spill] sm:$0xff] }
 0x1a0   : > { %9550 = vst [vmem:[#allocation64_spill] sm:$0xff] %v8193_v31  ;;  %v8198_v14 = vadd.f32 %v5331_v1, %v9551_v49  ;;  %v8201_v58 = vadd.f32 %v5395_v11, %v8008_v21  ;;  %2950 = vmatprep.mubr.bf16.mxu1 %v9553_v36  ;;  %3528 = vmatprep.mubr.bf16.mxu0 %v9554_v25  ;;  %v6521_v21 = vld [vmem:[%s9303_s1 + $0x448] sm:$0xff]   ;;  %v9561_v31 = vld [vmem:[#allocation25_spill] sm:$0xff] }
 0x1a2   : > { %9552 = vst [vmem:[#allocation53_spill] sm:$0xff] %v8201_v58  ;;  %v5332_v29 = vpop.f32.mrb[68].mxu1  ;;  %v5396_v48 = vpop.f32.mrb[68].mxu0 }
 0x1a3   : > { %v5333_v6 = vpop.f32.mrb[69].mxu1  ;;  %v5397_v35 = vpop.f32.mrb[69].mxu0 }
 0x1a4   : > { %v5334_v50 = vadd.f32 %v5333_v6, %v5332_v29  ;;  %v5398_v37 = vadd.f32 %v5397_v35, %v5396_v48  ;;  %v5335_v42 = vpop.f32.mrb[70].mxu1  ;;  %v5399_v3 = vpop.f32.mrb[70].mxu0  ;;  %v9557_v29 = vld [vmem:[#allocation14_spill] sm:$0xff]  ;;  %v9558_v48 = vld [vmem:[#allocation16_spill] sm:$0xff] }
 0x1a5   : > { %v5336_v62 = vpop.f32.mrb[71].mxu1  ;;  %v5400_v54 = vpop.f32.mrb[71].mxu0  ;;  %v9559_v6 = vld [vmem:[#allocation54_spill] sm:$0xff] }
 0x1a6   : > { %v8212_v1 = vadd.f32 %v5334_v50, %v9555_v24  ;;  %v8215_v11 = vadd.f32 %v5398_v37, %v8021_v45  ;;  %v5337_v49 = vadd.f32 %v5336_v62, %v5335_v42  ;;  %v5401_v25 = vadd.f32 %v5400_v54, %v5399_v3  ;;  %v6522_v45 = vld [vmem:[%s9303_s1 + $0x408] sm:$0xff]   ;;  %v9562_v50 = vld [vmem:[#allocation26_spill] sm:$0xff]  ;;  %v6525_v37 = vld [vmem:[%s9303_s1 + $0x450] sm:$0xff]  }
 0x1a7   : > { %2951 = vmatmul.mubr.bf16.gmra.mrb[176].mxu1 %v9557_v29  ;;  %3529 = vmatmul.mubr.bf16.vlgmr.msra.gmra.mrb[176].mxu0 %v9558_v48 }
 0x1a8   : > { %9556 = vst [vmem:[#allocation23_spill] sm:$0xff] %v8215_v11  ;;  %v8220_v35 = vadd.f32 %v5337_v49, %v9559_v6  ;;  %v8223_v58 = vadd.f32 %v5401_v25, %v8028_v40  ;;  %6023 = vmatpush3.bf16.msra.mxu0 %v6518_v30  ;;  %2958 = vmatprep.mubr.bf16.mxu1 %v9561_v31  ;;  %v9563_v6 = vld [vmem:[#allocation8_spill] sm:$0xff] }
 0x1a9   : > { %3536 = vmatprep.mubr.bf16.mxu0 %v9562_v50  ;;  %6024 = vmatprep.subr.bf16.mxu0 %v6521_v21  ;;  %v6526_v21 = vld [vmem:[%s9303_s1 + $0x410] sm:$0xff]  }
 0x1aa   : > { %9560 = vst [vmem:[#allocation24_spill] sm:$0xff] %v8223_v58  ;;  %v5338_v42 = vpop.f32.mrb[72].mxu1  ;;  %v5402_v3 = vpop.f32.mrb[72].mxu0 }
 0x1ab   : > { %v5339_v62 = vpop.f32.mrb[73].mxu1  ;;  %v5403_v54 = vpop.f32.mrb[73].mxu0 }
 0x1ac   : > { %v5340_v40 = vadd.f32 %v5339_v62, %v5338_v42  ;;  %v5404_v24 = vadd.f32 %v5403_v54, %v5402_v3  ;;  %v5341_v30 = vpop.f32.mrb[74].mxu1  ;;  %v5405_v49 = vpop.f32.mrb[74].mxu0  ;;  %6025 = vmatpush3.bf16.msra.mxu0 %v6522_v45  ;;  %v6529_v42 = vld [vmem:[%s9303_s1 + $0x458] sm:$0xff]   ;;  %v9566_v3 = vld [vmem:[#allocation21_spill] sm:$0xff] }
 0x1ad   : > { %v5342_v25 = vpop.f32.mrb[75].mxu1  ;;  %v5406_v48 = vpop.f32.mrb[75].mxu0  ;;  %6026 = vmatprep.subr.bf16.mxu0 %v6525_v37  ;;  %v9565_v45 = vld [vmem:[#allocation18_spill] sm:$0xff]  ;;  %v9567_v37 = vld [vmem:[#allocation55_spill] sm:$0xff] }
 0x1ae   : > { %v8237_v50 = vadd.f32 %v5340_v40, %v9563_v6  ;;  %v8240_v58 = vadd.f32 %v5404_v24, %v8047_v38  ;;  %v5343_v11 = vadd.f32 %v5342_v25, %v5341_v30  ;;  %v5407_v31 = vadd.f32 %v5406_v48, %v5405_v49  ;;  %v9569_v40 = vld [vmem:[#allocation28_spill] sm:$0xff]  ;;  %v9570_v38 = vld [vmem:[#allocation30_spill] sm:$0xff] }
 0x1af   : > { %2959 = vmatmul.mubr.bf16.gmra.mrb[180].mxu1 %v9565_v45  ;;  %3537 = vmatmul.mubr.bf16.gmra.mrb[180].mxu0 %v9566_v3  ;;  %v6530_v24 = vld [vmem:[%s9303_s1 + $0x418] sm:$0xff]  }
 0x1b0   : > { %9564 = vst [vmem:[#allocation7_spill] sm:$0xff] %v8240_v58  ;;  %v8248_v62 = vadd.f32 %v5343_v11, %v9567_v37  ;;  %v8251_v54 = vadd.f32 %v5407_v31, %v8054_v41  ;;  %2966 = vmatprep.mubr.bf16.mxu1 %v9569_v40  ;;  %3544 = vmatprep.mubr.bf16.mxu0 %v9570_v38  ;;  %v6533_v11 = vld [vmem:[%s9303_s1 + $0x460] sm:$0xff]  }
 0x1b1   : > { %6027 = vmatpush3.bf16.msra.mxu0 %v6526_v21  ;;  %v6534_v38 = vld [vmem:[%s9303_s1 + $0x420] sm:$0xff]  }
 0x1b2   : > { %9568 = vst [vmem:[#allocation16_spill] sm:$0xff] %v8251_v54  ;;  %v5344_v30 = vpop.f32.mrb[76].mxu1  ;;  %v5408_v49 = vpop.f32.mrb[76].mxu0  ;;  %6028 = vmatprep.subr.bf16.mxu0 %v6529_v42  ;;  %v9571_v54 = vld [vmem:[#allocation56_spill] sm:$0xff] }
 0x1b3   : > { %v5345_v25 = vpop.f32.mrb[77].mxu1  ;;  %v5409_v48 = vpop.f32.mrb[77].mxu0 }
 0x1b4   : > { %v5346_v41 = vadd.f32 %v5345_v25, %v5344_v30  ;;  %v5410_v31 = vadd.f32 %v5409_v48, %v5408_v49  ;;  %v5347_v6 = vpop.f32.mrb[78].mxu1  ;;  %v5411_v3 = vpop.f32.mrb[78].mxu0  ;;  %v6535_v30 = vld [vmem:[%s9303_s1 + $0x468] sm:$0xff]   ;;  %v9573_v49 = vld [vmem:[#allocation31_spill] sm:$0xff]  ;;  %v9575_v25 = vld [vmem:[#allocation57_spill] sm:$0xff] }
 0x1b5   : > { %v5348_v37 = vpop.f32.mrb[79].mxu1  ;;  %v5412_v21 = vpop.f32.mrb[79].mxu0  ;;  %6029 = vmatpush3.bf16.msra.mxu0 %v6530_v24  ;;  %v9574_v24 = vld [vmem:[#allocation35_spill] sm:$0xff] }
 0x1b6   : > { %v8265_v42 = vadd.f32 %v5346_v41, %v9571_v54  ;;  %v8268_v58 = vadd.f32 %v5410_v31, %v8070_v33  ;;  %v5349_v40 = vadd.f32 %v5348_v37, %v5347_v6  ;;  %v5413_v45 = vadd.f32 %v5412_v21, %v5411_v3  ;;  %6030 = vmatprep.subr.bf16.mxu0 %v6533_v11  ;;  %v9577_v41 = vld [vmem:[#allocation32_spill] sm:$0xff]  ;;  %v6576_v33 = vld [vmem:[%s6786_s23 + $0x7c] ss:$8 sps:$4 sm:$0xff]  }
 0x1b7   : > { %2967 = vmatmul.mubr.bf16.gmra.mrb[184].mxu1 %v9573_v49  ;;  %3545 = vmatmul.mubr.bf16.gmra.mrb[184].mxu0 %v9574_v24  ;;  %v6536_v11 = vld [vmem:[%s9303_s1 + $0x428] sm:$0xff]  }
 0x1b8   : > { %9572 = vst [vmem:[#allocation54_spill] sm:$0xff] %v8268_v58  ;;  %v8276_v48 = vadd.f32 %v5349_v40, %v9575_v25  ;;  %v8279_v54 = vadd.f32 %v5413_v45, %v8083_v57  ;;  %2974 = vmatprep.mubr.bf16.mxu1 %v9577_v41  ;;  %3552 = vmatprep.mubr.bf16.mxu0 %v6576_v33  ;;  %v6537_v40 = vld [vmem:[%s9303_s1 + $0x470] sm:$0xff]  }
 0x1b9   : > { %6031 = vmatpush3.bf16.msra.mxu0 %v6534_v38  ;;  %v6578_v41 = vld [vmem:[%s6786_s23 + $0x94] ss:$8 sps:$4 sm:$0xff]  }
 0x1ba   : > { %9576 = vst [vmem:[#allocation26_spill] sm:$0xff] %v8279_v54  ;;  %v5414_v31 = vpop.f32.mrb[80].mxu0  ;;  %v5478_v6 = vpop.f32.mrb[80].mxu1  ;;  %6032 = vmatprep.subr.bf16.mxu0 %v6535_v30  ;;  %v6538_v30 = vld [vmem:[%s9303_s1 + $0x430] sm:$0xff]  }
 0x1bb   : > { %v5415_v3 = vpop.f32.mrb[81].mxu0  ;;  %v5479_v57 = vpop.f32.mrb[81].mxu1 }
 0x1bc   : > { %v5416_v45 = vadd.f32 %v5415_v3, %v5414_v31  ;;  %v5417_v37 = vpop.f32.mrb[82].mxu0  ;;  %v8289_v21 = vadd.f32 %v5479_v57, %v5478_v6  ;;  %v5481_v38 = vpop.f32.mrb[82].mxu1  ;;  %v6539_v31 = vld [vmem:[%s9303_s1 + $0x478] sm:$0xff]   ;;  %v9579_v6 = vld [vmem:[#allocation36_spill] sm:$0xff] }
 0x1bd   : > { %v5418_v24 = vpop.f32.mrb[83].mxu0  ;;  %v5482_v25 = vpop.f32.mrb[83].mxu1  ;;  %6033 = vmatpush3.bf16.msra.mxu0 %v6536_v11  ;;  %v6577_v3 = vld [vmem:[%s6786_s23 + $0x78] ss:$8 sps:$4 sm:$0xff]   ;;  %v9581_v57 = vld [vmem:[#allocation40_spill] sm:$0xff] }
 0x1be   : > { %v8295_v33 = vadd.f32 %v5416_v45, %v8096_v59  ;;  %v5419_v54 = vadd.f32 %v5418_v24, %v5417_v37  ;;  %v8297_v58 = vadd.f32 %v5482_v25, %v5481_v38  ;;  %6034 = vmatprep.subr.bf16.mxu0 %v6537_v40  ;;  %v6540_v59 = vld [vmem:[%s9303_s1 + $0x438] sm:$0xff]  }
 0x1bf   : > { %2975 = vmatmul.mubr.bf16.gmra.mrb[188].mxu1 %v9579_v6  ;;  %3553 = vmatmul.mubr.bf16.gmra.mrb[188].mxu0 %v6577_v3 }
 0x1c0   : > { %9578 = vst [vmem:[#allocation8_spill] sm:$0xff] %v8295_v33  ;;  %v8305_v11 = vadd.f32 %v5419_v54, %v8111_v28  ;;  %2982 = vmatprep.mubr.bf16.mxu1 %v9581_v57  ;;  %3560 = vmatprep.mubr.bf16.mxu0 %v6578_v41  ;;  %v9583_v57 = vld [vmem:[#allocation37_spill] sm:$0xff] }
 0x1c1   : > { %6035 = vmatpush3.bf16.msra.mxu0 %v6538_v30 }
 0x1c2   : > { %9580 = vst [vmem:[#allocation21_spill] sm:$0xff] %v8305_v11  ;;  %v5420_v40 = vpop.f32.mrb[84].mxu0  ;;  %v5484_v45 = vpop.f32.mrb[84].mxu1  ;;  %6036 = vmatprep.subr.bf16.mxu0 %v6539_v31  ;;  %v6579_v31 = vld [vmem:[%s6786_s23 + $0x90] ss:$8 sps:$4 sm:$0xff]  }
 0x1c3   : > { %v5421_v37 = vpop.f32.mrb[85].mxu0  ;;  %v5485_v38 = vpop.f32.mrb[85].mxu1 }
 0x1c4   : > { %v5422_v24 = vadd.f32 %v5421_v37, %v5420_v40  ;;  %v5423_v25 = vpop.f32.mrb[86].mxu0  ;;  %v8312_v28 = vadd.f32 %v5485_v38, %v5484_v45  ;;  %v5487_v54 = vpop.f32.mrb[86].mxu1  ;;  %v9585_v40 = vld [vmem:[#allocation42_spill] sm:$0xff]  ;;  %v6580_v45 = vld [vmem:[%s6786_s23 + $0xac] ss:$8 sps:$4 sm:$0xff]  }
 0x1c5   : > { %v5424_v3 = vpop.f32.mrb[87].mxu0  ;;  %v5488_v11 = vpop.f32.mrb[87].mxu1  ;;  %6037 = vmatpush3.bf16.msra.mxu0 %v6540_v59 }
 0x1c6   : > { %v8315_v41 = vadd.f32 %v5422_v24, %v8124_v8  ;;  %v5425_v30 = vadd.f32 %v5424_v3, %v5423_v25  ;;  %v8317_v33 = vadd.f32 %v5488_v11, %v5487_v54 }
 0x1c7   : > { %2983 = vmatmul.mubr.bf16.gmra.mrb[192].mxu1 %v9583_v57  ;;  %3561 = vmatmul.mubr.bf16.gmra.mrb[192].mxu0 %v6579_v31  ;;  %v9616_v57 = vld [vmem:[#allocation38_spill] sm:$0xff] }
 0x1c8   : > { %9582 = vst [vmem:[#allocation55_spill] sm:$0xff] %v8315_v41  ;;  %v8322_v6 = vadd.f32 %v5425_v30, %v8134_v47  ;;  %2990 = vmatprep.mubr.bf16.mxu1 %v9585_v40  ;;  %3568 = vmatprep.mubr.bf16.mxu0 %v6580_v45  ;;  %v9587_v41 = vld [vmem:[#allocation50_spill] sm:$0xff]  ;;  %v6581_v45 = vld [vmem:[%s6786_s23 + $0xa8] ss:$8 sps:$4 sm:$0xff]  }
 0x1ca   : > { %9584 = vst [vmem:[#allocation30_spill] sm:$0xff] %v8322_v6  ;;  %v5426_v37 = vpop.f32.mrb[88].mxu0  ;;  %v5490_v59 = vpop.f32.mrb[88].mxu1 }
 0x1cb   : > { %v5427_v38 = vpop.f32.mrb[89].mxu0  ;;  %v5491_v8 = vpop.f32.mrb[89].mxu1 }
 0x1cc   : > { %v5428_v24 = vadd.f32 %v5427_v38, %v5426_v37  ;;  %v5429_v11 = vpop.f32.mrb[90].mxu0  ;;  %v8326_v25 = vadd.f32 %v5491_v8, %v5490_v59  ;;  %v5493_v54 = vpop.f32.mrb[90].mxu1  ;;  %v9589_v37 = vld [vmem:[#allocation51_spill] sm:$0xff]  ;;  %v1203_v38 = vrot.slane %v7979_v52, 1  ;;  %v1204_v8 = vrot.slane %v8141_v53, 1 }
 0x1cd   : > { %v5430_v3 = vpop.f32.mrb[91].mxu0  ;;  %v5494_v31 = vpop.f32.mrb[91].mxu1  ;;  %v6582_v59 = vld [vmem:[%s6786_s23 + $0xc4] ss:$8 sps:$4 sm:$0xff]  }
 0x1ce   : > { %v8329_v47 = vadd.f32 %v5428_v24, %v8147_v60  ;;  %v5431_v30 = vadd.f32 %v5430_v3, %v5429_v11  ;;  %v8331_v6 = vadd.f32 %v5494_v31, %v5493_v54 }
 0x1cf   : > { %2991 = vmatmul.mubr.bf16.gmra.mrb[196].mxu1 %v9587_v41  ;;  %3569 = vmatmul.mubr.bf16.gmra.mrb[196].mxu0 %v6581_v45  ;;  %v6583_v41 = vld [vmem:[%s6786_s23 + $0xc0] ss:$8 sps:$4 sm:$0xff]  }
 0x1d0   : > { %9586 = vst [vmem:[#allocation56_spill] sm:$0xff] %v8329_v47  ;;  %v8336_v40 = vadd.f32 %v5431_v30, %v8155_v55  ;;  %2998 = vmatprep.mubr.bf16.mxu1 %v9589_v37  ;;  %3576 = vmatprep.mubr.bf16.mxu0 %v6582_v59  ;;  %v8345_v47 = vsel %vm1103_vm1, %v1203_v38, %v1204_v8  ;;  %v9592_v37 = vld [vmem:[#allocation52_spill] sm:$0xff]  ;;  %v1200_v38 = vrot.slane %v7994_v17, 1  ;;  %v1201_v8 = vrot.slane %v8162_v12, 1 }
 0x1d1   : > { %9590 = vst [vmem:[#allocation57_spill] sm:$0xff] %v8345_v47 }
 0x1d2   : > { %9588 = vst [vmem:[#allocation35_spill] sm:$0xff] %v8336_v40  ;;  %v5432_v60 = vpop.f32.mrb[92].mxu0  ;;  %v5496_v24 = vpop.f32.mrb[92].mxu1 }
 0x1d3   : > { %v5433_v11 = vpop.f32.mrb[93].mxu0  ;;  %v5497_v54 = vpop.f32.mrb[93].mxu1 }
 0x1d4   : > { %v5434_v3 = vadd.f32 %v5433_v11, %v5432_v60  ;;  %v5435_v31 = vpop.f32.mrb[94].mxu0  ;;  %v8342_v45 = vadd.f32 %v5497_v54, %v5496_v24  ;;  %v5499_v55 = vpop.f32.mrb[94].mxu1  ;;  %v6584_v24 = vld [vmem:[%s6786_s23 + $0xdc] ss:$8 sps:$4 sm:$0xff]  }
 0x1d5   : > { %v5436_v30 = vpop.f32.mrb[95].mxu0  ;;  %v5500_v40 = vpop.f32.mrb[95].mxu1 }
 0x1d6   : > { %v8348_v52 = vadd.f32 %v5434_v3, %v8171_v9  ;;  %v5437_v53 = vadd.f32 %v5436_v30, %v5435_v31  ;;  %v8350_v59 = vadd.f32 %v5500_v40, %v5499_v55 }
 0x1d7   : > { %2999 = vmatmul.mubr.bf16.gmra.mrb[200].mxu1 %v9592_v37  ;;  %3577 = vmatmul.mubr.bf16.gmra.mrb[200].mxu0 %v6583_v41 }
 0x1d8   : > { %9591 = vst [vmem:[#allocation65_spill] sm:$0xff] %v8348_v52  ;;  %v8355_v60 = vadd.f32 %v5437_v53, %v8179_v22  ;;  %3006 = vmatprep.mubr.bf16.mxu1 %v8345_v47  ;;  %3584 = vmatprep.mubr.bf16.mxu0 %v6584_v24  ;;  %v8364_v22 = vsel %vm1103_vm1, %v1200_v38, %v1201_v8  ;;  %v6586_v38 = vld [vmem:[%s6786_s23 + $0xf4] ss:$8 sps:$4 sm:$0xff]   ;;  %v6587_v52 = vld [vmem:[%s6786_s23 + $0xf0] ss:$8 sps:$4 sm:$0xff]   ;;  %v9601_v47 = vld [vmem:[#allocation11_spill] sm:$0xff] }
 0x1d9   : > { %9594 = vst [vmem:[#allocation67_spill] sm:$0xff] %v8364_v22  ;;  %v9597_v8 = vld [vmem:[#allocation9_spill] sm:$0xff] }
 0x1da   : > { %9593 = vst [vmem:[#allocation66_spill] sm:$0xff] %v8355_v60  ;;  %v5438_v9 = vpop.f32.mrb[96].mxu0  ;;  %v5502_v11 = vpop.f32.mrb[96].mxu1 }
 0x1db   : > { %v5439_v40 = vpop.f32.mrb[97].mxu0  ;;  %v5503_v54 = vpop.f32.mrb[97].mxu1 }
 0x1dc   : > { %v5440_v3 = vadd.f32 %v5439_v40, %v5438_v9  ;;  %v5441_v31 = vpop.f32.mrb[98].mxu0  ;;  %v8361_v41 = vadd.f32 %v5503_v54, %v5502_v11  ;;  %v5505_v55 = vpop.f32.mrb[98].mxu1  ;;  %v6585_v9 = vld [vmem:[%s6786_s23 + $0xd8] ss:$8 sps:$4 sm:$0xff]  }
 0x1dd   : > { %v5442_v30 = vpop.f32.mrb[99].mxu0  ;;  %v5506_v53 = vpop.f32.mrb[99].mxu1 }
 0x1de   : > { %v8367_v17 = vadd.f32 %v5440_v3, %v8190_v0  ;;  %v5443_v12 = vadd.f32 %v5442_v30, %v5441_v31  ;;  %v8369_v24 = vadd.f32 %v5506_v53, %v5505_v55  ;;  %v4109_v3 = vld [vmem:[%s8106_s25 + $0x10] sm:$0xff]  ;;  %v4110_v31 = vld [vmem:[%s8106_s25 + $0x18] sm:$0xff] }
 0x1df   : > { %3007 = vmatmul.mubr.bf16.gmra.mrb[204].mxu1 %v8364_v22  ;;  %3585 = vmatmul.mubr.bf16.gmra.mrb[204].mxu0 %v6585_v9  ;;  %v9599_v22 = vld [vmem:[#allocation10_spill] sm:$0xff] }
 0x1e0   : > { %9595 = vst [vmem:[#allocation68_spill] sm:$0xff] %v8367_v17  ;;  %v8374_v11 = vadd.f32 %v5443_v12, %v8198_v14  ;;  %3592 = vmatprep.mubr.bf16.mxu0 %v6586_v38  ;;  %3689 = vmatprep.mubr.bf16.mxu1 %v9597_v8  ;;  %v6242_v17 = vpack.c.bf16 %v4110_v31, %v4109_v3 }
 0x1e2   : > { %9596 = vst [vmem:[#allocation69_spill] sm:$0xff] %v8374_v11  ;;  %v5444_v40 = vpop.f32.mrb[100].mxu0  ;;  %v5508_v54 = vpop.f32.mrb[100].mxu1 }
 0x1e3   : > { %v5445_v60 = vpop.f32.mrb[101].mxu0  ;;  %v5509_v0 = vpop.f32.mrb[101].mxu1 }
 0x1e4   : > { %v5446_v55 = vadd.f32 %v5445_v60, %v5444_v40  ;;  %v5447_v30 = vpop.f32.mrb[102].mxu0  ;;  %v8380_v53 = vadd.f32 %v5509_v0, %v5508_v54  ;;  %v5511_v14 = vpop.f32.mrb[102].mxu1  ;;  %v4111_v60 = vld [vmem:[%s8106_s25 + $0x20] sm:$0xff]  ;;  %v4112_v40 = vld [vmem:[%s8106_s25 + $0x28] sm:$0xff] }
 0x1e5   : > { %v5448_v12 = vpop.f32.mrb[103].mxu0  ;;  %v5512_v9 = vpop.f32.mrb[103].mxu1  ;;  %v6588_v0 = vld [vmem:[%s6786_s23 + $0x10c] ss:$8 sps:$4 sm:$0xff]   ;;  %v6246_v3 = vpack.c.bf16 %v4112_v40, %v4111_v60  ;;  %v6589_v40 = vld [vmem:[%s6786_s23 + $0x108] ss:$8 sps:$4 sm:$0xff]  }
 0x1e6   : > { %v8383_v38 = vadd.f32 %v5446_v55, %v8212_v1  ;;  %v5449_v8 = vadd.f32 %v5448_v12, %v5447_v30  ;;  %v8385_v11 = vadd.f32 %v5512_v9, %v5511_v14  ;;  %v4113_v30 = vld [vmem:[%s8106_s25 + $0x30] sm:$0xff] }
 0x1e7   : > { %3593 = vmatmul.mubr.bf16.gmra.mrb[208].mxu0 %v6587_v52  ;;  %3690 = vmatmul.mubr.bf16.vlgmr.msra.gmra.mrb[208].mxu1 %v9599_v22  ;;  %v4114_v22 = vld [vmem:[%s8106_s25 + $0x38] sm:$0xff] }
 0x1e8   : > { %9598 = vst [vmem:[#allocation9_spill] sm:$0xff] %v8383_v38  ;;  %v8392_v54 = vadd.f32 %v5449_v8, %v8220_v35  ;;  %3600 = vmatprep.mubr.bf16.mxu0 %v6588_v0  ;;  %3697 = vmatprep.mubr.bf16.mxu1 %v9601_v47  ;;  %v6250_v60 = vpack.c.bf16 %v4114_v22, %v4113_v30  ;;  %v9603_v38 = vld [vmem:[#allocation12_spill] sm:$0xff] }
 0x1e9   : > { %6241 = vmatpush3.bf16.msra.mxu1 %v8121_v56 }
 0x1ea   : > { %9600 = vst [vmem:[#allocation10_spill] sm:$0xff] %v8392_v54  ;;  %v5450_v1 = vpop.f32.mrb[104].mxu0  ;;  %v5514_v55 = vpop.f32.mrb[104].mxu1  ;;  %6243 = vmatprep.subr.bf16.mxu1 %v6242_v17 }
 0x1eb   : > { %v5451_v31 = vpop.f32.mrb[105].mxu0  ;;  %v5515_v52 = vpop.f32.mrb[105].mxu1 }
 0x1ec   : > { %v5452_v14 = vadd.f32 %v5451_v31, %v5450_v1  ;;  %v5453_v12 = vpop.f32.mrb[106].mxu0  ;;  %v8399_v35 = vadd.f32 %v5515_v52, %v5514_v55  ;;  %v5517_v9 = vpop.f32.mrb[106].mxu1  ;;  %v6590_v55 = vld [vmem:[%s6786_s23 + $0x124] ss:$8 sps:$4 sm:$0xff]   ;;  %v9605_v31 = vld [vmem:[#allocation13_spill] sm:$0xff] }
 0x1ed   : > { %v5454_v8 = vpop.f32.mrb[107].mxu0  ;;  %v5518_v0 = vpop.f32.mrb[107].mxu1  ;;  %6245 = vmatpush3.bf16.msra.mxu1 %v6242_v17 }
 0x1ee   : > { %v8402_v56 = vadd.f32 %v5452_v14, %v8237_v50  ;;  %v5455_v47 = vadd.f32 %v5454_v8, %v5453_v12  ;;  %v8404_v54 = vadd.f32 %v5518_v0, %v5517_v9  ;;  %6247 = vmatprep.subr.bf16.mxu1 %v6246_v3 }
 0x1ef   : > { %3601 = vmatmul.mubr.bf16.gmra.mrb[212].mxu0 %v6589_v40  ;;  %3698 = vmatmul.mubr.bf16.gmra.mrb[212].mxu1 %v9603_v38  ;;  %v9607_v40 = vld [vmem:[#allocation15_spill] sm:$0xff] }
 0x1f0   : > { %9602 = vst [vmem:[#allocation11_spill] sm:$0xff] %v8402_v56  ;;  %v8409_v1 = vadd.f32 %v5455_v47, %v8248_v62  ;;  %3608 = vmatprep.mubr.bf16.mxu0 %v6590_v55  ;;  %3705 = vmatprep.mubr.bf16.mxu1 %v9605_v31  ;;  %v6591_v47 = vld [vmem:[%s6786_s23 + $0x120] ss:$8 sps:$4 sm:$0xff]   ;;  %v6592_v31 = vld [vmem:[%s6786_s23 + $0x13c] ss:$8 sps:$4 sm:$0xff]  }
 0x1f1   : > { %6249 = vmatpush3.bf16.msra.mxu1 %v6246_v3 }
 0x1f2   : > { %9604 = vst [vmem:[#allocation12_spill] sm:$0xff] %v8409_v1  ;;  %v5456_v50 = vpop.f32.mrb[108].mxu0  ;;  %v5520_v17 = vpop.f32.mrb[108].mxu1  ;;  %6251 = vmatprep.subr.bf16.mxu1 %v6250_v60 }
 0x1f3   : > { %v5457_v52 = vpop.f32.mrb[109].mxu0  ;;  %v5521_v14 = vpop.f32.mrb[109].mxu1 }
 0x1f4   : > { %v5458_v30 = vadd.f32 %v5457_v52, %v5456_v50  ;;  %v5459_v22 = vpop.f32.mrb[110].mxu0  ;;  %v8413_v12 = vadd.f32 %v5521_v14, %v5520_v17  ;;  %v5523_v38 = vpop.f32.mrb[110].mxu1  ;;  %v9609_v50 = vld [vmem:[#allocation17_spill] sm:$0xff] }
 0x1f5   : > { %v5460_v9 = vpop.f32.mrb[111].mxu0  ;;  %v5524_v62 = vpop.f32.mrb[111].mxu1  ;;  %6253 = vmatpush3.bf16.msra.mxu1 %v6250_v60 }
 0x1f6   : > { %v8416_v8 = vadd.f32 %v5458_v30, %v8265_v42  ;;  %v5461_v0 = vadd.f32 %v5460_v9, %v5459_v22  ;;  %v8418_v3 = vadd.f32 %v5524_v62, %v5523_v38 }
 0x1f7   : > { %3609 = vmatmul.mubr.bf16.gmra.mrb[216].mxu0 %v6591_v47  ;;  %3706 = vmatmul.mubr.bf16.gmra.mrb[216].mxu1 %v9607_v40  ;;  %v6593_v40 = vld [vmem:[%s6786_s23 + $0x138] ss:$8 sps:$4 sm:$0xff]  }
 0x1f8   : > { %9606 = vst [vmem:[#allocation13_spill] sm:$0xff] %v8416_v8  ;;  %v8423_v55 = vadd.f32 %v5461_v0, %v8276_v48  ;;  %3616 = vmatprep.mubr.bf16.mxu0 %v6592_v31  ;;  %3713 = vmatprep.mubr.bf16.mxu1 %v9609_v50  ;;  %v9610_v31 = vld [vmem:[#allocation20_spill] sm:$0xff] }
 0x1fa   : > { %9608 = vst [vmem:[#allocation15_spill] sm:$0xff] %v8423_v55  ;;  %v5590_v17 = vpop.f32.mrb[112].mxu0  ;;  %v5526_v60 = vpop.f32.mrb[112].mxu1 }
 0x1fb   : > { %v5591_v42 = vpop.f32.mrb[113].mxu0  ;;  %v5527_v52 = vpop.f32.mrb[113].mxu1 }
 0x1fc   : > { %v5592_v14 = vadd.f32 %v5591_v42, %v5590_v17  ;;  %v5593_v30 = vpop.f32.mrb[114].mxu0  ;;  %v8427_v22 = vadd.f32 %v5527_v52, %v5526_v60  ;;  %v5529_v38 = vpop.f32.mrb[114].mxu1  ;;  %v6594_v17 = vld [vmem:[%s6786_s23 + $0x154] ss:$8 sps:$4 sm:$0xff]  }
 0x1fd   : > { %v5594_v9 = vpop.f32.mrb[115].mxu0  ;;  %v5530_v62 = vpop.f32.mrb[115].mxu1  ;;  %v9611_v60 = vld [vmem:[#allocation22_spill] sm:$0xff] }
 0x1fe   : > { %v8430_v48 = vadd.f32 %v5592_v14, %v8289_v21  ;;  %v5595_v0 = vadd.f32 %v5594_v9, %v5593_v30  ;;  %v8432_v47 = vadd.f32 %v5530_v62, %v5529_v38 }
 0x1ff   : > { %3617 = vmatmul.mubr.bf16.gmra.mrb[220].mxu0 %v6593_v40  ;;  %3714 = vmatmul.mubr.bf16.gmra.mrb[220].mxu1 %v9610_v31 }
 0x200   : > { %v8437_v50 = vadd.f32 %v5595_v0, %v8297_v58  ;;  %3624 = vmatprep.mubr.bf16.mxu0 %v6594_v17  ;;  %3721 = vmatprep.mubr.bf16.mxu1 %v9611_v60  ;;  %v6595_v17 = vld [vmem:[%s6786_s23 + $0x150] ss:$8 sps:$4 sm:$0xff]   ;;  %v9612_v60 = vld [vmem:[#allocation27_spill] sm:$0xff] }
 0x202   : > { %v5596_v42 = vpop.f32.mrb[116].mxu0  ;;  %v5532_v52 = vpop.f32.mrb[116].mxu1 }
 0x203   : > { %v5597_v21 = vpop.f32.mrb[117].mxu0  ;;  %v5533_v14 = vpop.f32.mrb[117].mxu1 }
 0x204   : > { %v5598_v30 = vadd.f32 %v5597_v21, %v5596_v42  ;;  %v5599_v38 = vpop.f32.mrb[118].mxu0  ;;  %v8441_v9 = vadd.f32 %v5533_v14, %v5532_v52  ;;  %v5535_v62 = vpop.f32.mrb[118].mxu1  ;;  %v6596_v42 = vld [vmem:[%s6786_s23 + $0x16c] ss:$8 sps:$4 sm:$0xff]  }
 0x205   : > { %v5600_v40 = vpop.f32.mrb[119].mxu0  ;;  %v5536_v31 = vpop.f32.mrb[119].mxu1  ;;  %v9613_v52 = vld [vmem:[#allocation29_spill] sm:$0xff] }
 0x206   : > { %v8444_v58 = vadd.f32 %v5598_v30, %v8312_v28  ;;  %v5601_v0 = vadd.f32 %v5600_v40, %v5599_v38  ;;  %v8446_v55 = vadd.f32 %v5536_v31, %v5535_v62 }
 0x207   : > { %3625 = vmatmul.mubr.bf16.gmra.mrb[224].mxu0 %v6595_v17  ;;  %3722 = vmatmul.mubr.bf16.gmra.mrb[224].mxu1 %v9612_v60 }
 0x208   : > { %v8451_v8 = vadd.f32 %v5601_v0, %v8317_v33  ;;  %3632 = vmatprep.mubr.bf16.mxu0 %v6596_v42  ;;  %3729 = vmatprep.mubr.bf16.mxu1 %v9613_v52  ;;  %v6597_v42 = vld [vmem:[%s6786_s23 + $0x168] ss:$8 sps:$4 sm:$0xff]  }
 0x209   : > { %v9614_v52 = vld [vmem:[#allocation33_spill] sm:$0xff] }
 0x20a   : > { %v5602_v21 = vpop.f32.mrb[120].mxu0  ;;  %v5538_v14 = vpop.f32.mrb[120].mxu1 }
 0x20b   : > { %v5603_v28 = vpop.f32.mrb[121].mxu0  ;;  %v5539_v30 = vpop.f32.mrb[121].mxu1 }
 0x20c   : > { %v5604_v38 = vadd.f32 %v5603_v28, %v5602_v21  ;;  %v5605_v62 = vpop.f32.mrb[122].mxu0  ;;  %v8455_v40 = vadd.f32 %v5539_v30, %v5538_v14  ;;  %v5541_v31 = vpop.f32.mrb[122].mxu1  ;;  %v6598_v21 = vld [vmem:[%s6786_s23 + $0x184] ss:$8 sps:$4 sm:$0xff]   ;;  %v9615_v14 = vld [vmem:[#allocation34_spill] sm:$0xff] }
 0x20d   : > { %v5606_v17 = vpop.f32.mrb[123].mxu0  ;;  %v5542_v60 = vpop.f32.mrb[123].mxu1 }
 0x20e   : > { %v8458_v33 = vadd.f32 %v5604_v38, %v8326_v25  ;;  %v5607_v0 = vadd.f32 %v5606_v17, %v5605_v62  ;;  %v8460_v1 = vadd.f32 %v5542_v60, %v5541_v31 }
 0x20f   : > { %3633 = vmatmul.mubr.bf16.gmra.mrb[228].mxu0 %v6597_v42  ;;  %3730 = vmatmul.mubr.bf16.gmra.mrb[228].mxu1 %v9614_v52  ;;  %v8472_v42 = vld [vmem:[%s6786_s23 + $0x19c] ss:$8 sps:$4 sm:$0xff]  }
 0x210   : > { %v8465_v56 = vadd.f32 %v5607_v0, %v8331_v6  ;;  %3640 = vmatprep.mubr.bf16.mxu0 %v6598_v21  ;;  %3737 = vmatprep.mubr.bf16.mxu1 %v9615_v14  ;;  %v6599_v14 = vld [vmem:[%s6786_s23 + $0x180] ss:$8 sps:$4 sm:$0xff]  }
 0x212   : > { %v5608_v28 = vpop.f32.mrb[124].mxu0  ;;  %v5544_v30 = vpop.f32.mrb[124].mxu1 }
 0x213   : > { %v5609_v25 = vpop.f32.mrb[125].mxu0  ;;  %v5545_v38 = vpop.f32.mrb[125].mxu1 }
 0x214   : > { %v5610_v62 = vadd.f32 %v5609_v25, %v5608_v28  ;;  %v5611_v31 = vpop.f32.mrb[126].mxu0  ;;  %v8469_v17 = vadd.f32 %v5545_v38, %v5544_v30  ;;  %v5547_v60 = vpop.f32.mrb[126].mxu1  ;;  %v9617_v30 = vld [vmem:[#allocation41_spill] sm:$0xff] }
 0x215   : > { %v5612_v52 = vpop.f32.mrb[127].mxu0  ;;  %v5548_v6 = vpop.f32.mrb[127].mxu1 }
 0x216   : > { %v8475_v0 = vadd.f32 %v5610_v62, %v8342_v45  ;;  %v5613_v21 = vadd.f32 %v5612_v52, %v5611_v31  ;;  %v8477_v37 = vadd.f32 %v5548_v6, %v5547_v60  ;;  %v8487_v45 = vld [vmem:[%s6786_s23 + $0x198] ss:$8 sps:$4 sm:$0xff]  }
 0x217   : > { %3641 = vmatmul.mubr.bf16.gmra.mrb[232].mxu0 %v6599_v14  ;;  %3738 = vmatmul.mubr.bf16.gmra.mrb[232].mxu1 %v9616_v57 }
 0x218   : > { %v8482_v28 = vadd.f32 %v5613_v21, %v8350_v59  ;;  %3648 = vmatprep.mubr.bf16.mxu0 %v8472_v42  ;;  %3745 = vmatprep.mubr.bf16.mxu1 %v9617_v30 }
 0x21a   : > { %v5614_v25 = vpop.f32.mrb[128].mxu0  ;;  %v5550_v38 = vpop.f32.mrb[128].mxu1 }
 0x21b   : > { %v5615_v49 = vpop.f32.mrb[129].mxu0  ;;  %v5551_v29 = vpop.f32.mrb[129].mxu1 }
 0x21c   : > { %v5616_v62 = vadd.f32 %v5615_v49, %v5614_v25  ;;  %v5617_v31 = vpop.f32.mrb[130].mxu0  ;;  %v8489_v60 = vadd.f32 %v5551_v29, %v5550_v38  ;;  %v5553_v52 = vpop.f32.mrb[130].mxu1  ;;  %v9619_v49 = vld [vmem:[#allocation43_spill] sm:$0xff]  ;;  %v9620_v29 = vld [vmem:[#allocation44_spill] sm:$0xff] }
 0x21d   : > { %v5618_v6 = vpop.f32.mrb[131].mxu0  ;;  %v5554_v57 = vpop.f32.mrb[131].mxu1 }
 0x21e   : > { %9618 = vst [vmem:[#allocation17_spill] sm:$0xff] %v8489_v60  ;;  %v8492_v59 = vadd.f32 %v5616_v62, %v8361_v41  ;;  %v5619_v21 = vadd.f32 %v5618_v6, %v5617_v31  ;;  %v8494_v14 = vadd.f32 %v5554_v57, %v5553_v52 }
 0x21f   : > { %3649 = vmatmul.mubr.bf16.gmra.mrb[236].mxu0 %v8487_v45  ;;  %3746 = vmatmul.mubr.bf16.gmra.mrb[236].mxu1 %v7398_v23 }
 0x220   : > { %v8499_v30 = vadd.f32 %v5619_v21, %v8369_v24  ;;  %3753 = vmatprep.mubr.bf16.mxu1 %v9619_v49  ;;  %3850 = vmatprep.mubr.bf16.mxu0 %v9620_v29 }
 0x222   : > { %v5620_v25 = vpop.f32.mrb[132].mxu0  ;;  %v5556_v38 = vpop.f32.mrb[132].mxu1 }
 0x223   : > { %v5621_v60 = vpop.f32.mrb[133].mxu0  ;;  %v5557_v20 = vpop.f32.mrb[133].mxu1 }
 0x224   : > { %v5622_v41 = vadd.f32 %v5621_v60, %v5620_v25  ;;  %v5623_v62 = vpop.f32.mrb[134].mxu0  ;;  %v8503_v31 = vadd.f32 %v5557_v20, %v5556_v38  ;;  %v5559_v52 = vpop.f32.mrb[134].mxu1  ;;  %v9622_v60 = vld [vmem:[#allocation45_spill] sm:$0xff]  ;;  %v9623_v20 = vld [vmem:[#allocation46_spill] sm:$0xff] }
 0x225   : > { %v5624_v6 = vpop.f32.mrb[135].mxu0  ;;  %v5560_v57 = vpop.f32.mrb[135].mxu1 }
 0x226   : > { %9621 = vst [vmem:[#allocation20_spill] sm:$0xff] %v8503_v31  ;;  %v8506_v23 = vadd.f32 %v5622_v41, %v8380_v53  ;;  %v5625_v24 = vadd.f32 %v5624_v6, %v5623_v62  ;;  %v8508_v21 = vadd.f32 %v5560_v57, %v5559_v52 }
 0x227   : > { %3754 = vmatmul.mubr.bf16.gmra.mrb[240].mxu1 %v7455_v27  ;;  %3851 = vmatmul.mubr.bf16.vlgmr.msra.gmra.mrb[240].mxu0 %v7462_v46 }
 0x228   : > { %v8513_v49 = vadd.f32 %v5625_v24, %v8385_v11  ;;  %3761 = vmatprep.mubr.bf16.mxu1 %v9622_v60  ;;  %3858 = vmatprep.mubr.bf16.mxu0 %v9623_v20  ;;  %v9625_v24 = vld [vmem:[#allocation47_spill] sm:$0xff]  ;;  %v9626_v20 = vld [vmem:[#allocation48_spill] sm:$0xff] }
 0x22a   : > { %v5626_v29 = vpop.f32.mrb[136].mxu0  ;;  %v5562_v25 = vpop.f32.mrb[136].mxu1 }
 0x22b   : > { %v5627_v38 = vpop.f32.mrb[137].mxu0  ;;  %v5563_v31 = vpop.f32.mrb[137].mxu1 }
 0x22c   : > { %v5628_v53 = vadd.f32 %v5627_v38, %v5626_v29  ;;  %v5629_v41 = vpop.f32.mrb[138].mxu0  ;;  %v8517_v62 = vadd.f32 %v5563_v31, %v5562_v25  ;;  %v5565_v52 = vpop.f32.mrb[138].mxu1  ;;  %v9627_v31 = vld [vmem:[#allocation49_spill] sm:$0xff] }
 0x22d   : > { %v5630_v6 = vpop.f32.mrb[139].mxu0  ;;  %v5566_v27 = vpop.f32.mrb[139].mxu1 }
 0x22e   : > { %9624 = vst [vmem:[#allocation22_spill] sm:$0xff] %v8517_v62  ;;  %v8520_v46 = vadd.f32 %v5628_v53, %v8399_v35  ;;  %v5631_v11 = vadd.f32 %v5630_v6, %v5629_v41  ;;  %v8522_v57 = vadd.f32 %v5566_v27, %v5565_v52 }
 0x22f   : > { %3762 = vmatmul.mubr.bf16.gmra.mrb[244].mxu1 %v7508_v61  ;;  %3859 = vmatmul.mubr.bf16.gmra.mrb[244].mxu0 %v9625_v24 }
 0x230   : > { %v8527_v60 = vadd.f32 %v5631_v11, %v8404_v54  ;;  %3769 = vmatprep.mubr.bf16.mxu1 %v9626_v20  ;;  %3866 = vmatprep.mubr.bf16.mxu0 %v9627_v31 }
 0x232   : > { %v5632_v29 = vpop.f32.mrb[140].mxu0  ;;  %v5568_v25 = vpop.f32.mrb[140].mxu1 }
 0x233   : > { %v5633_v38 = vpop.f32.mrb[141].mxu0  ;;  %v5569_v62 = vpop.f32.mrb[141].mxu1 }
 0x234   : > { %v5634_v35 = vadd.f32 %v5633_v38, %v5632_v29  ;;  %v5635_v53 = vpop.f32.mrb[142].mxu0  ;;  %v8531_v41 = vadd.f32 %v5569_v62, %v5568_v25  ;;  %v5571_v52 = vpop.f32.mrb[142].mxu1 }
 0x235   : > { %v5636_v6 = vpop.f32.mrb[143].mxu0  ;;  %v5572_v61 = vpop.f32.mrb[143].mxu1 }
 0x236   : > { %v8534_v27 = vadd.f32 %v5634_v35, %v8413_v12  ;;  %v5637_v54 = vadd.f32 %v5636_v6, %v5635_v53  ;;  %v8536_v11 = vadd.f32 %v5572_v61, %v5571_v52 }
 0x237   : > { %3770 = vmatmul.mubr.bf16.gmra.mrb[248].mxu1 %v7554_v16  ;;  %3867 = vmatmul.mubr.bf16.gmra.mrb[248].mxu0 %v7561_v5 }
 0x238   : > { %v8541_v24 = vadd.f32 %v5637_v54, %v8418_v3  ;;  %3777 = vmatprep.mubr.bf16.mxu1 %v7565_v32  ;;  %3874 = vmatprep.mubr.bf16.mxu0 %v7572_v63  ;;  %v9628_v32 = vld [vmem:[#allocation39_spill] sm:$0xff] }
 0x23a   : > { %v5638_v62 = vpop.f32.mrb[144].mxu0  ;;  %v5702_v20 = vpop.f32.mrb[144].mxu1 }
 0x23b   : > { %v5639_v31 = vpop.f32.mrb[145].mxu0  ;;  %v5703_v29 = vpop.f32.mrb[145].mxu1 }
 0x23c   : > { %v5640_v12 = vadd.f32 %v5639_v31, %v5638_v62  ;;  %v5704_v25 = vadd.f32 %v5703_v29, %v5702_v20  ;;  %v5641_v38 = vpop.f32.mrb[146].mxu0  ;;  %v5705_v35 = vpop.f32.mrb[146].mxu1 }
 0x23d   : > { %v5642_v53 = vpop.f32.mrb[147].mxu0  ;;  %v5706_v52 = vpop.f32.mrb[147].mxu1 }
 0x23e   : > { %v8546_v16 = vadd.f32 %v5640_v12, %v8427_v22  ;;  %v2889_v5 = vadd.f32 %v5704_v25, %v8430_v48  ;;  %v5643_v3 = vadd.f32 %v5642_v53, %v5641_v38  ;;  %v5707_v6 = vadd.f32 %v5706_v52, %v5705_v35  ;;  %v9629_v22 = vld [vmem:[#allocation58_spill] sm:$0xff]  ;;  %v363_v53 = vld [vmem:[%s6786_s23 + $0x1a8] sm:$0x11]  ;;  %v9630_v52 = vld [vmem:[#allocation59_spill] sm:$0xff]  ;;  %s6604_s23 = sshll.u32 %s6664_s22, 4  ;;  %s6605_s23 = int_to_ptr.vmem [resolvable:$false] %s6604_s23 }
 0x23f   : > { %3778 = vmatmul.mubr.bf16.gmra.mrb[252].mxu1 %v7594_v39  ;;  %3875 = vmatmul.mubr.bf16.gmra.mrb[252].mxu0 %v7601_v19  ;;  %s6606_s25 = scalar_lea.vmem %s6605_s23, 8192  ;;  %p6607_p3 = scmp.lt.s32.totalorder %s9256_s26, %s6605_s23 }
 0x240   : > { %v8552_v63 = vadd.f32 %v2889_v5, %v9628_v32  ;;  %v8555_v61 = vadd.f32 %v5643_v3, %v8432_v47  ;;  %v2892_v54 = vadd.f32 %v5707_v6, %v8437_v50  ;;  %3785 = vmatprep.mubr.bf16.mxu1 %v7605_v18  ;;  %3882 = vmatprep.mubr.bf16.mxu0 %v7612_v34  ;;  %v1058_v32 = vshll.u32 %v8472_v42, 16  ;;  %p6608_p4 = scmp.lt.s32.totalorder %s6606_s25, %s6600_s10 }
 0x242   : > { %v8561_v48 = vadd.f32 %v2892_v54, %v9629_v22  ;;  %v5644_v62 = vpop.f32.mrb[148].mxu0  ;;  %v5708_v39 = vpop.f32.mrb[148].mxu1  ;;  %v9632_v54 = vld [vmem:[#allocation60_spill] sm:$0xff]  ;;  %p6609_p5 = por %p6608_p4, %p6607_p3 }
 0x243   : > { %v5645_v20 = vpop.f32.mrb[149].mxu0  ;;  %v5709_v19 = vpop.f32.mrb[149].mxu1 }
 0x244   : > { %v5646_v31 = vadd.f32 %v5645_v20, %v5644_v62  ;;  %v5710_v29 = vadd.f32 %v5709_v19, %v5708_v39  ;;  %v5647_v12 = vpop.f32.mrb[150].mxu0  ;;  %v5711_v25 = vpop.f32.mrb[150].mxu1  ;;  %p6610_p7 = pnand %p6609_p5, %p6603_p2 }
 0x245   : > { %v5648_v47 = vpop.f32.mrb[151].mxu0  ;;  %v5712_v38 = vpop.f32.mrb[151].mxu1 }
 0x246   : > { %v8564_v50 = vadd.f32 %v5646_v31, %v8441_v9  ;;  %v2897_v18 = vadd.f32 %v5710_v29, %v8444_v58  ;;  %v5649_v34 = vadd.f32 %v5648_v47, %v5647_v12  ;;  %v5713_v35 = vadd.f32 %v5712_v38, %v5711_v25  ;;  %v9631_v9 = vld [vmem:[#allocation19_spill] sm:$0xff] }
 0x247   : > { %3786 = vmatmul.mubr.bf16.gmra.mrb[0].mxu1 %v7624_v15  ;;  %3883 = vmatmul.mubr.bf16.gmra.mrb[0].mxu0 %v7631_v4  ;;  %v8579_v58 = vcombine.high %v363_v53, %v363_v53  ;;  %v1060_v12 = vrot.slane %v1058_v32, 1 }
 0x248   : > { %v8571_v5 = vadd.f32 %v2897_v18, %v9630_v52  ;;  %v8574_v3 = vadd.f32 %v5649_v34, %v8446_v55  ;;  %v2900_v6 = vadd.f32 %v5713_v35, %v8451_v8  ;;  %3793 = vmatprep.mubr.bf16.mxu1 %v7634_v2  ;;  %3890 = vmatprep.mubr.bf16.mxu0 %v9631_v9  ;;  %v1056_v2 = vshrl.u32 %v8472_v42, 16 }
 0x249   : > { %v1063_v25 = vshll.u32 %v8579_v58, 16  ;;  %v1046_v35 = vshll.u32 %v8487_v45, 16  ;;  %v8594_v52 = vcombine.low %v363_v53, %v363_v53 }
 0x24a   : > { %v8583_v15 = vadd.f32 %v2900_v6, %v9632_v54  ;;  %v5650_v4 = vpop.f32.mrb[152].mxu0  ;;  %v5714_v22 = vpop.f32.mrb[152].mxu1  ;;  %v9633_v6 = vld [vmem:[#allocation61_spill] sm:$0xff] }
 0x24b   : > { %v5651_v62 = vpop.f32.mrb[153].mxu0  ;;  %v5715_v39 = vpop.f32.mrb[153].mxu1  ;;  %v1065_v54 = vrot.slane %v1063_v25, 1 }
 0x24c   : > { %v5652_v20 = vadd.f32 %v5651_v62, %v5650_v4  ;;  %v5716_v55 = vadd.f32 %v5715_v39, %v5714_v22  ;;  %v5653_v19 = vpop.f32.mrb[154].mxu0  ;;  %v5717_v31 = vpop.f32.mrb[154].mxu1  ;;  %v9634_v4 = vld [vmem:[#allocation62_spill] sm:$0xff]  ;;  %v1044_v22 = vshrl.u32 %v8487_v45, 16  ;;  %v1048_v62 = vrot.slane %v1046_v35, 1 }
 0x24d   : > { %v5654_v8 = vpop.f32.mrb[155].mxu0  ;;  %v5718_v29 = vpop.f32.mrb[155].mxu1 }
 0x24e   : > { %v8588_v47 = vadd.f32 %v5652_v20, %v8455_v40  ;;  %v2905_v38 = vadd.f32 %v5716_v55, %v8458_v33  ;;  %v5655_v18 = vadd.f32 %v5654_v8, %v5653_v19  ;;  %v5719_v34 = vadd.f32 %v5718_v29, %v5717_v31 }
 0x24f   : > { %3794 = vmatmul.mubr.bf16.gmra.mrb[4].mxu1 %v7654_v10  ;;  %3891 = vmatmul.mubr.bf16.gmra.mrb[4].mxu0 %v7657_v44  ;;  %v1061_v33 = vor.u32 %v1060_v12, %v1056_v2 }
 0x250   : > { %v8597_v9 = vadd.f32 %v2905_v38, %v9633_v6  ;;  %v8600_v32 = vadd.f32 %v5655_v18, %v8460_v1  ;;  %v2908_v40 = vadd.f32 %v5719_v34, %v8465_v56  ;;  %3801 = vmatprep.mubr.bf16.mxu1 %v8168_v43  ;;  %3898 = vmatprep.mubr.bf16.mxu0 %v7660_v13  ;;  %v1051_v43 = vshll.u32 %v8594_v52, 16 }
 0x251   : > { %v1066_v8 = vsel %vm634_vm0, %v1061_v33, %v1065_v54  ;;  %v1049_v38 = vor.u32 %v1048_v62, %v1044_v22 }
 0x252   : > { %v8606_v10 = vadd.f32 %v2908_v40, %v9634_v4  ;;  %v5656_v44 = vpop.f32.mrb[156].mxu0  ;;  %v5720_v53 = vpop.f32.mrb[156].mxu1  ;;  %v1053_v6 = vrot.slane %v1051_v43, 1 }
 0x253   : > { %v5657_v39 = vpop.f32.mrb[157].mxu0  ;;  %v5721_v20 = vpop.f32.mrb[157].mxu1 }
 0x254   : > { %v5658_v1 = vadd.f32 %v5657_v39, %v5656_v44  ;;  %v5722_v55 = vadd.f32 %v5721_v20, %v5720_v53  ;;  %v5659_v19 = vpop.f32.mrb[158].mxu0  ;;  %v5723_v56 = vpop.f32.mrb[158].mxu1 }
 0x255   : > { %v5660_v31 = vpop.f32.mrb[159].mxu0  ;;  %v5724_v13 = vpop.f32.mrb[159].mxu1 }
 0x256   : > { %v8612_v29 = vadd.f32 %v5658_v1, %v8469_v17  ;;  %v2913_v2 = vadd.f32 %v5722_v55, %v8475_v0  ;;  %v5661_v12 = vadd.f32 %v5660_v31, %v5659_v19  ;;  %v5725_v25 = vadd.f32 %v5724_v13, %v5723_v56  ;;  %v9635_v17 = vld [vmem:[#allocation63_spill] sm:$0xff]  ;;  %v9637_v55 = vld [vmem:[#allocation14_spill] sm:$0xff]  ;;  %v9638_v19 = vld [vmem:[#allocation64_spill] sm:$0xff] }
 0x257   : > { %3802 = vmatmul.mubr.bf16.gmra.mrb[8].mxu1 %v8187_v26  ;;  %3899 = vmatmul.mubr.bf16.gmra.mrb[8].mxu0 %v7671_v7  ;;  %v9639_v13 = vld [vmem:[#allocation25_spill] sm:$0xff] }
 0x258   : > { %v8618_v18 = vadd.f32 %v2913_v2, %v8174_v51  ;;  %v8621_v34 = vadd.f32 %v5661_v12, %v8477_v37  ;;  %v2916_v35 = vadd.f32 %v5725_v25, %v8482_v28  ;;  %3809 = vmatprep.mubr.bf16.mxu1 %v1066_v8  ;;  %3906 = vmatprep.mubr.bf16.mxu0 %v9553_v36  ;;  %v4075_v28 = vld [vmem:[%s9306_s4] sm:$0xff]  ;;  %v9636_v36 = vld [vmem:[#allocation17_spill] sm:$0xff] }
 0x259   : > { %v1054_v37 = vsel %vm634_vm0, %v1049_v38, %v1053_v6  ;;  %v9640_v8 = vld [vmem:[#allocation53_spill] sm:$0xff] }
 0x25a   : > { %v8626_v0 = vadd.f32 %v2916_v35, %v9635_v17  ;;  %v5662_v40 = vpop.f32.mrb[160].mxu0  ;;  %v5726_v26 = vpop.f32.mrb[160].mxu1 }
 0x25b   : > { %v5663_v33 = vpop.f32.mrb[161].mxu0  ;;  %v5727_v7 = vpop.f32.mrb[161].mxu1 }
 0x25c   : > { %v5664_v54 = vadd.f32 %v5663_v33, %v5662_v40  ;;  %v5728_v4 = vadd.f32 %v5727_v7, %v5726_v26  ;;  %v5665_v51 = vpop.f32.mrb[162].mxu0  ;;  %v5729_v44 = vpop.f32.mrb[162].mxu1  ;;  %v4077_v33 = vld [vmem:[%s9306_s4 + $0x10] sm:$0xff]  ;;  %v9641_v7 = vld [vmem:[#allocation20_spill] sm:$0xff] }
 0x25d   : > { %v5666_v53 = vpop.f32.mrb[163].mxu0  ;;  %v5730_v22 = vpop.f32.mrb[163].mxu1 }
 0x25e   : > { %v8633_v62 = vadd.f32 %v5664_v54, %v9636_v36  ;;  %v2921_v39 = vadd.f32 %v5728_v4, %v8492_v59  ;;  %v5667_v20 = vadd.f32 %v5666_v53, %v5665_v51  ;;  %v5731_v1 = vadd.f32 %v5730_v22, %v5729_v44  ;;  %v9643_v53 = vld [vmem:[#allocation23_spill] sm:$0xff] }
 0x25f   : > { %3810 = vmatmul.mubr.bf16.gmra.mrb[12].mxu1 %v1054_v37  ;;  %3907 = vmatmul.mubr.bf16.gmra.mrb[12].mxu0 %v9637_v55  ;;  %v9642_v37 = vld [vmem:[#allocation18_spill] sm:$0xff] }
 0x260   : > { %v8638_v56 = vadd.f32 %v2921_v39, %v9638_v19  ;;  %v8641_v43 = vadd.f32 %v5667_v20, %v8494_v14  ;;  %v2924_v31 = vadd.f32 %v5731_v1, %v8499_v30  ;;  %3914 = vmatprep.mubr.bf16.mxu0 %v9639_v13  ;;  %6190 = vmatprep.mubr.msk.f32.mxu1 %vm4115_vm2, %v4075_v28  ;;  %v4076_v14 = vld [vmem:[%s9306_s4 + $0x8] sm:$0xff]  ;;  %v4079_v20 = vld [vmem:[%s9306_s4 + $0x20] sm:$0xff] }
 0x261   : > { %v9644_v39 = vld [vmem:[#allocation28_spill] sm:$0xff] }
 0x262   : > { %v8647_v2 = vadd.f32 %v2924_v31, %v9640_v8  ;;  %v5668_v59 = vpop.f32.mrb[164].mxu0  ;;  %v5732_v12 = vpop.f32.mrb[164].mxu1  ;;  %v9645_v1 = vld [vmem:[#allocation24_spill] sm:$0xff] }
 0x263   : > { %v5669_v25 = vpop.f32.mrb[165].mxu0  ;;  %v5733_v38 = vpop.f32.mrb[165].mxu1 }
 0x264   : > { %v5670_v35 = vadd.f32 %v5669_v25, %v5668_v59  ;;  %v5734_v6 = vadd.f32 %v5733_v38, %v5732_v12  ;;  %v5671_v17 = vpop.f32.mrb[166].mxu0  ;;  %v5735_v40 = vpop.f32.mrb[166].mxu1  ;;  %v4080_v25 = vld [vmem:[%s9306_s4 + $0x28] sm:$0xff] }
 0x265   : > { %v5672_v30 = vpop.f32.mrb[167].mxu0  ;;  %v5736_v26 = vpop.f32.mrb[167].mxu1 }
 0x266   : > { %v8656_v54 = vadd.f32 %v5670_v35, %v9641_v7  ;;  %v2929_v4 = vadd.f32 %v5734_v6, %v8506_v23  ;;  %v5673_v51 = vadd.f32 %v5672_v30, %v5671_v17  ;;  %v5737_v44 = vadd.f32 %v5736_v26, %v5735_v40  ;;  %v4078_v23 = vld [vmem:[%s9306_s4 + $0x18] sm:$0xff]  ;;  %v4081_v6 = vld [vmem:[%s9306_s4 + $0x30] sm:$0xff]  ;;  %v9648_v7 = vld [vmem:[#allocation7_spill] sm:$0xff] }
 0x267   : > { %3915 = vmatmul.mubr.bf16.gmra.mrb[16].mxu0 %v9642_v37  ;;  %6191 = vmatmul.mubr.msk.f32.vlgmr.msra.gmra.mrb[16].mxu1 %vm4115_vm2, %v4076_v14  ;;  %v9646_v17 = vld [vmem:[#allocation22_spill] sm:$0xff]  ;;  %v9649_v37 = vld [vmem:[#allocation32_spill] sm:$0xff] }
 0x268   : > { %v8662_v22 = vadd.f32 %v2929_v4, %v9643_v53  ;;  %v8665_v28 = vadd.f32 %v5673_v51, %v8508_v21  ;;  %v2932_v36 = vadd.f32 %v5737_v44, %v8513_v49  ;;  %6193 = vmatprep.mubr.msk.f32.mxu1 %vm4115_vm2, %v4077_v33  ;;  %3922 = vmatprep.mubr.bf16.mxu0 %v9644_v39  ;;  %v9647_v33 = vld [vmem:[#allocation31_spill] sm:$0xff] }
 0x269   : > { %v4083_v53 = vld [vmem:[%s9306_s4 + $0x40] sm:$0xff] }
 0x26a   : > { %v8677_v55 = vadd.f32 %v2932_v36, %v9645_v1  ;;  %v5674_v19 = vpop.f32.mrb[168].mxu0  ;;  %v5738_v21 = vpop.f32.mrb[168].mxu1  ;;  %v9650_v36 = vld [vmem:[#allocation16_spill] sm:$0xff] }
 0x26b   : > { %v5675_v31 = vpop.f32.mrb[169].mxu0  ;;  %v5739_v13 = vpop.f32.mrb[169].mxu1  ;;  %6194 = vmatmul.mubr.msk.f32.gmra.mrb[18].mxu1 %vm4115_vm2, %v4078_v23 }
 0x26c   : > { %v5676_v49 = vadd.f32 %v5675_v31, %v5674_v19  ;;  %v5740_v8 = vadd.f32 %v5739_v13, %v5738_v21  ;;  %v5677_v59 = vpop.f32.mrb[170].mxu0  ;;  %v5741_v12 = vpop.f32.mrb[170].mxu1  ;;  %6196 = vmatprep.mubr.msk.f32.mxu1 %vm4115_vm2, %v4079_v20  ;;  %v4084_v13 = vld [vmem:[%s9306_s4 + $0x48] sm:$0xff] }
 0x26d   : > { %v5678_v38 = vpop.f32.mrb[171].mxu0  ;;  %v5742_v35 = vpop.f32.mrb[171].mxu1 }
 0x26e   : > { %v8688_v40 = vadd.f32 %v5676_v49, %v9646_v17  ;;  %v2937_v14 = vadd.f32 %v5740_v8, %v8520_v46  ;;  %v5679_v30 = vadd.f32 %v5678_v38, %v5677_v59  ;;  %v5743_v26 = vadd.f32 %v5742_v35, %v5741_v12  ;;  %v4082_v46 = vld [vmem:[%s9306_s4 + $0x38] sm:$0xff]  ;;  %v4085_v59 = vld [vmem:[%s9306_s4 + $0x50] sm:$0xff] }
 0x26f   : > { %3923 = vmatmul.mubr.bf16.gmra.mrb[20].mxu0 %v9647_v33  ;;  %6197 = vmatmul.mubr.msk.f32.gmra.mrb[20].mxu1 %vm4115_vm2, %v4080_v25  ;;  %v9652_v17 = vld [vmem:[#allocation54_spill] sm:$0xff]  ;;  %v4087_v33 = vld [vmem:[%s9306_s4 + $0x60] sm:$0xff] }
 0x270   : > { %v8694_v4 = vadd.f32 %v2937_v14, %v9648_v7  ;;  %v8697_v51 = vadd.f32 %v5679_v30, %v8522_v57  ;;  %v2940_v44 = vadd.f32 %v5743_v26, %v8527_v60  ;;  %6199 = vmatprep.mubr.msk.f32.mxu1 %vm4115_vm2, %v4081_v6  ;;  %3930 = vmatprep.mubr.bf16.mxu0 %v9649_v37  ;;  %v9651_v6 = vld [vmem:[#allocation36_spill] sm:$0xff]  ;;  %v9655_v7 = vld [vmem:[#allocation26_spill] sm:$0xff] }
 0x272   : > { %v8709_v23 = vadd.f32 %v2940_v44, %v9650_v36  ;;  %v5680_v39 = vpop.f32.mrb[172].mxu0  ;;  %v5744_v57 = vpop.f32.mrb[172].mxu1 }
 0x273   : > { %v5681_v20 = vpop.f32.mrb[173].mxu0  ;;  %v5745_v1 = vpop.f32.mrb[173].mxu1  ;;  %6200 = vmatmul.mubr.msk.f32.gmra.mrb[22].mxu1 %vm4115_vm2, %v4082_v46 }
 0x274   : > { %v5682_v60 = vadd.f32 %v5681_v20, %v5680_v39  ;;  %v5746_v19 = vadd.f32 %v5745_v1, %v5744_v57  ;;  %v5683_v21 = vpop.f32.mrb[174].mxu0  ;;  %v5747_v31 = vpop.f32.mrb[174].mxu1  ;;  %6202 = vmatprep.mubr.msk.f32.mxu1 %vm4115_vm2, %v4083_v53  ;;  %v4088_v20 = vld [vmem:[%s9306_s4 + $0x68] sm:$0xff] }
 0x275   : > { %v5684_v49 = vpop.f32.mrb[175].mxu0  ;;  %v5748_v8 = vpop.f32.mrb[175].mxu1 }
 0x276   : > { %v8720_v12 = vadd.f32 %v5682_v60, %v8531_v41  ;;  %v2945_v25 = vadd.f32 %v5746_v19, %v8534_v27  ;;  %v5685_v38 = vadd.f32 %v5684_v49, %v5683_v21  ;;  %v5749_v35 = vadd.f32 %v5748_v8, %v5747_v31  ;;  %v4086_v41 = vld [vmem:[%s9306_s4 + $0x58] sm:$0xff]  ;;  %v9654_v27 = vld [vmem:[#allocation40_spill] sm:$0xff]  ;;  %v4089_v19 = vld [vmem:[%s9306_s4 + $0x70] sm:$0xff] }
 0x277   : > { %3931 = vmatmul.mubr.bf16.gmra.mrb[24].mxu0 %v9651_v6  ;;  %6203 = vmatmul.mubr.msk.f32.gmra.mrb[24].mxu1 %vm4115_vm2, %v4084_v13  ;;  %v9657_v49 = vld [vmem:[#allocation37_spill] sm:$0xff]  ;;  %v9658_v8 = vld [vmem:[#allocation8_spill] sm:$0xff] }
 0x278   : > { %v8726_v14 = vadd.f32 %v2945_v25, %v9652_v17  ;;  %v8729_v30 = vadd.f32 %v5685_v38, %v8536_v11  ;;  %v2948_v26 = vadd.f32 %v5749_v35, %v8541_v24  ;;  %6205 = vmatprep.mubr.msk.f32.mxu1 %vm4115_vm2, %v4085_v59  ;;  %3938 = vmatprep.mubr.bf16.mxu0 %v9654_v27  ;;  %v4090_v38 = vld [vmem:[%s9306_s4 + $0x78] sm:$0xff]  ;;  %v9661_v6 = vld [vmem:[#allocation21_spill] sm:$0xff] }
 0x279   : > { %v9660_v35 = vld [vmem:[#allocation42_spill] sm:$0xff] }
 0x27a   : > { %9653 = vst [vmem:[#allocation27_spill] sm:$0xff] %v8726_v14  ;;  %v8741_v44 = vadd.f32 %v2948_v26, %v9655_v7  ;;  %v5750_v46 = vpop.f32.mrb[176].mxu1  ;;  %v5814_v11 = vpop.f32.mrb[176].mxu0 }
 0x27b   : > { %v5751_v37 = vpop.f32.mrb[177].mxu1  ;;  %v5815_v53 = vpop.f32.mrb[177].mxu0  ;;  %6206 = vmatmul.mubr.msk.f32.gmra.mrb[26].mxu1 %vm4115_vm2, %v4086_v41 }
 0x27c   : > { %9656 = vst [vmem:[#allocation29_spill] sm:$0xff] %v8741_v44  ;;  %v5752_v24 = vadd.f32 %v5751_v37, %v5750_v46  ;;  %v8744_v36 = vadd.f32 %v5815_v53, %v5814_v11  ;;  %v5753_v39 = vpop.f32.mrb[178].mxu1  ;;  %v5817_v57 = vpop.f32.mrb[178].mxu0  ;;  %6208 = vmatprep.mubr.msk.f32.mxu1 %vm4115_vm2, %v4087_v33  ;;  %v4092_v37 = vld [vmem:[%s9306_s4 + $0x88] sm:$0xff] }
 0x27d   : > { %v5754_v1 = vpop.f32.mrb[179].mxu1  ;;  %v5818_v60 = vpop.f32.mrb[179].mxu0 }
 0x27e   : > { %v2953_v21 = vadd.f32 %v5752_v24, %v8546_v16  ;;  %v5755_v31 = vadd.f32 %v5754_v1, %v5753_v39  ;;  %v8754_v13 = vadd.f32 %v5818_v60, %v5817_v57  ;;  %v4091_v16 = vld [vmem:[%s9306_s4 + $0x80] sm:$0xff]  ;;  %v4093_v39 = vld [vmem:[%s9306_s4 + $0x90] sm:$0xff]  ;;  %v9663_v60 = vld [vmem:[#allocation50_spill] sm:$0xff] }
 0x27f   : > { %3939 = vmatmul.mubr.bf16.gmra.mrb[28].mxu0 %v9657_v49  ;;  %6209 = vmatmul.mubr.msk.f32.gmra.mrb[28].mxu1 %vm4115_vm2, %v4088_v20  ;;  %v4094_v49 = vld [vmem:[%s9306_s4 + $0x98] sm:$0xff] }
 0x280   : > { %v8759_v59 = vadd.f32 %v2953_v21, %v9658_v8  ;;  %v2956_v25 = vadd.f32 %v5755_v31, %v8555_v61  ;;  %6211 = vmatprep.mubr.msk.f32.mxu1 %vm4115_vm2, %v4089_v19  ;;  %3946 = vmatprep.mubr.bf16.mxu0 %v9660_v35  ;;  %v9664_v19 = vld [vmem:[#allocation55_spill] sm:$0xff] }
 0x281   : > { %v9666_v8 = vld [vmem:[#allocation51_spill] sm:$0xff] }
 0x282   : > { %9659 = vst [vmem:[#allocation33_spill] sm:$0xff] %v8759_v59  ;;  %v8771_v17 = vadd.f32 %v2956_v25, %v9661_v6  ;;  %v5756_v26 = vpop.f32.mrb[180].mxu1  ;;  %v5820_v41 = vpop.f32.mrb[180].mxu0  ;;  %v9667_v25 = vld [vmem:[#allocation30_spill] sm:$0xff] }
 0x283   : > { %v5757_v27 = vpop.f32.mrb[181].mxu1  ;;  %v5821_v33 = vpop.f32.mrb[181].mxu0  ;;  %6212 = vmatmul.mubr.msk.f32.gmra.mrb[30].mxu1 %vm4115_vm2, %v4090_v38 }
 0x284   : > { %9662 = vst [vmem:[#allocation34_spill] sm:$0xff] %v8771_v17  ;;  %v5758_v61 = vadd.f32 %v5757_v27, %v5756_v26  ;;  %v8774_v7 = vadd.f32 %v5821_v33, %v5820_v41  ;;  %v5759_v46 = vpop.f32.mrb[182].mxu1  ;;  %v5823_v11 = vpop.f32.mrb[182].mxu0  ;;  %6214 = vmatprep.mubr.msk.f32.mxu1 %vm4115_vm2, %v4091_v16 }
 0x285   : > { %v5760_v53 = vpop.f32.mrb[183].mxu1  ;;  %v5824_v24 = vpop.f32.mrb[183].mxu0 }
 0x286   : > { %v2961_v57 = vadd.f32 %v5758_v61, %v8564_v50  ;;  %v5761_v20 = vadd.f32 %v5760_v53, %v5759_v46  ;;  %v8784_v1 = vadd.f32 %v5824_v24, %v5823_v11  ;;  %v4095_v50 = vld [vmem:[%s9306_s4 + $0xa0] sm:$0xff]  ;;  %v4096_v61 = vld [vmem:[%s9306_s4 + $0xa8] sm:$0xff] }
 0x287   : > { %3947 = vmatmul.mubr.bf16.gmra.mrb[32].mxu0 %v9663_v60  ;;  %6215 = vmatmul.mubr.msk.f32.gmra.mrb[32].mxu1 %vm4115_vm2, %v4092_v37  ;;  %v4097_v37 = vld [vmem:[%s9306_s4 + $0xb0] sm:$0xff] }
 0x288   : > { %v8789_v21 = vadd.f32 %v2961_v57, %v9664_v19  ;;  %v2964_v31 = vadd.f32 %v5761_v20, %v8574_v3  ;;  %6217 = vmatprep.mubr.msk.f32.mxu1 %vm4115_vm2, %v4093_v39  ;;  %3954 = vmatprep.mubr.bf16.mxu0 %v9666_v8  ;;  %v9669_v57 = vld [vmem:[#allocation52_spill] sm:$0xff]  ;;  %v1209_v8 = vrot.slane %v8472_v42, 1 }
 0x289   : > { %v9670_v20 = vld [vmem:[#allocation56_spill] sm:$0xff] }
 0x28a   : > { %9665 = vst [vmem:[#allocation38_spill] sm:$0xff] %v8789_v21  ;;  %v8801_v38 = vadd.f32 %v2964_v31, %v9667_v25  ;;  %v5762_v35 = vpop.f32.mrb[184].mxu1  ;;  %v5826_v16 = vpop.f32.mrb[184].mxu0  ;;  %v4098_v31 = vld [vmem:[%s9306_s4 + $0xb8] sm:$0xff]  ;;  %v9673_v25 = vld [vmem:[#allocation35_spill] sm:$0xff]  ;;  %v4100_v42 = vld [vmem:[%s9306_s4 + $0xc8] sm:$0xff] }
 0x28b   : > { %v5763_v6 = vpop.f32.mrb[185].mxu1  ;;  %v5827_v26 = vpop.f32.mrb[185].mxu0  ;;  %6218 = vmatmul.mubr.msk.f32.gmra.mrb[34].mxu1 %vm4115_vm2, %v4094_v49  ;;  %v9672_v49 = vld [vmem:[#allocation57_spill] sm:$0xff] }
 0x28c   : > { %9668 = vst [vmem:[#allocation41_spill] sm:$0xff] %v8801_v38  ;;  %v5764_v3 = vadd.f32 %v5763_v6, %v5762_v35  ;;  %v8804_v41 = vadd.f32 %v5827_v26, %v5826_v16  ;;  %v5765_v27 = vpop.f32.mrb[186].mxu1  ;;  %v5829_v33 = vpop.f32.mrb[186].mxu0  ;;  %6220 = vmatprep.mubr.msk.f32.mxu1 %vm4115_vm2, %v4095_v50  ;;  %v1210_v50 = vrot.slane %v8579_v58, 1 }
 0x28d   : > { %v5766_v46 = vpop.f32.mrb[187].mxu1  ;;  %v5830_v11 = vpop.f32.mrb[187].mxu0 }
 0x28e   : > { %v2969_v53 = vadd.f32 %v5764_v3, %v8588_v47  ;;  %v5767_v24 = vadd.f32 %v5766_v46, %v5765_v27  ;;  %v8814_v39 = vadd.f32 %v5830_v11, %v5829_v33  ;;  %v4099_v47 = vld [vmem:[%s9306_s4 + $0xc0] sm:$0xff]  ;;  %v4101_v11 = vld [vmem:[%s9306_s4 + $0xd0] sm:$0xff] }
 0x28f   : > { %3955 = vmatmul.mubr.bf16.gmra.mrb[36].mxu0 %v9669_v57  ;;  %6221 = vmatmul.mubr.msk.f32.gmra.mrb[36].mxu1 %vm4115_vm2, %v4096_v61 }
 0x290   : > { %v8819_v60 = vadd.f32 %v2969_v53, %v9670_v20  ;;  %v2972_v19 = vadd.f32 %v5767_v24, %v8600_v32  ;;  %6223 = vmatprep.mubr.msk.f32.mxu1 %vm4115_vm2, %v4097_v37  ;;  %3962 = vmatprep.mubr.bf16.mxu0 %v9672_v49  ;;  %v1211_v37 = vsel %vm1103_vm1, %v1209_v8, %v1210_v50  ;;  %v9675_v20 = vld [vmem:[#allocation67_spill] sm:$0xff]  ;;  %v9676_v49 = vld [vmem:[#allocation65_spill] sm:$0xff]  ;;  %v9678_v50 = vld [vmem:[#allocation66_spill] sm:$0xff] }
 0x291   : > { %v4103_v8 = vld [vmem:[%s9306_s4 + $0xe0] sm:$0xff] }
 0x292   : > { %9671 = vst [vmem:[#allocation43_spill] sm:$0xff] %v8819_v60  ;;  %v8833_v35 = vadd.f32 %v2972_v19, %v9673_v25  ;;  %v5768_v32 = vpop.f32.mrb[188].mxu1  ;;  %v5832_v16 = vpop.f32.mrb[188].mxu0  ;;  %v1206_v19 = vrot.slane %v8487_v45, 1 }
 0x293   : > { %v5769_v6 = vpop.f32.mrb[189].mxu1  ;;  %v5833_v26 = vpop.f32.mrb[189].mxu0  ;;  %6224 = vmatmul.mubr.msk.f32.gmra.mrb[38].mxu1 %vm4115_vm2, %v4098_v31  ;;  %v1207_v31 = vrot.slane %v8594_v52, 1 }
 0x294   : > { %9674 = vst [vmem:[#allocation44_spill] sm:$0xff] %v8833_v35  ;;  %v5770_v3 = vadd.f32 %v5769_v6, %v5768_v32  ;;  %v8836_v27 = vadd.f32 %v5833_v26, %v5832_v16  ;;  %v5771_v33 = vpop.f32.mrb[190].mxu1  ;;  %v5835_v61 = vpop.f32.mrb[190].mxu0  ;;  %6226 = vmatprep.mubr.msk.f32.mxu1 %vm4115_vm2, %v4099_v47 }
 0x295   : > { %v5772_v58 = vpop.f32.mrb[191].mxu1  ;;  %v5836_v46 = vpop.f32.mrb[191].mxu0 }
 0x296   : > { %v2977_v53 = vadd.f32 %v5770_v3, %v8612_v29  ;;  %v5773_v24 = vadd.f32 %v5772_v58, %v5771_v33  ;;  %v8847_v57 = vadd.f32 %v5836_v46, %v5835_v61  ;;  %v4102_v29 = vld [vmem:[%s9306_s4 + $0xd8] sm:$0xff]  ;;  %v1208_v61 = vsel %vm1103_vm1, %v1206_v19, %v1207_v31 }
 0x297   : > { %3963 = vmatmul.mubr.bf16.gmra.mrb[40].mxu0 %v9675_v20  ;;  %6227 = vmatmul.mubr.msk.f32.gmra.mrb[40].mxu1 %vm4115_vm2, %v4100_v42  ;;  %v4104_v42 = vld [vmem:[%s9306_s4 + $0xe8] sm:$0xff] }
 0x298   : > { %v8854_v47 = vadd.f32 %v2977_v53, %v9676_v49  ;;  %v2980_v25 = vadd.f32 %v5773_v24, %v8621_v34  ;;  %6229 = vmatprep.mubr.msk.f32.mxu1 %vm4115_vm2, %v4101_v11  ;;  %3970 = vmatprep.mubr.bf16.mxu0 %v1211_v37  ;;  %v4105_v11 = vld [vmem:[%s9306_s4 + $0xf0] sm:$0xff]  ;;  %v9680_v20 = vld [vmem:[#allocation68_spill] sm:$0xff]  ;;  %v4106_v49 = vld [vmem:[%s9306_s4 + $0xf8] sm:$0xff] }
 0x29a   : > { %9677 = vst [vmem:[#allocation45_spill] sm:$0xff] %v8854_v47  ;;  %v8865_v45 = vadd.f32 %v2980_v25, %v9678_v50  ;;  %v5774_v52 = vpop.f32.mrb[192].mxu1  ;;  %v5838_v32 = vpop.f32.mrb[192].mxu0  ;;  %v9682_v25 = vld [vmem:[#allocation69_spill] sm:$0xff] }
 0x29b   : > { %v5775_v16 = vpop.f32.mrb[193].mxu1  ;;  %v5839_v6 = vpop.f32.mrb[193].mxu0  ;;  %6230 = vmatmul.mubr.msk.f32.gmra.mrb[42].mxu1 %vm4115_vm2, %v4102_v29 }
 0x29c   : > { %9679 = vst [vmem:[#allocation46_spill] sm:$0xff] %v8865_v45  ;;  %v5776_v34 = vadd.f32 %v5775_v16, %v5774_v52  ;;  %v8868_v26 = vadd.f32 %v5839_v6, %v5838_v32  ;;  %v5777_v3 = vpop.f32.mrb[194].mxu1  ;;  %v5841_v33 = vpop.f32.mrb[194].mxu0  ;;  %6232 = vmatprep.mubr.msk.f32.mxu1 %vm4115_vm2, %v4103_v8 }
 0x29d   : > { %v5778_v58 = vpop.f32.mrb[195].mxu1  ;;  %v5842_v46 = vpop.f32.mrb[195].mxu0 }
 0x29e   : > { %v2985_v37 = vadd.f32 %v5776_v34, %v8633_v62  ;;  %v5779_v53 = vadd.f32 %v5778_v58, %v5777_v3  ;;  %v8879_v24 = vadd.f32 %v5842_v46, %v5841_v33  ;;  %v9684_v58 = vld [vmem:[#allocation9_spill] sm:$0xff] }
 0x29f   : > { %3971 = vmatmul.mubr.bf16.gmra.mrb[44].mxu0 %v1208_v61  ;;  %6233 = vmatmul.mubr.msk.f32.gmra.mrb[44].mxu1 %vm4115_vm2, %v4104_v42 }
 0x2a0   : > { %v8883_v19 = vadd.f32 %v2985_v37, %v9680_v20  ;;  %v2988_v31 = vadd.f32 %v5779_v53, %v8641_v43  ;;  %6235 = vmatprep.mubr.msk.f32.mxu1 %vm4115_vm2, %v4105_v11  ;;  %v9686_v37 = vld [vmem:[#allocation10_spill] sm:$0xff] }
 0x2a2   : > { %9681 = vst [vmem:[#allocation47_spill] sm:$0xff] %v8883_v19  ;;  %v8891_v29 = vadd.f32 %v2988_v31, %v9682_v25  ;;  %v5780_v62 = vpop.f32.mrb[196].mxu1  ;;  %v5844_v8 = vpop.f32.mrb[196].mxu0 }
 0x2a3   : > { %v5781_v50 = vpop.f32.mrb[197].mxu1  ;;  %v5845_v52 = vpop.f32.mrb[197].mxu0  ;;  %6236 = vmatmul.mubr.msk.f32.gmra.mrb[46].mxu1 %vm4115_vm2, %v4106_v49 }
 0x2a4   : > { %9683 = vst [vmem:[#allocation48_spill] sm:$0xff] %v8891_v29  ;;  %v5782_v32 = vadd.f32 %v5781_v50, %v5780_v62  ;;  %v8894_v16 = vadd.f32 %v5845_v52, %v5844_v8  ;;  %v5783_v6 = vpop.f32.mrb[198].mxu1  ;;  %v5847_v43 = vpop.f32.mrb[198].mxu0 }
 0x2a5   : > { %v5784_v34 = vpop.f32.mrb[199].mxu1  ;;  %v5848_v3 = vpop.f32.mrb[199].mxu0 }
 0x2a6   : > { %v2993_v33 = vadd.f32 %v5782_v32, %v8656_v54  ;;  %v5785_v61 = vadd.f32 %v5784_v34, %v5783_v6  ;;  %v8897_v42 = vadd.f32 %v5848_v3, %v5847_v43 }
 0x2a8   : > { %v8900_v46 = vadd.f32 %v2993_v33, %v9684_v58  ;;  %v2996_v11 = vadd.f32 %v5785_v61, %v8665_v28  ;;  %v9688_v28 = vld [vmem:[#allocation11_spill] sm:$0xff]  ;;  %v9690_v61 = vld [vmem:[#allocation12_spill] sm:$0xff] }
 0x2aa   : > { %9685 = vst [vmem:[#allocation49_spill] sm:$0xff] %v8900_v46  ;;  %v8904_v53 = vadd.f32 %v2996_v11, %v9686_v37  ;;  %v5786_v20 = vpop.f32.mrb[200].mxu1  ;;  %v5850_v31 = vpop.f32.mrb[200].mxu0 }
 0x2ab   : > { %v5787_v49 = vpop.f32.mrb[201].mxu1  ;;  %v5851_v25 = vpop.f32.mrb[201].mxu0 }
 0x2ac   : > { %9687 = vst [vmem:[#allocation39_spill] sm:$0xff] %v8904_v53  ;;  %v5788_v62 = vadd.f32 %v5787_v49, %v5786_v20  ;;  %v8906_v8 = vadd.f32 %v5851_v25, %v5850_v31  ;;  %v5789_v50 = vpop.f32.mrb[202].mxu1  ;;  %v5853_v54 = vpop.f32.mrb[202].mxu0 }
 0x2ad   : > { %v5790_v52 = vpop.f32.mrb[203].mxu1  ;;  %v5854_v32 = vpop.f32.mrb[203].mxu0 }
 0x2ae   : > { %v3001_v6 = vadd.f32 %v5788_v62, %v8688_v40  ;;  %v5791_v43 = vadd.f32 %v5790_v52, %v5789_v50  ;;  %v8909_v34 = vadd.f32 %v5854_v32, %v5853_v54 }
 0x2b0   : > { %v8912_v3 = vadd.f32 %v3001_v6, %v9688_v28  ;;  %v3004_v33 = vadd.f32 %v5791_v43, %v8697_v51  ;;  %v9692_v51 = vld [vmem:[#allocation13_spill] sm:$0xff]  ;;  %v9694_v28 = vld [vmem:[#allocation15_spill] sm:$0xff] }
 0x2b2   : > { %9689 = vst [vmem:[#allocation58_spill] sm:$0xff] %v8912_v3  ;;  %v8916_v58 = vadd.f32 %v3004_v33, %v9690_v61  ;;  %v5792_v11 = vpop.f32.mrb[204].mxu1  ;;  %v5856_v37 = vpop.f32.mrb[204].mxu0 }
 0x2b3   : > { %v5793_v20 = vpop.f32.mrb[205].mxu1  ;;  %v5857_v31 = vpop.f32.mrb[205].mxu0 }
 0x2b4   : > { %9691 = vst [vmem:[#allocation59_spill] sm:$0xff] %v8916_v58  ;;  %v5794_v49 = vadd.f32 %v5793_v20, %v5792_v11  ;;  %v8918_v25 = vadd.f32 %v5857_v31, %v5856_v37  ;;  %v5795_v53 = vpop.f32.mrb[206].mxu1  ;;  %v5859_v40 = vpop.f32.mrb[206].mxu0 }
 0x2b5   : > { %v5796_v62 = vpop.f32.mrb[207].mxu1  ;;  %v5860_v50 = vpop.f32.mrb[207].mxu0 }
 0x2b6   : > { %v3009_v54 = vadd.f32 %v5794_v49, %v8720_v12  ;;  %v5797_v52 = vadd.f32 %v5796_v62, %v5795_v53  ;;  %v8921_v32 = vadd.f32 %v5860_v50, %v5859_v40 }
 0x2b8   : > { %v8924_v6 = vadd.f32 %v3009_v54, %v9692_v51  ;;  %v3012_v43 = vadd.f32 %v5797_v52, %v8729_v30 }
 0x2ba   : > { %9693 = vst [vmem:[#allocation19_spill] sm:$0xff] %v8924_v6  ;;  %v8928_v33 = vadd.f32 %v3012_v43, %v9694_v28  ;;  %v5862_v61 = vpop.f32.mrb[208].mxu0  ;;  %v5926_v11 = vpop.f32.mrb[208].mxu1 }
 0x2bb   : > { %v5863_v37 = vpop.f32.mrb[209].mxu0  ;;  %v5927_v20 = vpop.f32.mrb[209].mxu1 }
 0x2bc   : > { %9695 = vst [vmem:[#allocation60_spill] sm:$0xff] %v8928_v33  ;;  %v8930_v31 = vadd.f32 %v5863_v37, %v5862_v61  ;;  %v5928_v58 = vadd.f32 %v5927_v20, %v5926_v11  ;;  %v5865_v3 = vpop.f32.mrb[210].mxu0  ;;  %v5929_v12 = vpop.f32.mrb[210].mxu1 }
 0x2bd   : > { %v5866_v53 = vpop.f32.mrb[211].mxu0  ;;  %v5930_v49 = vpop.f32.mrb[211].mxu1 }
 0x2be   : > { %v8933_v40 = vadd.f32 %v5928_v58, %v8744_v36  ;;  %v8935_v62 = vadd.f32 %v5866_v53, %v5865_v3  ;;  %v5931_v30 = vadd.f32 %v5930_v49, %v5929_v12 }
 0x2c0   : > { %v8938_v50 = vadd.f32 %v5931_v30, %v8754_v13 }
 0x2c2   : > { %v5868_v54 = vpop.f32.mrb[212].mxu0  ;;  %v5932_v52 = vpop.f32.mrb[212].mxu1 }
 0x2c3   : > { %v5869_v51 = vpop.f32.mrb[213].mxu0  ;;  %v5933_v43 = vpop.f32.mrb[213].mxu1 }
 0x2c4   : > { %v8940_v28 = vadd.f32 %v5869_v51, %v5868_v54  ;;  %v5934_v61 = vadd.f32 %v5933_v43, %v5932_v52  ;;  %v5871_v11 = vpop.f32.mrb[214].mxu0  ;;  %v5935_v37 = vpop.f32.mrb[214].mxu1 }
 0x2c5   : > { %v5872_v20 = vpop.f32.mrb[215].mxu0  ;;  %v5936_v33 = vpop.f32.mrb[215].mxu1 }
 0x2c6   : > { %v8943_v36 = vadd.f32 %v5934_v61, %v8774_v7  ;;  %v8945_v3 = vadd.f32 %v5872_v20, %v5871_v11  ;;  %v5937_v58 = vadd.f32 %v5936_v33, %v5935_v37 }
 0x2c8   : > { %v8948_v13 = vadd.f32 %v5937_v58, %v8784_v1 }
 0x2ca   : > { %v5874_v12 = vpop.f32.mrb[216].mxu0  ;;  %v5938_v53 = vpop.f32.mrb[216].mxu1 }
 0x2cb   : > { %v5875_v49 = vpop.f32.mrb[217].mxu0  ;;  %v5939_v30 = vpop.f32.mrb[217].mxu1 }
 0x2cc   : > { %v8950_v54 = vadd.f32 %v5875_v49, %v5874_v12  ;;  %v5940_v52 = vadd.f32 %v5939_v30, %v5938_v53  ;;  %v5877_v51 = vpop.f32.mrb[218].mxu0  ;;  %v5941_v43 = vpop.f32.mrb[218].mxu1 }
 0x2cd   : > { %v5878_v6 = vpop.f32.mrb[219].mxu0  ;;  %v5942_v46 = vpop.f32.mrb[219].mxu1 }
 0x2ce   : > { %v8953_v7 = vadd.f32 %v5940_v52, %v8804_v41  ;;  %v8955_v61 = vadd.f32 %v5878_v6, %v5877_v51  ;;  %v5943_v33 = vadd.f32 %v5942_v46, %v5941_v43 }
 0x2d0   : > { %v8958_v1 = vadd.f32 %v5943_v33, %v8814_v39 }
 0x2d2   : > { %v5880_v11 = vpop.f32.mrb[220].mxu0  ;;  %v5944_v37 = vpop.f32.mrb[220].mxu1 }
 0x2d3   : > { %v5881_v20 = vpop.f32.mrb[221].mxu0  ;;  %v5945_v58 = vpop.f32.mrb[221].mxu1 }
 0x2d4   : > { %v8960_v12 = vadd.f32 %v5881_v20, %v5880_v11  ;;  %v5946_v53 = vadd.f32 %v5945_v58, %v5944_v37  ;;  %v5883_v49 = vpop.f32.mrb[222].mxu0  ;;  %v5947_v30 = vpop.f32.mrb[222].mxu1 }
 0x2d5   : > { %v5884_v29 = vpop.f32.mrb[223].mxu0  ;;  %v5948_v19 = vpop.f32.mrb[223].mxu1 }
 0x2d6   : > { %v8963_v41 = vadd.f32 %v5946_v53, %v8836_v27  ;;  %v8965_v6 = vadd.f32 %v5884_v29, %v5883_v49  ;;  %v5949_v46 = vadd.f32 %v5948_v19, %v5947_v30 }
 0x2d8   : > { %v8968_v39 = vadd.f32 %v5949_v46, %v8847_v57 }
 0x2da   : > { %v5886_v52 = vpop.f32.mrb[224].mxu0  ;;  %v5950_v51 = vpop.f32.mrb[224].mxu1 }
 0x2db   : > { %v5887_v43 = vpop.f32.mrb[225].mxu0  ;;  %v5951_v33 = vpop.f32.mrb[225].mxu1 }
 0x2dc   : > { %v8970_v11 = vadd.f32 %v5887_v43, %v5886_v52  ;;  %v5952_v37 = vadd.f32 %v5951_v33, %v5950_v51  ;;  %v5889_v20 = vpop.f32.mrb[226].mxu0  ;;  %v5953_v58 = vpop.f32.mrb[226].mxu1 }
 0x2dd   : > { %v5890_v45 = vpop.f32.mrb[227].mxu0  ;;  %v5954_v47 = vpop.f32.mrb[227].mxu1 }
 0x2de   : > { %v8973_v27 = vadd.f32 %v5952_v37, %v8868_v26  ;;  %v8975_v29 = vadd.f32 %v5890_v45, %v5889_v20  ;;  %v5955_v19 = vadd.f32 %v5954_v47, %v5953_v58 }
 0x2e0   : > { %v8978_v57 = vadd.f32 %v5955_v19, %v8879_v24 }
 0x2e2   : > { %v5892_v53 = vpop.f32.mrb[228].mxu0  ;;  %v5956_v49 = vpop.f32.mrb[228].mxu1 }
 0x2e3   : > { %v5893_v30 = vpop.f32.mrb[229].mxu0  ;;  %v5957_v46 = vpop.f32.mrb[229].mxu1 }
 0x2e4   : > { %v8980_v52 = vadd.f32 %v5893_v30, %v5892_v53  ;;  %v5958_v51 = vadd.f32 %v5957_v46, %v5956_v49  ;;  %v5895_v43 = vpop.f32.mrb[230].mxu0  ;;  %v5959_v33 = vpop.f32.mrb[230].mxu1 }
 0x2e5   : > { %v5896_v35 = vpop.f32.mrb[231].mxu0  ;;  %v5960_v60 = vpop.f32.mrb[231].mxu1 }
 0x2e6   : > { %v8983_v26 = vadd.f32 %v5958_v51, %v8894_v16  ;;  %v8985_v45 = vadd.f32 %v5896_v35, %v5895_v43  ;;  %v5961_v47 = vadd.f32 %v5960_v60, %v5959_v33 }
 0x2e8   : > { %v8988_v24 = vadd.f32 %v5961_v47, %v8897_v42 }
 0x2ea   : > { %v5898_v37 = vpop.f32.mrb[232].mxu0  ;;  %v5962_v20 = vpop.f32.mrb[232].mxu1 }
 0x2eb   : > { %v5899_v58 = vpop.f32.mrb[233].mxu0  ;;  %v5963_v19 = vpop.f32.mrb[233].mxu1 }
 0x2ec   : > { %v8990_v53 = vadd.f32 %v5899_v58, %v5898_v37  ;;  %v5964_v49 = vadd.f32 %v5963_v19, %v5962_v20  ;;  %v5901_v30 = vpop.f32.mrb[234].mxu0  ;;  %v5965_v46 = vpop.f32.mrb[234].mxu1 }
 0x2ed   : > { %v5902_v38 = vpop.f32.mrb[235].mxu0  ;;  %v5966_v21 = vpop.f32.mrb[235].mxu1 }
 0x2ee   : > { %v8993_v16 = vadd.f32 %v5964_v49, %v8906_v8  ;;  %v8995_v35 = vadd.f32 %v5902_v38, %v5901_v30  ;;  %v5967_v60 = vadd.f32 %v5966_v21, %v5965_v46 }
 0x2f0   : > { %v8998_v42 = vadd.f32 %v5967_v60, %v8909_v34 }
 0x2f2   : > { %v5904_v51 = vpop.f32.mrb[236].mxu0  ;;  %v5968_v43 = vpop.f32.mrb[236].mxu1 }
 0x2f3   : > { %v5905_v33 = vpop.f32.mrb[237].mxu0  ;;  %v5969_v47 = vpop.f32.mrb[237].mxu1 }
 0x2f4   : > { %v9000_v37 = vadd.f32 %v5905_v33, %v5904_v51  ;;  %v5970_v20 = vadd.f32 %v5969_v47, %v5968_v43  ;;  %v5907_v58 = vpop.f32.mrb[238].mxu0  ;;  %v5971_v19 = vpop.f32.mrb[238].mxu1 }
 0x2f5   : > { %v5908_v17 = vpop.f32.mrb[239].mxu0  ;;  %v5972_v59 = vpop.f32.mrb[239].mxu1 }
 0x2f6   : > { %9696 = vst [vmem:[#allocation61_spill] sm:$0xff] %v9000_v37  ;;  %v9003_v8 = vadd.f32 %v5970_v20, %v8918_v25  ;;  %v9005_v38 = vadd.f32 %v5908_v17, %v5907_v58  ;;  %v5973_v21 = vadd.f32 %v5972_v59, %v5971_v19 }
 0x2f8   : > { %v9008_v34 = vadd.f32 %v5973_v21, %v8921_v32 }
 0x2fa   : > { %v5974_v49 = vpop.f32.mrb[240].mxu1  ;;  %v6038_v30 = vpop.f32.mrb[240].mxu0 }
 0x2fb   : > { %v5975_v46 = vpop.f32.mrb[241].mxu1  ;;  %v6039_v60 = vpop.f32.mrb[241].mxu0 }
 0x2fc   : > { %v5976_v51 = vadd.f32 %v5975_v46, %v5974_v49  ;;  %v6040_v33 = vadd.f32 %v6039_v60, %v6038_v30  ;;  %v5977_v43 = vpop.f32.mrb[242].mxu1  ;;  %v6041_v47 = vpop.f32.mrb[242].mxu0 }
 0x2fd   : > { %v5978_v44 = vpop.f32.mrb[243].mxu1  ;;  %v6042_v14 = vpop.f32.mrb[243].mxu0 }
 0x2fe   : > { %v9011_v37 = vadd.f32 %v5976_v51, %v8930_v31  ;;  %v3853_v17 = vadd.f32 %v6040_v33, %v8933_v40  ;;  %v5979_v25 = vadd.f32 %v5978_v44, %v5977_v43  ;;  %v6043_v59 = vadd.f32 %v6042_v14, %v6041_v47 }
 0x300   : > { %v9015_v32 = vadd.f32 %v5979_v25, %v8935_v62  ;;  %v3856_v20 = vadd.f32 %v6043_v59, %v8938_v50  ;;  %v9019_v58 = vadd.f32 %v3853_v17, %v8552_v63 }
 0x302   : > { %v5980_v19 = vpop.f32.mrb[244].mxu1  ;;  %v6044_v21 = vpop.f32.mrb[244].mxu0  ;;  %v9022_v49 = vadd.f32 %v3856_v20, %v8561_v48 }
 0x303   : > { %v5981_v30 = vpop.f32.mrb[245].mxu1  ;;  %v6045_v31 = vpop.f32.mrb[245].mxu0 }
 0x304   : > { %v5982_v46 = vadd.f32 %v5981_v30, %v5980_v19  ;;  %v6046_v60 = vadd.f32 %v6045_v31, %v6044_v21  ;;  %v5983_v40 = vpop.f32.mrb[246].mxu1  ;;  %v6047_v44 = vpop.f32.mrb[246].mxu0 }
 0x305   : > { %v5984_v14 = vpop.f32.mrb[247].mxu1  ;;  %v6048_v51 = vpop.f32.mrb[247].mxu0 }
 0x306   : > { %v9025_v62 = vadd.f32 %v5982_v46, %v8940_v28  ;;  %v3861_v50 = vadd.f32 %v6046_v60, %v8943_v36  ;;  %v5985_v63 = vadd.f32 %v5984_v14, %v5983_v40  ;;  %v6049_v33 = vadd.f32 %v6048_v51, %v6047_v44 }
 0x308   : > { %v9029_v43 = vadd.f32 %v5985_v63, %v8945_v3  ;;  %v3864_v48 = vadd.f32 %v6049_v33, %v8948_v13  ;;  %v9033_v47 = vadd.f32 %v3861_v50, %v8571_v5 }
 0x30a   : > { %v5986_v17 = vpop.f32.mrb[248].mxu1  ;;  %v6050_v25 = vpop.f32.mrb[248].mxu0  ;;  %v9036_v59 = vadd.f32 %v3864_v48, %v8583_v15 }
 0x30b   : > { %v5987_v20 = vpop.f32.mrb[249].mxu1  ;;  %v6051_v28 = vpop.f32.mrb[249].mxu0 }
 0x30c   : > { %v5988_v19 = vadd.f32 %v5987_v20, %v5986_v17  ;;  %v6052_v21 = vadd.f32 %v6051_v28, %v6050_v25  ;;  %v5989_v36 = vpop.f32.mrb[250].mxu1  ;;  %v6053_v30 = vpop.f32.mrb[250].mxu0 }
 0x30d   : > { %v5990_v31 = vpop.f32.mrb[251].mxu1  ;;  %v6054_v46 = vpop.f32.mrb[251].mxu0 }
 0x30e   : > { %v9039_v3 = vadd.f32 %v5988_v19, %v8950_v54  ;;  %v3869_v13 = vadd.f32 %v6052_v21, %v8953_v7  ;;  %v5991_v5 = vadd.f32 %v5990_v31, %v5989_v36  ;;  %v6055_v60 = vadd.f32 %v6054_v46, %v6053_v30 }
 0x310   : > { %v9043_v40 = vadd.f32 %v5991_v5, %v8955_v61  ;;  %v3872_v15 = vadd.f32 %v6055_v60, %v8958_v1  ;;  %v9047_v44 = vadd.f32 %v3869_v13, %v8597_v9 }
 0x312   : > { %v5992_v14 = vpop.f32.mrb[252].mxu1  ;;  %v6056_v51 = vpop.f32.mrb[252].mxu0  ;;  %v9050_v50 = vadd.f32 %v3872_v15, %v8606_v10 }
 0x313   : > { %v5993_v63 = vpop.f32.mrb[253].mxu1  ;;  %v6057_v54 = vpop.f32.mrb[253].mxu0 }
 0x314   : > { %v5994_v33 = vadd.f32 %v5993_v63, %v5992_v14  ;;  %v6058_v48 = vadd.f32 %v6057_v54, %v6056_v51  ;;  %v5995_v7 = vpop.f32.mrb[254].mxu1  ;;  %v6059_v17 = vpop.f32.mrb[254].mxu0 }
 0x315   : > { %v5996_v25 = vpop.f32.mrb[255].mxu1  ;;  %v6060_v20 = vpop.f32.mrb[255].mxu0 }
 0x316   : > { %v9053_v61 = vadd.f32 %v5994_v33, %v8960_v12  ;;  %v3877_v1 = vadd.f32 %v6058_v48, %v8963_v41  ;;  %v5997_v9 = vadd.f32 %v5996_v25, %v5995_v7  ;;  %v6061_v28 = vadd.f32 %v6060_v20, %v6059_v17 }
 0x318   : > { %v9057_v19 = vadd.f32 %v5997_v9, %v8965_v6  ;;  %v3880_v10 = vadd.f32 %v6061_v28, %v8968_v39  ;;  %v9061_v21 = vadd.f32 %v3877_v1, %v8618_v18 }
 0x31a   : > { %v5998_v36 = vpop.f32.mrb[0].mxu1  ;;  %v6062_v30 = vpop.f32.mrb[0].mxu0  ;;  %v9064_v31 = vadd.f32 %v3880_v10, %v8626_v0 }
 0x31b   : > { %v5999_v46 = vpop.f32.mrb[1].mxu1  ;;  %v6063_v12 = vpop.f32.mrb[1].mxu0 }
 0x31c   : > { %v6000_v13 = vadd.f32 %v5999_v46, %v5998_v36  ;;  %v6064_v5 = vadd.f32 %v6063_v12, %v6062_v30  ;;  %v6001_v41 = vpop.f32.mrb[2].mxu1  ;;  %v6065_v60 = vpop.f32.mrb[2].mxu0 }
 0x31d   : > { %v6002_v15 = vpop.f32.mrb[3].mxu1  ;;  %v6066_v14 = vpop.f32.mrb[3].mxu0 }
 0x31e   : > { %v9067_v6 = vadd.f32 %v6000_v13, %v8970_v11  ;;  %v3885_v39 = vadd.f32 %v6064_v5, %v8973_v27  ;;  %v6003_v18 = vadd.f32 %v6002_v15, %v6001_v41  ;;  %v6067_v51 = vadd.f32 %v6066_v14, %v6065_v60 }
 0x320   : > { %v9071_v63 = vadd.f32 %v6003_v18, %v8975_v29  ;;  %v3888_v0 = vadd.f32 %v6067_v51, %v8978_v57  ;;  %v9075_v54 = vadd.f32 %v3885_v39, %v8638_v56 }
 0x322   : > { %v6004_v33 = vpop.f32.mrb[4].mxu1  ;;  %v6068_v48 = vpop.f32.mrb[4].mxu0  ;;  %v9078_v7 = vadd.f32 %v3888_v0, %v8647_v2 }
 0x323   : > { %v6005_v17 = vpop.f32.mrb[5].mxu1  ;;  %v6069_v11 = vpop.f32.mrb[5].mxu0 }
 0x324   : > { %v6006_v25 = vadd.f32 %v6005_v17, %v6004_v33  ;;  %v6070_v20 = vadd.f32 %v6069_v11, %v6068_v48  ;;  %v6007_v27 = vpop.f32.mrb[6].mxu1  ;;  %v6071_v1 = vpop.f32.mrb[6].mxu0 }
 0x325   : > { %v6008_v9 = vpop.f32.mrb[7].mxu1  ;;  %v6072_v28 = vpop.f32.mrb[7].mxu0 }
 0x326   : > { %v9081_v29 = vadd.f32 %v6006_v25, %v8980_v52  ;;  %v3893_v57 = vadd.f32 %v6070_v20, %v8983_v26  ;;  %v6009_v56 = vadd.f32 %v6008_v9, %v6007_v27  ;;  %v6073_v10 = vadd.f32 %v6072_v28, %v6071_v1  ;;  %v9697_v9 = vld [vmem:[#allocation61_spill] sm:$0xff] }
 0x328   : > { %v9085_v36 = vadd.f32 %v6009_v56, %v8985_v45  ;;  %v3896_v2 = vadd.f32 %v6073_v10, %v8988_v24  ;;  %v9089_v30 = vadd.f32 %v3893_v57, %v8662_v22 }
 0x32a   : > { %v6010_v46 = vpop.f32.mrb[8].mxu1  ;;  %v6074_v12 = vpop.f32.mrb[8].mxu0  ;;  %v9092_v13 = vadd.f32 %v3896_v2, %v8677_v55  ;;  %v9698_v2 = vld [vmem:[#allocation27_spill] sm:$0xff] }
 0x32b   : > { %v6011_v5 = vpop.f32.mrb[9].mxu1  ;;  %v6075_v52 = vpop.f32.mrb[9].mxu0 }
 0x32c   : > { %v6012_v41 = vadd.f32 %v6011_v5, %v6010_v46  ;;  %v6076_v60 = vadd.f32 %v6075_v52, %v6074_v12  ;;  %v6013_v26 = vpop.f32.mrb[10].mxu1  ;;  %v6077_v15 = vpop.f32.mrb[10].mxu0 }
 0x32d   : > { %v6014_v14 = vpop.f32.mrb[11].mxu1  ;;  %v6078_v39 = vpop.f32.mrb[11].mxu0 }
 0x32e   : > { %v9095_v45 = vadd.f32 %v6012_v41, %v8990_v53  ;;  %v3901_v24 = vadd.f32 %v6076_v60, %v8993_v16  ;;  %v6015_v22 = vadd.f32 %v6014_v14, %v6013_v26  ;;  %v6079_v18 = vadd.f32 %v6078_v39, %v6077_v15  ;;  %v9699_v41 = vld [vmem:[#allocation29_spill] sm:$0xff] }
 0x330   : > { %v9099_v51 = vadd.f32 %v6015_v22, %v8995_v35  ;;  %v3904_v55 = vadd.f32 %v6079_v18, %v8998_v42  ;;  %v9103_v0 = vadd.f32 %v3901_v24, %v8694_v4 }
 0x332   : > { %v6016_v33 = vpop.f32.mrb[12].mxu1  ;;  %v6080_v48 = vpop.f32.mrb[12].mxu0  ;;  %v9106_v17 = vadd.f32 %v3904_v55, %v8709_v23  ;;  %v9116_v23 = vld [vmem:[%s9304_s2] ss:$0 sm:$0xff] }
 0x333   : > { %v6017_v53 = vpop.f32.mrb[13].mxu1  ;;  %v6081_v11 = vpop.f32.mrb[13].mxu0  ;;  %v4477_v12 = vadd.f32 %v9116_v23, %v9022_v49  ;;  %v4476_v52 = vadd.f32 %v9116_v23, %v9019_v58  ;;  %v4479_v58 = vadd.f32 %v9116_v23, %v9036_v59  ;;  %v4478_v55 = vadd.f32 %v9116_v23, %v9033_v47 }
 0x334   : > { %v6018_v25 = vadd.f32 %v6017_v53, %v6016_v33  ;;  %v6082_v16 = vadd.f32 %v6081_v11, %v6080_v48  ;;  %v6019_v20 = vpop.f32.mrb[14].mxu1  ;;  %v6083_v27 = vpop.f32.mrb[14].mxu0  ;;  %v4481_v59 = vadd.f32 %v9116_v23, %v9050_v50  ;;  %v4480_v47 = vadd.f32 %v9116_v23, %v9047_v44 }
 0x335   : > { %v6020_v1 = vpop.f32.mrb[15].mxu1  ;;  %v6084_v35 = vpop.f32.mrb[15].mxu0 }
 0x336   : > { %v9109_v28 = vadd.f32 %v6018_v25, %v9697_v9  ;;  %v3909_v4 = vadd.f32 %v6082_v16, %v9003_v8  ;;  %v6021_v42 = vadd.f32 %v6020_v1, %v6019_v20  ;;  %v6085_v57 = vadd.f32 %v6084_v35, %v6083_v27  ;;  %v9700_v25 = vld [vmem:[#allocation33_spill] sm:$0xff]  ;;  %v9701_v27 = vld [vmem:[#allocation34_spill] sm:$0xff] }
 0x338   : > { %v9119_v56 = vadd.f32 %v6021_v42, %v9005_v38  ;;  %v3912_v10 = vadd.f32 %v6085_v57, %v9008_v34  ;;  %v9123_v46 = vadd.f32 %v3909_v4, %v9698_v2 }
 0x33a   : > { %v6086_v8 = vpop.f32.mrb[16].mxu0  ;;  %v6192_v5 = vpop.f32.mrb[16].mxu1  ;;  %v9130_v60 = vadd.f32 %v3912_v10, %v9699_v41  ;;  %v4483_v10 = vadd.f32 %v9116_v23, %v9064_v31  ;;  %v4485_v31 = vadd.f32 %v9116_v23, %v9078_v7  ;;  %v4487_v7 = vadd.f32 %v9116_v23, %v9092_v13 }
 0x33b   : > { %v4509_v26 = vadd.f32 %v6192_v5, %v4477_v12  ;;  %v6087_v15 = vpop.f32.mrb[17].mxu0  ;;  %v4278_v38 = vpop.f32.mrb[17].mxu1  ;;  %v4489_v13 = vadd.f32 %v9116_v23, %v9106_v17 }
 0x33c   : > { %v6088_v14 = vadd.f32 %v6087_v15, %v6086_v8  ;;  %v4508_v39 = vadd.f32 %v4476_v52, %v4278_v38  ;;  %v6089_v34 = vpop.f32.mrb[18].mxu0  ;;  %v4482_v8 = vadd.f32 %v9116_v23, %v9061_v21  ;;  %v9702_v15 = vld [vmem:[#allocation38_spill] sm:$0xff]  ;;  %v4484_v21 = vadd.f32 %v9116_v23, %v9075_v54 }
 0x33d   : > { %4541 = vst [vmem:[%s9132_s16 + $0x8] sm:$0xff] %v4509_v26  ;;  %v6090_v49 = vpop.f32.mrb[19].mxu0  ;;  %v4491_v17 = vadd.f32 %v9116_v23, %v9130_v60 }
 0x33e   : > { %v3917_v24 = vadd.f32 %v6088_v14, %v9011_v37  ;;  %4540 = vst [vmem:[%s9132_s16] sm:$0xff] %v4508_v39  ;;  %v6091_v22 = vadd.f32 %v6090_v49, %v6089_v34  ;;  %v6195_v18 = vpop.f32.mrb[18].mxu1  ;;  %v9703_v39 = vld [vmem:[#allocation41_spill] sm:$0xff] }
 0x33f   : > { %v4511_v33 = vadd.f32 %v6195_v18, %v4479_v58  ;;  %v4288_v48 = vpop.f32.mrb[19].mxu1 }
 0x340   : > { %v3920_v53 = vadd.f32 %v6091_v22, %v9015_v32  ;;  %v4510_v11 = vadd.f32 %v4478_v55, %v4288_v48  ;;  %v9143_v16 = vadd.f32 %v3917_v24, %v9700_v25 }
 0x341   : > { %4543 = vst [vmem:[%s9132_s16 + $0x18] sm:$0xff] %v4511_v33 }
 0x342   : > { %4542 = vst [vmem:[%s9132_s16 + $0x10] sm:$0xff] %v4510_v11  ;;  %v6092_v37 = vpop.f32.mrb[20].mxu0  ;;  %v6198_v20 = vpop.f32.mrb[20].mxu1  ;;  %v9152_v1 = vadd.f32 %v3920_v53, %v9701_v27  ;;  %v4486_v53 = vadd.f32 %v9116_v23, %v9089_v30  ;;  %v9705_v30 = vld [vmem:[#allocation44_spill] sm:$0xff] }
 0x343   : > { %v4513_v32 = vadd.f32 %v6198_v20, %v4481_v59  ;;  %v6093_v35 = vpop.f32.mrb[21].mxu0  ;;  %v4298_v9 = vpop.f32.mrb[21].mxu1  ;;  %v9704_v20 = vld [vmem:[#allocation43_spill] sm:$0xff] }
 0x344   : > { %v6094_v4 = vadd.f32 %v6093_v35, %v6092_v37  ;;  %v4512_v42 = vadd.f32 %v4480_v47, %v4298_v9  ;;  %v6095_v57 = vpop.f32.mrb[22].mxu0  ;;  %v4493_v60 = vadd.f32 %v9116_v23, %v9152_v1 }
 0x345   : > { %4545 = vst [vmem:[%s9132_s16 + $0x28] sm:$0xff] %v4513_v32  ;;  %v6096_v50 = vpop.f32.mrb[23].mxu0  ;;  %v4488_v32 = vadd.f32 %v9116_v23, %v9103_v0 }
 0x346   : > { %v3925_v2 = vadd.f32 %v6094_v4, %v9025_v62  ;;  %4544 = vst [vmem:[%s9132_s16 + $0x20] sm:$0xff] %v4512_v42  ;;  %v6097_v44 = vadd.f32 %v6096_v50, %v6095_v57  ;;  %v6201_v12 = vpop.f32.mrb[22].mxu1 }
 0x347   : > { %v4515_v5 = vadd.f32 %v6201_v12, %v4483_v10  ;;  %v4308_v52 = vpop.f32.mrb[23].mxu1  ;;  %v4490_v12 = vadd.f32 %v9116_v23, %v9123_v46  ;;  %v9707_v46 = vld [vmem:[#allocation46_spill] sm:$0xff] }
 0x348   : > { %v3928_v41 = vadd.f32 %v6097_v44, %v9029_v43  ;;  %v4514_v26 = vadd.f32 %v4482_v8, %v4308_v52  ;;  %v9163_v38 = vadd.f32 %v3925_v2, %v9702_v15 }
 0x349   : > { %4547 = vst [vmem:[%s9132_s16 + $0x38] sm:$0xff] %v4515_v5 }
 0x34a   : > { %4546 = vst [vmem:[%s9132_s16 + $0x30] sm:$0xff] %v4514_v26  ;;  %v6098_v62 = vpop.f32.mrb[24].mxu0  ;;  %v6204_v14 = vpop.f32.mrb[24].mxu1  ;;  %v4030_v34 = vadd.f32 %v3928_v41, %v9703_v39  ;;  %v9706_v26 = vld [vmem:[#allocation45_spill] sm:$0xff] }
 0x34b   : > { %v4517_v49 = vadd.f32 %v6204_v14, %v4485_v31  ;;  %v6099_v43 = vpop.f32.mrb[25].mxu0  ;;  %v4318_v58 = vpop.f32.mrb[25].mxu1 }
 0x34c   : > { %v6100_v24 = vadd.f32 %v6099_v43, %v6098_v62  ;;  %v4516_v22 = vadd.f32 %v4484_v21, %v4318_v58  ;;  %v6101_v18 = vpop.f32.mrb[26].mxu0  ;;  %v4492_v62 = vadd.f32 %v9116_v23, %v9143_v16  ;;  %v4495_v1 = vadd.f32 %v9116_v23, %v4030_v34 }
 0x34d   : > { %4549 = vst [vmem:[%s9132_s16 + $0x48] sm:$0xff] %v4517_v49  ;;  %v6102_v55 = vpop.f32.mrb[27].mxu0  ;;  %v4494_v16 = vadd.f32 %v9116_v23, %v9163_v38 }
 0x34e   : > { %v3933_v33 = vadd.f32 %v6100_v24, %v9039_v3  ;;  %4548 = vst [vmem:[%s9132_s16 + $0x40] sm:$0xff] %v4516_v22  ;;  %v6103_v48 = vadd.f32 %v6102_v55, %v6101_v18  ;;  %v6207_v54 = vpop.f32.mrb[26].mxu1 }
 0x34f   : > { %v4519_v11 = vadd.f32 %v6207_v54, %v4487_v7  ;;  %v4328_v25 = vpop.f32.mrb[27].mxu1 }
 0x350   : > { %v3936_v59 = vadd.f32 %v6103_v48, %v9043_v40  ;;  %v4518_v37 = vadd.f32 %v4486_v53, %v4328_v25  ;;  %v4031_v47 = vadd.f32 %v3933_v33, %v9704_v20  ;;  %v9708_v53 = vld [vmem:[#allocation47_spill] sm:$0xff] }
 0x351   : > { %4551 = vst [vmem:[%s9132_s16 + $0x58] sm:$0xff] %v4519_v11 }
 0x352   : > { %4550 = vst [vmem:[%s9132_s16 + $0x50] sm:$0xff] %v4518_v37  ;;  %v6104_v3 = vpop.f32.mrb[28].mxu0  ;;  %v6210_v27 = vpop.f32.mrb[28].mxu1  ;;  %v4032_v35 = vadd.f32 %v3936_v59, %v9705_v30  ;;  %v4496_v59 = vadd.f32 %v9116_v23, %v4031_v47  ;;  %v9709_v37 = vld [vmem:[#allocation48_spill] sm:$0xff] }
 0x353   : > { %v4521_v9 = vadd.f32 %v6210_v27, %v4489_v13  ;;  %v6105_v4 = vpop.f32.mrb[29].mxu0  ;;  %v4338_v40 = vpop.f32.mrb[29].mxu1 }
 0x354   : > { %v6106_v42 = vadd.f32 %v6105_v4, %v6104_v3  ;;  %v4520_v57 = vadd.f32 %v4488_v32, %v4338_v40  ;;  %v6107_v50 = vpop.f32.mrb[30].mxu0  ;;  %v4497_v25 = vadd.f32 %v9116_v23, %v4032_v35 }
 0x355   : > { %4553 = vst [vmem:[%s9132_s16 + $0x68] sm:$0xff] %v4521_v9  ;;  %v6108_v10 = vpop.f32.mrb[31].mxu0 }
 0x356   : > { %v3941_v2 = vadd.f32 %v6106_v42, %v9053_v61  ;;  %4552 = vst [vmem:[%s9132_s16 + $0x60] sm:$0xff] %v4520_v57  ;;  %v6109_v44 = vadd.f32 %v6108_v10, %v6107_v50  ;;  %v6213_v0 = vpop.f32.mrb[30].mxu1 }
 0x357   : > { %v4523_v8 = vadd.f32 %v6213_v0, %v4491_v17  ;;  %v4348_v5 = vpop.f32.mrb[31].mxu1  ;;  %v9710_v17 = vld [vmem:[#allocation49_spill] sm:$0xff] }
 0x358   : > { %v3944_v52 = vadd.f32 %v6109_v44, %v9057_v19  ;;  %v4522_v41 = vadd.f32 %v4490_v12, %v4348_v5  ;;  %v4033_v15 = vadd.f32 %v3941_v2, %v9706_v26 }
 0x359   : > { %4555 = vst [vmem:[%s9132_s16 + $0x78] sm:$0xff] %v4523_v8  ;;  %v9711_v8 = vld [vmem:[#allocation39_spill] sm:$0xff] }
 0x35a   : > { %4554 = vst [vmem:[%s9132_s16 + $0x70] sm:$0xff] %v4522_v41  ;;  %v6110_v61 = vpop.f32.mrb[32].mxu0  ;;  %v6216_v31 = vpop.f32.mrb[32].mxu1  ;;  %v4034_v14 = vadd.f32 %v3944_v52, %v9707_v46  ;;  %v4498_v47 = vadd.f32 %v9116_v23, %v4033_v15 }
 0x35b   : > { %v4525_v21 = vadd.f32 %v6216_v31, %v4493_v60  ;;  %v6111_v39 = vpop.f32.mrb[33].mxu0  ;;  %v4358_v19 = vpop.f32.mrb[33].mxu1 }
 0x35c   : > { %v6112_v49 = vadd.f32 %v6111_v39, %v6110_v61  ;;  %v4524_v43 = vadd.f32 %v4492_v62, %v4358_v19  ;;  %v6113_v58 = vpop.f32.mrb[34].mxu0  ;;  %v4499_v35 = vadd.f32 %v9116_v23, %v4034_v14 }
 0x35d   : > { %4557 = vst [vmem:[%s9132_s16 + $0x88] sm:$0xff] %v4525_v21  ;;  %v6114_v24 = vpop.f32.mrb[35].mxu0 }
 0x35e   : > { %v3949_v22 = vadd.f32 %v6112_v49, %v9067_v6  ;;  %4556 = vst [vmem:[%s9132_s16 + $0x80] sm:$0xff] %v4524_v43  ;;  %v6115_v18 = vadd.f32 %v6114_v24, %v6113_v58  ;;  %v6219_v55 = vpop.f32.mrb[34].mxu1  ;;  %v9712_v58 = vld [vmem:[#allocation58_spill] sm:$0xff] }
 0x35f   : > { %v4527_v7 = vadd.f32 %v6219_v55, %v4495_v1  ;;  %v4368_v33 = vpop.f32.mrb[35].mxu1 }
 0x360   : > { %v3952_v48 = vadd.f32 %v6115_v18, %v9071_v63  ;;  %v4526_v54 = vadd.f32 %v4494_v16, %v4368_v33  ;;  %v4035_v11 = vadd.f32 %v3949_v22, %v9708_v53  ;;  %v9713_v22 = vld [vmem:[#allocation59_spill] sm:$0xff] }
 0x361   : > { %4559 = vst [vmem:[%s9132_s16 + $0x98] sm:$0xff] %v4527_v7 }
 0x362   : > { %4558 = vst [vmem:[%s9132_s16 + $0x90] sm:$0xff] %v4526_v54  ;;  %v6116_v6 = vpop.f32.mrb[36].mxu0  ;;  %v6222_v34 = vpop.f32.mrb[36].mxu1  ;;  %v4036_v20 = vadd.f32 %v3952_v48, %v9709_v37  ;;  %v4500_v12 = vadd.f32 %v9116_v23, %v4035_v11 }
 0x363   : > { %v4529_v38 = vadd.f32 %v6222_v34, %v4497_v25  ;;  %v6117_v13 = vpop.f32.mrb[37].mxu0  ;;  %v4378_v3 = vpop.f32.mrb[37].mxu1 }
 0x364   : > { %v6118_v27 = vadd.f32 %v6117_v13, %v6116_v6  ;;  %v4528_v63 = vadd.f32 %v4496_v59, %v4378_v3  ;;  %v6119_v32 = vpop.f32.mrb[38].mxu0  ;;  %v4501_v44 = vadd.f32 %v9116_v23, %v4036_v20  ;;  %v9714_v20 = vld [vmem:[#allocation19_spill] sm:$0xff]  ;;  %v9715_v13 = vld [vmem:[#allocation60_spill] sm:$0xff] }
 0x365   : > { %4561 = vst [vmem:[%s9132_s16 + $0xa8] sm:$0xff] %v4529_v38  ;;  %v6120_v30 = vpop.f32.mrb[39].mxu0 }
 0x366   : > { %v3957_v9 = vadd.f32 %v6118_v27, %v9081_v29  ;;  %4560 = vst [vmem:[%s9132_s16 + $0xa0] sm:$0xff] %v4528_v63  ;;  %v6121_v4 = vadd.f32 %v6120_v30, %v6119_v32  ;;  %v6225_v40 = vpop.f32.mrb[38].mxu1 }
 0x367   : > { %v4531_v42 = vadd.f32 %v6225_v40, %v4499_v35  ;;  %v4388_v57 = vpop.f32.mrb[39].mxu1 }
 0x368   : > { %v3960_v50 = vadd.f32 %v6121_v4, %v9085_v36  ;;  %v4530_v10 = vadd.f32 %v4498_v47, %v4388_v57  ;;  %v4037_v2 = vadd.f32 %v3957_v9, %v9710_v17 }
 0x369   : > { %4563 = vst [vmem:[%s9132_s16 + $0xb8] sm:$0xff] %v4531_v42 }
 0x36a   : > { %4562 = vst [vmem:[%s9132_s16 + $0xb0] sm:$0xff] %v4530_v10  ;;  %v6122_v0 = vpop.f32.mrb[40].mxu0  ;;  %v6228_v29 = vpop.f32.mrb[40].mxu1  ;;  %v4038_v5 = vadd.f32 %v3960_v50, %v9711_v8  ;;  %v4502_v21 = vadd.f32 %v9116_v23, %v4037_v2 }
 0x36b   : > { %v4533_v52 = vadd.f32 %v6228_v29, %v4501_v44  ;;  %v6123_v41 = vpop.f32.mrb[41].mxu0  ;;  %v4398_v26 = vpop.f32.mrb[41].mxu1 }
 0x36c   : > { %v6124_v15 = vadd.f32 %v6123_v41, %v6122_v0  ;;  %v4532_v36 = vadd.f32 %v4500_v12, %v4398_v26  ;;  %v6125_v60 = vpop.f32.mrb[42].mxu0  ;;  %v4503_v61 = vadd.f32 %v9116_v23, %v4038_v5 }
 0x36d   : > { %4565 = vst [vmem:[%s9132_s16 + $0xc8] sm:$0xff] %v4533_v52  ;;  %v6126_v31 = vpop.f32.mrb[43].mxu0 }
 0x36e   : > { %v3965_v62 = vadd.f32 %v6124_v15, %v9095_v45  ;;  %4564 = vst [vmem:[%s9132_s16 + $0xc0] sm:$0xff] %v4532_v36  ;;  %v6127_v46 = vadd.f32 %v6126_v31, %v6125_v60  ;;  %v6231_v14 = vpop.f32.mrb[42].mxu1 }
 0x36f   : > { %v4535_v39 = vadd.f32 %v6231_v14, %v4503_v61  ;;  %v4408_v19 = vpop.f32.mrb[43].mxu1 }
 0x370   : > { %v3968_v49 = vadd.f32 %v6127_v46, %v9099_v51  ;;  %v4534_v43 = vadd.f32 %v4502_v21, %v4408_v19  ;;  %v4039_v24 = vadd.f32 %v3965_v62, %v9712_v58 }
 0x371   : > { %4567 = vst [vmem:[%s9132_s16 + $0xd8] sm:$0xff] %v4535_v39 }
 0x372   : > { %4566 = vst [vmem:[%s9132_s16 + $0xd0] sm:$0xff] %v4534_v43  ;;  %v6128_v1 = vpop.f32.mrb[44].mxu0  ;;  %v4040_v18 = vadd.f32 %v3968_v49, %v9713_v22  ;;  %v6234_v45 = vpop.f32.mrb[44].mxu1  ;;  %v4504_v55 = vadd.f32 %v9116_v23, %v4039_v24 }
 0x373   : > { %v6129_v16 = vpop.f32.mrb[45].mxu0  ;;  %v4418_v7 = vpop.f32.mrb[45].mxu1 }
 0x374   : > { %v4505_v33 = vadd.f32 %v9116_v23, %v4040_v18  ;;  %v6130_v48 = vadd.f32 %v6129_v16, %v6128_v1  ;;  %v4536_v51 = vadd.f32 %v4504_v55, %v4418_v7  ;;  %v6131_v54 = vpop.f32.mrb[46].mxu0 }
 0x375   : > { %v6132_v53 = vpop.f32.mrb[47].mxu0 }
 0x376   : > { %v4537_v11 = vadd.f32 %v6234_v45, %v4505_v33  ;;  %v3973_v25 = vadd.f32 %v6130_v48, %v9109_v28  ;;  %4568 = vst [vmem:[%s9132_s16 + $0xe0] sm:$0xff] %v4536_v51  ;;  %v6133_v6 = vadd.f32 %v6132_v53, %v6131_v54  ;;  %v6237_v34 = vpop.f32.mrb[46].mxu1 }
 0x377   : > { %v4428_v59 = vpop.f32.mrb[47].mxu1 }
 0x378   : > { %4569 = vst [vmem:[%s9132_s16 + $0xe8] sm:$0xff] %v4537_v11  ;;  %v3976_v37 = vadd.f32 %v6133_v6, %v9119_v56  ;;  %v4041_v38 = vadd.f32 %v3973_v25, %v9714_v20 }
 0x37a   : > { %v4042_v3 = vadd.f32 %v3976_v37, %v9715_v13  ;;  %v4506_v27 = vadd.f32 %v9116_v23, %v4041_v38 }
 0x37c   : > { %v4507_v28 = vadd.f32 %v9116_v23, %v4042_v3  ;;  %v4538_v63 = vadd.f32 %v4506_v27, %v4428_v59 }
 0x37e   : > { %v4539_v56 = vadd.f32 %v6237_v34, %v4507_v28  ;;  %4570 = vst [vmem:[%s9132_s16 + $0xf0] sm:$0xff] %v4538_v63 }
 0x380   : > { %4571 = vst [vmem:[%s9132_s16 + $0xf8] sm:$0xff] %v4539_v56 }
 0x381   : > { %6613 = shalt.err (!%p6610_p7)
}
 0x382   : > { %s6614_s11 = scalar_lea.hbm %s9254_s7, 4096  ;;  %s6618_s14 = scalar_lea.hbm %s9307_s5, 8192 }
 0x383   : > { %p6615_p10 = scmp.ne.s32.totalorder %s9254_s7, %s6614_s11  ;;  %p6619_p13 = scmp.lt.u32.totalorder %s9254_s7, %s9307_s5 }
 0x384   : > { %p6620_p0 = scmp.lt.u32.totalorder %s6618_s14, %s6614_s11  ;;  %p6622_p2 = scmp.lt.u32.totalorder %s6614_s11, %s9254_s7 }
 0x385   : > { %p6616_p11 = pnand %p6615_p10, %p6736_p6 }
 0x386   : > { %p6621_p1 = por %p6620_p0, %p6619_p13 }
 0x387   : > { %p6617_p12 = pneg %p6616_p11 }
 0x388   : > { %p6623_p3 = por %p6622_p2, %p6621_p1 }
 0x38a   : > { %p6624_p4 = pnand %p6623_p3, %p6617_p12 }
 0x38c   : > { %6627 = shalt.err (!%p6624_p4)
}
 0x38d   : > { %s6665_s17 = smov 128   ;;  %s6666_s30 = smov 8  }
 0x38e   : > { %6271 = dma.vmem_to_hbm [thread:$0]  (%p6736_p6), %s9256_s26, 4096, %s9254_s7, %s4573_s9, %s6665_s17, %s6665_s17, %s6666_s30  }
 0x38f PF: > { %s4601_s6 = sand.u32 1, %s6650_s18   ;;  %p6274_p5 = pnand %p4668_p9, %p6740_p8 }
 0x390   : > { %s4602_s10 = scalar_lea.sflag [#allocation5], %s4601_s6 }
 0x391   : > { %6645 = dma.done.wait (!%p6274_p5), %s4602_s10, 4096  }
 0x392   : > { %6647 = vsyncadd (!%p6274_p5), %s4602_s10, 4294963200  ;;  %p15_p7 = scmp.ge.s32.totalorder %s6722_s24, 4   ;;  %s9716_s18 = smov %s6654_s19 }
 0x393   : > { %s9717_s19 = smov %s6658_s20  ;;  %s9718_s20 = smov %s6734_s27 }
 0x394   : > { %s9719_s21 = smov %s6722_s24  ;;  %17 = sbr.rel (!%p15_p7) target bundleno = 3 (0x3), region = 123 }
 0x39b   :  { %4607 = vsyncpa [#allocation5], 1 }
 0x39c   :  { %4609 = vsyncpa [#allocation5 + $0x1], 1 }

</bundles_post_ra>
